<compile_context>
chip_gen: v7x
topology: tpu7x:2x2x1
jax: 0.10.0
libtpu: 0.0.40
codegen_flags: <defaults>
</compile_context>

<pallas_src>
import jax
import jax.numpy as jnp
import numpy as np
from jax.experimental import pallas as pl
from jax.experimental.pallas import tpu as pltpu


def _make_kernel(H, W, b_tile, c_out, yc):
    inv_hw = 1.0 / float(H * W)      # true (un-padded) H*W
    wb = W * b_tile                  # matmul N dimension: (x, b) jointly on lanes
    n_chunks = H // yc

    def kernel(x_ref, wexp_ref, wd_ref, bd_ref, out_ref):
        # x_ref:    (H+2, (W+2)*b_tile)   padded image block, lane index = w*b_tile + b
        # wexp_ref: (yc*c_out, 10*yc)     block-diagonal conv weights + bias column
        # wd_ref:   (c_out, 128)          dense weight (padded to 128 lanes, resident)
        # bd_ref:   (1, 128)              dense bias (padded, resident)
        # out_ref:  (b_tile, 128)         logits slab (classes on lanes)
        ones_rows = jnp.ones((yc, wb), jnp.float32)     # hoisted bias rows of R
        acc = jnp.zeros((c_out, wb), jnp.float32)       # sum over y of relu(conv)

        for ci in range(n_chunks):                      # 2 chunks for H=16, yc=8
            y0 = ci * yc
            # ---- im2col slab R: (10*yc, W*b_tile) --------------------------------
            # row t*yc + y' (t = 3*di + dj) holds x_pad[y0+y'+di, x+dj, b].
            # dj shifts are aligned 128-lane-tile slices (free); di shifts are static
            # sublane slices (XLU work, hidden under the MXU).
            pieces = [
                x_ref[y0 + di:y0 + di + yc, dj * b_tile:dj * b_tile + wb]
                for di in range(3) for dj in range(3)
            ]
            pieces.append(ones_rows)                    # bias rows
            r_mat = jnp.concatenate(pieces, axis=0)     # (10*yc, wb)

            # ---- conv (+ bias) for yc output rows as ONE MXU matmul --------------
            conv_out = jnp.dot(wexp_ref[...], r_mat,
                               preferred_element_type=jnp.float32)  # (yc*c_out, wb)

            # ---- fused ReLU + y reduction (aligned row-block slab adds) ----------
            for yi in range(yc):
                blk = conv_out[yi * c_out:(yi + 1) * c_out, :]       # (c_out, wb)
                acc = acc + jnp.maximum(blk, 0.0)

        # ---- global average pool: reduce x with aligned lane-tile slices ---------
        pooled = acc[:, 0:b_tile]
        for xx in range(1, W):
            pooled = pooled + acc[:, xx * b_tile:(xx + 1) * b_tile]
        pooled = pooled * inv_hw                         # (c_out, b_tile)

        # ---- dense layer: tiny transpose + one MXU matmul -------------------------
        logits = jnp.dot(pooled.T, wd_ref[...],
                         preferred_element_type=jnp.float32)         # (b_tile, 128)
        out_ref[...] = logits + bd_ref[...]

    return kernel


def exercise4_brevitas_forward(x, conv_w, conv_b, dense_w, dense_b, *, b_tile=128):
    """x: (N, 1, H, W) f32; conv_w: (32,1,3,3); conv_b: (32,);
    dense_w: (10, 32) [PyTorch layout]; dense_b: (10,). Returns (N, 10).

    b_tile must be a multiple of 128; 128 keeps >=2 'parallel' grid steps for v7x,
    256 merges to a single step on the single-core v5e/v6e."""
    N, cin, H, W = x.shape
    assert cin == 1
    assert b_tile % 128 == 0
    c_out = conv_w.shape[0]
    assert c_out % 8 == 0
    n_cls = dense_w.shape[0]
    out_lanes = 128                      # lane-dense padded logits width
    yc = 8 if H % 8 == 0 else H          # y-chunk size (rows per MXU matmul)
    k_im = 10 * yc                       # 9*yc tap rows + yc ones rows

    x = x.astype(jnp.float32)
    n_pad = (-N) % b_tile
    n_total = N + n_pad
    n_blocks = n_total // b_tile

    # Wrapper-side layout plumbing: pad spatially (conv pad=1), pad batch to a
    # multiple of b_tile, pack (column, batch) jointly on the lane axis.
    x2 = jnp.pad(x[:, 0, :, :], ((0, n_pad), (1, 1), (1, 1)))       # (Nt, H+2, W+2)
    x2 = x2.reshape(n_blocks, b_tile, H + 2, W + 2)
    x2 = jnp.transpose(x2, (0, 2, 3, 1))                            # (nb, H+2, W+2, b_tile)
    x2 = x2.reshape(n_blocks, H + 2, (W + 2) * b_tile)

    # Block-diagonal expanded conv weights: L[(y,c), (t,y')] = w[c,t] * (y==y');
    # an extra column carries the conv bias (multiplied by the ones rows of R).
    conv_w9 = conv_w.reshape(c_out, 9).astype(jnp.float32)          # t = 3*di + dj
    eye_yc = jnp.eye(yc, dtype=jnp.float32)
    w_block = jnp.einsum('ct,yz->yctz', conv_w9, eye_yc).reshape(yc * c_out, 9 * yc)
    bias_block = jnp.zeros((yc * c_out, yc), jnp.float32).at[:, 0].set(
        jnp.tile(conv_b.astype(jnp.float32), yc))
    w_exp = jnp.concatenate([w_block, bias_block], axis=1)          # (yc*c_out, 10*yc)

    # Dense weight/bias padded to 128 output lanes (zeros beyond column n_cls).
    wd_pad = jnp.zeros((c_out, out_lanes), jnp.float32).at[:, :n_cls].set(
        dense_w.astype(jnp.float32).T)
    bd_pad = jnp.zeros((1, out_lanes), jnp.float32).at[:, :n_cls].set(
        dense_b.astype(jnp.float32)[None, :])

    kernel = _make_kernel(H, W, b_tile, c_out, yc)

    out = pl.pallas_call(
        kernel,
        out_shape=jax.ShapeDtypeStruct((n_total, out_lanes), jnp.float32),
        grid=(n_blocks,),
        in_specs=[
            # padded image block: squeeze the batch-block dim, full (H+2, (W+2)*b_tile)
            pl.BlockSpec((None, H + 2, (W + 2) * b_tile), lambda j: (j, 0, 0)),
            pl.BlockSpec((yc * c_out, k_im), lambda j: (0, 0)),      # conv weights (resident)
            pl.BlockSpec((c_out, out_lanes), lambda j: (0, 0)),      # dense weight (resident)
            pl.BlockSpec((1, out_lanes), lambda j: (0, 0)),          # dense bias (resident)
        ],
        out_specs=pl.BlockSpec((b_tile, out_lanes), lambda j: (j, 0)),
        compiler_params=pltpu.CompilerParams(
            dimension_semantics=("parallel",),      # batch axis is embarrassingly parallel
            vmem_limit_bytes=32 * 1024 * 1024,      # explicit; usage is ~5-8 MiB/step
        ),
    )(x2, w_exp, wd_pad, bd_pad)

    return out[:N, :n_cls]


def _reference_forward(x, conv_w, conv_b, dense_w, dense_b):
    """Pure-JAX reference with identical semantics (for a numerical self-check)."""
    N, _, H, W = x.shape
    c_out = conv_w.shape[0]
    xp = jnp.pad(x[:, 0, :, :], ((0, 0), (1, 1), (1, 1)))
    acc = jnp.zeros((N, c_out, H, W), jnp.float32)
    for di in range(3):
        for dj in range(3):
            acc = acc + (conv_w[:, 0, di, dj][None, :, None, None]
                         * xp[:, None, di:di + H, dj:dj + W])
    acc = acc + conv_b[None, :, None, None]
    acc = jnp.maximum(acc, 0.0)
    pooled = jnp.mean(acc, axis=(2, 3))                       # (N, 32)
    return jnp.dot(pooled, dense_w.T,
                   precision=jax.lax.Precision.HIGHEST) + dense_b[None, :]


if __name__ == "__main__":
    key = jax.random.PRNGKey(0)
    kx, kw, kb, kdw, kdb = jax.random.split(key, 5)

    N, H, W = 200, 16, 16                 # batch padded to 256 inside the wrapper
    x = jax.random.normal(kx, (N, 1, H, W), dtype=jnp.float32)
    conv_w = 0.2 * jax.random.normal(kw, (32, 1, 3, 3), dtype=jnp.float32)
    conv_b = 0.1 * jax.random.normal(kb, (32,), dtype=jnp.float32)
    dense_w = 0.2 * jax.random.normal(kdw, (10, 32), dtype=jnp.float32)
    dense_b = 0.1 * jax.random.normal(kdb, (10,), dtype=jnp.float32)

    out = jax.jit(exercise4_brevitas_forward)(x, conv_w, conv_b, dense_w, dense_b)
    out = jax.block_until_ready(out)
    assert out.shape == (N, 10)

    ref = _reference_forward(x, conv_w, conv_b, dense_w, dense_b)
    # Tolerance is loosened vs. the VPU version: both conv and dense now run on the
    # MXU at its default (multi-pass bf16) precision for f32 inputs, per the review.
    np.testing.assert_allclose(np.asarray(out), np.asarray(ref), rtol=1e-2, atol=1e-2)

    print("KERNEL_OK")
</pallas_src>

<mosaic_0001>
module attributes {stable_mosaic.version = 11 : i64} {
  func.func @kernel(%arg0: i32, %arg1: memref<1x18x2304xf32, #tpu.memory_space<vmem>>, %arg2: memref<256x80xf32, #tpu.memory_space<vmem>>, %arg3: memref<32x128xf32, #tpu.memory_space<vmem>>, %arg4: memref<1x128xf32, #tpu.memory_space<vmem>>, %arg5: memref<128x128xf32, #tpu.memory_space<vmem>>) attributes {dimension_semantics = [#tpu.dimension_semantics<parallel>], iteration_bounds = array<i64: 2>, scalar_prefetch = 0 : i64, scratch_operands = 0 : i64, tpu.core_type = #tpu.core_type<tc>, window_params = [{transform_indices = @transform_0, window_bounds = array<i64: 1, 18, 2304>}, {pipeline_mode = #tpu.pipeline_mode<synchronous>, transform_indices = @transform_1, window_bounds = array<i64: 256, 80>}, {pipeline_mode = #tpu.pipeline_mode<synchronous>, transform_indices = @transform_2, window_bounds = array<i64: 32, 128>}, {pipeline_mode = #tpu.pipeline_mode<synchronous>, transform_indices = @transform_3, window_bounds = array<i64: 1, 128>}, {transform_indices = @transform_4, window_bounds = array<i64: 128, 128>}]} {
    %cst = arith.constant 1.000000e+00 : f32
    %0 = vector.broadcast %cst : f32 to vector<8x2048xf32>
    %cst_0 = arith.constant 0.000000e+00 : f32
    %1 = vector.broadcast %cst_0 : f32 to vector<32x2048xf32>
    %c0 = arith.constant 0 : index
    %c0_1 = arith.constant 0 : index
    %c0_2 = arith.constant 0 : index
    %2 = vector.load %arg1[%c0, %c0_1, %c0_2] : memref<1x18x2304xf32, #tpu.memory_space<vmem>>, vector<1x8x2048xf32>
    %3 = vector.shape_cast %2 : vector<1x8x2048xf32> to vector<8x2048xf32>
    %c0_3 = arith.constant 0 : index
    %c0_4 = arith.constant 0 : index
    %c128 = arith.constant 128 : index
    %4 = vector.load %arg1[%c0_3, %c0_4, %c128] : memref<1x18x2304xf32, #tpu.memory_space<vmem>>, vector<1x8x2048xf32>
    %5 = vector.shape_cast %4 : vector<1x8x2048xf32> to vector<8x2048xf32>
    %c0_5 = arith.constant 0 : index
    %c0_6 = arith.constant 0 : index
    %c256 = arith.constant 256 : index
    %6 = vector.load %arg1[%c0_5, %c0_6, %c256] : memref<1x18x2304xf32, #tpu.memory_space<vmem>>, vector<1x8x2048xf32>
    %7 = vector.shape_cast %6 : vector<1x8x2048xf32> to vector<8x2048xf32>
    %c0_7 = arith.constant 0 : index
    %c1 = arith.constant 1 : index
    %c0_8 = arith.constant 0 : index
    %8 = vector.load %arg1[%c0_7, %c1, %c0_8] : memref<1x18x2304xf32, #tpu.memory_space<vmem>>, vector<1x8x2048xf32>
    %9 = vector.shape_cast %8 : vector<1x8x2048xf32> to vector<8x2048xf32>
    %c0_9 = arith.constant 0 : index
    %c1_10 = arith.constant 1 : index
    %c128_11 = arith.constant 128 : index
    %10 = vector.load %arg1[%c0_9, %c1_10, %c128_11] : memref<1x18x2304xf32, #tpu.memory_space<vmem>>, vector<1x8x2048xf32>
    %11 = vector.shape_cast %10 : vector<1x8x2048xf32> to vector<8x2048xf32>
    %c0_12 = arith.constant 0 : index
    %c1_13 = arith.constant 1 : index
    %c256_14 = arith.constant 256 : index
    %12 = vector.load %arg1[%c0_12, %c1_13, %c256_14] : memref<1x18x2304xf32, #tpu.memory_space<vmem>>, vector<1x8x2048xf32>
    %13 = vector.shape_cast %12 : vector<1x8x2048xf32> to vector<8x2048xf32>
    %c0_15 = arith.constant 0 : index
    %c2 = arith.constant 2 : index
    %c0_16 = arith.constant 0 : index
    %14 = vector.load %arg1[%c0_15, %c2, %c0_16] : memref<1x18x2304xf32, #tpu.memory_space<vmem>>, vector<1x8x2048xf32>
    %15 = vector.shape_cast %14 : vector<1x8x2048xf32> to vector<8x2048xf32>
    %c0_17 = arith.constant 0 : index
    %c2_18 = arith.constant 2 : index
    %c128_19 = arith.constant 128 : index
    %16 = vector.load %arg1[%c0_17, %c2_18, %c128_19] : memref<1x18x2304xf32, #tpu.memory_space<vmem>>, vector<1x8x2048xf32>
    %17 = vector.shape_cast %16 : vector<1x8x2048xf32> to vector<8x2048xf32>
    %c0_20 = arith.constant 0 : index
    %c2_21 = arith.constant 2 : index
    %c256_22 = arith.constant 256 : index
    %18 = vector.load %arg1[%c0_20, %c2_21, %c256_22] : memref<1x18x2304xf32, #tpu.memory_space<vmem>>, vector<1x8x2048xf32>
    %19 = vector.shape_cast %18 : vector<1x8x2048xf32> to vector<8x2048xf32>
    %20 = tpu.concatenate %3, %5, %7, %9, %11, %13, %15, %17, %19, %0 in 0 : vector<8x2048xf32>, vector<8x2048xf32>, vector<8x2048xf32>, vector<8x2048xf32>, vector<8x2048xf32>, vector<8x2048xf32>, vector<8x2048xf32>, vector<8x2048xf32>, vector<8x2048xf32>, vector<8x2048xf32> -> vector<80x2048xf32>
    %c0_23 = arith.constant 0 : index
    %c0_24 = arith.constant 0 : index
    %21 = vector.load %arg2[%c0_23, %c0_24] : memref<256x80xf32, #tpu.memory_space<vmem>>, vector<256x80xf32>
    %cst_25 = arith.constant dense<0.000000e+00> : vector<256x2048xf32>
    %22 = tpu.matmul %21, %20, %cst_25 {dimension_numbers = #tpu.dot_dimension_numbers<[1], [0], [0], [1], [0, 0, 1, 1], [], []>} : vector<256x80xf32>, vector<80x2048xf32>, vector<256x2048xf32> -> vector<256x2048xf32>
    %23 = vector.extract_strided_slice %22 {offsets = [0, 0], sizes = [32, 2048], strides = [1, 1]} : vector<256x2048xf32> to vector<32x2048xf32>
    %cst_26 = arith.constant 0.000000e+00 : f32
    %24 = vector.broadcast %cst_26 : f32 to vector<32x2048xf32>
    %25 = arith.maximumf %23, %24 : vector<32x2048xf32>
    %26 = arith.addf %1, %25 : vector<32x2048xf32>
    %27 = vector.extract_strided_slice %22 {offsets = [32, 0], sizes = [32, 2048], strides = [1, 1]} : vector<256x2048xf32> to vector<32x2048xf32>
    %cst_27 = arith.constant 0.000000e+00 : f32
    %28 = vector.broadcast %cst_27 : f32 to vector<32x2048xf32>
    %29 = arith.maximumf %27, %28 : vector<32x2048xf32>
    %30 = arith.addf %26, %29 : vector<32x2048xf32>
    %31 = vector.extract_strided_slice %22 {offsets = [64, 0], sizes = [32, 2048], strides = [1, 1]} : vector<256x2048xf32> to vector<32x2048xf32>
    %cst_28 = arith.constant 0.000000e+00 : f32
    %32 = vector.broadcast %cst_28 : f32 to vector<32x2048xf32>
    %33 = arith.maximumf %31, %32 : vector<32x2048xf32>
    %34 = arith.addf %30, %33 : vector<32x2048xf32>
    %35 = vector.extract_strided_slice %22 {offsets = [96, 0], sizes = [32, 2048], strides = [1, 1]} : vector<256x2048xf32> to vector<32x2048xf32>
    %cst_29 = arith.constant 0.000000e+00 : f32
    %36 = vector.broadcast %cst_29 : f32 to vector<32x2048xf32>
    %37 = arith.maximumf %35, %36 : vector<32x2048xf32>
    %38 = arith.addf %34, %37 : vector<32x2048xf32>
    %39 = vector.extract_strided_slice %22 {offsets = [128, 0], sizes = [32, 2048], strides = [1, 1]} : vector<256x2048xf32> to vector<32x2048xf32>
    %cst_30 = arith.constant 0.000000e+00 : f32
    %40 = vector.broadcast %cst_30 : f32 to vector<32x2048xf32>
    %41 = arith.maximumf %39, %40 : vector<32x2048xf32>
    %42 = arith.addf %38, %41 : vector<32x2048xf32>
    %43 = vector.extract_strided_slice %22 {offsets = [160, 0], sizes = [32, 2048], strides = [1, 1]} : vector<256x2048xf32> to vector<32x2048xf32>
    %cst_31 = arith.constant 0.000000e+00 : f32
    %44 = vector.broadcast %cst_31 : f32 to vector<32x2048xf32>
    %45 = arith.maximumf %43, %44 : vector<32x2048xf32>
    %46 = arith.addf %42, %45 : vector<32x2048xf32>
    %47 = vector.extract_strided_slice %22 {offsets = [192, 0], sizes = [32, 2048], strides = [1, 1]} : vector<256x2048xf32> to vector<32x2048xf32>
    %cst_32 = arith.constant 0.000000e+00 : f32
    %48 = vector.broadcast %cst_32 : f32 to vector<32x2048xf32>
    %49 = arith.maximumf %47, %48 : vector<32x2048xf32>
    %50 = arith.addf %46, %49 : vector<32x2048xf32>
    %51 = vector.extract_strided_slice %22 {offsets = [224, 0], sizes = [32, 2048], strides = [1, 1]} : vector<256x2048xf32> to vector<32x2048xf32>
    %cst_33 = arith.constant 0.000000e+00 : f32
    %52 = vector.broadcast %cst_33 : f32 to vector<32x2048xf32>
    %53 = arith.maximumf %51, %52 : vector<32x2048xf32>
    %54 = arith.addf %50, %53 : vector<32x2048xf32>
    %c0_34 = arith.constant 0 : index
    %c8 = arith.constant 8 : index
    %c0_35 = arith.constant 0 : index
    %55 = vector.load %arg1[%c0_34, %c8, %c0_35] : memref<1x18x2304xf32, #tpu.memory_space<vmem>>, vector<1x8x2048xf32>
    %56 = vector.shape_cast %55 : vector<1x8x2048xf32> to vector<8x2048xf32>
    %c0_36 = arith.constant 0 : index
    %c8_37 = arith.constant 8 : index
    %c128_38 = arith.constant 128 : index
    %57 = vector.load %arg1[%c0_36, %c8_37, %c128_38] : memref<1x18x2304xf32, #tpu.memory_space<vmem>>, vector<1x8x2048xf32>
    %58 = vector.shape_cast %57 : vector<1x8x2048xf32> to vector<8x2048xf32>
    %c0_39 = arith.constant 0 : index
    %c8_40 = arith.constant 8 : index
    %c256_41 = arith.constant 256 : index
    %59 = vector.load %arg1[%c0_39, %c8_40, %c256_41] : memref<1x18x2304xf32, #tpu.memory_space<vmem>>, vector<1x8x2048xf32>
    %60 = vector.shape_cast %59 : vector<1x8x2048xf32> to vector<8x2048xf32>
    %c0_42 = arith.constant 0 : index
    %c9 = arith.constant 9 : index
    %c0_43 = arith.constant 0 : index
    %61 = vector.load %arg1[%c0_42, %c9, %c0_43] : memref<1x18x2304xf32, #tpu.memory_space<vmem>>, vector<1x8x2048xf32>
    %62 = vector.shape_cast %61 : vector<1x8x2048xf32> to vector<8x2048xf32>
    %c0_44 = arith.constant 0 : index
    %c9_45 = arith.constant 9 : index
    %c128_46 = arith.constant 128 : index
    %63 = vector.load %arg1[%c0_44, %c9_45, %c128_46] : memref<1x18x2304xf32, #tpu.memory_space<vmem>>, vector<1x8x2048xf32>
    %64 = vector.shape_cast %63 : vector<1x8x2048xf32> to vector<8x2048xf32>
    %c0_47 = arith.constant 0 : index
    %c9_48 = arith.constant 9 : index
    %c256_49 = arith.constant 256 : index
    %65 = vector.load %arg1[%c0_47, %c9_48, %c256_49] : memref<1x18x2304xf32, #tpu.memory_space<vmem>>, vector<1x8x2048xf32>
    %66 = vector.shape_cast %65 : vector<1x8x2048xf32> to vector<8x2048xf32>
    %c0_50 = arith.constant 0 : index
    %c10 = arith.constant 10 : index
    %c0_51 = arith.constant 0 : index
    %67 = vector.load %arg1[%c0_50, %c10, %c0_51] : memref<1x18x2304xf32, #tpu.memory_space<vmem>>, vector<1x8x2048xf32>
    %68 = vector.shape_cast %67 : vector<1x8x2048xf32> to vector<8x2048xf32>
    %c0_52 = arith.constant 0 : index
    %c10_53 = arith.constant 10 : index
    %c128_54 = arith.constant 128 : index
    %69 = vector.load %arg1[%c0_52, %c10_53, %c128_54] : memref<1x18x2304xf32, #tpu.memory_space<vmem>>, vector<1x8x2048xf32>
    %70 = vector.shape_cast %69 : vector<1x8x2048xf32> to vector<8x2048xf32>
    %c0_55 = arith.constant 0 : index
    %c10_56 = arith.constant 10 : index
    %c256_57 = arith.constant 256 : index
    %71 = vector.load %arg1[%c0_55, %c10_56, %c256_57] : memref<1x18x2304xf32, #tpu.memory_space<vmem>>, vector<1x8x2048xf32>
    %72 = vector.shape_cast %71 : vector<1x8x2048xf32> to vector<8x2048xf32>
    %73 = tpu.concatenate %56, %58, %60, %62, %64, %66, %68, %70, %72, %0 in 0 : vector<8x2048xf32>, vector<8x2048xf32>, vector<8x2048xf32>, vector<8x2048xf32>, vector<8x2048xf32>, vector<8x2048xf32>, vector<8x2048xf32>, vector<8x2048xf32>, vector<8x2048xf32>, vector<8x2048xf32> -> vector<80x2048xf32>
    %c0_58 = arith.constant 0 : index
    %c0_59 = arith.constant 0 : index
    %74 = vector.load %arg2[%c0_58, %c0_59] : memref<256x80xf32, #tpu.memory_space<vmem>>, vector<256x80xf32>
    %cst_60 = arith.constant dense<0.000000e+00> : vector<256x2048xf32>
    %75 = tpu.matmul %74, %73, %cst_60 {dimension_numbers = #tpu.dot_dimension_numbers<[1], [0], [0], [1], [0, 0, 1, 1], [], []>} : vector<256x80xf32>, vector<80x2048xf32>, vector<256x2048xf32> -> vector<256x2048xf32>
    %76 = vector.extract_strided_slice %75 {offsets = [0, 0], sizes = [32, 2048], strides = [1, 1]} : vector<256x2048xf32> to vector<32x2048xf32>
    %cst_61 = arith.constant 0.000000e+00 : f32
    %77 = vector.broadcast %cst_61 : f32 to vector<32x2048xf32>
    %78 = arith.maximumf %76, %77 : vector<32x2048xf32>
    %79 = arith.addf %54, %78 : vector<32x2048xf32>
    %80 = vector.extract_strided_slice %75 {offsets = [32, 0], sizes = [32, 2048], strides = [1, 1]} : vector<256x2048xf32> to vector<32x2048xf32>
    %cst_62 = arith.constant 0.000000e+00 : f32
    %81 = vector.broadcast %cst_62 : f32 to vector<32x2048xf32>
    %82 = arith.maximumf %80, %81 : vector<32x2048xf32>
    %83 = arith.addf %79, %82 : vector<32x2048xf32>
    %84 = vector.extract_strided_slice %75 {offsets = [64, 0], sizes = [32, 2048], strides = [1, 1]} : vector<256x2048xf32> to vector<32x2048xf32>
    %cst_63 = arith.constant 0.000000e+00 : f32
    %85 = vector.broadcast %cst_63 : f32 to vector<32x2048xf32>
    %86 = arith.maximumf %84, %85 : vector<32x2048xf32>
    %87 = arith.addf %83, %86 : vector<32x2048xf32>
    %88 = vector.extract_strided_slice %75 {offsets = [96, 0], sizes = [32, 2048], strides = [1, 1]} : vector<256x2048xf32> to vector<32x2048xf32>
    %cst_64 = arith.constant 0.000000e+00 : f32
    %89 = vector.broadcast %cst_64 : f32 to vector<32x2048xf32>
    %90 = arith.maximumf %88, %89 : vector<32x2048xf32>
    %91 = arith.addf %87, %90 : vector<32x2048xf32>
    %92 = vector.extract_strided_slice %75 {offsets = [128, 0], sizes = [32, 2048], strides = [1, 1]} : vector<256x2048xf32> to vector<32x2048xf32>
    %cst_65 = arith.constant 0.000000e+00 : f32
    %93 = vector.broadcast %cst_65 : f32 to vector<32x2048xf32>
    %94 = arith.maximumf %92, %93 : vector<32x2048xf32>
    %95 = arith.addf %91, %94 : vector<32x2048xf32>
    %96 = vector.extract_strided_slice %75 {offsets = [160, 0], sizes = [32, 2048], strides = [1, 1]} : vector<256x2048xf32> to vector<32x2048xf32>
    %cst_66 = arith.constant 0.000000e+00 : f32
    %97 = vector.broadcast %cst_66 : f32 to vector<32x2048xf32>
    %98 = arith.maximumf %96, %97 : vector<32x2048xf32>
    %99 = arith.addf %95, %98 : vector<32x2048xf32>
    %100 = vector.extract_strided_slice %75 {offsets = [192, 0], sizes = [32, 2048], strides = [1, 1]} : vector<256x2048xf32> to vector<32x2048xf32>
    %cst_67 = arith.constant 0.000000e+00 : f32
    %101 = vector.broadcast %cst_67 : f32 to vector<32x2048xf32>
    %102 = arith.maximumf %100, %101 : vector<32x2048xf32>
    %103 = arith.addf %99, %102 : vector<32x2048xf32>
    %104 = vector.extract_strided_slice %75 {offsets = [224, 0], sizes = [32, 2048], strides = [1, 1]} : vector<256x2048xf32> to vector<32x2048xf32>
    %cst_68 = arith.constant 0.000000e+00 : f32
    %105 = vector.broadcast %cst_68 : f32 to vector<32x2048xf32>
    %106 = arith.maximumf %104, %105 : vector<32x2048xf32>
    %107 = arith.addf %103, %106 : vector<32x2048xf32>
    %108 = vector.extract_strided_slice %107 {offsets = [0, 0], sizes = [32, 128], strides = [1, 1]} : vector<32x2048xf32> to vector<32x128xf32>
    %109 = vector.extract_strided_slice %107 {offsets = [0, 128], sizes = [32, 128], strides = [1, 1]} : vector<32x2048xf32> to vector<32x128xf32>
    %110 = arith.addf %108, %109 : vector<32x128xf32>
    %111 = vector.extract_strided_slice %107 {offsets = [0, 256], sizes = [32, 128], strides = [1, 1]} : vector<32x2048xf32> to vector<32x128xf32>
    %112 = arith.addf %110, %111 : vector<32x128xf32>
    %113 = vector.extract_strided_slice %107 {offsets = [0, 384], sizes = [32, 128], strides = [1, 1]} : vector<32x2048xf32> to vector<32x128xf32>
    %114 = arith.addf %112, %113 : vector<32x128xf32>
    %115 = vector.extract_strided_slice %107 {offsets = [0, 512], sizes = [32, 128], strides = [1, 1]} : vector<32x2048xf32> to vector<32x128xf32>
    %116 = arith.addf %114, %115 : vector<32x128xf32>
    %117 = vector.extract_strided_slice %107 {offsets = [0, 640], sizes = [32, 128], strides = [1, 1]} : vector<32x2048xf32> to vector<32x128xf32>
    %118 = arith.addf %116, %117 : vector<32x128xf32>
    %119 = vector.extract_strided_slice %107 {offsets = [0, 768], sizes = [32, 128], strides = [1, 1]} : vector<32x2048xf32> to vector<32x128xf32>
    %120 = arith.addf %118, %119 : vector<32x128xf32>
    %121 = vector.extract_strided_slice %107 {offsets = [0, 896], sizes = [32, 128], strides = [1, 1]} : vector<32x2048xf32> to vector<32x128xf32>
    %122 = arith.addf %120, %121 : vector<32x128xf32>
    %123 = vector.extract_strided_slice %107 {offsets = [0, 1024], sizes = [32, 128], strides = [1, 1]} : vector<32x2048xf32> to vector<32x128xf32>
    %124 = arith.addf %122, %123 : vector<32x128xf32>
    %125 = vector.extract_strided_slice %107 {offsets = [0, 1152], sizes = [32, 128], strides = [1, 1]} : vector<32x2048xf32> to vector<32x128xf32>
    %126 = arith.addf %124, %125 : vector<32x128xf32>
    %127 = vector.extract_strided_slice %107 {offsets = [0, 1280], sizes = [32, 128], strides = [1, 1]} : vector<32x2048xf32> to vector<32x128xf32>
    %128 = arith.addf %126, %127 : vector<32x128xf32>
    %129 = vector.extract_strided_slice %107 {offsets = [0, 1408], sizes = [32, 128], strides = [1, 1]} : vector<32x2048xf32> to vector<32x128xf32>
    %130 = arith.addf %128, %129 : vector<32x128xf32>
    %131 = vector.extract_strided_slice %107 {offsets = [0, 1536], sizes = [32, 128], strides = [1, 1]} : vector<32x2048xf32> to vector<32x128xf32>
    %132 = arith.addf %130, %131 : vector<32x128xf32>
    %133 = vector.extract_strided_slice %107 {offsets = [0, 1664], sizes = [32, 128], strides = [1, 1]} : vector<32x2048xf32> to vector<32x128xf32>
    %134 = arith.addf %132, %133 : vector<32x128xf32>
    %135 = vector.extract_strided_slice %107 {offsets = [0, 1792], sizes = [32, 128], strides = [1, 1]} : vector<32x2048xf32> to vector<32x128xf32>
    %136 = arith.addf %134, %135 : vector<32x128xf32>
    %137 = vector.extract_strided_slice %107 {offsets = [0, 1920], sizes = [32, 128], strides = [1, 1]} : vector<32x2048xf32> to vector<32x128xf32>
    %138 = arith.addf %136, %137 : vector<32x128xf32>
    %cst_69 = arith.constant 3.906250e-03 : f32
    %139 = vector.broadcast %cst_69 : f32 to vector<32x128xf32>
    %140 = arith.mulf %138, %139 : vector<32x128xf32>
    %141 = tpu.transpose %140, [1, 0] : vector<32x128xf32> -> vector<128x32xf32>
    %c0_70 = arith.constant 0 : index
    %c0_71 = arith.constant 0 : index
    %142 = vector.load %arg3[%c0_70, %c0_71] : memref<32x128xf32, #tpu.memory_space<vmem>>, vector<32x128xf32>
    %cst_72 = arith.constant dense<0.000000e+00> : vector<128x128xf32>
    %143 = tpu.matmul %141, %142, %cst_72 {dimension_numbers = #tpu.dot_dimension_numbers<[1], [0], [0], [1], [0, 0, 1, 1], [], []>} : vector<128x32xf32>, vector<32x128xf32>, vector<128x128xf32> -> vector<128x128xf32>
    %c0_73 = arith.constant 0 : index
    %c0_74 = arith.constant 0 : index
    %144 = vector.load %arg4[%c0_73, %c0_74] : memref<1x128xf32, #tpu.memory_space<vmem>>, vector<1x128xf32>
    %145 = vector.broadcast %144 : vector<1x128xf32> to vector<128x128xf32>
    %146 = arith.addf %143, %145 : vector<128x128xf32>
    %c0_75 = arith.constant 0 : index
    %c0_76 = arith.constant 0 : index
    %147 = vector.load %arg5[%c0_75, %c0_76] : memref<128x128xf32, #tpu.memory_space<vmem>>, vector<128x128xf32>
    tpu.vector_store %arg5[%c0_75, %c0_76], %146 {strides = array<i32>} : memref<128x128xf32, #tpu.memory_space<vmem>>, vector<128x128xf32>,
    return
  }
  func.func @transform_0(%arg0: i32) -> (i32, i32, i32) {
    %c0_i32 = arith.constant 0 : i32
    %c0_i32_0 = arith.constant 0 : i32
    %c0_i32_1 = arith.constant 0 : i32
    return %arg0, %c0_i32, %c0_i32_0 : i32, i32, i32
  }
  func.func @transform_1(%arg0: i32) -> (i32, i32) {
    %c0_i32 = arith.constant 0 : i32
    %c0_i32_0 = arith.constant 0 : i32
    %c0_i32_1 = arith.constant 0 : i32
    return %c0_i32, %c0_i32_0 : i32, i32
  }
  func.func @transform_2(%arg0: i32) -> (i32, i32) {
    %c0_i32 = arith.constant 0 : i32
    %c0_i32_0 = arith.constant 0 : i32
    %c0_i32_1 = arith.constant 0 : i32
    return %c0_i32, %c0_i32_0 : i32, i32
  }
  func.func @transform_3(%arg0: i32) -> (i32, i32) {
    %c0_i32 = arith.constant 0 : i32
    %c0_i32_0 = arith.constant 0 : i32
    %c0_i32_1 = arith.constant 0 : i32
    return %c0_i32, %c0_i32_0 : i32, i32
  }
  func.func @transform_4(%arg0: i32) -> (i32, i32) {
    %c0_i32 = arith.constant 0 : i32
    %c0_i32_0 = arith.constant 0 : i32
    return %arg0, %c0_i32 : i32, i32
  }
}

</mosaic_0001>

<bundles_post_ra>
// kernel: exercise4_brevitas_forward.1
= control target key start
LH: loop header
LB: loop body
LE: loop exit
PB: predicated region body
PF: predicated region fallthrough
CT: control target
= control target key end

     0   :  { %s8645_s15 = smov 0   ;;  %s13697_s0 = inlined_call_operand.vmem [shape: f32[2,18,2304], index: 0, kind: input, shape index: {}]   ;;  %s13698_s1 = inlined_call_operand.vmem [shape: f32[256,80], index: 1, kind: input, shape index: {}]   ;;  %s13699_s2 = inlined_call_operand.vmem [shape: f32[32,128], index: 2, kind: input, shape index: {}]   ;;  %s13700_s3 = inlined_call_operand.vmem [shape: f32[1,128], index: 3, kind: input, shape index: {}]   ;;  %s13701_s4 = inlined_call_operand.vmem [shape: f32[256,128], index: 4, kind: output, shape index: {}]  }
   0x1 LB: > { %s8651_s16 = sadd.s32 4294967295, %s8616_s15   ;;  %p7479_p0 = scmp.ge.s32.totalorder %s8616_s15, 1  ;;  %s8616_s15 = sphi %s8645_s15, %s14_s15  }
   0x2   : > { %p162_p1 = scmp.lt.s32.totalorder %s8616_s15, 3 }
   0x4   : > { %p163_p2 = pnand %p7479_p0, %p162_p1 }
   0x6   : > { %166 = sbr.rel (%p163_p2) target bundleno = 1688 (0x698), region = 36 }
   0xd   : > { %p188_p3 = scmp.lt.s32.totalorder %s8651_s16, 1  ;;  %v13704_v0 = vmov 0.0   ;;  %vm321_vm0 = vcmask 1046528   ;;  %vm430_vm1 = vcmask 1045504   ;;  %vm539_vm2 = vcmask 654336   ;;  %s7481_s9 = sshll.u32 %s8651_s16, 4 }
   0xe   : > { %700 = vmatprep.mubr.f32.mxu0 %v13704_v0  ;;  %957 = vmatprep.mubr.f32.mxu1 %v13704_v0  ;;  %vm7209_vm3 = vcmask 261120   ;;  %p194_p4 = scmp.lt.s32.totalorder %s7481_s9, 31 }
   0xf   : > { %s189_s17 = scalar_select %p188_p3, %s8651_s16, 1 }
  0x10   : > { %s13827_s9 = smov (!%p194_p4, %s7481_s9), 31 }
  0x11   : > { %s8398_s18 = smul.u32 432, %s189_s17  ;;  %s7482_s10 = sshll.u32 %s13827_s9, 3 }
  0x12   : > { %s13676_s17 = scalar_lea.vmem %s13701_s4, %s7482_s10 }
  0x13   : > { %s8662_s21 = scalar_lea.vmem %s13697_s0, %s8398_s18 }
  0x14   : > { %v200_v1 = vld [vmem:[%s8662_s21 + $0x8] sm:$0xff]  ;;  %v201_v2 = vld [vmem:[%s8662_s21 + $0x10] sm:$0xff]  ;;  %v202_v3 = vld [vmem:[%s8662_s21 + $0x18] sm:$0xff] }
  0x15   : > { %v8066_v4 = vpack.c.bf16 %v201_v2, %v200_v1  ;;  %v8668_v5 = vld [vmem:[%s8662_s21 + $0x20] sm:$0xff]  ;;  %v8088_v7 = vpack.c.bf16 %v202_v3, %v201_v2  ;;  %v218_v10 = vld [vmem:[%s8662_s21 + $0x8] sm:$0xfe]  ;;  %v234_v11 = vld [vmem:[%s8662_s21 + $0x98] sm:$0x1] }
  0x16   : > { %v199_v6 = vld [vmem:[%s8662_s21] sm:$0xff]  ;;  %v8086_v8 = vpack.c.bf16 %v8668_v5, %v202_v3  ;;  %v220_v12 = vld [vmem:[%s8662_s21 + $0x18] sm:$0xfe]  ;;  %v325_v13 = vrot.slane %v218_v10, 1  ;;  %v326_v14 = vrot.slane %v234_v11, 1  ;;  %v8677_v17 = vld [vmem:[%s8662_s21 + $0x28] sm:$0xff] }
  0x17   : > { %v8068_v9 = vpack.c.bf16 %v200_v1, %v199_v6  ;;  %8067 = vmatprep.subr.bf16.mxu0 %v8066_v4  ;;  %v236_v15 = vld [vmem:[%s8662_s21 + $0xa8] sm:$0x1]  ;;  %v331_v16 = vrot.slane %v220_v12, 1  ;;  %v217_v19 = vld [vmem:[%s8662_s21] sm:$0xfe] }
  0x18   : > { %8087 = vmatprep.subr.bf16.mxu1 %v8086_v8  ;;  %v332_v18 = vrot.slane %v236_v15, 1  ;;  %v233_v20 = vld [vmem:[%s8662_s21 + $0x90] sm:$0x1]  ;;  %v327_v21 = vsel %vm321_vm0, %v325_v13, %v326_v14  ;;  %v322_v22 = vrot.slane %v217_v19, 1  ;;  %v219_v24 = vld [vmem:[%s8662_s21 + $0x10] sm:$0xfe] }
  0x19   : > { %8069 = vmatpush1.bf16.msra.mxu0 %v8068_v9  ;;  %8089 = vmatpush1.bf16.msra.mxu1 %v8088_v7  ;;  %v323_v23 = vrot.slane %v233_v20, 1  ;;  %v235_v25 = vld [vmem:[%s8662_s21 + $0xa0] sm:$0x1]  ;;  %v8070_v26 = vpack.c.bf16 %v327_v21, %v202_v3  ;;  %v328_v28 = vrot.slane %v219_v24, 1  ;;  %v221_v30 = vld [vmem:[%s8662_s21 + $0x20] sm:$0xfe] }
  0x1a   : > { %v333_v27 = vsel %vm321_vm0, %v331_v16, %v332_v18  ;;  %v329_v29 = vrot.slane %v235_v25, 1  ;;  %v222_v31 = vld [vmem:[%s8662_s21 + $0x28] sm:$0xfe]  ;;  %v237_v34 = vld [vmem:[%s8662_s21 + $0xb0] sm:$0x1]  ;;  %v334_v36 = vrot.slane %v221_v30, 1 }
  0x1b   : > { %v8090_v32 = vpack.c.bf16 %v333_v27, %v8677_v17  ;;  %v324_v33 = vsel %vm321_vm0, %v322_v22, %v323_v23  ;;  %v238_v35 = vld [vmem:[%s8662_s21 + $0xb8] sm:$0x1]  ;;  %v337_v37 = vrot.slane %v222_v31, 1  ;;  %8071 = vmatprep.subr.bf16.mxu0 %v8070_v26  ;;  %v335_v40 = vrot.slane %v237_v34, 1  ;;  %v254_v42 = vld [vmem:[%s8662_s21 + $0x8] sm:$0xfc] }
  0x1c   : > { %v8072_v38 = vpack.c.bf16 %v324_v33, %v201_v2  ;;  %v330_v39 = vsel %vm321_vm0, %v328_v28, %v329_v29  ;;  %v338_v41 = vrot.slane %v238_v35, 1  ;;  %v255_v43 = vld [vmem:[%s8662_s21 + $0x10] sm:$0xfc]  ;;  %v270_v47 = vld [vmem:[%s8662_s21 + $0x98] sm:$0x3]  ;;  %v434_v49 = vrot.slane %v254_v42, 2 }
  0x1d   : > { %8091 = vmatprep.subr.bf16.mxu1 %v8090_v32  ;;  %v8092_v44 = vpack.c.bf16 %v330_v39, %v8668_v5  ;;  %v8074_v45 = vpack.c.bf16 %v333_v27, %v330_v39  ;;  %v8076_v46 = vpack.c.bf16 %v330_v39, %v327_v21  ;;  %v271_v48 = vld [vmem:[%s8662_s21 + $0xa0] sm:$0x3]  ;;  %v8698_v50 = vsel %vm321_vm0, %v334_v36, %v335_v40  ;;  %v256_v54 = vld [vmem:[%s8662_s21 + $0x18] sm:$0xfc]  ;;  %v257_v55 = vld [vmem:[%s8662_s21 + $0x20] sm:$0xfc] }
  0x1e   : > { %8073 = vmatpush1.bf16.msra.mxu0 %v8072_v38  ;;  %v8701_v51 = vsel %vm321_vm0, %v337_v37, %v338_v41  ;;  %v435_v52 = vrot.slane %v270_v47, 2  ;;  %v437_v53 = vrot.slane %v255_v43, 2  ;;  %v8096_v57 = vpack.c.bf16 %v8698_v50, %v333_v27  ;;  %v272_v59 = vld [vmem:[%s8662_s21 + $0xa8] sm:$0x3]  ;;  %v273_v60 = vld [vmem:[%s8662_s21 + $0xb0] sm:$0x3] }
  0x1f   : > { %8093 = vmatpush1.bf16.msra.mxu1 %v8092_v44  ;;  %8075 = vmatprep.subr.bf16.mxu0 %v8074_v45  ;;  %v8094_v56 = vpack.c.bf16 %v8701_v51, %v8698_v50  ;;  %v438_v58 = vrot.slane %v271_v48, 2  ;;  %v440_v61 = vrot.slane %v256_v54, 2  ;;  %v441_v63 = vrot.slane %v272_v59, 2  ;;  %v253_v3 = vld [vmem:[%s8662_s21] sm:$0xfc]  ;;  %v8723_v19 = vld [vmem:[%s8662_s21 + $0x30] sm:$0xff] }
  0x20   : > { %v436_v62 = vsel %vm430_vm1, %v434_v49, %v435_v52  ;;  %v443_v1 = vrot.slane %v257_v55, 2  ;;  %v444_v2 = vrot.slane %v273_v60, 2  ;;  %v269_v6 = vld [vmem:[%s8662_s21 + $0x90] sm:$0x3]  ;;  %v431_v7 = vrot.slane %v253_v3, 2  ;;  %v8729_v25 = vld [vmem:[%s8662_s21 + $0x38] sm:$0xff] }
  0x21   : > { %8095 = vmatprep.subr.bf16.mxu1 %v8094_v56  ;;  %v439_v4 = vsel %vm430_vm1, %v437_v53, %v438_v58  ;;  %v258_v8 = vld [vmem:[%s8662_s21 + $0x28] sm:$0xfc]  ;;  %v442_v10 = vsel %vm430_vm1, %v440_v61, %v441_v63  ;;  %v432_v12 = vrot.slane %v269_v6, 2  ;;  %v274_v13 = vld [vmem:[%s8662_s21 + $0xb8] sm:$0x3]  ;;  %v13702_v22 = vmov 1.0  }
  0x22   : > { %8077 = vmatpush1.bf16.msra.mxu0 %v8076_v46  ;;  %v8078_v9 = vpack.c.bf16 %v439_v4, %v436_v62  ;;  %v8717_v11 = vsel %vm430_vm1, %v443_v1, %v444_v2  ;;  %v224_v14 = vld [vmem:[%s8662_s21 + $0x38] sm:$0xfe]  ;;  %v8100_v16 = vpack.c.bf16 %v442_v10, %v439_v4  ;;  %v446_v18 = vrot.slane %v258_v8, 2  ;;  %v240_v20 = vld [vmem:[%s8662_s21 + $0xc8] sm:$0x1]  ;;  %v8732_v26 = vld [vmem:[%s8662_s21 + $0x40] sm:$0xff] }
  0x23   : > { %8097 = vmatpush1.bf16.msra.mxu1 %v8096_v57  ;;  %v8098_v15 = vpack.c.bf16 %v8717_v11, %v442_v10  ;;  %v433_v21 = vsel %vm430_vm1, %v431_v7, %v432_v12  ;;  %v8082_v23 = vpack.c.bf16 %v13702_v22, %v442_v10  ;;  %v447_v24 = vrot.slane %v274_v13, 2  ;;  %v223_v27 = vld [vmem:[%s8662_s21 + $0x30] sm:$0xfe]  ;;  %v239_v31 = vld [vmem:[%s8662_s21 + $0xc0] sm:$0x1]  ;;  %v8758_v46 = vld [vmem:[%s8662_s21 + $0x48] sm:$0xff] }
  0x24   : > { %8079 = vmatprep.subr.bf16.mxu0 %v8078_v9  ;;  %v8080_v28 = vpack.c.bf16 %v436_v62, %v433_v21  ;;  %v343_v29 = vrot.slane %v224_v14, 1  ;;  %v344_v30 = vrot.slane %v240_v20, 1  ;;  %v225_v32 = vld [vmem:[%s8662_s21 + $0x40] sm:$0xfe]  ;;  %v8106_v34 = vpack.c.bf16 %v8723_v19, %v8677_v17  ;;  %v226_v35 = vld [vmem:[%s8662_s21 + $0x48] sm:$0xfe] }
  0x25   : > { %8099 = vmatprep.subr.bf16.mxu1 %v8098_v15  ;;  %v8738_v33 = vsel %vm430_vm1, %v446_v18, %v447_v24  ;;  %v241_v36 = vld [vmem:[%s8662_s21 + $0xd0] sm:$0x1]  ;;  %v242_v37 = vld [vmem:[%s8662_s21 + $0xd8] sm:$0x1]  ;;  %v8084_v39 = vpack.c.bf16 %v13702_v22, %v439_v4  ;;  %v8104_v40 = vpack.c.bf16 %v13702_v22, %v8717_v11  ;;  %v8126_v41 = vpack.c.bf16 %v8732_v26, %v8729_v25  ;;  %v8755_v45 = vld [vmem:[%s13698_s1] sm:$0xff] }
  0x26   : > { %8081 = vmatpush1.bf16.msra.mxu0 %v8080_v28  ;;  %v8102_v38 = vpack.c.bf16 %v13702_v22, %v8738_v33  ;;  %v340_v42 = vrot.slane %v223_v27, 1  ;;  %v341_v43 = vrot.slane %v239_v31, 1  ;;  %v346_v44 = vrot.slane %v225_v32, 1  ;;  %v259_v53 = vld [vmem:[%s8662_s21 + $0x30] sm:$0xfc]  ;;  %v8792_v8 = vld [vmem:[%s13698_s1 + $0x8] sm:$0xff] }
  0x27   : > { %8101 = vmatpush1.bf16.msra.mxu1 %v8100_v16  ;;  %8083 = vmatprep.subr.bf16.mxu0 %v8082_v23  ;;  %v8761_v47 = vsel %vm321_vm0, %v343_v29, %v344_v30  ;;  %v347_v48 = vrot.slane %v241_v36, 1  ;;  %v349_v49 = vrot.slane %v226_v35, 1  ;;  %v350_v52 = vrot.slane %v242_v37, 1  ;;  %v275_v54 = vld [vmem:[%s8662_s21 + $0xc0] sm:$0x3]  ;;  %v8801_v14 = vld [vmem:[%s8662_s21 + $0x50] sm:$0xff] }
  0x28   : > { %8103 = vmatprep.subr.bf16.mxu1 %v8102_v38  ;;  %v260_v55 = vld [vmem:[%s8662_s21 + $0x38] sm:$0xfc]  ;;  %v8108_v56 = vpack.c.bf16 %v8677_v17, %v8668_v5  ;;  %v8128_v57 = vpack.c.bf16 %v8729_v25, %v8723_v19  ;;  %v261_v58 = vld [vmem:[%s8662_s21 + $0x40] sm:$0xfc]  ;;  %v276_v59 = vld [vmem:[%s8662_s21 + $0xc8] sm:$0x3]  ;;  %v8110_v61 = vpack.c.bf16 %v8701_v51, %v8729_v25  ;;  %v8130_v62 = vpack.c.bf16 %v8761_v47, %v8758_v46 }
  0x29   : > { %v277_v60 = vld [vmem:[%s8662_s21 + $0xd0] sm:$0x3]  ;;  %v342_v5 = vsel %vm321_vm0, %v340_v42, %v341_v43  ;;  %v8779_v17 = vsel %vm321_vm0, %v346_v44, %v347_v48  ;;  %v8782_v63 = vsel %vm321_vm0, %v349_v49, %v350_v52  ;;  %v449_v1 = vrot.slane %v259_v53, 2  ;;  %v262_v9 = vld [vmem:[%s8662_s21 + $0x48] sm:$0xfc]  ;;  %v8818_v24 = vld [vmem:[%s8662_s21 + $0x58] sm:$0xff] }
  0x2a   : > { %8085 = vmatpush1.bf16.msra.mxu0 %v8084_v39  ;;  %v450_v2 = vrot.slane %v275_v54, 2  ;;  %v452_v3 = vrot.slane %v260_v55, 2  ;;  %v453_v4 = vrot.slane %v276_v59, 2  ;;  %v455_v6 = vrot.slane %v261_v58, 2  ;;  %v278_v10 = vld [vmem:[%s8662_s21 + $0xd8] sm:$0x3] }
  0x2b   : > { %8105 = vmatpush1.bf16.msra.mxu1 %v8104_v40  ;;  %8107 = vmatprep.subr.bf16.mxu0 %v8106_v34  ;;  %v456_v7 = vrot.slane %v277_v60, 2  ;;  %v8112_v12 = vpack.c.bf16 %v8698_v50, %v8723_v19  ;;  %v8132_v13 = vpack.c.bf16 %v342_v5, %v8732_v26  ;;  %v8114_v16 = vpack.c.bf16 %v8761_v47, %v342_v5  ;;  %v8825_v25 = vld [vmem:[%s13698_s1 + $0x10] sm:$0xff]  ;;  %v8858_v38 = vld [vmem:[%s8662_s21 + $0x60] sm:$0xff]  ;;  %v8883_v42 = vld [vmem:[%s13698_s1 + $0x28] sm:$0xff] }
  0x2c   : > { %8127 = vmatprep.subr.bf16.mxu1 %v8126_v41  ;;  %v8134_v18 = vpack.c.bf16 %v8782_v63, %v8779_v17  ;;  %v451_v20 = vsel %vm430_vm1, %v449_v1, %v450_v2  ;;  %v454_v50 = vsel %vm430_vm1, %v452_v3, %v453_v4  ;;  %v458_v21 = vrot.slane %v262_v9, 2  ;;  %v8894_v43 = vld [vmem:[%s13698_s1 + $0x30] sm:$0xff]  ;;  %v8920_v49 = vld [vmem:[%s13698_s1 + $0x40] sm:$0xff]  ;;  %v8931_v52 = vld [vmem:[%s13698_s1 + $0x48] sm:$0xff] }
  0x2d   : > { %7483 = vmatmul.mubr.msk.f32.vlgmr.msra.gmra.mrb[0].mxu0 %vm539_vm2, %v8755_v45  ;;  %v8815_v19 = vsel %vm430_vm1, %v455_v6, %v456_v7  ;;  %v459_v23 = vrot.slane %v278_v10, 2  ;;  %v8116_v28 = vpack.c.bf16 %v342_v5, %v8701_v51  ;;  %v8136_v29 = vpack.c.bf16 %v8779_v17, %v8761_v47  ;;  %v8846_v51 = vld [vmem:[%s13698_s1 + $0x18] sm:$0xff]  ;;  %v8942_v53 = vld [vmem:[%s13698_s1 + $0x50] sm:$0xff]  ;;  %v8964_v55 = vld [vmem:[%s13698_s1 + $0x60] sm:$0xff] }
  0x2e   : > { %7515 = vmatmul.mubr.msk.f32.vlgmr.msra.gmra.mrb[0].mxu1 %vm539_vm2, %v8755_v45  ;;  %8109 = vmatpush1.bf16.msra.mxu0 %v8108_v56  ;;  %v8118_v30 = vpack.c.bf16 %v451_v20, %v8738_v33  ;;  %v8138_v31 = vpack.c.bf16 %v8815_v19, %v454_v50  ;;  %v8120_v34 = vpack.c.bf16 %v8738_v33, %v8717_v11  ;;  %v8865_v11 = vld [vmem:[%s13698_s1 + $0x20] sm:$0xff]  ;;  %v8907_v47 = vld [vmem:[%s13698_s1 + $0x38] sm:$0xff]  ;;  %v8975_v56 = vld [vmem:[%s13698_s1 + $0x68] sm:$0xff] }
  0x2f   : > { %706 = vmatprep.mubr.f32.mxu0 %v13704_v0  ;;  %963 = vmatprep.mubr.f32.mxu1 %v13704_v0  ;;  %v8839_v32 = vsel %vm430_vm1, %v458_v21, %v459_v23  ;;  %v8140_v35 = vpack.c.bf16 %v454_v50, %v451_v20  ;;  %v8122_v36 = vpack.c.bf16 %v13702_v22, %v454_v50  ;;  %v8953_v54 = vld [vmem:[%s13698_s1 + $0x58] sm:$0xff]  ;;  %v9008_v59 = vld [vmem:[%s13698_s1 + $0x80] sm:$0xff]  ;;  %v9019_v60 = vld [vmem:[%s13698_s1 + $0x88] sm:$0xff] }
  0x30   : > { %8129 = vmatpush1.bf16.msra.mxu1 %v8128_v57  ;;  %8111 = vmatprep.subr.bf16.mxu0 %v8110_v61  ;;  %v8142_v37 = vpack.c.bf16 %v13702_v22, %v8839_v32  ;;  %v8124_v33 = vpack.c.bf16 %v13702_v22, %v451_v20  ;;  %v8144_v39 = vpack.c.bf16 %v13702_v22, %v8815_v19  ;;  %v8986_v57 = vld [vmem:[%s13698_s1 + $0x70] sm:$0xff]  ;;  %v8997_v58 = vld [vmem:[%s13698_s1 + $0x78] sm:$0xff]  ;;  %v9052_v5 = vld [vmem:[%s13698_s1 + $0xa0] sm:$0xff] }
  0x31   : > { %8131 = vmatprep.subr.bf16.mxu1 %v8130_v62  ;;  %7484 = vmatmul.mubr.msk.f32.gmra.mrb[2].mxu0 %vm539_vm2, %v8792_v8  ;;  %v8146_v40 = vpack.c.bf16 %v8801_v14, %v8758_v46  ;;  %v8166_v41 = vpack.c.bf16 %v8858_v38, %v8818_v24  ;;  %v9030_v61 = vld [vmem:[%s13698_s1 + $0x90] sm:$0xff]  ;;  %v9041_v62 = vld [vmem:[%s13698_s1 + $0x98] sm:$0xff]  ;;  %v9063_v1 = vld [vmem:[%s13698_s1 + $0xa8] sm:$0xff] }
  0x32   : > { %7516 = vmatmul.mubr.msk.f32.gmra.mrb[2].mxu1 %vm539_vm2, %v8792_v8  ;;  %712 = vmatprep.mubr.f32.mxu0 %v13704_v0  ;;  %v9074_v2 = vld [vmem:[%s13698_s1 + $0xb0] sm:$0xff]  ;;  %v9085_v3 = vld [vmem:[%s13698_s1 + $0xb8] sm:$0xff]  ;;  %v9096_v4 = vld [vmem:[%s13698_s1 + $0xc0] sm:$0xff] }
  0x33   : > { %969 = vmatprep.mubr.f32.mxu1 %v13704_v0  ;;  %8113 = vmatpush1.bf16.msra.mxu0 %v8112_v12  ;;  %v9107_v6 = vld [vmem:[%s13698_s1 + $0xc8] sm:$0xff]  ;;  %v9118_v7 = vld [vmem:[%s13698_s1 + $0xd0] sm:$0xff]  ;;  %v9129_v9 = vld [vmem:[%s13698_s1 + $0xd8] sm:$0xff] }
  0x34   : > { %8133 = vmatpush1.bf16.msra.mxu1 %v8132_v13  ;;  %8115 = vmatprep.subr.bf16.mxu0 %v8114_v16  ;;  %v9140_v10 = vld [vmem:[%s13698_s1 + $0xe0] sm:$0xff]  ;;  %v9151_v12 = vld [vmem:[%s13698_s1 + $0xe8] sm:$0xff]  ;;  %v228_v13 = vld [vmem:[%s8662_s21 + $0x58] sm:$0xfe] }
  0x35   : > { %8135 = vmatprep.subr.bf16.mxu1 %v8134_v18  ;;  %7485 = vmatmul.mubr.msk.f32.gmra.mrb[4].mxu0 %vm539_vm2, %v8825_v25  ;;  %v244_v16 = vld [vmem:[%s8662_s21 + $0xe8] sm:$0x1]  ;;  %v9164_v18 = vld [vmem:[%s13698_s1 + $0xf0] sm:$0xff]  ;;  %v355_v20 = vrot.slane %v228_v13, 1  ;;  %v243_v23 = vld [vmem:[%s8662_s21 + $0xe0] sm:$0x1] }
  0x36   : > { %7517 = vmatmul.mubr.msk.f32.gmra.mrb[4].mxu1 %vm539_vm2, %v8825_v25  ;;  %718 = vmatprep.mubr.f32.mxu0 %v13704_v0  ;;  %v356_v50 = vrot.slane %v244_v16, 1  ;;  %v227_v21 = vld [vmem:[%s8662_s21 + $0x50] sm:$0xfe]  ;;  %v279_v22 = vld [vmem:[%s8662_s21 + $0xe0] sm:$0x3] }
  0x37   : > { %975 = vmatprep.mubr.f32.mxu1 %v13704_v0  ;;  %8117 = vmatpush1.bf16.msra.mxu0 %v8116_v28  ;;  %v229_v28 = vld [vmem:[%s8662_s21 + $0x60] sm:$0xfe]  ;;  %v263_v16 = vld [vmem:[%s8662_s21 + $0x50] sm:$0xfc]  ;;  %v462_v44 = vrot.slane %v279_v22, 2  ;;  %v13711_v22 = vpack.c.bf16 %v8818_v24, %v8801_v14 }
  0x38   : > { %8137 = vmatpush1.bf16.msra.mxu1 %v8136_v29  ;;  %8119 = vmatprep.subr.bf16.mxu0 %v8118_v30  ;;  %v230_v29 = vld [vmem:[%s8662_s21 + $0x68] sm:$0xfe]  ;;  %v245_v30 = vld [vmem:[%s8662_s21 + $0xf0] sm:$0x1]  ;;  %v461_v48 = vrot.slane %v263_v16, 2 }
  0x39   : > { %8139 = vmatprep.subr.bf16.mxu1 %v8138_v31  ;;  %7486 = vmatmul.mubr.msk.f32.gmra.mrb[6].mxu0 %vm539_vm2, %v8846_v51  ;;  %v246_v31 = vld [vmem:[%s8662_s21 + $0xf8] sm:$0x1] }
  0x3a   : > { %7518 = vmatmul.mubr.msk.f32.gmra.mrb[6].mxu1 %vm539_vm2, %v8846_v51  ;;  %724 = vmatprep.mubr.f32.mxu0 %v13704_v0  ;;  %v362_v13 = vrot.slane %v246_v31, 1 }
  0x3b   : > { %981 = vmatprep.mubr.f32.mxu1 %v13704_v0  ;;  %8121 = vmatpush1.bf16.msra.mxu0 %v8120_v34  ;;  %v9181_v34 = vld [vmem:[%s13698_s1 + $0xf8] sm:$0xff] }
  0x3c   : > { %8141 = vmatpush1.bf16.msra.mxu1 %v8140_v35  ;;  %8123 = vmatprep.subr.bf16.mxu0 %v8122_v36  ;;  %13708 = vst [vmem:[#allocation2_spill] sm:$0xff] %v9181_v34  ;;  %v9184_v35 = vsel %vm321_vm0, %v355_v20, %v356_v50  ;;  %v352_v36 = vrot.slane %v227_v21, 1  ;;  %v264_v20 = vld [vmem:[%s8662_s21 + $0x58] sm:$0xfc]  ;;  %v265_v50 = vld [vmem:[%s8662_s21 + $0x60] sm:$0xfc] }
  0x3d   : > { %8143 = vmatprep.subr.bf16.mxu1 %v8142_v37  ;;  %7487 = vmatmul.mubr.msk.f32.gmra.mrb[8].mxu0 %vm539_vm2, %v8865_v11  ;;  %v353_v37 = vrot.slane %v243_v23, 1  ;;  %v280_v21 = vld [vmem:[%s8662_s21 + $0xe8] sm:$0x3]  ;;  %v281_v23 = vld [vmem:[%s8662_s21 + $0xf0] sm:$0x3]  ;;  %v464_v27 = vrot.slane %v264_v20, 2 }
  0x3e   : > { %7519 = vmatmul.mubr.msk.f32.gmra.mrb[8].mxu1 %vm539_vm2, %v8865_v11  ;;  %730 = vmatprep.mubr.f32.mxu0 %v13704_v0  ;;  %v467_v15 = vrot.slane %v265_v50, 2 }
  0x3f   : > { %987 = vmatprep.mubr.f32.mxu1 %v13704_v0  ;;  %8125 = vmatpush1.bf16.msra.mxu0 %v8124_v33  ;;  %v9187_v33 = vld [vmem:[%s8662_s21 + $0x68] sm:$0xff] }
  0x40   : > { %8145 = vmatpush1.bf16.msra.mxu1 %v8144_v39  ;;  %8147 = vmatprep.subr.bf16.mxu0 %v8146_v40  ;;  %v358_v39 = vrot.slane %v229_v28, 1  ;;  %v359_v40 = vrot.slane %v245_v30, 1  ;;  %v8170_v28 = vpack.c.bf16 %v9184_v35, %v9187_v33 }
  0x41   : > { %8167 = vmatprep.subr.bf16.mxu1 %v8166_v41  ;;  %7488 = vmatmul.mubr.msk.f32.gmra.mrb[10].mxu0 %vm539_vm2, %v8883_v42  ;;  %v361_v41 = vrot.slane %v230_v29, 1  ;;  %v354_v29 = vsel %vm321_vm0, %v352_v36, %v353_v37  ;;  %v13709_v36 = vpack.c.bf16 %v8758_v46, %v8732_v26  ;;  %v13710_v37 = vmov 0.0  }
  0x42   : > { %7520 = vmatmul.mubr.msk.f32.gmra.mrb[10].mxu1 %vm539_vm2, %v8883_v42  ;;  %736 = vmatprep.mubr.f32.mxu0 %v13704_v0  ;;  %v9205_v30 = vsel %vm321_vm0, %v358_v39, %v359_v40  ;;  %v266_v39 = vld [vmem:[%s8662_s21 + $0x68] sm:$0xfc]  ;;  %v282_v40 = vld [vmem:[%s8662_s21 + $0xf8] sm:$0x3]  ;;  %v8154_v26 = vpack.c.bf16 %v9184_v35, %v354_v29 }
  0x43   : > { %993 = vmatprep.mubr.f32.mxu1 %v13704_v0  ;;  %v9208_v31 = vsel %vm321_vm0, %v361_v41, %v362_v13  ;;  %v13712_v41 = vpack.c.bf16 %v8782_v63, %v8818_v24  ;;  %v463_v13 = vsel %vm430_vm1, %v461_v48, %v462_v44  ;;  %v470_v20 = vrot.slane %v266_v39, 2  ;;  %v9254_v48 = vld [vmem:[%s8662_s21 + $0x78] sm:$0xff] }
  0x44   : > { %v8174_v46 = vpack.c.bf16 %v9208_v31, %v9205_v30  ;;  %v471_v50 = vrot.slane %v282_v40, 2  ;;  %v13713_v44 = vpack.c.bf16 %v8779_v17, %v8801_v14  ;;  %v8160_v14 = vpack.c.bf16 %v8839_v32, %v8815_v19 }
  0x45   : > { %7489 = vmatmul.mubr.msk.f32.gmra.mrb[12].mxu0 %vm539_vm2, %v8894_v43 }
  0x46   : > { %7521 = vmatmul.mubr.msk.f32.gmra.mrb[12].mxu1 %vm539_vm2, %v8894_v43  ;;  %742 = vmatprep.mubr.f32.mxu0 %v13704_v0  ;;  %v9261_v17 = vsel %vm430_vm1, %v470_v20, %v471_v50 }
  0x47   : > { %999 = vmatprep.mubr.f32.mxu1 %v13704_v0 }
  0x49   : > { %7490 = vmatmul.mubr.msk.f32.gmra.mrb[14].mxu0 %vm539_vm2, %v8907_v47 }
  0x4a   : > { %7522 = vmatmul.mubr.msk.f32.gmra.mrb[14].mxu1 %vm539_vm2, %v8907_v47  ;;  %748 = vmatprep.mubr.f32.mxu0 %v13704_v0 }
  0x4b   : > { %1005 = vmatprep.mubr.f32.mxu1 %v13704_v0 }
  0x4d   : > { %7491 = vmatmul.mubr.msk.f32.gmra.mrb[16].mxu0 %vm539_vm2, %v8920_v49 }
  0x4e   : > { %7523 = vmatmul.mubr.msk.f32.gmra.mrb[16].mxu1 %vm539_vm2, %v8920_v49  ;;  %754 = vmatprep.mubr.f32.mxu0 %v13704_v0 }
  0x4f   : > { %1011 = vmatprep.mubr.f32.mxu1 %v13704_v0 }
  0x51   : > { %7492 = vmatmul.mubr.msk.f32.gmra.mrb[18].mxu0 %vm539_vm2, %v8931_v52 }
  0x52   : > { %7524 = vmatmul.mubr.msk.f32.gmra.mrb[18].mxu1 %vm539_vm2, %v8931_v52  ;;  %760 = vmatprep.mubr.f32.mxu0 %v13704_v0 }
  0x53   : > { %1017 = vmatprep.mubr.f32.mxu1 %v13704_v0 }
  0x55   : > { %7493 = vmatmul.mubr.msk.f32.gmra.mrb[20].mxu0 %vm539_vm2, %v8942_v53 }
  0x56   : > { %7525 = vmatmul.mubr.msk.f32.gmra.mrb[20].mxu1 %vm539_vm2, %v8942_v53  ;;  %766 = vmatprep.mubr.f32.mxu0 %v13704_v0 }
  0x57   : > { %1023 = vmatprep.mubr.f32.mxu1 %v13704_v0 }
  0x59   : > { %7494 = vmatmul.mubr.msk.f32.gmra.mrb[22].mxu0 %vm539_vm2, %v8953_v54 }
  0x5a   : > { %7526 = vmatmul.mubr.msk.f32.gmra.mrb[22].mxu1 %vm539_vm2, %v8953_v54  ;;  %772 = vmatprep.mubr.f32.mxu0 %v13704_v0 }
  0x5b   : > { %1029 = vmatprep.mubr.f32.mxu1 %v13704_v0 }
  0x5d   : > { %7495 = vmatmul.mubr.msk.f32.gmra.mrb[24].mxu0 %vm539_vm2, %v8964_v55 }
  0x5e   : > { %7527 = vmatmul.mubr.msk.f32.gmra.mrb[24].mxu1 %vm539_vm2, %v8964_v55  ;;  %778 = vmatprep.mubr.f32.mxu0 %v13704_v0 }
  0x5f   : > { %1035 = vmatprep.mubr.f32.mxu1 %v13704_v0 }
  0x61   : > { %7496 = vmatmul.mubr.msk.f32.gmra.mrb[26].mxu0 %vm539_vm2, %v8975_v56 }
  0x62   : > { %7528 = vmatmul.mubr.msk.f32.gmra.mrb[26].mxu1 %vm539_vm2, %v8975_v56  ;;  %784 = vmatprep.mubr.f32.mxu0 %v13704_v0 }
  0x63   : > { %1041 = vmatprep.mubr.f32.mxu1 %v13704_v0 }
  0x65   : > { %7497 = vmatmul.mubr.msk.f32.gmra.mrb[28].mxu0 %vm539_vm2, %v8986_v57 }
  0x66   : > { %7529 = vmatmul.mubr.msk.f32.gmra.mrb[28].mxu1 %vm539_vm2, %v8986_v57  ;;  %790 = vmatprep.mubr.f32.mxu0 %v13704_v0 }
  0x67   : > { %1047 = vmatprep.mubr.f32.mxu1 %v13704_v0 }
  0x69   : > { %7498 = vmatmul.mubr.msk.f32.gmra.mrb[30].mxu0 %vm539_vm2, %v8997_v58 }
  0x6a   : > { %7530 = vmatmul.mubr.msk.f32.gmra.mrb[30].mxu1 %vm539_vm2, %v8997_v58  ;;  %796 = vmatprep.mubr.f32.mxu0 %v13704_v0 }
  0x6b   : > { %1053 = vmatprep.mubr.f32.mxu1 %v13704_v0 }
  0x6d   : > { %7499 = vmatmul.mubr.msk.f32.gmra.mrb[32].mxu0 %vm539_vm2, %v9008_v59 }
  0x6e   : > { %7531 = vmatmul.mubr.msk.f32.gmra.mrb[32].mxu1 %vm539_vm2, %v9008_v59  ;;  %802 = vmatprep.mubr.f32.mxu0 %v13704_v0 }
  0x6f   : > { %1059 = vmatprep.mubr.f32.mxu1 %v13704_v0 }
  0x71   : > { %7500 = vmatmul.mubr.msk.f32.gmra.mrb[34].mxu0 %vm539_vm2, %v9019_v60 }
  0x72   : > { %7532 = vmatmul.mubr.msk.f32.gmra.mrb[34].mxu1 %vm539_vm2, %v9019_v60  ;;  %808 = vmatprep.mubr.f32.mxu0 %v13704_v0 }
  0x73   : > { %1065 = vmatprep.mubr.f32.mxu1 %v13704_v0 }
  0x75   : > { %7501 = vmatmul.mubr.msk.f32.gmra.mrb[36].mxu0 %vm539_vm2, %v9030_v61 }
  0x76   : > { %7533 = vmatmul.mubr.msk.f32.gmra.mrb[36].mxu1 %vm539_vm2, %v9030_v61  ;;  %814 = vmatprep.mubr.f32.mxu0 %v13704_v0 }
  0x77   : > { %1071 = vmatprep.mubr.f32.mxu1 %v13704_v0 }
  0x79   : > { %7502 = vmatmul.mubr.msk.f32.gmra.mrb[38].mxu0 %vm539_vm2, %v9041_v62 }
  0x7a   : > { %7534 = vmatmul.mubr.msk.f32.gmra.mrb[38].mxu1 %vm539_vm2, %v9041_v62  ;;  %820 = vmatprep.mubr.f32.mxu0 %v13704_v0 }
  0x7b   : > { %1077 = vmatprep.mubr.f32.mxu1 %v13704_v0 }
  0x7d   : > { %7503 = vmatmul.mubr.msk.f32.gmra.mrb[40].mxu0 %vm539_vm2, %v9052_v5 }
  0x7e   : > { %7535 = vmatmul.mubr.msk.f32.gmra.mrb[40].mxu1 %vm539_vm2, %v9052_v5  ;;  %826 = vmatprep.mubr.f32.mxu0 %v13704_v0 }
  0x7f   : > { %1083 = vmatprep.mubr.f32.mxu1 %v13704_v0 }
  0x81   : > { %7504 = vmatmul.mubr.msk.f32.gmra.mrb[42].mxu0 %vm539_vm2, %v9063_v1 }
  0x82   : > { %7536 = vmatmul.mubr.msk.f32.gmra.mrb[42].mxu1 %vm539_vm2, %v9063_v1  ;;  %832 = vmatprep.mubr.f32.mxu0 %v13704_v0 }
  0x83   : > { %1089 = vmatprep.mubr.f32.mxu1 %v13704_v0 }
  0x85   : > { %7505 = vmatmul.mubr.msk.f32.gmra.mrb[44].mxu0 %vm539_vm2, %v9074_v2 }
  0x86   : > { %7537 = vmatmul.mubr.msk.f32.gmra.mrb[44].mxu1 %vm539_vm2, %v9074_v2  ;;  %838 = vmatprep.mubr.f32.mxu0 %v13704_v0 }
  0x87   : > { %1095 = vmatprep.mubr.f32.mxu1 %v13704_v0 }
  0x89   : > { %7506 = vmatmul.mubr.msk.f32.gmra.mrb[46].mxu0 %vm539_vm2, %v9085_v3 }
  0x8a   : > { %7538 = vmatmul.mubr.msk.f32.gmra.mrb[46].mxu1 %vm539_vm2, %v9085_v3  ;;  %844 = vmatprep.mubr.f32.mxu0 %v13704_v0 }
  0x8b   : > { %1101 = vmatprep.mubr.f32.mxu1 %v13704_v0 }
  0x8d   : > { %7507 = vmatmul.mubr.msk.f32.gmra.mrb[48].mxu0 %vm539_vm2, %v9096_v4 }
  0x8e   : > { %7539 = vmatmul.mubr.msk.f32.gmra.mrb[48].mxu1 %vm539_vm2, %v9096_v4  ;;  %850 = vmatprep.mubr.f32.mxu0 %v13704_v0 }
  0x8f   : > { %1107 = vmatprep.mubr.f32.mxu1 %v13704_v0 }
  0x91   : > { %7508 = vmatmul.mubr.msk.f32.gmra.mrb[50].mxu0 %vm539_vm2, %v9107_v6 }
  0x92   : > { %7540 = vmatmul.mubr.msk.f32.gmra.mrb[50].mxu1 %vm539_vm2, %v9107_v6  ;;  %856 = vmatprep.mubr.f32.mxu0 %v13704_v0 }
  0x93   : > { %1113 = vmatprep.mubr.f32.mxu1 %v13704_v0 }
  0x95   : > { %7509 = vmatmul.mubr.msk.f32.gmra.mrb[52].mxu0 %vm539_vm2, %v9118_v7 }
  0x96   : > { %7541 = vmatmul.mubr.msk.f32.gmra.mrb[52].mxu1 %vm539_vm2, %v9118_v7  ;;  %862 = vmatprep.mubr.f32.mxu0 %v13704_v0 }
  0x97   : > { %1119 = vmatprep.mubr.f32.mxu1 %v13704_v0 }
  0x99   : > { %7510 = vmatmul.mubr.msk.f32.gmra.mrb[54].mxu0 %vm539_vm2, %v9129_v9 }
  0x9a   : > { %7542 = vmatmul.mubr.msk.f32.gmra.mrb[54].mxu1 %vm539_vm2, %v9129_v9  ;;  %868 = vmatprep.mubr.f32.mxu0 %v13704_v0 }
  0x9b   : > { %1125 = vmatprep.mubr.f32.mxu1 %v13704_v0 }
  0x9d   : > { %7511 = vmatmul.mubr.msk.f32.gmra.mrb[56].mxu0 %vm539_vm2, %v9140_v10 }
  0x9e   : > { %7543 = vmatmul.mubr.msk.f32.gmra.mrb[56].mxu1 %vm539_vm2, %v9140_v10  ;;  %874 = vmatprep.mubr.f32.mxu0 %v13704_v0 }
  0x9f   : > { %1131 = vmatprep.mubr.f32.mxu1 %v13704_v0 }
  0xa1   : > { %7512 = vmatmul.mubr.msk.f32.gmra.mrb[58].mxu0 %vm539_vm2, %v9151_v12 }
  0xa2   : > { %7544 = vmatmul.mubr.msk.f32.gmra.mrb[58].mxu1 %vm539_vm2, %v9151_v12  ;;  %880 = vmatprep.mubr.f32.mxu0 %v13704_v0 }
  0xa3   : > { %1137 = vmatprep.mubr.f32.mxu1 %v13704_v0 }
  0xa5   : > { %7513 = vmatmul.mubr.msk.f32.gmra.mrb[60].mxu0 %vm539_vm2, %v9164_v18 }
  0xa6   : > { %7545 = vmatmul.mubr.msk.f32.gmra.mrb[60].mxu1 %vm539_vm2, %v9164_v18  ;;  %886 = vmatprep.mubr.f32.mxu0 %v13704_v0 }
  0xa7   : > { %1143 = vmatprep.mubr.f32.mxu1 %v13704_v0 }
  0xa9   : > { %7514 = vmatmul.mubr.msk.f32.gmra.mrb[62].mxu0 %vm539_vm2, %v9181_v34 }
  0xaa   : > { %7546 = vmatmul.mubr.msk.f32.gmra.mrb[62].mxu1 %vm539_vm2, %v9181_v34  ;;  %1214 = vmatprep.mubr.f32.mxu0 %v13704_v0  ;;  %v468_v34 = vrot.slane %v281_v23, 2 }
  0xab   : > { %1471 = vmatprep.mubr.f32.mxu1 %v13704_v0  ;;  %v465_v0 = vrot.slane %v280_v21, 2  ;;  %v9243_v21 = vld [vmem:[%s8662_s21 + $0x70] sm:$0xff] }
  0xac   : > { %v9238_v24 = vsel %vm430_vm1, %v467_v15, %v468_v34  ;;  %v8158_v15 = vpack.c.bf16 %v463_v13, %v8839_v32 }
  0xad   : > { %7547 = vmatmul.mubr.msk.f32.vlgmr.msra.gmra.mrb[64].mxu0 %vm539_vm2, %v8755_v45  ;;  %v466_v16 = vsel %vm430_vm1, %v464_v27, %v465_v0  ;;  %v8176_v0 = vpack.c.bf16 %v9205_v30, %v9184_v35  ;;  %v13714_v35 = vmov 1.0  }
  0xae   : > { %7579 = vmatmul.mubr.msk.f32.vlgmr.msra.gmra.mrb[64].mxu1 %vm539_vm2, %v8755_v45  ;;  %8149 = vmatpush1.bf16.msra.mxu0 %v13709_v36  ;;  %v8172_v45 = vpack.c.bf16 %v354_v29, %v8858_v38  ;;  %v8178_v27 = vpack.c.bf16 %v9238_v24, %v466_v16  ;;  %v8180_v34 = vpack.c.bf16 %v466_v16, %v463_v13 }
  0xaf   : > { %1220 = vmatprep.mubr.f32.mxu0 %v13710_v37  ;;  %1477 = vmatprep.mubr.f32.mxu1 %v13710_v37  ;;  %v8182_v23 = vpack.c.bf16 %v13714_v35, %v9261_v17  ;;  %v8164_v19 = vpack.c.bf16 %v13714_v35, %v463_v13  ;;  %v8184_v32 = vpack.c.bf16 %v13714_v35, %v9238_v24 }
  0xb0   : > { %8169 = vmatpush1.bf16.msra.mxu1 %v13711_v22  ;;  %8151 = vmatprep.subr.bf16.mxu0 %v13712_v41 }
  0xb1   : > { %8171 = vmatprep.subr.bf16.mxu1 %v8170_v28  ;;  %7548 = vmatmul.mubr.msk.f32.gmra.mrb[66].mxu0 %vm539_vm2, %v8792_v8  ;;  %v9277_v28 = vld [vmem:[%s8662_s21 + $0x80] sm:$0xff] }
  0xb2   : > { %7580 = vmatmul.mubr.msk.f32.gmra.mrb[66].mxu1 %vm539_vm2, %v8792_v8  ;;  %1226 = vmatprep.mubr.f32.mxu0 %v13710_v37  ;;  %v8156_v8 = vpack.c.bf16 %v354_v29, %v8782_v63  ;;  %v8208_v63 = vpack.c.bf16 %v9254_v48, %v9243_v21  ;;  %v8186_v29 = vpack.c.bf16 %v9243_v21, %v9187_v33 }
  0xb3   : > { %1483 = vmatprep.mubr.f32.mxu1 %v13710_v37  ;;  %8153 = vmatpush1.bf16.msra.mxu0 %v13713_v44 }
  0xb4   : > { %8173 = vmatpush1.bf16.msra.mxu1 %v8172_v45  ;;  %8155 = vmatprep.subr.bf16.mxu0 %v8154_v26 }
  0xb5   : > { %8175 = vmatprep.subr.bf16.mxu1 %v8174_v46  ;;  %7549 = vmatmul.mubr.msk.f32.gmra.mrb[68].mxu0 %vm539_vm2, %v8825_v25 }
  0xb6   : > { %7581 = vmatmul.mubr.msk.f32.gmra.mrb[68].mxu1 %vm539_vm2, %v8825_v25  ;;  %1232 = vmatprep.mubr.f32.mxu0 %v13710_v37  ;;  %v8162_v25 = vpack.c.bf16 %v13714_v35, %v466_v16 }
  0xb7   : > { %1489 = vmatprep.mubr.f32.mxu1 %v13710_v37  ;;  %8157 = vmatpush1.bf16.msra.mxu0 %v8156_v8 }
  0xb8   : > { %8177 = vmatpush1.bf16.msra.mxu1 %v8176_v0  ;;  %8159 = vmatprep.subr.bf16.mxu0 %v8158_v15 }
  0xb9   : > { %8179 = vmatprep.subr.bf16.mxu1 %v8178_v27  ;;  %7550 = vmatmul.mubr.msk.f32.gmra.mrb[70].mxu0 %vm539_vm2, %v8846_v51 }
  0xba   : > { %7582 = vmatmul.mubr.msk.f32.gmra.mrb[70].mxu1 %vm539_vm2, %v8846_v51  ;;  %1238 = vmatprep.mubr.f32.mxu0 %v13710_v37  ;;  %v8206_v51 = vpack.c.bf16 %v9277_v28, %v9254_v48 }
  0xbb   : > { %1495 = vmatprep.mubr.f32.mxu1 %v13710_v37  ;;  %8161 = vmatpush1.bf16.msra.mxu0 %v8160_v14 }
  0xbc   : > { %8181 = vmatpush1.bf16.msra.mxu1 %v8180_v34  ;;  %8163 = vmatprep.subr.bf16.mxu0 %v8162_v25 }
  0xbd   : > { %8183 = vmatprep.subr.bf16.mxu1 %v8182_v23  ;;  %7551 = vmatmul.mubr.msk.f32.gmra.mrb[72].mxu0 %vm539_vm2, %v8865_v11 }
  0xbe   : > { %7583 = vmatmul.mubr.msk.f32.gmra.mrb[72].mxu1 %vm539_vm2, %v8865_v11  ;;  %1244 = vmatprep.mubr.f32.mxu0 %v13710_v37 }
  0xbf   : > { %1501 = vmatprep.mubr.f32.mxu1 %v13710_v37  ;;  %8165 = vmatpush1.bf16.msra.mxu0 %v8164_v19 }
  0xc0   : > { %8185 = vmatpush1.bf16.msra.mxu1 %v8184_v32  ;;  %8187 = vmatprep.subr.bf16.mxu0 %v8186_v29 }
  0xc1   : > { %8207 = vmatprep.subr.bf16.mxu1 %v8206_v51  ;;  %7552 = vmatmul.mubr.msk.f32.gmra.mrb[74].mxu0 %vm539_vm2, %v8883_v42 }
  0xc2   : > { %7584 = vmatmul.mubr.msk.f32.gmra.mrb[74].mxu1 %vm539_vm2, %v8883_v42  ;;  %1250 = vmatprep.mubr.f32.mxu0 %v13710_v37 }
  0xc3   : > { %1507 = vmatprep.mubr.f32.mxu1 %v13710_v37 }
  0xc5   : > { %7553 = vmatmul.mubr.msk.f32.gmra.mrb[76].mxu0 %vm539_vm2, %v8894_v43 }
  0xc6   : > { %7585 = vmatmul.mubr.msk.f32.gmra.mrb[76].mxu1 %vm539_vm2, %v8894_v43  ;;  %1256 = vmatprep.mubr.f32.mxu0 %v13710_v37 }
  0xc7   : > { %1513 = vmatprep.mubr.f32.mxu1 %v13710_v37 }
  0xc9   : > { %7554 = vmatmul.mubr.msk.f32.gmra.mrb[78].mxu0 %vm539_vm2, %v8907_v47 }
  0xca   : > { %7586 = vmatmul.mubr.msk.f32.gmra.mrb[78].mxu1 %vm539_vm2, %v8907_v47  ;;  %1262 = vmatprep.mubr.f32.mxu0 %v13710_v37 }
  0xcb   : > { %1519 = vmatprep.mubr.f32.mxu1 %v13710_v37 }
  0xcd   : > { %7555 = vmatmul.mubr.msk.f32.gmra.mrb[80].mxu0 %vm539_vm2, %v8920_v49 }
  0xce   : > { %7587 = vmatmul.mubr.msk.f32.gmra.mrb[80].mxu1 %vm539_vm2, %v8920_v49  ;;  %1268 = vmatprep.mubr.f32.mxu0 %v13710_v37 }
  0xcf   : > { %1525 = vmatprep.mubr.f32.mxu1 %v13710_v37 }
  0xd1   : > { %7556 = vmatmul.mubr.msk.f32.gmra.mrb[82].mxu0 %vm539_vm2, %v8931_v52 }
  0xd2   : > { %7588 = vmatmul.mubr.msk.f32.gmra.mrb[82].mxu1 %vm539_vm2, %v8931_v52  ;;  %1274 = vmatprep.mubr.f32.mxu0 %v13710_v37 }
  0xd3   : > { %1531 = vmatprep.mubr.f32.mxu1 %v13710_v37 }
  0xd5   : > { %7557 = vmatmul.mubr.msk.f32.gmra.mrb[84].mxu0 %vm539_vm2, %v8942_v53 }
  0xd6   : > { %7589 = vmatmul.mubr.msk.f32.gmra.mrb[84].mxu1 %vm539_vm2, %v8942_v53  ;;  %1280 = vmatprep.mubr.f32.mxu0 %v13710_v37 }
  0xd7   : > { %1537 = vmatprep.mubr.f32.mxu1 %v13710_v37 }
  0xd9   : > { %7558 = vmatmul.mubr.msk.f32.gmra.mrb[86].mxu0 %vm539_vm2, %v8953_v54 }
  0xda   : > { %7590 = vmatmul.mubr.msk.f32.gmra.mrb[86].mxu1 %vm539_vm2, %v8953_v54  ;;  %1286 = vmatprep.mubr.f32.mxu0 %v13710_v37 }
  0xdb   : > { %1543 = vmatprep.mubr.f32.mxu1 %v13710_v37 }
  0xdd   : > { %7559 = vmatmul.mubr.msk.f32.gmra.mrb[88].mxu0 %vm539_vm2, %v8964_v55 }
  0xde   : > { %7591 = vmatmul.mubr.msk.f32.gmra.mrb[88].mxu1 %vm539_vm2, %v8964_v55  ;;  %1292 = vmatprep.mubr.f32.mxu0 %v13710_v37 }
  0xdf   : > { %1549 = vmatprep.mubr.f32.mxu1 %v13710_v37 }
  0xe1   : > { %7560 = vmatmul.mubr.msk.f32.gmra.mrb[90].mxu0 %vm539_vm2, %v8975_v56 }
  0xe2   : > { %7592 = vmatmul.mubr.msk.f32.gmra.mrb[90].mxu1 %vm539_vm2, %v8975_v56  ;;  %1298 = vmatprep.mubr.f32.mxu0 %v13710_v37 }
  0xe3   : > { %1555 = vmatprep.mubr.f32.mxu1 %v13710_v37 }
  0xe5   : > { %7561 = vmatmul.mubr.msk.f32.gmra.mrb[92].mxu0 %vm539_vm2, %v8986_v57 }
  0xe6   : > { %7593 = vmatmul.mubr.msk.f32.gmra.mrb[92].mxu1 %vm539_vm2, %v8986_v57  ;;  %1304 = vmatprep.mubr.f32.mxu0 %v13710_v37 }
  0xe7   : > { %1561 = vmatprep.mubr.f32.mxu1 %v13710_v37 }
  0xe9   : > { %7562 = vmatmul.mubr.msk.f32.gmra.mrb[94].mxu0 %vm539_vm2, %v8997_v58 }
  0xea   : > { %7594 = vmatmul.mubr.msk.f32.gmra.mrb[94].mxu1 %vm539_vm2, %v8997_v58  ;;  %1310 = vmatprep.mubr.f32.mxu0 %v13710_v37 }
  0xeb   : > { %1567 = vmatprep.mubr.f32.mxu1 %v13710_v37 }
  0xed   : > { %7563 = vmatmul.mubr.msk.f32.gmra.mrb[96].mxu0 %vm539_vm2, %v9008_v59 }
  0xee   : > { %7595 = vmatmul.mubr.msk.f32.gmra.mrb[96].mxu1 %vm539_vm2, %v9008_v59  ;;  %1316 = vmatprep.mubr.f32.mxu0 %v13710_v37 }
  0xef   : > { %1573 = vmatprep.mubr.f32.mxu1 %v13710_v37 }
  0xf1   : > { %7564 = vmatmul.mubr.msk.f32.gmra.mrb[98].mxu0 %vm539_vm2, %v9019_v60 }
  0xf2   : > { %7596 = vmatmul.mubr.msk.f32.gmra.mrb[98].mxu1 %vm539_vm2, %v9019_v60  ;;  %1322 = vmatprep.mubr.f32.mxu0 %v13710_v37 }
  0xf3   : > { %1579 = vmatprep.mubr.f32.mxu1 %v13710_v37 }
  0xf5   : > { %7565 = vmatmul.mubr.msk.f32.gmra.mrb[100].mxu0 %vm539_vm2, %v9030_v61 }
  0xf6   : > { %7597 = vmatmul.mubr.msk.f32.gmra.mrb[100].mxu1 %vm539_vm2, %v9030_v61  ;;  %1328 = vmatprep.mubr.f32.mxu0 %v13710_v37 }
  0xf7   : > { %1585 = vmatprep.mubr.f32.mxu1 %v13710_v37 }
  0xf9   : > { %7566 = vmatmul.mubr.msk.f32.gmra.mrb[102].mxu0 %vm539_vm2, %v9041_v62 }
  0xfa   : > { %7598 = vmatmul.mubr.msk.f32.gmra.mrb[102].mxu1 %vm539_vm2, %v9041_v62  ;;  %1334 = vmatprep.mubr.f32.mxu0 %v13710_v37 }
  0xfb   : > { %1591 = vmatprep.mubr.f32.mxu1 %v13710_v37 }
  0xfd   : > { %7567 = vmatmul.mubr.msk.f32.gmra.mrb[104].mxu0 %vm539_vm2, %v9052_v5 }
  0xfe   : > { %7599 = vmatmul.mubr.msk.f32.gmra.mrb[104].mxu1 %vm539_vm2, %v9052_v5  ;;  %1340 = vmatprep.mubr.f32.mxu0 %v13710_v37 }
  0xff   : > { %1597 = vmatprep.mubr.f32.mxu1 %v13710_v37 }
 0x100   : > { %v702_v11 = vpop.f32.mrb[0].mxu0 }
 0x101   : > { %v959_v42 = vpop.f32.mrb[0].mxu1  ;;  %v704_v43 = vpop.f32.mrb[1].mxu0  ;;  %7568 = vmatmul.mubr.msk.f32.gmra.mrb[106].mxu0 %vm539_vm2, %v9063_v1 }
 0x102   : > { %7600 = vmatmul.mubr.msk.f32.gmra.mrb[106].mxu1 %vm539_vm2, %v9063_v1  ;;  %v961_v47 = vpop.f32.mrb[1].mxu1  ;;  %1346 = vmatprep.mubr.f32.mxu0 %v13710_v37 }
 0x103   : > { %1603 = vmatprep.mubr.f32.mxu1 %v13710_v37  ;;  %v2695_v45 = vmax.f32 %v961_v47, 0.0  ;;  %v9459_v47 = vld [vmem:[%s8662_s21 + $0x70] sm:$0xfe] }
 0x104   : > { %v708_v49 = vpop.f32.mrb[2].mxu0 }
 0x105   : > { %v965_v52 = vpop.f32.mrb[2].mxu1  ;;  %v710_v53 = vpop.f32.mrb[3].mxu0  ;;  %7569 = vmatmul.mubr.msk.f32.gmra.mrb[108].mxu0 %vm539_vm2, %v9074_v2  ;;  %v2708_v8 = vmax.f32 %v708_v49, 0.0 }
 0x106   : > { %7601 = vmatmul.mubr.msk.f32.gmra.mrb[108].mxu1 %vm539_vm2, %v9074_v2  ;;  %v967_v54 = vpop.f32.mrb[3].mxu1  ;;  %1352 = vmatprep.mubr.f32.mxu0 %v13710_v37  ;;  %v2692_v2 = vmax.f32 %v702_v11, 0.0  ;;  %v2709_v34 = vmax.f32 %v710_v53, 0.0 }
 0x107   : > { %1609 = vmatprep.mubr.f32.mxu1 %v13710_v37  ;;  %v2711_v25 = vmax.f32 %v967_v54, 0.0 }
 0x108   : > { %v9402_v55 = vpop.f32.mrb[4].mxu0 }
 0x109   : > { %v9404_v56 = vpop.f32.mrb[4].mxu1  ;;  %v9406_v57 = vpop.f32.mrb[5].mxu0  ;;  %7570 = vmatmul.mubr.msk.f32.gmra.mrb[110].mxu0 %vm539_vm2, %v9085_v3  ;;  %v2724_v49 = vmax.f32 %v9402_v55, 0.0 }
 0x10a   : > { %7602 = vmatmul.mubr.msk.f32.gmra.mrb[110].mxu1 %vm539_vm2, %v9085_v3  ;;  %v9412_v58 = vpop.f32.mrb[5].mxu1  ;;  %1358 = vmatprep.mubr.f32.mxu0 %v13710_v37  ;;  %v2694_v3 = vmax.f32 %v959_v42, 0.0 }
 0x10b   : > { %1615 = vmatprep.mubr.f32.mxu1 %v13710_v37 }
 0x10c   : > { %v9416_v59 = vpop.f32.mrb[6].mxu0 }
 0x10d   : > { %v9418_v60 = vpop.f32.mrb[6].mxu1  ;;  %v9420_v61 = vpop.f32.mrb[7].mxu0  ;;  %7571 = vmatmul.mubr.msk.f32.gmra.mrb[112].mxu0 %vm539_vm2, %v9096_v4 }
 0x10e   : > { %7603 = vmatmul.mubr.msk.f32.gmra.mrb[112].mxu1 %vm539_vm2, %v9096_v4  ;;  %v9426_v62 = vpop.f32.mrb[7].mxu1  ;;  %1364 = vmatprep.mubr.f32.mxu0 %v13710_v37  ;;  %v2693_v4 = vmax.f32 %v704_v43, 0.0 }
 0x10f   : > { %1621 = vmatprep.mubr.f32.mxu1 %v13710_v37 }
 0x110   : > { %v726_v5 = vpop.f32.mrb[8].mxu0 }
 0x111   : > { %v983_v1 = vpop.f32.mrb[8].mxu1  ;;  %v2820_v36 = vmax.f32 %v726_v5, 0.0  ;;  %v728_v40 = vpop.f32.mrb[9].mxu0  ;;  %7572 = vmatmul.mubr.msk.f32.gmra.mrb[114].mxu0 %vm539_vm2, %v9107_v6 }
 0x112   : > { %v2822_v39 = vmax.f32 %v983_v1, 0.0  ;;  %v985_v22 = vpop.f32.mrb[9].mxu1  ;;  %7604 = vmatmul.mubr.msk.f32.gmra.mrb[114].mxu1 %vm539_vm2, %v9107_v6  ;;  %v2821_v41 = vmax.f32 %v728_v40, 0.0  ;;  %1370 = vmatprep.mubr.f32.mxu0 %v13710_v37  ;;  %v2710_v6 = vmax.f32 %v965_v52, 0.0  ;;  %v2726_v52 = vmax.f32 %v9404_v56, 0.0 }
 0x113   : > { %v2823_v26 = vmax.f32 %v985_v22, 0.0  ;;  %1627 = vmatprep.mubr.f32.mxu1 %v13710_v37  ;;  %v9436_v46 = vadd.f32 %v2820_v36, %v2692_v2  ;;  %v2725_v2 = vmax.f32 %v9406_v57, 0.0  ;;  %v364_v40 = vrot.slane %v9459_v47, 1 }
 0x114   : > { %v9438_v13 = vadd.f32 %v2822_v39, %v2694_v3  ;;  %v9440_v16 = vadd.f32 %v2821_v41, %v2693_v4  ;;  %v732_v50 = vpop.f32.mrb[10].mxu0  ;;  %v2727_v3 = vmax.f32 %v9412_v58, 0.0  ;;  %v248_v41 = vld [vmem:[%s8662_s21 + $0x108] sm:$0x1] }
 0x115   : > { %v9442_v20 = vadd.f32 %v2823_v26, %v2695_v45  ;;  %v989_v44 = vpop.f32.mrb[10].mxu1  ;;  %v2836_v0 = vmax.f32 %v732_v50, 0.0  ;;  %v734_v27 = vpop.f32.mrb[11].mxu0  ;;  %7573 = vmatmul.mubr.msk.f32.gmra.mrb[116].mxu0 %vm539_vm2, %v9118_v7  ;;  %v232_v45 = vld [vmem:[%s8662_s21 + $0x78] sm:$0xfe]  ;;  %v2740_v26 = vmax.f32 %v9416_v59, 0.0 }
 0x116   : > { %v2838_v15 = vmax.f32 %v989_v44, 0.0  ;;  %v991_v14 = vpop.f32.mrb[11].mxu1  ;;  %7605 = vmatmul.mubr.msk.f32.gmra.mrb[116].mxu1 %vm539_vm2, %v9118_v7  ;;  %v2837_v23 = vmax.f32 %v734_v27, 0.0  ;;  %1376 = vmatprep.mubr.f32.mxu0 %v13710_v37  ;;  %v9462_v7 = vld [vmem:[%s8662_s21 + $0x100] sm:$0x1]  ;;  %v2742_v50 = vmax.f32 %v9418_v60, 0.0 }
 0x117   : > { %v2839_v19 = vmax.f32 %v991_v14, 0.0  ;;  %1633 = vmatprep.mubr.f32.mxu1 %v13710_v37  ;;  %v9450_v32 = vadd.f32 %v2836_v0, %v2708_v8  ;;  %v365_v22 = vrot.slane %v9462_v7, 1  ;;  %v2743_v27 = vmax.f32 %v9426_v62, 0.0 }
 0x118   : > { %v9452_v29 = vadd.f32 %v2838_v15, %v2710_v6  ;;  %v9454_v51 = vadd.f32 %v2837_v23, %v2709_v34  ;;  %v738_v42 = vpop.f32.mrb[12].mxu0  ;;  %v2741_v15 = vmax.f32 %v9420_v61, 0.0  ;;  %v368_v23 = vrot.slane %v248_v41, 1  ;;  %v9533_v41 = vld [vmem:[%s8662_s21 + $0x88] sm:$0xff] }
 0x119   : > { %v9456_v11 = vadd.f32 %v2839_v19, %v2711_v25  ;;  %v995_v43 = vpop.f32.mrb[12].mxu1  ;;  %v2852_v53 = vmax.f32 %v738_v42, 0.0  ;;  %v740_v5 = vpop.f32.mrb[13].mxu0  ;;  %7574 = vmatmul.mubr.msk.f32.gmra.mrb[118].mxu0 %vm539_vm2, %v9129_v9  ;;  %v367_v25 = vrot.slane %v232_v45, 1  ;;  %v249_v42 = vld [vmem:[%s8662_s21 + $0x80] sm:$0xfe] }
 0x11a   : > { %v2854_v54 = vmax.f32 %v995_v43, 0.0  ;;  %v997_v1 = vpop.f32.mrb[13].mxu1  ;;  %7606 = vmatmul.mubr.msk.f32.gmra.mrb[118].mxu1 %vm539_vm2, %v9129_v9  ;;  %v2853_v36 = vmax.f32 %v740_v5, 0.0  ;;  %1382 = vmatprep.mubr.f32.mxu0 %v13710_v37  ;;  %v251_v5 = vld [vmem:[%s8662_s21 + $0x88] sm:$0xfe] }
 0x11b   : > { %v2855_v55 = vmax.f32 %v997_v1, 0.0  ;;  %1639 = vmatprep.mubr.f32.mxu1 %v13710_v37  ;;  %v9474_v56 = vadd.f32 %v2852_v53, %v2724_v49  ;;  %v252_v1 = vld [vmem:[%s8662_s21 + $0x118] sm:$0x1] }
 0x11c   : > { %v9476_v39 = vadd.f32 %v2854_v54, %v2726_v52  ;;  %v9480_v9 = vadd.f32 %v2853_v36, %v2725_v2  ;;  %v744_v57 = vpop.f32.mrb[14].mxu0  ;;  %v250_v52 = vld [vmem:[%s8662_s21 + $0x110] sm:$0x1]  ;;  %v9521_v36 = vsel %vm321_vm0, %v364_v40, %v365_v22 }
 0x11d   : > { %v9482_v4 = vadd.f32 %v2855_v55, %v2727_v3  ;;  %v1001_v58 = vpop.f32.mrb[14].mxu1  ;;  %v2868_v44 = vmax.f32 %v744_v57, 0.0  ;;  %v746_v6 = vpop.f32.mrb[15].mxu0  ;;  %7575 = vmatmul.mubr.msk.f32.gmra.mrb[120].mxu0 %vm539_vm2, %v9140_v10 }
 0x11e   : > { %v2870_v8 = vmax.f32 %v1001_v58, 0.0  ;;  %v1003_v0 = vpop.f32.mrb[15].mxu1  ;;  %7607 = vmatmul.mubr.msk.f32.gmra.mrb[120].mxu1 %vm539_vm2, %v9140_v10  ;;  %v2869_v14 = vmax.f32 %v746_v6, 0.0  ;;  %1388 = vmatprep.mubr.f32.mxu0 %v13710_v37 }
 0x11f   : > { %v2871_v34 = vmax.f32 %v1003_v0, 0.0  ;;  %1645 = vmatprep.mubr.f32.mxu1 %v13710_v37  ;;  %v9496_v59 = vadd.f32 %v2868_v44, %v2740_v26  ;;  %v389_v26 = vrot.slane %v250_v52, 1  ;;  %v286_v52 = vld [vmem:[%s8662_s21 + $0x110] sm:$0x3] }
 0x120   : > { %v9498_v60 = vadd.f32 %v2870_v8, %v2742_v50  ;;  %v9500_v19 = vadd.f32 %v2869_v14, %v2741_v15  ;;  %v750_v61 = vpop.f32.mrb[16].mxu0  ;;  %v8188_v15 = vpack.c.bf16 %v9187_v33, %v8858_v38  ;;  %v283_v14 = vld [vmem:[%s8662_s21 + $0x100] sm:$0x3]  ;;  %v284_v33 = vld [vmem:[%s8662_s21 + $0x108] sm:$0x3] }
 0x121   : > { %v9502_v10 = vadd.f32 %v2871_v34, %v2743_v27  ;;  %v1007_v62 = vpop.f32.mrb[16].mxu1  ;;  %v2948_v43 = vmax.f32 %v750_v61, 0.0  ;;  %v752_v7 = vpop.f32.mrb[17].mxu0  ;;  %7576 = vmatmul.mubr.msk.f32.gmra.mrb[122].mxu0 %vm539_vm2, %v9151_v12  ;;  %v267_v27 = vld [vmem:[%s8662_s21 + $0x70] sm:$0xfc] }
 0x122   : > { %v2950_v47 = vmax.f32 %v1007_v62, 0.0  ;;  %v1009_v49 = vpop.f32.mrb[17].mxu1  ;;  %7608 = vmatmul.mubr.msk.f32.gmra.mrb[122].mxu1 %vm539_vm2, %v9151_v12  ;;  %v2949_v53 = vmax.f32 %v752_v7, 0.0  ;;  %1394 = vmatprep.mubr.f32.mxu0 %v13710_v37  ;;  %v9524_v12 = vsel %vm321_vm0, %v367_v25, %v368_v23  ;;  %v268_v34 = vld [vmem:[%s8662_s21 + $0x78] sm:$0xfc] }
 0x123   : > { %v2951_v54 = vmax.f32 %v1009_v49, 0.0  ;;  %1651 = vmatprep.mubr.f32.mxu1 %v13710_v37  ;;  %v9515_v2 = vadd.f32 %v2948_v43, %v9436_v46  ;;  %v388_v46 = vrot.slane %v249_v42, 1  ;;  %v8210_v38 = vpack.c.bf16 %v9524_v12, %v9533_v41  ;;  %v285_v62 = vld [vmem:[%s8662_s21 + $0x80] sm:$0xfc] }
 0x124   : > { %v9518_v3 = vadd.f32 %v2950_v47, %v9438_v13  ;;  %v9527_v55 = vadd.f32 %v2949_v53, %v9440_v16  ;;  %v756_v58 = vpop.f32.mrb[18].mxu0  ;;  %v394_v16 = vrot.slane %v251_v5, 1  ;;  %v473_v5 = vrot.slane %v267_v27, 2 }
 0x125   : > { %v9530_v57 = vadd.f32 %v2951_v54, %v9442_v20  ;;  %v1013_v45 = vpop.f32.mrb[18].mxu1  ;;  %v2964_v13 = vmax.f32 %v756_v58, 0.0  ;;  %v758_v40 = vpop.f32.mrb[19].mxu0  ;;  %7577 = vmatmul.mubr.msk.f32.gmra.mrb[124].mxu0 %vm539_vm2, %v9164_v18  ;;  %v395_v20 = vrot.slane %v252_v1, 1  ;;  %v474_v1 = vrot.slane %v283_v14, 2 }
 0x126   : > { %v2966_v50 = vmax.f32 %v1013_v45, 0.0  ;;  %v1015_v22 = vpop.f32.mrb[19].mxu1  ;;  %7609 = vmatmul.mubr.msk.f32.gmra.mrb[124].mxu1 %vm539_vm2, %v9164_v18  ;;  %v2965_v44 = vmax.f32 %v758_v40, 0.0  ;;  %1400 = vmatprep.mubr.f32.mxu0 %v13710_v37  ;;  %v8212_v18 = vpack.c.bf16 %v9521_v36, %v9277_v28  ;;  %v476_v41 = vrot.slane %v268_v34, 2 }
 0x127   : > { %v2967_v8 = vmax.f32 %v1015_v22, 0.0  ;;  %1657 = vmatprep.mubr.f32.mxu1 %v13710_v37  ;;  %v9542_v6 = vadd.f32 %v2964_v13, %v9450_v32  ;;  %v9574_v49 = vsel %vm321_vm0, %v394_v16, %v395_v20  ;;  %v497_v22 = vrot.slane %v285_v62, 2 }
 0x128   : > { %v9545_v0 = vadd.f32 %v2966_v50, %v9452_v29  ;;  %v9555_v25 = vadd.f32 %v2965_v44, %v9454_v51  ;;  %v762_v32 = vpop.f32.mrb[20].mxu0  ;;  %v8190_v29 = vpack.c.bf16 %v9208_v31, %v9254_v48  ;;  %v13715_v51 = vld [vmem:[#allocation2_spill] sm:$0xff]  ;;  %v498_v16 = vrot.slane %v286_v52, 2 }
 0x129   : > { %v9558_v23 = vadd.f32 %v2967_v8, %v9456_v11  ;;  %v1019_v61 = vpop.f32.mrb[20].mxu1  ;;  %v2980_v42 = vmax.f32 %v762_v32, 0.0  ;;  %v764_v47 = vpop.f32.mrb[21].mxu0  ;;  %7578 = vmatmul.mubr.msk.f32.gmra.mrb[126].mxu0 %vm539_vm2, %v13715_v51  ;;  %v9571_v11 = vsel %vm321_vm0, %v388_v46, %v389_v26  ;;  %v477_v46 = vrot.slane %v284_v33, 2  ;;  %v288_v33 = vld [vmem:[%s8662_s21 + $0x118] sm:$0x3] }
 0x12a   : > { %v2982_v43 = vmax.f32 %v1019_v61, 0.0  ;;  %v1021_v7 = vpop.f32.mrb[21].mxu1  ;;  %7610 = vmatmul.mubr.msk.f32.gmra.mrb[126].mxu1 %vm539_vm2, %v13715_v51  ;;  %v2981_v53 = vmax.f32 %v764_v47, 0.0  ;;  %1728 = vmatprep.mubr.f32.mxu0 %v13710_v37  ;;  %v8214_v34 = vpack.c.bf16 %v9574_v49, %v9571_v11  ;;  %v9604_v32 = vsel %vm430_vm1, %v473_v5, %v474_v1  ;;  %v287_v61 = vld [vmem:[%s8662_s21 + $0x88] sm:$0xfc] }
 0x12b   : > { %v2983_v54 = vmax.f32 %v1021_v7, 0.0  ;;  %1985 = vmatprep.mubr.f32.mxu1 %v13710_v37  ;;  %v9580_v58 = vadd.f32 %v2980_v42, %v9474_v56  ;;  %v504_v51 = vrot.slane %v288_v33, 2  ;;  %v8196_v49 = vpack.c.bf16 %v9521_v36, %v9208_v31 }
 0x12c   : > { %v9583_v45 = vadd.f32 %v2982_v43, %v9476_v39  ;;  %v9586_v26 = vadd.f32 %v2981_v53, %v9480_v9  ;;  %v768_v50 = vpop.f32.mrb[22].mxu0  ;;  %v8409_v39 = vld [vmem:[%s13698_s1] sm:$0xff]  ;;  %v8192_v9 = vpack.c.bf16 %v9205_v30, %v9243_v21  ;;  %v8216_v52 = vpack.c.bf16 %v9571_v11, %v9524_v12 }
 0x12d   : > { %v9589_v13 = vadd.f32 %v2983_v54, %v9482_v4  ;;  %v1025_v40 = vpop.f32.mrb[22].mxu1  ;;  %v2996_v20 = vmax.f32 %v768_v50, 0.0  ;;  %v770_v44 = vpop.f32.mrb[23].mxu0  ;;  %7611 = vmatmul.mubr.msk.f32.vlgmr.msra.gmra.mrb[128].mxu0 %vm539_vm2, %v8409_v39  ;;  %v8194_v4 = vpack.c.bf16 %v9524_v12, %v9521_v36  ;;  %v9642_v53 = vld [vmem:[%s8662_s21 + $0xa0] sm:$0xff]  ;;  %v8198_v1 = vpack.c.bf16 %v9604_v32, %v9261_v17 }
 0x12e   : > { %v2998_v56 = vmax.f32 %v1025_v40, 0.0  ;;  %v1027_v8 = vpop.f32.mrb[23].mxu1  ;;  %7643 = vmatmul.mubr.msk.f32.vlgmr.msra.gmra.mrb[128].mxu1 %vm539_vm2, %v8409_v39  ;;  %v2997_v27 = vmax.f32 %v770_v44, 0.0  ;;  %8189 = vmatpush1.bf16.msra.mxu0 %v8188_v15  ;;  %v9619_v15 = vsel %vm430_vm1, %v476_v41, %v477_v46  ;;  %v9664_v41 = vld [vmem:[%s8662_s21 + $0xa8] sm:$0xff] }
 0x12f   : > { %v2999_v14 = vmax.f32 %v1027_v8, 0.0  ;;  %1734 = vmatprep.mubr.f32.mxu0 %v13710_v37  ;;  %v9609_v62 = vadd.f32 %v2996_v20, %v9496_v59  ;;  %1991 = vmatprep.mubr.f32.mxu1 %v13710_v37  ;;  %v8220_v20 = vpack.c.bf16 %v9619_v15, %v9604_v32  ;;  %v8202_v8 = vpack.c.bf16 %v13714_v35, %v9619_v15 }
 0x130   : > { %v9612_v30 = vadd.f32 %v2998_v56, %v9498_v60  ;;  %8209 = vmatpush1.bf16.msra.mxu1 %v8208_v63  ;;  %v9622_v42 = vadd.f32 %v2997_v27, %v9500_v19  ;;  %v774_v59 = vpop.f32.mrb[24].mxu0  ;;  %8191 = vmatprep.subr.bf16.mxu0 %v8190_v29  ;;  %v9628_v60 = vsel %vm430_vm1, %v497_v22, %v498_v16  ;;  %v8410_v19 = vld [vmem:[%s13698_s1 + $0x8] sm:$0xff] }
 0x131   : > { %v9625_v43 = vadd.f32 %v2999_v14, %v9502_v10  ;;  %v1031_v47 = vpop.f32.mrb[24].mxu1  ;;  %8211 = vmatprep.subr.bf16.mxu1 %v8210_v38  ;;  %v3076_v7 = vmax.f32 %v774_v59, 0.0  ;;  %v776_v48 = vpop.f32.mrb[25].mxu0  ;;  %7612 = vmatmul.mubr.msk.f32.gmra.mrb[130].mxu0 %vm539_vm2, %v8410_v19  ;;  %v503_v10 = vrot.slane %v287_v61, 2  ;;  %v8200_v16 = vpack.c.bf16 %v9261_v17, %v9238_v24 }
 0x132   : > { %v3078_v21 = vmax.f32 %v1031_v47, 0.0  ;;  %v1033_v63 = vpop.f32.mrb[25].mxu1  ;;  %7644 = vmatmul.mubr.msk.f32.gmra.mrb[130].mxu1 %vm539_vm2, %v8410_v19  ;;  %v3077_v29 = vmax.f32 %v776_v48, 0.0  ;;  %1740 = vmatprep.mubr.f32.mxu0 %v13710_v37  ;;  %v8204_v59 = vpack.c.bf16 %v13714_v35, %v9604_v32 }
 0x133   : > { %v3079_v38 = vmax.f32 %v1033_v63, 0.0  ;;  %1997 = vmatprep.mubr.f32.mxu1 %v13710_v37  ;;  %v9645_v54 = vadd.f32 %v3076_v7, %v9515_v2  ;;  %8193 = vmatpush1.bf16.msra.mxu0 %v8192_v9 }
 0x134   : > { %v9648_v5 = vadd.f32 %v3078_v21, %v9518_v3  ;;  %8213 = vmatpush1.bf16.msra.mxu1 %v8212_v18  ;;  %v9656_v31 = vadd.f32 %v3077_v29, %v9527_v55  ;;  %v780_v11 = vpop.f32.mrb[26].mxu0  ;;  %8195 = vmatprep.subr.bf16.mxu0 %v8194_v4  ;;  %v8218_v3 = vpack.c.bf16 %v9628_v60, %v9619_v15  ;;  %v8411_v55 = vld [vmem:[%s13698_s1 + $0x10] sm:$0xff]  ;;  %v8413_v29 = vld [vmem:[%s13698_s1 + $0x20] sm:$0xff] }
 0x135   : > { %v9659_v12 = vadd.f32 %v3079_v38, %v9530_v57  ;;  %v1037_v2 = vpop.f32.mrb[26].mxu1  ;;  %8215 = vmatprep.subr.bf16.mxu1 %v8214_v34  ;;  %v3092_v28 = vmax.f32 %v780_v11, 0.0  ;;  %v782_v18 = vpop.f32.mrb[27].mxu0  ;;  %7613 = vmatmul.mubr.msk.f32.gmra.mrb[132].mxu0 %vm539_vm2, %v8411_v55  ;;  %v505_v57 = vsel %vm430_vm1, %v503_v10, %v504_v51  ;;  %v8224_v15 = vpack.c.bf16 %v13714_v35, %v9628_v60 }
 0x136   : > { %v3094_v36 = vmax.f32 %v1037_v2, 0.0  ;;  %v1039_v46 = vpop.f32.mrb[27].mxu1  ;;  %7645 = vmatmul.mubr.msk.f32.gmra.mrb[132].mxu1 %vm539_vm2, %v8411_v55  ;;  %v3093_v40 = vmax.f32 %v782_v18, 0.0  ;;  %1746 = vmatprep.mubr.f32.mxu0 %v13710_v37 }
 0x137   : > { %v3095_v22 = vmax.f32 %v1039_v46, 0.0  ;;  %2003 = vmatprep.mubr.f32.mxu1 %v13710_v37  ;;  %v9681_v56 = vadd.f32 %v3092_v28, %v9542_v6  ;;  %8197 = vmatpush1.bf16.msra.mxu0 %v8196_v49  ;;  %v8222_v6 = vpack.c.bf16 %v13714_v35, %v505_v57 }
 0x138   : > { %v9684_v44 = vadd.f32 %v3094_v36, %v9545_v0  ;;  %8217 = vmatpush1.bf16.msra.mxu1 %v8216_v52  ;;  %v9689_v39 = vadd.f32 %v3093_v40, %v9555_v25  ;;  %v786_v17 = vpop.f32.mrb[28].mxu0  ;;  %8199 = vmatprep.subr.bf16.mxu0 %v8198_v1  ;;  %v9696_v0 = vld [vmem:[%s8662_s21 + $0x98] sm:$0xff] }
 0x139   : > { %v9692_v24 = vadd.f32 %v3095_v22, %v9558_v23  ;;  %v1043_v9 = vpop.f32.mrb[28].mxu1  ;;  %8219 = vmatprep.subr.bf16.mxu1 %v8218_v3  ;;  %v3108_v4 = vmax.f32 %v786_v17, 0.0  ;;  %v788_v14 = vpop.f32.mrb[29].mxu0  ;;  %v8412_v25 = vld [vmem:[%s13698_s1 + $0x18] sm:$0xff]  ;;  %v9704_v23 = vld [vmem:[%s8662_s21 + $0xb0] sm:$0xff]  ;;  %v8226_v21 = vpack.c.bf16 %v9642_v53, %v9696_v0 }
 0x13a   : > { %v3110_v27 = vmax.f32 %v1043_v9, 0.0  ;;  %v1045_v34 = vpop.f32.mrb[29].mxu1  ;;  %7614 = vmatmul.mubr.msk.f32.gmra.mrb[134].mxu0 %vm539_vm2, %v8412_v25  ;;  %7646 = vmatmul.mubr.msk.f32.gmra.mrb[134].mxu1 %vm539_vm2, %v8412_v25  ;;  %v3109_v61 = vmax.f32 %v788_v14, 0.0 }
 0x13b   : > { %v3111_v33 = vmax.f32 %v1045_v34, 0.0  ;;  %1752 = vmatprep.mubr.f32.mxu0 %v13710_v37  ;;  %2009 = vmatprep.mubr.f32.mxu1 %v13710_v37  ;;  %v9713_v47 = vadd.f32 %v3108_v4, %v9580_v58  ;;  %v8246_v58 = vpack.c.bf16 %v9704_v23, %v9664_v41 }
 0x13c   : > { %v9716_v7 = vadd.f32 %v3110_v27, %v9583_v45  ;;  %8201 = vmatpush1.bf16.msra.mxu0 %v8200_v16  ;;  %8221 = vmatpush1.bf16.msra.mxu1 %v8220_v20  ;;  %v9721_v48 = vadd.f32 %v3109_v61, %v9586_v26  ;;  %v792_v60 = vpop.f32.mrb[30].mxu0 }
 0x13d   : > { %v9724_v63 = vadd.f32 %v3111_v33, %v9589_v13  ;;  %v1049_v19 = vpop.f32.mrb[30].mxu1  ;;  %8203 = vmatprep.subr.bf16.mxu0 %v8202_v8  ;;  %8223 = vmatprep.subr.bf16.mxu1 %v8222_v6  ;;  %v3124_v45 = vmax.f32 %v792_v60, 0.0  ;;  %v794_v10 = vpop.f32.mrb[31].mxu0 }
 0x13e   : > { %v3126_v32 = vmax.f32 %v1049_v19, 0.0  ;;  %v1051_v51 = vpop.f32.mrb[31].mxu1  ;;  %7615 = vmatmul.mubr.msk.f32.gmra.mrb[136].mxu0 %vm539_vm2, %v8413_v29  ;;  %7647 = vmatmul.mubr.msk.f32.gmra.mrb[136].mxu1 %vm539_vm2, %v8413_v29  ;;  %v3125_v26 = vmax.f32 %v794_v10, 0.0 }
 0x13f   : > { %v3127_v13 = vmax.f32 %v1051_v51, 0.0  ;;  %1758 = vmatprep.mubr.f32.mxu0 %v13710_v37  ;;  %2015 = vmatprep.mubr.f32.mxu1 %v13710_v37  ;;  %v9736_v38 = vadd.f32 %v3124_v45, %v9609_v62 }
 0x140   : > { %v9739_v49 = vadd.f32 %v3126_v32, %v9612_v30  ;;  %8205 = vmatpush1.bf16.msra.mxu0 %v8204_v59  ;;  %8225 = vmatpush1.bf16.msra.mxu1 %v8224_v15  ;;  %v9742_v52 = vadd.f32 %v3125_v26, %v9622_v42  ;;  %v798_v11 = vpop.f32.mrb[32].mxu0  ;;  %v8414_v30 = vld [vmem:[%s13698_s1 + $0x28] sm:$0xff] }
 0x141   : > { %v9745_v1 = vadd.f32 %v3127_v13, %v9625_v43  ;;  %v1055_v2 = vpop.f32.mrb[32].mxu1  ;;  %8227 = vmatprep.subr.bf16.mxu0 %v8226_v21  ;;  %8247 = vmatprep.subr.bf16.mxu1 %v8246_v58  ;;  %v3204_v3 = vmax.f32 %v798_v11, 0.0  ;;  %v800_v36 = vpop.f32.mrb[33].mxu0 }
 0x142   : > { %v3206_v28 = vmax.f32 %v1055_v2, 0.0  ;;  %v1057_v62 = vpop.f32.mrb[33].mxu1  ;;  %7616 = vmatmul.mubr.msk.f32.gmra.mrb[138].mxu0 %vm539_vm2, %v8414_v30  ;;  %7648 = vmatmul.mubr.msk.f32.gmra.mrb[138].mxu1 %vm539_vm2, %v8414_v30  ;;  %v3205_v42 = vmax.f32 %v800_v36, 0.0 }
 0x143   : > { %v3207_v18 = vmax.f32 %v1057_v62, 0.0  ;;  %1764 = vmatprep.mubr.f32.mxu0 %v13710_v37  ;;  %2021 = vmatprep.mubr.f32.mxu1 %v13710_v37  ;;  %v9755_v43 = vadd.f32 %v3204_v3, %v9645_v54  ;;  %v8415_v54 = vld [vmem:[%s13698_s1 + $0x30] sm:$0xff] }
 0x144   : > { %v9758_v46 = vadd.f32 %v3206_v28, %v9648_v5  ;;  %v9761_v55 = vadd.f32 %v3205_v42, %v9656_v31  ;;  %v804_v40 = vpop.f32.mrb[34].mxu0 }
 0x145   : > { %v9764_v57 = vadd.f32 %v3207_v18, %v9659_v12  ;;  %v1061_v22 = vpop.f32.mrb[34].mxu1  ;;  %v3220_v16 = vmax.f32 %v804_v40, 0.0  ;;  %v806_v8 = vpop.f32.mrb[35].mxu0 }
 0x146   : > { %v3222_v20 = vmax.f32 %v1061_v22, 0.0  ;;  %v1063_v17 = vpop.f32.mrb[35].mxu1  ;;  %7617 = vmatmul.mubr.msk.f32.gmra.mrb[140].mxu0 %vm539_vm2, %v8415_v54  ;;  %7649 = vmatmul.mubr.msk.f32.gmra.mrb[140].mxu1 %vm539_vm2, %v8415_v54  ;;  %v3221_v5 = vmax.f32 %v806_v8, 0.0 }
 0x147   : > { %v3223_v31 = vmax.f32 %v1063_v17, 0.0  ;;  %1770 = vmatprep.mubr.f32.mxu0 %v13710_v37  ;;  %2027 = vmatprep.mubr.f32.mxu1 %v13710_v37  ;;  %v9774_v12 = vadd.f32 %v3220_v16, %v9681_v56  ;;  %v8416_v56 = vld [vmem:[%s13698_s1 + $0x38] sm:$0xff] }
 0x148   : > { %v9777_v9 = vadd.f32 %v3222_v20, %v9684_v44  ;;  %v9780_v6 = vadd.f32 %v3221_v5, %v9689_v39  ;;  %v810_v27 = vpop.f32.mrb[36].mxu0 }
 0x149   : > { %v9783_v4 = vadd.f32 %v3223_v31, %v9692_v24  ;;  %v1067_v14 = vpop.f32.mrb[36].mxu1  ;;  %v3236_v34 = vmax.f32 %v810_v27, 0.0  ;;  %v812_v61 = vpop.f32.mrb[37].mxu0 }
 0x14a   : > { %v3238_v25 = vmax.f32 %v1067_v14, 0.0  ;;  %v1069_v33 = vpop.f32.mrb[37].mxu1  ;;  %7618 = vmatmul.mubr.msk.f32.gmra.mrb[142].mxu0 %vm539_vm2, %v8416_v56  ;;  %7650 = vmatmul.mubr.msk.f32.gmra.mrb[142].mxu1 %vm539_vm2, %v8416_v56  ;;  %v3237_v44 = vmax.f32 %v812_v61, 0.0 }
 0x14b   : > { %v3239_v39 = vmax.f32 %v1069_v33, 0.0  ;;  %1776 = vmatprep.mubr.f32.mxu0 %v13710_v37  ;;  %2033 = vmatprep.mubr.f32.mxu1 %v13710_v37  ;;  %v9793_v24 = vadd.f32 %v3236_v34, %v9713_v47  ;;  %v8417_v47 = vld [vmem:[%s13698_s1 + $0x40] sm:$0xff] }
 0x14c   : > { %v9796_v15 = vadd.f32 %v3238_v25, %v9716_v7  ;;  %v9799_v59 = vadd.f32 %v3237_v44, %v9721_v48  ;;  %v816_v60 = vpop.f32.mrb[38].mxu0 }
 0x14d   : > { %v9802_v21 = vadd.f32 %v3239_v39, %v9724_v63  ;;  %v1073_v19 = vpop.f32.mrb[38].mxu1  ;;  %v3252_v58 = vmax.f32 %v816_v60, 0.0  ;;  %v818_v32 = vpop.f32.mrb[39].mxu0 }
 0x14e   : > { %v3254_v45 = vmax.f32 %v1073_v19, 0.0  ;;  %v1075_v10 = vpop.f32.mrb[39].mxu1  ;;  %7619 = vmatmul.mubr.msk.f32.gmra.mrb[144].mxu0 %vm539_vm2, %v8417_v47  ;;  %7651 = vmatmul.mubr.msk.f32.gmra.mrb[144].mxu1 %vm539_vm2, %v8417_v47  ;;  %v3253_v7 = vmax.f32 %v818_v32, 0.0 }
 0x14f   : > { %v3255_v48 = vmax.f32 %v1075_v10, 0.0  ;;  %1782 = vmatprep.mubr.f32.mxu0 %v13710_v37  ;;  %2039 = vmatprep.mubr.f32.mxu1 %v13710_v37  ;;  %v9812_v63 = vadd.f32 %v3252_v58, %v9736_v38  ;;  %v8418_v38 = vld [vmem:[%s13698_s1 + $0x48] sm:$0xff] }
 0x150   : > { %v9815_v51 = vadd.f32 %v3254_v45, %v9739_v49  ;;  %v9818_v29 = vadd.f32 %v3253_v7, %v9742_v52  ;;  %v822_v13 = vpop.f32.mrb[40].mxu0 }
 0x151   : > { %v9821_v26 = vadd.f32 %v3255_v48, %v9745_v1  ;;  %v1079_v11 = vpop.f32.mrb[40].mxu1  ;;  %v3332_v2 = vmax.f32 %v822_v13, 0.0  ;;  %v824_v28 = vpop.f32.mrb[41].mxu0 }
 0x152   : > { %v3334_v3 = vmax.f32 %v1079_v11, 0.0  ;;  %v1081_v36 = vpop.f32.mrb[41].mxu1  ;;  %7620 = vmatmul.mubr.msk.f32.gmra.mrb[146].mxu0 %vm539_vm2, %v8418_v38  ;;  %7652 = vmatmul.mubr.msk.f32.gmra.mrb[146].mxu1 %vm539_vm2, %v8418_v38  ;;  %v3333_v49 = vmax.f32 %v824_v28, 0.0 }
 0x153   : > { %v3335_v52 = vmax.f32 %v1081_v36, 0.0  ;;  %1788 = vmatprep.mubr.f32.mxu0 %v13710_v37  ;;  %2045 = vmatprep.mubr.f32.mxu1 %v13710_v37  ;;  %v9831_v1 = vadd.f32 %v3332_v2, %v9755_v43  ;;  %v8419_v43 = vld [vmem:[%s13698_s1 + $0x50] sm:$0xff] }
 0x154   : > { %v9834_v62 = vadd.f32 %v3334_v3, %v9758_v46  ;;  %v9837_v30 = vadd.f32 %v3333_v49, %v9761_v55  ;;  %v828_v18 = vpop.f32.mrb[42].mxu0 }
 0x155   : > { %v9840_v42 = vadd.f32 %v3335_v52, %v9764_v57  ;;  %v1085_v40 = vpop.f32.mrb[42].mxu1  ;;  %v3348_v22 = vmax.f32 %v828_v18, 0.0  ;;  %v830_v20 = vpop.f32.mrb[43].mxu0 }
 0x156   : > { %v3350_v16 = vmax.f32 %v1085_v40, 0.0  ;;  %v1087_v8 = vpop.f32.mrb[43].mxu1  ;;  %7621 = vmatmul.mubr.msk.f32.gmra.mrb[148].mxu0 %vm539_vm2, %v8419_v43  ;;  %7653 = vmatmul.mubr.msk.f32.gmra.mrb[148].mxu1 %vm539_vm2, %v8419_v43  ;;  %v3349_v46 = vmax.f32 %v830_v20, 0.0 }
 0x157   : > { %v3351_v55 = vmax.f32 %v1087_v8, 0.0  ;;  %1794 = vmatprep.mubr.f32.mxu0 %v13710_v37  ;;  %2051 = vmatprep.mubr.f32.mxu1 %v13710_v37  ;;  %v9850_v57 = vadd.f32 %v3348_v22, %v9774_v12  ;;  %v8420_v12 = vld [vmem:[%s13698_s1 + $0x58] sm:$0xff] }
 0x158   : > { %v9853_v17 = vadd.f32 %v3350_v16, %v9777_v9  ;;  %v9856_v54 = vadd.f32 %v3349_v46, %v9780_v6  ;;  %v834_v31 = vpop.f32.mrb[44].mxu0 }
 0x159   : > { %v9859_v5 = vadd.f32 %v3351_v55, %v9783_v4  ;;  %v1091_v27 = vpop.f32.mrb[44].mxu1  ;;  %v3364_v14 = vmax.f32 %v834_v31, 0.0  ;;  %v836_v25 = vpop.f32.mrb[45].mxu0 }
 0x15a   : > { %v3366_v34 = vmax.f32 %v1091_v27, 0.0  ;;  %v1093_v61 = vpop.f32.mrb[45].mxu1  ;;  %7622 = vmatmul.mubr.msk.f32.gmra.mrb[150].mxu0 %vm539_vm2, %v8420_v12  ;;  %7654 = vmatmul.mubr.msk.f32.gmra.mrb[150].mxu1 %vm539_vm2, %v8420_v12  ;;  %v3365_v9 = vmax.f32 %v836_v25, 0.0 }
 0x15b   : > { %v3367_v6 = vmax.f32 %v1093_v61, 0.0  ;;  %1800 = vmatprep.mubr.f32.mxu0 %v13710_v37  ;;  %2057 = vmatprep.mubr.f32.mxu1 %v13710_v37  ;;  %v9869_v4 = vadd.f32 %v3364_v14, %v9793_v24  ;;  %v8421_v24 = vld [vmem:[%s13698_s1 + $0x60] sm:$0xff] }
 0x15c   : > { %v9872_v33 = vadd.f32 %v3366_v34, %v9796_v15  ;;  %v9875_v56 = vadd.f32 %v3365_v9, %v9799_v59  ;;  %v840_v39 = vpop.f32.mrb[46].mxu0 }
 0x15d   : > { %v9878_v44 = vadd.f32 %v3367_v6, %v9802_v21  ;;  %v1097_v60 = vpop.f32.mrb[46].mxu1  ;;  %v3380_v19 = vmax.f32 %v840_v39, 0.0  ;;  %v842_v45 = vpop.f32.mrb[47].mxu0 }
 0x15e   : > { %v3382_v58 = vmax.f32 %v1097_v60, 0.0  ;;  %v1099_v32 = vpop.f32.mrb[47].mxu1  ;;  %7623 = vmatmul.mubr.msk.f32.gmra.mrb[152].mxu0 %vm539_vm2, %v8421_v24  ;;  %7655 = vmatmul.mubr.msk.f32.gmra.mrb[152].mxu1 %vm539_vm2, %v8421_v24  ;;  %v3381_v15 = vmax.f32 %v842_v45, 0.0 }
 0x15f   : > { %v3383_v59 = vmax.f32 %v1099_v32, 0.0  ;;  %1806 = vmatprep.mubr.f32.mxu0 %v13710_v37  ;;  %2063 = vmatprep.mubr.f32.mxu1 %v13710_v37  ;;  %v9888_v21 = vadd.f32 %v3380_v19, %v9812_v63  ;;  %v8422_v63 = vld [vmem:[%s13698_s1 + $0x68] sm:$0xff] }
 0x160   : > { %v9891_v10 = vadd.f32 %v3382_v58, %v9815_v51  ;;  %v9894_v47 = vadd.f32 %v3381_v15, %v9818_v29  ;;  %v846_v48 = vpop.f32.mrb[48].mxu0 }
 0x161   : > { %v9897_v7 = vadd.f32 %v3383_v59, %v9821_v26  ;;  %v1103_v13 = vpop.f32.mrb[48].mxu1  ;;  %v3460_v11 = vmax.f32 %v846_v48, 0.0  ;;  %v848_v3 = vpop.f32.mrb[49].mxu0 }
 0x162   : > { %v3462_v2 = vmax.f32 %v1103_v13, 0.0  ;;  %v1105_v28 = vpop.f32.mrb[49].mxu1  ;;  %7624 = vmatmul.mubr.msk.f32.gmra.mrb[154].mxu0 %vm539_vm2, %v8422_v63  ;;  %7656 = vmatmul.mubr.msk.f32.gmra.mrb[154].mxu1 %vm539_vm2, %v8422_v63  ;;  %v3461_v51 = vmax.f32 %v848_v3, 0.0 }
 0x163   : > { %v3463_v29 = vmax.f32 %v1105_v28, 0.0  ;;  %1812 = vmatprep.mubr.f32.mxu0 %v13710_v37  ;;  %2069 = vmatprep.mubr.f32.mxu1 %v13710_v37  ;;  %v9907_v26 = vadd.f32 %v3460_v11, %v9831_v1  ;;  %v8423_v1 = vld [vmem:[%s13698_s1 + $0x70] sm:$0xff] }
 0x164   : > { %v9910_v36 = vadd.f32 %v3462_v2, %v9834_v62  ;;  %v9913_v38 = vadd.f32 %v3461_v51, %v9837_v30  ;;  %v852_v52 = vpop.f32.mrb[50].mxu0 }
 0x165   : > { %v9916_v49 = vadd.f32 %v3463_v29, %v9840_v42  ;;  %v1109_v18 = vpop.f32.mrb[50].mxu1  ;;  %v3476_v40 = vmax.f32 %v852_v52, 0.0  ;;  %v854_v16 = vpop.f32.mrb[51].mxu0 }
 0x166   : > { %v3478_v22 = vmax.f32 %v1109_v18, 0.0  ;;  %v1111_v20 = vpop.f32.mrb[51].mxu1  ;;  %7625 = vmatmul.mubr.msk.f32.gmra.mrb[156].mxu0 %vm539_vm2, %v8423_v1  ;;  %7657 = vmatmul.mubr.msk.f32.gmra.mrb[156].mxu1 %vm539_vm2, %v8423_v1  ;;  %v3477_v62 = vmax.f32 %v854_v16, 0.0 }
 0x167   : > { %v3479_v30 = vmax.f32 %v1111_v20, 0.0  ;;  %1818 = vmatprep.mubr.f32.mxu0 %v13710_v37  ;;  %2075 = vmatprep.mubr.f32.mxu1 %v13710_v37  ;;  %v9926_v42 = vadd.f32 %v3476_v40, %v9850_v57  ;;  %v8424_v57 = vld [vmem:[%s13698_s1 + $0x78] sm:$0xff] }
 0x168   : > { %v9929_v8 = vadd.f32 %v3478_v22, %v9853_v17  ;;  %v9932_v43 = vadd.f32 %v3477_v62, %v9856_v54  ;;  %v858_v55 = vpop.f32.mrb[52].mxu0 }
 0x169   : > { %v9935_v46 = vadd.f32 %v3479_v30, %v9859_v5  ;;  %v1115_v31 = vpop.f32.mrb[52].mxu1  ;;  %v3492_v27 = vmax.f32 %v858_v55, 0.0  ;;  %v860_v34 = vpop.f32.mrb[53].mxu0 }
 0x16a   : > { %v3494_v14 = vmax.f32 %v1115_v31, 0.0  ;;  %v1117_v25 = vpop.f32.mrb[53].mxu1  ;;  %7626 = vmatmul.mubr.msk.f32.gmra.mrb[158].mxu0 %vm539_vm2, %v8424_v57  ;;  %7658 = vmatmul.mubr.msk.f32.gmra.mrb[158].mxu1 %vm539_vm2, %v8424_v57  ;;  %v3493_v17 = vmax.f32 %v860_v34, 0.0 }
 0x16b   : > { %v3495_v54 = vmax.f32 %v1117_v25, 0.0  ;;  %1824 = vmatprep.mubr.f32.mxu0 %v13710_v37  ;;  %2081 = vmatprep.mubr.f32.mxu1 %v13710_v37  ;;  %v9945_v5 = vadd.f32 %v3492_v27, %v9869_v4  ;;  %v8425_v4 = vld [vmem:[%s13698_s1 + $0x80] sm:$0xff] }
 0x16c   : > { %v9948_v61 = vadd.f32 %v3494_v14, %v9872_v33  ;;  %v9951_v12 = vadd.f32 %v3493_v17, %v9875_v56  ;;  %v864_v6 = vpop.f32.mrb[54].mxu0 }
 0x16d   : > { %v9954_v9 = vadd.f32 %v3495_v54, %v9878_v44  ;;  %v1121_v39 = vpop.f32.mrb[54].mxu1  ;;  %v3508_v60 = vmax.f32 %v864_v6, 0.0  ;;  %v866_v58 = vpop.f32.mrb[55].mxu0 }
 0x16e   : > { %v3510_v19 = vmax.f32 %v1121_v39, 0.0  ;;  %v1123_v45 = vpop.f32.mrb[55].mxu1  ;;  %7627 = vmatmul.mubr.msk.f32.gmra.mrb[160].mxu0 %vm539_vm2, %v8425_v4  ;;  %7659 = vmatmul.mubr.msk.f32.gmra.mrb[160].mxu1 %vm539_vm2, %v8425_v4  ;;  %v3509_v33 = vmax.f32 %v866_v58, 0.0 }
 0x16f   : > { %v3511_v56 = vmax.f32 %v1123_v45, 0.0  ;;  %1830 = vmatprep.mubr.f32.mxu0 %v13710_v37  ;;  %2087 = vmatprep.mubr.f32.mxu1 %v13710_v37  ;;  %v9964_v44 = vadd.f32 %v3508_v60, %v9888_v21  ;;  %v8426_v21 = vld [vmem:[%s13698_s1 + $0x88] sm:$0xff] }
 0x170   : > { %v9967_v32 = vadd.f32 %v3510_v19, %v9891_v10  ;;  %v9970_v24 = vadd.f32 %v3509_v33, %v9894_v47  ;;  %v870_v59 = vpop.f32.mrb[56].mxu0 }
 0x171   : > { %v9973_v15 = vadd.f32 %v3511_v56, %v9897_v7  ;;  %v1127_v48 = vpop.f32.mrb[56].mxu1  ;;  %v3588_v13 = vmax.f32 %v870_v59, 0.0  ;;  %v872_v2 = vpop.f32.mrb[57].mxu0 }
 0x172   : > { %v3590_v11 = vmax.f32 %v1127_v48, 0.0  ;;  %v1129_v3 = vpop.f32.mrb[57].mxu1  ;;  %7628 = vmatmul.mubr.msk.f32.gmra.mrb[162].mxu0 %vm539_vm2, %v8426_v21  ;;  %7660 = vmatmul.mubr.msk.f32.gmra.mrb[162].mxu1 %vm539_vm2, %v8426_v21  ;;  %v3589_v10 = vmax.f32 %v872_v2, 0.0 }
 0x173   : > { %v3591_v47 = vmax.f32 %v1129_v3, 0.0  ;;  %1836 = vmatprep.mubr.f32.mxu0 %v13710_v37  ;;  %2093 = vmatprep.mubr.f32.mxu1 %v13710_v37  ;;  %v9983_v7 = vadd.f32 %v3588_v13, %v9907_v26  ;;  %v8427_v26 = vld [vmem:[%s13698_s1 + $0x90] sm:$0xff]  ;;  %v8430_v13 = vld [vmem:[%s13698_s1 + $0xa8] sm:$0xff] }
 0x174   : > { %v9986_v28 = vadd.f32 %v3590_v11, %v9910_v36  ;;  %v9989_v63 = vadd.f32 %v3589_v10, %v9913_v38  ;;  %v876_v29 = vpop.f32.mrb[58].mxu0  ;;  %v8431_v11 = vld [vmem:[%s13698_s1 + $0xb0] sm:$0xff] }
 0x175   : > { %v9992_v51 = vadd.f32 %v3591_v47, %v9916_v49  ;;  %v1133_v52 = vpop.f32.mrb[58].mxu1  ;;  %v3604_v18 = vmax.f32 %v876_v29, 0.0  ;;  %v878_v22 = vpop.f32.mrb[59].mxu0  ;;  %v8432_v47 = vld [vmem:[%s13698_s1 + $0xb8] sm:$0xff] }
 0x176   : > { %v3606_v40 = vmax.f32 %v1133_v52, 0.0  ;;  %v1135_v16 = vpop.f32.mrb[59].mxu1  ;;  %7629 = vmatmul.mubr.msk.f32.gmra.mrb[164].mxu0 %vm539_vm2, %v8427_v26  ;;  %7661 = vmatmul.mubr.msk.f32.gmra.mrb[164].mxu1 %vm539_vm2, %v8427_v26  ;;  %v3605_v36 = vmax.f32 %v878_v22, 0.0  ;;  %v8433_v22 = vld [vmem:[%s13698_s1 + $0xc0] sm:$0xff] }
 0x177   : > { %v3607_v38 = vmax.f32 %v1135_v16, 0.0  ;;  %1842 = vmatprep.mubr.f32.mxu0 %v13710_v37  ;;  %2099 = vmatprep.mubr.f32.mxu1 %v13710_v37  ;;  %v10002_v49 = vadd.f32 %v3604_v18, %v9926_v42  ;;  %v8428_v42 = vld [vmem:[%s13698_s1 + $0x98] sm:$0xff] }
 0x178   : > { %v10005_v20 = vadd.f32 %v3606_v40, %v9929_v8  ;;  %v10008_v1 = vadd.f32 %v3605_v36, %v9932_v43  ;;  %v882_v30 = vpop.f32.mrb[60].mxu0 }
 0x179   : > { %v10011_v62 = vadd.f32 %v3607_v38, %v9935_v46  ;;  %v1139_v55 = vpop.f32.mrb[60].mxu1  ;;  %v3620_v31 = vmax.f32 %v882_v30, 0.0  ;;  %v884_v14 = vpop.f32.mrb[61].mxu0 }
 0x17a   : > { %13716 = vst [vmem:[#allocation2_spill] sm:$0xff] %v10008_v1  ;;  %v3622_v27 = vmax.f32 %v1139_v55, 0.0  ;;  %v1141_v34 = vpop.f32.mrb[61].mxu1  ;;  %7630 = vmatmul.mubr.msk.f32.gmra.mrb[166].mxu0 %vm539_vm2, %v8428_v42  ;;  %7662 = vmatmul.mubr.msk.f32.gmra.mrb[166].mxu1 %vm539_vm2, %v8428_v42  ;;  %v3621_v8 = vmax.f32 %v884_v14, 0.0 }
 0x17b   : > { %13717 = vst [vmem:[#allocation3_spill] sm:$0xff] %v10011_v62  ;;  %v3623_v43 = vmax.f32 %v1141_v34, 0.0  ;;  %1848 = vmatprep.mubr.f32.mxu0 %v13710_v37  ;;  %2105 = vmatprep.mubr.f32.mxu1 %v13710_v37  ;;  %v10021_v46 = vadd.f32 %v3620_v31, %v9945_v5  ;;  %v8429_v5 = vld [vmem:[%s13698_s1 + $0xa0] sm:$0xff]  ;;  %v8434_v34 = vld [vmem:[%s13698_s1 + $0xc8] sm:$0xff] }
 0x17c   : > { %v10024_v25 = vadd.f32 %v3622_v27, %v9948_v61  ;;  %v10027_v57 = vadd.f32 %v3621_v8, %v9951_v12  ;;  %v888_v54 = vpop.f32.mrb[62].mxu0 }
 0x17d   : > { %13718 = vst [vmem:[#allocation4_spill] sm:$0xff] %v10021_v46  ;;  %v10030_v17 = vadd.f32 %v3623_v43, %v9954_v9  ;;  %v1145_v6 = vpop.f32.mrb[62].mxu1  ;;  %v3636_v39 = vmax.f32 %v888_v54, 0.0  ;;  %v890_v19 = vpop.f32.mrb[63].mxu0 }
 0x17e   : > { %13719 = vst [vmem:[#allocation5_spill] sm:$0xff] %v10024_v25  ;;  %13720 = vst [vmem:[#allocation6_spill] sm:$0xff] %v10027_v57  ;;  %v3638_v60 = vmax.f32 %v1145_v6, 0.0  ;;  %v1147_v58 = vpop.f32.mrb[63].mxu1  ;;  %7631 = vmatmul.mubr.msk.f32.gmra.mrb[168].mxu0 %vm539_vm2, %v8429_v5  ;;  %7663 = vmatmul.mubr.msk.f32.gmra.mrb[168].mxu1 %vm539_vm2, %v8429_v5  ;;  %v3637_v61 = vmax.f32 %v890_v19, 0.0 }
 0x17f   : > { %13721 = vst [vmem:[#allocation7_spill] sm:$0xff] %v10030_v17  ;;  %v3639_v12 = vmax.f32 %v1147_v58, 0.0  ;;  %1854 = vmatprep.mubr.f32.mxu0 %v13710_v37  ;;  %2111 = vmatprep.mubr.f32.mxu1 %v13710_v37  ;;  %v10040_v9 = vadd.f32 %v3636_v39, %v9964_v44 }
 0x180   : > { %v10043_v45 = vadd.f32 %v3638_v60, %v9967_v32  ;;  %v10046_v4 = vadd.f32 %v3637_v61, %v9970_v24  ;;  %v1216_v56 = vpop.f32.mrb[64].mxu0  ;;  %v3735_v60 = vld [vmem:[%s8662_s21 + $0x98] sm:$0xfe] }
 0x181   : > { %13722 = vst [vmem:[#allocation8_spill] sm:$0xff] %v10040_v9  ;;  %v10049_v33 = vadd.f32 %v3639_v12, %v9973_v15  ;;  %v1473_v59 = vpop.f32.mrb[64].mxu1  ;;  %v1218_v48 = vpop.f32.mrb[65].mxu0  ;;  %v2696_v38 = vmax.f32 %v1216_v56, 0.0  ;;  %v10120_v12 = vld [vmem:[%s8662_s21 + $0xa0] sm:$0xfe] }
 0x182   : > { %13723 = vst [vmem:[#allocation9_spill] sm:$0xff] %v10043_v45  ;;  %13724 = vst [vmem:[#allocation10_spill] sm:$0xff] %v10046_v4  ;;  %7632 = vmatmul.mubr.msk.f32.gmra.mrb[170].mxu0 %vm539_vm2, %v8430_v13  ;;  %7664 = vmatmul.mubr.msk.f32.gmra.mrb[170].mxu1 %vm539_vm2, %v8430_v13  ;;  %v1475_v44 = vpop.f32.mrb[65].mxu1  ;;  %v2698_v30 = vmax.f32 %v1473_v59, 0.0  ;;  %v2697_v42 = vmax.f32 %v1218_v48, 0.0 }
 0x183   : > { %13725 = vst [vmem:[#allocation11_spill] sm:$0xff] %v10049_v33  ;;  %1860 = vmatprep.mubr.f32.mxu0 %v13710_v37  ;;  %2117 = vmatprep.mubr.f32.mxu1 %v13710_v37  ;;  %v2699_v8 = vmax.f32 %v1475_v44, 0.0  ;;  %v3751_v56 = vld [vmem:[%s8662_s21 + $0x128] sm:$0x1]  ;;  %v3790_v4 = vld [vmem:[%s8662_s21 + $0x140] sm:$0x3] }
 0x184   : > { %v10058_v32 = vpop.f32.mrb[66].mxu0  ;;  %v3959_v1 = vrot.slane %v3790_v4, 2 }
 0x185   : > { %v10060_v24 = vpop.f32.mrb[66].mxu1  ;;  %v10062_v15 = vpop.f32.mrb[67].mxu0  ;;  %v2712_v59 = vmax.f32 %v10058_v32, 0.0 }
 0x186   : > { %7633 = vmatmul.mubr.msk.f32.gmra.mrb[172].mxu0 %vm539_vm2, %v8431_v11  ;;  %7665 = vmatmul.mubr.msk.f32.gmra.mrb[172].mxu1 %vm539_vm2, %v8431_v11  ;;  %v10069_v2 = vpop.f32.mrb[67].mxu1  ;;  %v2714_v48 = vmax.f32 %v10060_v24, 0.0 }
 0x187   : > { %1866 = vmatprep.mubr.f32.mxu0 %v13710_v37  ;;  %2123 = vmatprep.mubr.f32.mxu1 %v13710_v37  ;;  %v2715_v32 = vmax.f32 %v10069_v2, 0.0  ;;  %v3844_v2 = vrot.slane %v10120_v12, 1 }
 0x188   : > { %v10073_v3 = vpop.f32.mrb[68].mxu0 }
 0x189   : > { %v10075_v21 = vpop.f32.mrb[68].mxu1  ;;  %v10077_v10 = vpop.f32.mrb[69].mxu0 }
 0x18a   : > { %7634 = vmatmul.mubr.msk.f32.gmra.mrb[174].mxu0 %vm539_vm2, %v8432_v47  ;;  %7666 = vmatmul.mubr.msk.f32.gmra.mrb[174].mxu1 %vm539_vm2, %v8432_v47  ;;  %v10084_v29 = vpop.f32.mrb[69].mxu1  ;;  %v2729_v12 = vmax.f32 %v10077_v10, 0.0  ;;  %v10167_v10 = vld [vmem:[%s8662_s21 + $0xa8] sm:$0xfe] }
 0x18b   : > { %1872 = vmatprep.mubr.f32.mxu0 %v13710_v37  ;;  %2129 = vmatprep.mubr.f32.mxu1 %v13710_v37 }
 0x18c   : > { %v10088_v52 = vpop.f32.mrb[70].mxu0 }
 0x18d   : > { %v10090_v18 = vpop.f32.mrb[70].mxu1  ;;  %v10092_v40 = vpop.f32.mrb[71].mxu0 }
 0x18e   : > { %7635 = vmatmul.mubr.msk.f32.gmra.mrb[176].mxu0 %vm539_vm2, %v8433_v22  ;;  %7667 = vmatmul.mubr.msk.f32.gmra.mrb[176].mxu1 %vm539_vm2, %v8433_v22  ;;  %v10099_v16 = vpop.f32.mrb[71].mxu1  ;;  %v8435_v22 = vld [vmem:[%s13698_s1 + $0xd0] sm:$0xff] }
 0x18f   : > { %1878 = vmatprep.mubr.f32.mxu0 %v13710_v37  ;;  %2135 = vmatprep.mubr.f32.mxu1 %v13710_v37 }
 0x190   : > { %v1240_v26 = vpop.f32.mrb[72].mxu0 }
 0x191   : > { %v1497_v36 = vpop.f32.mrb[72].mxu1  ;;  %v2824_v55 = vmax.f32 %v1240_v26, 0.0  ;;  %v1242_v27 = vpop.f32.mrb[73].mxu0  ;;  %v2713_v26 = vmax.f32 %v10062_v15, 0.0 }
 0x192   : > { %v2826_v31 = vmax.f32 %v1497_v36, 0.0  ;;  %v1499_v14 = vpop.f32.mrb[73].mxu1  ;;  %7636 = vmatmul.mubr.msk.f32.gmra.mrb[178].mxu0 %vm539_vm2, %v8434_v34  ;;  %7668 = vmatmul.mubr.msk.f32.gmra.mrb[178].mxu1 %vm539_vm2, %v8434_v34  ;;  %v2825_v43 = vmax.f32 %v1242_v27, 0.0 }
 0x193   : > { %v2827_v54 = vmax.f32 %v1499_v14, 0.0  ;;  %1884 = vmatprep.mubr.f32.mxu0 %v13710_v37  ;;  %2141 = vmatprep.mubr.f32.mxu1 %v13710_v37  ;;  %v10110_v6 = vadd.f32 %v2824_v55, %v2696_v38  ;;  %v3752_v55 = vld [vmem:[%s8662_s21 + $0x130] sm:$0x1] }
 0x194   : > { %v10112_v39 = vadd.f32 %v2826_v31, %v2698_v30  ;;  %v10115_v19 = vadd.f32 %v2825_v43, %v2697_v42  ;;  %v1246_v5 = vpop.f32.mrb[74].mxu0  ;;  %v3841_v31 = vrot.slane %v3735_v60, 1  ;;  %v3842_v42 = vrot.slane %v3751_v56, 1 }
 0x195   : > { %v10117_v58 = vadd.f32 %v2827_v54, %v2699_v8  ;;  %v1503_v61 = vpop.f32.mrb[74].mxu1  ;;  %v2840_v13 = vmax.f32 %v1246_v5, 0.0  ;;  %v1248_v11 = vpop.f32.mrb[75].mxu0  ;;  %v10145_v8 = vld [vmem:[%s8662_s21 + $0x90] sm:$0xfe]  ;;  %v2728_v43 = vmax.f32 %v10073_v3, 0.0 }
 0x196   : > { %v2842_v44 = vmax.f32 %v1503_v61, 0.0  ;;  %v1505_v47 = vpop.f32.mrb[75].mxu1  ;;  %7637 = vmatmul.mubr.msk.f32.gmra.mrb[180].mxu0 %vm539_vm2, %v8435_v22  ;;  %7669 = vmatmul.mubr.msk.f32.gmra.mrb[180].mxu1 %vm539_vm2, %v8435_v22  ;;  %v2841_v36 = vmax.f32 %v1248_v11, 0.0  ;;  %v2730_v54 = vmax.f32 %v10075_v21, 0.0  ;;  %v2731_v3 = vmax.f32 %v10084_v29, 0.0 }
 0x197   : > { %v2843_v24 = vmax.f32 %v1505_v47, 0.0  ;;  %1890 = vmatprep.mubr.f32.mxu0 %v13710_v37  ;;  %2147 = vmatprep.mubr.f32.mxu1 %v13710_v37  ;;  %v10134_v38 = vadd.f32 %v2840_v13, %v2712_v59  ;;  %v3845_v11 = vrot.slane %v3752_v55, 1  ;;  %v10163_v47 = vld [vmem:[%s8662_s21 + $0x120] sm:$0x1]  ;;  %v3838_v22 = vrot.slane %v10145_v8, 1  ;;  %v10256_v8 = vld [vmem:[%s8662_s21 + $0xb8] sm:$0xff] }
 0x198   : > { %v10136_v30 = vadd.f32 %v2842_v44, %v2714_v48  ;;  %v10139_v27 = vadd.f32 %v2841_v36, %v2713_v26  ;;  %v1252_v15 = vpop.f32.mrb[76].mxu0  ;;  %v8436_v48 = vld [vmem:[%s13698_s1 + $0xd8] sm:$0xff]  ;;  %v2744_v55 = vmax.f32 %v10088_v52, 0.0  ;;  %v2747_v52 = vmax.f32 %v10099_v16, 0.0 }
 0x199   : > { %v10141_v14 = vadd.f32 %v2843_v24, %v2715_v32  ;;  %v1509_v34 = vpop.f32.mrb[76].mxu1  ;;  %v2856_v5 = vmax.f32 %v1252_v15, 0.0  ;;  %v1254_v59 = vpop.f32.mrb[77].mxu0  ;;  %v10174_v24 = vsel %vm321_vm0, %v3841_v31, %v3842_v42  ;;  %v10177_v15 = vld [vmem:[%s8662_s21 + $0x138] sm:$0x1]  ;;  %v8437_v31 = vld [vmem:[%s13698_s1 + $0xe0] sm:$0xff] }
 0x19a   : > { %v2858_v61 = vmax.f32 %v1509_v34, 0.0  ;;  %v1511_v60 = vpop.f32.mrb[77].mxu1  ;;  %7638 = vmatmul.mubr.msk.f32.gmra.mrb[182].mxu0 %vm539_vm2, %v8436_v48  ;;  %7670 = vmatmul.mubr.msk.f32.gmra.mrb[182].mxu1 %vm539_vm2, %v8436_v48  ;;  %v2857_v21 = vmax.f32 %v1254_v59, 0.0  ;;  %v10180_v34 = vld [vmem:[%s8662_s21 + $0xb0] sm:$0xfe]  ;;  %v2745_v42 = vmax.f32 %v10092_v40, 0.0 }
 0x19b   : > { %v2859_v56 = vmax.f32 %v1511_v60, 0.0  ;;  %1896 = vmatprep.mubr.f32.mxu0 %v13710_v37  ;;  %2153 = vmatprep.mubr.f32.mxu1 %v13710_v37  ;;  %v10158_v13 = vadd.f32 %v2856_v5, %v2728_v43  ;;  %v2746_v43 = vmax.f32 %v10090_v18, 0.0  ;;  %v3754_v48 = vld [vmem:[%s8662_s21 + $0x140] sm:$0x1]  ;;  %v3739_v40 = vld [vmem:[%s8662_s21 + $0xb8] sm:$0xfe] }
 0x19c   : > { %v10160_v44 = vadd.f32 %v2858_v61, %v2730_v54  ;;  %v10169_v29 = vadd.f32 %v2857_v21, %v2729_v12  ;;  %v1258_v32 = vpop.f32.mrb[78].mxu0  ;;  %v10199_v21 = vsel %vm321_vm0, %v3844_v2, %v3845_v11 }
 0x19d   : > { %v10171_v26 = vadd.f32 %v2859_v56, %v2731_v3  ;;  %v1515_v36 = vpop.f32.mrb[78].mxu1  ;;  %v2872_v54 = vmax.f32 %v1258_v32, 0.0  ;;  %v1260_v61 = vpop.f32.mrb[79].mxu0  ;;  %v3839_v56 = vrot.slane %v10163_v47, 1  ;;  %v3755_v32 = vld [vmem:[%s8662_s21 + $0x148] sm:$0x1] }
 0x19e   : > { %v2874_v5 = vmax.f32 %v1515_v36, 0.0  ;;  %v1517_v59 = vpop.f32.mrb[79].mxu1  ;;  %7639 = vmatmul.mubr.msk.f32.gmra.mrb[184].mxu0 %vm539_vm2, %v8437_v31  ;;  %7671 = vmatmul.mubr.msk.f32.gmra.mrb[184].mxu1 %vm539_vm2, %v8437_v31  ;;  %v2873_v18 = vmax.f32 %v1260_v61, 0.0  ;;  %v10209_v31 = vld [vmem:[%s8662_s21 + $0x90] sm:$0xff]  ;;  %v8438_v47 = vld [vmem:[%s13698_s1 + $0xe8] sm:$0xff] }
 0x19f   : > { %v2875_v60 = vmax.f32 %v1517_v59, 0.0  ;;  %1902 = vmatprep.mubr.f32.mxu0 %v13710_v37  ;;  %2159 = vmatprep.mubr.f32.mxu1 %v13710_v37  ;;  %v10194_v12 = vadd.f32 %v2872_v54, %v2744_v55  ;;  %v3847_v55 = vrot.slane %v10167_v10, 1  ;;  %v13726_v4 = vpack.c.bf16 %v9696_v0, %v10209_v31 }
 0x1a0   : > { %v10196_v3 = vadd.f32 %v2874_v5, %v2746_v43  ;;  %v10204_v16 = vadd.f32 %v2873_v18, %v2745_v42  ;;  %v1264_v61 = vpop.f32.mrb[80].mxu0  ;;  %v3848_v43 = vrot.slane %v10177_v15, 1  ;;  %v3850_v42 = vrot.slane %v10180_v34, 1  ;;  %v8441_v34 = vld [vmem:[%s13698_s1 + $0xf8] sm:$0xff] }
 0x1a1   : > { %v10206_v36 = vadd.f32 %v2875_v60, %v2747_v52  ;;  %v1521_v59 = vpop.f32.mrb[80].mxu1  ;;  %v2952_v54 = vmax.f32 %v1264_v61, 0.0  ;;  %v1266_v2 = vpop.f32.mrb[81].mxu0  ;;  %v3851_v52 = vrot.slane %v3754_v48, 1  ;;  %v3853_v15 = vrot.slane %v3739_v40, 1 }
 0x1a2   : > { %v2954_v5 = vmax.f32 %v1521_v59, 0.0  ;;  %v1523_v11 = vpop.f32.mrb[81].mxu1  ;;  %7640 = vmatmul.mubr.msk.f32.gmra.mrb[186].mxu0 %vm539_vm2, %v8438_v47  ;;  %7672 = vmatmul.mubr.msk.f32.gmra.mrb[186].mxu1 %vm539_vm2, %v8438_v47  ;;  %v2953_v18 = vmax.f32 %v1266_v2, 0.0  ;;  %v3854_v60 = vrot.slane %v3755_v32, 1  ;;  %v13727_v0 = vpack.c.bf16 %v9664_v41, %v9642_v53 }
 0x1a3   : > { %v2955_v10 = vmax.f32 %v1523_v11, 0.0  ;;  %1908 = vmatprep.mubr.f32.mxu0 %v13710_v37  ;;  %2165 = vmatprep.mubr.f32.mxu1 %v13710_v37  ;;  %v10222_v61 = vadd.f32 %v2952_v54, %v10110_v6  ;;  %v10245_v54 = vld [vmem:[%s8662_s21 + $0x98] sm:$0xfc]  ;;  %v10266_v6 = vsel %vm321_vm0, %v3850_v42, %v3851_v52  ;;  %v3773_v42 = vld [vmem:[%s8662_s21 + $0xa8] sm:$0xfc] }
 0x1a4   : > { %v10225_v59 = vadd.f32 %v2954_v5, %v10112_v39  ;;  %v10232_v2 = vadd.f32 %v2953_v18, %v10115_v19  ;;  %v1270_v40 = vpop.f32.mrb[82].mxu0  ;;  %v10242_v39 = vsel %vm321_vm0, %v3838_v22, %v3839_v56  ;;  %v10248_v5 = vld [vmem:[%s8662_s21 + $0x128] sm:$0x3]  ;;  %v10259_v22 = vsel %vm321_vm0, %v3847_v55, %v3848_v43  ;;  %v3772_v55 = vld [vmem:[%s8662_s21 + $0xa0] sm:$0xfc] }
 0x1a5   : > { %v10235_v11 = vadd.f32 %v2955_v10, %v10117_v58  ;;  %v1527_v32 = vpop.f32.mrb[82].mxu1  ;;  %v2968_v47 = vmax.f32 %v1270_v40, 0.0  ;;  %v1272_v18 = vpop.f32.mrb[83].mxu0  ;;  %v8439_v10 = vld [vmem:[%s13698_s1 + $0xf0] sm:$0xff]  ;;  %v3949_v56 = vrot.slane %v10245_v54, 2  ;;  %v3950_v48 = vrot.slane %v10248_v5, 2 }
 0x1a6   : > { %v2970_v19 = vmax.f32 %v1527_v32, 0.0  ;;  %v1529_v58 = vpop.f32.mrb[83].mxu1  ;;  %7641 = vmatmul.mubr.msk.f32.gmra.mrb[188].mxu0 %vm539_vm2, %v8439_v10  ;;  %7673 = vmatmul.mubr.msk.f32.gmra.mrb[188].mxu1 %vm539_vm2, %v8439_v10  ;;  %v2969_v40 = vmax.f32 %v1272_v18, 0.0  ;;  %v10269_v10 = vsel %vm321_vm0, %v3853_v15, %v3854_v60  ;;  %v8250_v54 = vpack.c.bf16 %v10259_v22, %v10256_v8  ;;  %v3774_v5 = vld [vmem:[%s8662_s21 + $0xb0] sm:$0xfc] }
 0x1a7   : > { %v2971_v32 = vmax.f32 %v1529_v58, 0.0  ;;  %1914 = vmatprep.mubr.f32.mxu0 %v13710_v37  ;;  %2171 = vmatprep.mubr.f32.mxu1 %v13710_v37  ;;  %v10273_v43 = vadd.f32 %v2968_v47, %v10134_v38  ;;  %v3788_v58 = vld [vmem:[%s8662_s21 + $0x130] sm:$0x3]  ;;  %v10289_v38 = vld [vmem:[%s8662_s21 + $0xa0] sm:$0xff]  ;;  %v10296_v47 = vld [vmem:[%s8662_s21 + $0x90] sm:$0xfc] }
 0x1a8   : > { %v10276_v18 = vadd.f32 %v2970_v19, %v10136_v30  ;;  %v10283_v52 = vadd.f32 %v2969_v40, %v10139_v27  ;;  %v1276_v60 = vpop.f32.mrb[84].mxu0  ;;  %v3789_v27 = vld [vmem:[%s8662_s21 + $0x138] sm:$0x3]  ;;  %v3952_v9 = vrot.slane %v3772_v55, 2  ;;  %v3953_v17 = vrot.slane %v3788_v58, 2 }
 0x1a9   : > { %v10286_v15 = vadd.f32 %v2971_v32, %v10141_v14  ;;  %v1533_v50 = vpop.f32.mrb[84].mxu1  ;;  %v2984_v19 = vmax.f32 %v1276_v60, 0.0  ;;  %v1278_v14 = vpop.f32.mrb[85].mxu0  ;;  %v3955_v30 = vrot.slane %v3773_v42, 2  ;;  %v3956_v25 = vrot.slane %v3789_v27, 2 }
 0x1aa   : > { %v2986_v40 = vmax.f32 %v1533_v50, 0.0  ;;  %v1535_v32 = vpop.f32.mrb[85].mxu1  ;;  %7642 = vmatmul.mubr.msk.f32.gmra.mrb[190].mxu0 %vm539_vm2, %v8441_v34  ;;  %7674 = vmatmul.mubr.msk.f32.gmra.mrb[190].mxu1 %vm539_vm2, %v8441_v34  ;;  %v2985_v45 = vmax.f32 %v1278_v14, 0.0  ;;  %v3786_v50 = vld [vmem:[%s8662_s21 + $0x120] sm:$0x3]  ;;  %v3958_v62 = vrot.slane %v3774_v5, 2  ;;  %v10339_v5 = vsel %vm430_vm1, %v3952_v9, %v3953_v17 }
 0x1ab   : > { %v2987_v60 = vmax.f32 %v1535_v32, 0.0  ;;  %2242 = vmatprep.mubr.f32.mxu0 %v13710_v37  ;;  %2499 = vmatprep.mubr.f32.mxu1 %v13710_v37  ;;  %v10314_v57 = vadd.f32 %v2984_v19, %v10158_v13  ;;  %v3775_v27 = vld [vmem:[%s8662_s21 + $0xb8] sm:$0xfc]  ;;  %v10354_v31 = vsel %vm430_vm1, %v3955_v30, %v3956_v25 }
 0x1ac   : > { %v10317_v34 = vadd.f32 %v2986_v40, %v10160_v44  ;;  %v10320_v33 = vadd.f32 %v2985_v45, %v10169_v29  ;;  %v1282_v32 = vpop.f32.mrb[86].mxu0  ;;  %v8442_v44 = vld [vmem:[%s13698_s1] sm:$0xff]  ;;  %v3946_v45 = vrot.slane %v10296_v47, 2  ;;  %v3947_v29 = vrot.slane %v3786_v50, 2  ;;  %v3791_v40 = vld [vmem:[%s8662_s21 + $0x148] sm:$0x3] }
 0x1ad   : > { %v10323_v14 = vadd.f32 %v2987_v60, %v10171_v26  ;;  %v1539_v46 = vpop.f32.mrb[86].mxu1  ;;  %v3000_v55 = vmax.f32 %v1282_v32, 0.0  ;;  %v1284_v58 = vpop.f32.mrb[87].mxu0 }
 0x1ae   : > { %v3002_v13 = vmax.f32 %v1539_v46, 0.0  ;;  %v1541_v19 = vpop.f32.mrb[87].mxu1  ;;  %7675 = vmatmul.mubr.msk.f32.vlgmr.msra.gmra.mrb[192].mxu0 %vm539_vm2, %v8442_v44  ;;  %7707 = vmatmul.mubr.msk.f32.vlgmr.msra.gmra.mrb[192].mxu1 %vm539_vm2, %v8442_v44  ;;  %v3001_v26 = vmax.f32 %v1284_v58, 0.0  ;;  %v10336_v46 = vsel %vm430_vm1, %v3949_v56, %v3950_v48  ;;  %v10366_v56 = vsel %vm430_vm1, %v3958_v62, %v3959_v1 }
 0x1af   : > { %v3003_v42 = vmax.f32 %v1541_v19, 0.0  ;;  %8229 = vmatpush1.bf16.msra.mxu0 %v13726_v4  ;;  %2248 = vmatprep.mubr.f32.mxu0 %v13710_v37  ;;  %v10344_v60 = vadd.f32 %v3000_v55, %v10194_v12  ;;  %v8256_v1 = vpack.c.bf16 %v10266_v6, %v10259_v22  ;;  %v3948_v62 = vsel %vm430_vm1, %v3946_v45, %v3947_v29  ;;  %v10379_v55 = vld [vmem:[%s8662_s21 + $0xc0] sm:$0xff] }
 0x1b0   : > { %v10347_v47 = vadd.f32 %v3002_v13, %v10196_v3  ;;  %2505 = vmatprep.mubr.f32.mxu1 %v13710_v37  ;;  %8249 = vmatpush1.bf16.msra.mxu1 %v13727_v0  ;;  %v10357_v17 = vadd.f32 %v3001_v26, %v10204_v16  ;;  %v1288_v12 = vpop.f32.mrb[88].mxu0  ;;  %v13728_v3 = vpack.c.bf16 %v10174_v24, %v9664_v41  ;;  %v8443_v16 = vld [vmem:[%s13698_s1 + $0x8] sm:$0xff]  ;;  %v3962_v41 = vrot.slane %v3791_v40, 2  ;;  %v8444_v40 = vld [vmem:[%s13698_s1 + $0x10] sm:$0xff] }
 0x1b1   : > { %v10360_v9 = vadd.f32 %v3003_v42, %v10206_v36  ;;  %v1545_v48 = vpop.f32.mrb[88].mxu1  ;;  %8251 = vmatprep.subr.bf16.mxu1 %v8250_v54  ;;  %v3080_v53 = vmax.f32 %v1288_v12, 0.0  ;;  %v1290_v30 = vpop.f32.mrb[89].mxu0  ;;  %v3961_v36 = vrot.slane %v3775_v27, 2  ;;  %v13729_v19 = vpack.c.bf16 %v10242_v39, %v10289_v38  ;;  %v10410_v38 = vld [vmem:[%s8662_s21 + $0xc8] sm:$0xff] }
 0x1b2   : > { %8231 = vmatprep.subr.bf16.mxu0 %v13728_v3  ;;  %v3082_v25 = vmax.f32 %v1545_v48, 0.0  ;;  %v1547_v50 = vpop.f32.mrb[89].mxu1  ;;  %7676 = vmatmul.mubr.msk.f32.gmra.mrb[194].mxu0 %vm539_vm2, %v8443_v16  ;;  %v3081_v32 = vmax.f32 %v1290_v30, 0.0  ;;  %v13730_v44 = vpack.c.bf16 %v10199_v21, %v9704_v23  ;;  %v8238_v26 = vpack.c.bf16 %v10339_v5, %v10336_v46 }
 0x1b3   : > { %7708 = vmatmul.mubr.msk.f32.gmra.mrb[194].mxu1 %vm539_vm2, %v8443_v16  ;;  %v3083_v54 = vmax.f32 %v1547_v50, 0.0  ;;  %2254 = vmatprep.mubr.f32.mxu0 %v13710_v37  ;;  %v10382_v13 = vadd.f32 %v3080_v53, %v10222_v61  ;;  %v13731_v42 = vpack.c.bf16 %v10259_v22, %v10199_v21  ;;  %v13732_v39 = vpack.c.bf16 %v10269_v10, %v10266_v6 }
 0x1b4   : > { %2511 = vmatprep.mubr.f32.mxu1 %v13710_v37  ;;  %v10385_v58 = vadd.f32 %v3082_v25, %v10225_v59  ;;  %8233 = vmatpush1.bf16.msra.mxu0 %v13729_v19  ;;  %v10396_v45 = vadd.f32 %v3081_v32, %v10232_v2  ;;  %v1294_v29 = vpop.f32.mrb[90].mxu0  ;;  %v8258_v23 = vpack.c.bf16 %v10366_v56, %v10354_v31 }
 0x1b5   : > { %8253 = vmatpush1.bf16.msra.mxu1 %v13730_v44  ;;  %v10399_v61 = vadd.f32 %v3083_v54, %v10235_v11  ;;  %v1551_v59 = vpop.f32.mrb[90].mxu1  ;;  %8235 = vmatprep.subr.bf16.mxu0 %v13731_v42  ;;  %v3096_v2 = vmax.f32 %v1294_v29, 0.0  ;;  %v1296_v27 = vpop.f32.mrb[91].mxu0  ;;  %v10418_v22 = vsel %vm430_vm1, %v3961_v36, %v3962_v41  ;;  %v8240_v3 = vpack.c.bf16 %v10336_v46, %v3948_v62 }
 0x1b6   : > { %8255 = vmatprep.subr.bf16.mxu1 %v13732_v39  ;;  %v3098_v4 = vmax.f32 %v1551_v59, 0.0  ;;  %v1553_v11 = vpop.f32.mrb[91].mxu1  ;;  %7677 = vmatmul.mubr.msk.f32.gmra.mrb[196].mxu0 %vm539_vm2, %v8444_v40  ;;  %v3097_v12 = vmax.f32 %v1296_v27, 0.0  ;;  %v8260_v53 = vpack.c.bf16 %v10354_v31, %v10339_v5  ;;  %v13733_v50 = vpack.c.bf16 %v10199_v21, %v10174_v24 }
 0x1b7   : > { %7709 = vmatmul.mubr.msk.f32.gmra.mrb[196].mxu1 %vm539_vm2, %v8444_v40  ;;  %v3099_v48 = vmax.f32 %v1553_v11, 0.0  ;;  %2260 = vmatprep.mubr.f32.mxu0 %v13710_v37  ;;  %v10428_v25 = vadd.f32 %v3096_v2, %v10273_v43  ;;  %v8242_v16 = vpack.c.bf16 %v13714_v35, %v10354_v31  ;;  %v8445_v31 = vld [vmem:[%s13698_s1 + $0x18] sm:$0xff]  ;;  %v8244_v62 = vpack.c.bf16 %v13714_v35, %v10339_v5 }
 0x1b8   : > { %2517 = vmatprep.mubr.f32.mxu1 %v13710_v37  ;;  %v10431_v30 = vadd.f32 %v3098_v4, %v10276_v18  ;;  %8237 = vmatpush1.bf16.msra.mxu0 %v13733_v50  ;;  %v10439_v46 = vadd.f32 %v3097_v12, %v10283_v52  ;;  %v1300_v43 = vpop.f32.mrb[92].mxu0  ;;  %v8262_v18 = vpack.c.bf16 %v13714_v35, %v10418_v22  ;;  %v10452_v52 = vld [vmem:[%s8662_s21 + $0xd0] sm:$0xff] }
 0x1b9   : > { %8257 = vmatpush1.bf16.msra.mxu1 %v8256_v1  ;;  %v10442_v36 = vadd.f32 %v3099_v48, %v10286_v15  ;;  %v1557_v41 = vpop.f32.mrb[92].mxu1  ;;  %8239 = vmatprep.subr.bf16.mxu0 %v8238_v26  ;;  %v3112_v24 = vmax.f32 %v1300_v43, 0.0  ;;  %v1302_v32 = vpop.f32.mrb[93].mxu0  ;;  %v8264_v19 = vpack.c.bf16 %v13714_v35, %v10366_v56  ;;  %v8266_v29 = vpack.c.bf16 %v10379_v55, %v10256_v8  ;;  %v8446_v8 = vld [vmem:[%s13698_s1 + $0x20] sm:$0xff] }
 0x1ba   : > { %8259 = vmatprep.subr.bf16.mxu1 %v8258_v23  ;;  %v3114_v21 = vmax.f32 %v1557_v41, 0.0  ;;  %v1559_v54 = vpop.f32.mrb[93].mxu1  ;;  %7678 = vmatmul.mubr.msk.f32.gmra.mrb[198].mxu0 %vm539_vm2, %v8445_v31  ;;  %v3113_v15 = vmax.f32 %v1302_v32, 0.0 }
 0x1bb   : > { %7710 = vmatmul.mubr.msk.f32.gmra.mrb[198].mxu1 %vm539_vm2, %v8445_v31  ;;  %v3115_v1 = vmax.f32 %v1559_v54, 0.0  ;;  %2266 = vmatprep.mubr.f32.mxu0 %v13710_v37  ;;  %v10461_v44 = vadd.f32 %v3112_v24, %v10314_v57  ;;  %v8286_v57 = vpack.c.bf16 %v10452_v52, %v10410_v38 }
 0x1bc   : > { %2523 = vmatprep.mubr.f32.mxu1 %v13710_v37  ;;  %v10464_v26 = vadd.f32 %v3114_v21, %v10317_v34  ;;  %8241 = vmatpush1.bf16.msra.mxu0 %v8240_v3  ;;  %v10469_v59 = vadd.f32 %v3113_v15, %v10320_v33  ;;  %v1306_v5 = vpop.f32.mrb[94].mxu0 }
 0x1bd   : > { %8261 = vmatpush1.bf16.msra.mxu1 %v8260_v53  ;;  %v10472_v42 = vadd.f32 %v3115_v1, %v10323_v14  ;;  %v1563_v39 = vpop.f32.mrb[94].mxu1  ;;  %8243 = vmatprep.subr.bf16.mxu0 %v8242_v16  ;;  %v3128_v34 = vmax.f32 %v1306_v5, 0.0  ;;  %v1308_v2 = vpop.f32.mrb[95].mxu0 }
 0x1be   : > { %8263 = vmatprep.subr.bf16.mxu1 %v8262_v18  ;;  %v3130_v23 = vmax.f32 %v1563_v39, 0.0  ;;  %v1565_v4 = vpop.f32.mrb[95].mxu1  ;;  %7679 = vmatmul.mubr.msk.f32.gmra.mrb[200].mxu0 %vm539_vm2, %v8446_v8  ;;  %v3129_v33 = vmax.f32 %v1308_v2, 0.0 }
 0x1bf   : > { %7711 = vmatmul.mubr.msk.f32.gmra.mrb[200].mxu1 %vm539_vm2, %v8446_v8  ;;  %v3131_v14 = vmax.f32 %v1565_v4, 0.0  ;;  %2272 = vmatprep.mubr.f32.mxu0 %v13710_v37  ;;  %v10484_v27 = vadd.f32 %v3128_v34, %v10344_v60 }
 0x1c0   : > { %2529 = vmatprep.mubr.f32.mxu1 %v13710_v37  ;;  %v10487_v11 = vadd.f32 %v3130_v23, %v10347_v47  ;;  %8245 = vmatpush1.bf16.msra.mxu0 %v8244_v62  ;;  %v10490_v40 = vadd.f32 %v3129_v33, %v10357_v17  ;;  %v1312_v48 = vpop.f32.mrb[96].mxu0  ;;  %v8447_v47 = vld [vmem:[%s13698_s1 + $0x28] sm:$0xff] }
 0x1c1   : > { %8265 = vmatpush1.bf16.msra.mxu1 %v8264_v19  ;;  %v10493_v12 = vadd.f32 %v3131_v14, %v10360_v9  ;;  %v1569_v3 = vpop.f32.mrb[96].mxu1  ;;  %8267 = vmatprep.subr.bf16.mxu0 %v8266_v29  ;;  %v3208_v53 = vmax.f32 %v1312_v48, 0.0  ;;  %v1314_v16 = vpop.f32.mrb[97].mxu0 }
 0x1c2   : > { %8287 = vmatprep.subr.bf16.mxu1 %v8286_v57  ;;  %v3210_v50 = vmax.f32 %v1569_v3, 0.0  ;;  %v1571_v60 = vpop.f32.mrb[97].mxu1  ;;  %7680 = vmatmul.mubr.msk.f32.gmra.mrb[202].mxu0 %vm539_vm2, %v8447_v47  ;;  %v3209_v17 = vmax.f32 %v1314_v16, 0.0 }
 0x1c3   : > { %7712 = vmatmul.mubr.msk.f32.gmra.mrb[202].mxu1 %vm539_vm2, %v8447_v47  ;;  %v3211_v43 = vmax.f32 %v1571_v60, 0.0  ;;  %2278 = vmatprep.mubr.f32.mxu0 %v13710_v37  ;;  %v10503_v9 = vadd.f32 %v3208_v53, %v10382_v13  ;;  %v8448_v13 = vld [vmem:[%s13698_s1 + $0x30] sm:$0xff] }
 0x1c4   : > { %2535 = vmatprep.mubr.f32.mxu1 %v13710_v37  ;;  %v10506_v41 = vadd.f32 %v3210_v50, %v10385_v58  ;;  %v10509_v18 = vadd.f32 %v3209_v17, %v10396_v45  ;;  %v1318_v21 = vpop.f32.mrb[98].mxu0 }
 0x1c5   : > { %v10512_v24 = vadd.f32 %v3211_v43, %v10399_v61  ;;  %v1575_v32 = vpop.f32.mrb[98].mxu1  ;;  %v3224_v54 = vmax.f32 %v1318_v21, 0.0  ;;  %v1320_v15 = vpop.f32.mrb[99].mxu0 }
 0x1c6   : > { %v3226_v31 = vmax.f32 %v1575_v32, 0.0  ;;  %v1577_v1 = vpop.f32.mrb[99].mxu1  ;;  %7681 = vmatmul.mubr.msk.f32.gmra.mrb[204].mxu0 %vm539_vm2, %v8448_v13  ;;  %v3225_v58 = vmax.f32 %v1320_v15, 0.0 }
 0x1c7   : > { %7713 = vmatmul.mubr.msk.f32.gmra.mrb[204].mxu1 %vm539_vm2, %v8448_v13  ;;  %v3227_v45 = vmax.f32 %v1577_v1, 0.0  ;;  %2284 = vmatprep.mubr.f32.mxu0 %v13710_v37  ;;  %v10522_v61 = vadd.f32 %v3224_v54, %v10428_v25  ;;  %v8449_v25 = vld [vmem:[%s13698_s1 + $0x38] sm:$0xff] }
 0x1c8   : > { %2541 = vmatprep.mubr.f32.mxu1 %v13710_v37  ;;  %v10525_v62 = vadd.f32 %v3226_v31, %v10431_v30  ;;  %v10528_v19 = vadd.f32 %v3225_v58, %v10439_v46  ;;  %v1324_v5 = vpop.f32.mrb[100].mxu0 }
 0x1c9   : > { %v10531_v29 = vadd.f32 %v3227_v45, %v10442_v36  ;;  %v1581_v39 = vpop.f32.mrb[100].mxu1  ;;  %v3240_v57 = vmax.f32 %v1324_v5, 0.0  ;;  %v1326_v23 = vpop.f32.mrb[101].mxu0 }
 0x1ca   : > { %v3242_v34 = vmax.f32 %v1581_v39, 0.0  ;;  %v1583_v2 = vpop.f32.mrb[101].mxu1  ;;  %7682 = vmatmul.mubr.msk.f32.gmra.mrb[206].mxu0 %vm539_vm2, %v8449_v25  ;;  %v3241_v30 = vmax.f32 %v1326_v23, 0.0 }
 0x1cb   : > { %7714 = vmatmul.mubr.msk.f32.gmra.mrb[206].mxu1 %vm539_vm2, %v8449_v25  ;;  %v3243_v46 = vmax.f32 %v1583_v2, 0.0  ;;  %2290 = vmatprep.mubr.f32.mxu0 %v13710_v37  ;;  %v10541_v36 = vadd.f32 %v3240_v57, %v10461_v44  ;;  %v8450_v44 = vld [vmem:[%s13698_s1 + $0x40] sm:$0xff] }
 0x1cc   : > { %2547 = vmatprep.mubr.f32.mxu1 %v13710_v37  ;;  %v10544_v4 = vadd.f32 %v3242_v34, %v10464_v26  ;;  %v10547_v8 = vadd.f32 %v3241_v30, %v10469_v59  ;;  %v1330_v14 = vpop.f32.mrb[102].mxu0 }
 0x1cd   : > { %v10550_v33 = vadd.f32 %v3243_v46, %v10472_v42  ;;  %v1587_v48 = vpop.f32.mrb[102].mxu1  ;;  %v3256_v3 = vmax.f32 %v1330_v14, 0.0  ;;  %v1332_v50 = vpop.f32.mrb[103].mxu0 }
 0x1ce   : > { %v3258_v53 = vmax.f32 %v1587_v48, 0.0  ;;  %v1589_v16 = vpop.f32.mrb[103].mxu1  ;;  %7683 = vmatmul.mubr.msk.f32.gmra.mrb[208].mxu0 %vm539_vm2, %v8450_v44  ;;  %v3257_v26 = vmax.f32 %v1332_v50, 0.0 }
 0x1cf   : > { %7715 = vmatmul.mubr.msk.f32.gmra.mrb[208].mxu1 %vm539_vm2, %v8450_v44  ;;  %v3259_v59 = vmax.f32 %v1589_v16, 0.0  ;;  %2296 = vmatprep.mubr.f32.mxu0 %v13710_v37  ;;  %v10560_v42 = vadd.f32 %v3256_v3, %v10484_v27  ;;  %v8451_v27 = vld [vmem:[%s13698_s1 + $0x48] sm:$0xff] }
 0x1d0   : > { %2553 = vmatprep.mubr.f32.mxu1 %v13710_v37  ;;  %v10563_v60 = vadd.f32 %v3258_v53, %v10487_v11  ;;  %v10566_v47 = vadd.f32 %v3257_v26, %v10490_v40  ;;  %v1336_v43 = vpop.f32.mrb[104].mxu0 }
 0x1d1   : > { %v10569_v17 = vadd.f32 %v3259_v59, %v10493_v12  ;;  %v1593_v21 = vpop.f32.mrb[104].mxu1  ;;  %v3336_v32 = vmax.f32 %v1336_v43, 0.0  ;;  %v1338_v31 = vpop.f32.mrb[105].mxu0 }
 0x1d2   : > { %v3338_v54 = vmax.f32 %v1593_v21, 0.0  ;;  %v1595_v15 = vpop.f32.mrb[105].mxu1  ;;  %7684 = vmatmul.mubr.msk.f32.gmra.mrb[210].mxu0 %vm539_vm2, %v8451_v27  ;;  %v3337_v11 = vmax.f32 %v1338_v31, 0.0 }
 0x1d3   : > { %7716 = vmatmul.mubr.msk.f32.gmra.mrb[210].mxu1 %vm539_vm2, %v8451_v27  ;;  %v3339_v40 = vmax.f32 %v1595_v15, 0.0  ;;  %2302 = vmatprep.mubr.f32.mxu0 %v13710_v37  ;;  %v10579_v12 = vadd.f32 %v3336_v32, %v10503_v9  ;;  %v8452_v9 = vld [vmem:[%s13698_s1 + $0x50] sm:$0xff] }
 0x1d4   : > { %2559 = vmatprep.mubr.f32.mxu1 %v13710_v37  ;;  %v10582_v1 = vadd.f32 %v3338_v54, %v10506_v41  ;;  %v10585_v13 = vadd.f32 %v3337_v11, %v10509_v18  ;;  %v1342_v45 = vpop.f32.mrb[106].mxu0 }
 0x1d5   : > { %v10588_v58 = vadd.f32 %v3339_v40, %v10512_v24  ;;  %v1599_v5 = vpop.f32.mrb[106].mxu1  ;;  %v3352_v39 = vmax.f32 %v1342_v45, 0.0  ;;  %v1344_v34 = vpop.f32.mrb[107].mxu0 }
 0x1d6   : > { %v3354_v57 = vmax.f32 %v1599_v5, 0.0  ;;  %v1601_v23 = vpop.f32.mrb[107].mxu1  ;;  %7685 = vmatmul.mubr.msk.f32.gmra.mrb[212].mxu0 %vm539_vm2, %v8452_v9  ;;  %v3353_v41 = vmax.f32 %v1344_v34, 0.0 }
 0x1d7   : > { %7717 = vmatmul.mubr.msk.f32.gmra.mrb[212].mxu1 %vm539_vm2, %v8452_v9  ;;  %v3355_v18 = vmax.f32 %v1601_v23, 0.0  ;;  %2308 = vmatprep.mubr.f32.mxu0 %v13710_v37  ;;  %v10598_v24 = vadd.f32 %v3352_v39, %v10522_v61  ;;  %v8453_v61 = vld [vmem:[%s13698_s1 + $0x58] sm:$0xff] }
 0x1d8   : > { %2565 = vmatprep.mubr.f32.mxu1 %v13710_v37  ;;  %v10601_v2 = vadd.f32 %v3354_v57, %v10525_v62  ;;  %v10604_v25 = vadd.f32 %v3353_v41, %v10528_v19  ;;  %v1348_v46 = vpop.f32.mrb[108].mxu0 }
 0x1d9   : > { %v10607_v30 = vadd.f32 %v3355_v18, %v10531_v29  ;;  %v1605_v14 = vpop.f32.mrb[108].mxu1  ;;  %v3368_v48 = vmax.f32 %v1348_v46, 0.0  ;;  %v1350_v53 = vpop.f32.mrb[109].mxu0 }
 0x1da   : > { %v3370_v3 = vmax.f32 %v1605_v14, 0.0  ;;  %v1607_v50 = vpop.f32.mrb[109].mxu1  ;;  %7686 = vmatmul.mubr.msk.f32.gmra.mrb[214].mxu0 %vm539_vm2, %v8453_v61  ;;  %v3369_v62 = vmax.f32 %v1350_v53, 0.0 }
 0x1db   : > { %7718 = vmatmul.mubr.msk.f32.gmra.mrb[214].mxu1 %vm539_vm2, %v8453_v61  ;;  %v3371_v19 = vmax.f32 %v1607_v50, 0.0  ;;  %2314 = vmatprep.mubr.f32.mxu0 %v13710_v37  ;;  %v10617_v29 = vadd.f32 %v3368_v48, %v10541_v36  ;;  %v8454_v36 = vld [vmem:[%s13698_s1 + $0x60] sm:$0xff] }
 0x1dc   : > { %2571 = vmatprep.mubr.f32.mxu1 %v13710_v37  ;;  %v10620_v16 = vadd.f32 %v3370_v3, %v10544_v4  ;;  %v10623_v44 = vadd.f32 %v3369_v62, %v10547_v8  ;;  %v1354_v59 = vpop.f32.mrb[110].mxu0 }
 0x1dd   : > { %v10626_v26 = vadd.f32 %v3371_v19, %v10550_v33  ;;  %v1611_v43 = vpop.f32.mrb[110].mxu1  ;;  %v3384_v21 = vmax.f32 %v1354_v59, 0.0  ;;  %v1356_v54 = vpop.f32.mrb[111].mxu0 }
 0x1de   : > { %v3386_v32 = vmax.f32 %v1611_v43, 0.0  ;;  %v1613_v31 = vpop.f32.mrb[111].mxu1  ;;  %7687 = vmatmul.mubr.msk.f32.gmra.mrb[216].mxu0 %vm539_vm2, %v8454_v36  ;;  %v3385_v4 = vmax.f32 %v1356_v54, 0.0 }
 0x1df   : > { %7719 = vmatmul.mubr.msk.f32.gmra.mrb[216].mxu1 %vm539_vm2, %v8454_v36  ;;  %v3387_v8 = vmax.f32 %v1613_v31, 0.0  ;;  %2320 = vmatprep.mubr.f32.mxu0 %v13710_v37  ;;  %v10636_v33 = vadd.f32 %v3384_v21, %v10560_v42  ;;  %v8455_v42 = vld [vmem:[%s13698_s1 + $0x68] sm:$0xff] }
 0x1e0   : > { %2577 = vmatprep.mubr.f32.mxu1 %v13710_v37  ;;  %v10639_v15 = vadd.f32 %v3386_v32, %v10563_v60  ;;  %v10642_v27 = vadd.f32 %v3385_v4, %v10566_v47  ;;  %v1360_v40 = vpop.f32.mrb[112].mxu0 }
 0x1e1   : > { %v10645_v11 = vadd.f32 %v3387_v8, %v10569_v17  ;;  %v1617_v45 = vpop.f32.mrb[112].mxu1  ;;  %v3464_v5 = vmax.f32 %v1360_v40, 0.0  ;;  %v1362_v57 = vpop.f32.mrb[113].mxu0 }
 0x1e2   : > { %v3466_v39 = vmax.f32 %v1617_v45, 0.0  ;;  %v1619_v34 = vpop.f32.mrb[113].mxu1  ;;  %7688 = vmatmul.mubr.msk.f32.gmra.mrb[218].mxu0 %vm539_vm2, %v8455_v42  ;;  %v3465_v60 = vmax.f32 %v1362_v57, 0.0 }
 0x1e3   : > { %7720 = vmatmul.mubr.msk.f32.gmra.mrb[218].mxu1 %vm539_vm2, %v8455_v42  ;;  %v3467_v47 = vmax.f32 %v1619_v34, 0.0  ;;  %2326 = vmatprep.mubr.f32.mxu0 %v13710_v37  ;;  %v10655_v17 = vadd.f32 %v3464_v5, %v10579_v12  ;;  %v8456_v12 = vld [vmem:[%s13698_s1 + $0x70] sm:$0xff] }
 0x1e4   : > { %2583 = vmatprep.mubr.f32.mxu1 %v13710_v37  ;;  %v10658_v23 = vadd.f32 %v3466_v39, %v10582_v1  ;;  %v10661_v9 = vadd.f32 %v3465_v60, %v10585_v13  ;;  %v1366_v18 = vpop.f32.mrb[114].mxu0 }
 0x1e5   : > { %v10664_v41 = vadd.f32 %v3467_v47, %v10588_v58  ;;  %v1623_v46 = vpop.f32.mrb[114].mxu1  ;;  %v3480_v14 = vmax.f32 %v1366_v18, 0.0  ;;  %v1368_v3 = vpop.f32.mrb[115].mxu0 }
 0x1e6   : > { %v3482_v48 = vmax.f32 %v1623_v46, 0.0  ;;  %v1625_v53 = vpop.f32.mrb[115].mxu1  ;;  %7689 = vmatmul.mubr.msk.f32.gmra.mrb[220].mxu0 %vm539_vm2, %v8456_v12  ;;  %v3481_v1 = vmax.f32 %v1368_v3, 0.0 }
 0x1e7   : > { %7721 = vmatmul.mubr.msk.f32.gmra.mrb[220].mxu1 %vm539_vm2, %v8456_v12  ;;  %v3483_v13 = vmax.f32 %v1625_v53, 0.0  ;;  %2332 = vmatprep.mubr.f32.mxu0 %v13710_v37  ;;  %v10674_v58 = vadd.f32 %v3480_v14, %v10598_v24  ;;  %v8457_v24 = vld [vmem:[%s13698_s1 + $0x78] sm:$0xff] }
 0x1e8   : > { %2589 = vmatprep.mubr.f32.mxu1 %v13710_v37  ;;  %v10677_v50 = vadd.f32 %v3482_v48, %v10601_v2  ;;  %v10680_v61 = vadd.f32 %v3481_v1, %v10604_v25  ;;  %v1372_v19 = vpop.f32.mrb[116].mxu0 }
 0x1e9   : > { %v10683_v62 = vadd.f32 %v3483_v13, %v10607_v30  ;;  %v1629_v59 = vpop.f32.mrb[116].mxu1  ;;  %v3496_v43 = vmax.f32 %v1372_v19, 0.0  ;;  %v1374_v32 = vpop.f32.mrb[117].mxu0 }
 0x1ea   : > { %v3498_v21 = vmax.f32 %v1629_v59, 0.0  ;;  %v1631_v54 = vpop.f32.mrb[117].mxu1  ;;  %7690 = vmatmul.mubr.msk.f32.gmra.mrb[222].mxu0 %vm539_vm2, %v8457_v24  ;;  %v3497_v2 = vmax.f32 %v1374_v32, 0.0 }
 0x1eb   : > { %7722 = vmatmul.mubr.msk.f32.gmra.mrb[222].mxu1 %vm539_vm2, %v8457_v24  ;;  %v3499_v25 = vmax.f32 %v1631_v54, 0.0  ;;  %2338 = vmatprep.mubr.f32.mxu0 %v13710_v37  ;;  %v10693_v30 = vadd.f32 %v3496_v43, %v10617_v29  ;;  %v8458_v29 = vld [vmem:[%s13698_s1 + $0x80] sm:$0xff] }
 0x1ec   : > { %2595 = vmatprep.mubr.f32.mxu1 %v13710_v37  ;;  %v10696_v31 = vadd.f32 %v3498_v21, %v10620_v16  ;;  %v10699_v36 = vadd.f32 %v3497_v2, %v10623_v44  ;;  %v1378_v8 = vpop.f32.mrb[118].mxu0 }
 0x1ed   : > { %v10702_v4 = vadd.f32 %v3499_v25, %v10626_v26  ;;  %v1635_v40 = vpop.f32.mrb[118].mxu1  ;;  %v3512_v45 = vmax.f32 %v1378_v8, 0.0  ;;  %v1380_v39 = vpop.f32.mrb[119].mxu0 }
 0x1ee   : > { %v3514_v5 = vmax.f32 %v1635_v40, 0.0  ;;  %v1637_v57 = vpop.f32.mrb[119].mxu1  ;;  %7691 = vmatmul.mubr.msk.f32.gmra.mrb[224].mxu0 %vm539_vm2, %v8458_v29  ;;  %v3513_v16 = vmax.f32 %v1380_v39, 0.0 }
 0x1ef   : > { %7723 = vmatmul.mubr.msk.f32.gmra.mrb[224].mxu1 %vm539_vm2, %v8458_v29  ;;  %v3515_v44 = vmax.f32 %v1637_v57, 0.0  ;;  %2344 = vmatprep.mubr.f32.mxu0 %v13710_v37  ;;  %v10712_v26 = vadd.f32 %v3512_v45, %v10636_v33  ;;  %v8459_v33 = vld [vmem:[%s13698_s1 + $0x88] sm:$0xff] }
 0x1f0   : > { %2601 = vmatprep.mubr.f32.mxu1 %v13710_v37  ;;  %v10715_v34 = vadd.f32 %v3514_v5, %v10639_v15  ;;  %v10718_v42 = vadd.f32 %v3513_v16, %v10642_v27  ;;  %v1384_v47 = vpop.f32.mrb[120].mxu0 }
 0x1f1   : > { %v10721_v60 = vadd.f32 %v3515_v44, %v10645_v11  ;;  %v1641_v18 = vpop.f32.mrb[120].mxu1  ;;  %v3592_v46 = vmax.f32 %v1384_v47, 0.0  ;;  %v1386_v48 = vpop.f32.mrb[121].mxu0 }
 0x1f2   : > { %v3594_v14 = vmax.f32 %v1641_v18, 0.0  ;;  %v1643_v3 = vpop.f32.mrb[121].mxu1  ;;  %7692 = vmatmul.mubr.msk.f32.gmra.mrb[226].mxu0 %vm539_vm2, %v8459_v33  ;;  %v3593_v15 = vmax.f32 %v1386_v48, 0.0 }
 0x1f3   : > { %7724 = vmatmul.mubr.msk.f32.gmra.mrb[226].mxu1 %vm539_vm2, %v8459_v33  ;;  %v3595_v27 = vmax.f32 %v1643_v3, 0.0  ;;  %2350 = vmatprep.mubr.f32.mxu0 %v13710_v37  ;;  %v10731_v11 = vadd.f32 %v3592_v46, %v10655_v17  ;;  %v8460_v17 = vld [vmem:[%s13698_s1 + $0x90] sm:$0xff] }
 0x1f4   : > { %2607 = vmatprep.mubr.f32.mxu1 %v13710_v37  ;;  %v10734_v53 = vadd.f32 %v3594_v14, %v10658_v23  ;;  %v1390_v12 = vpop.f32.mrb[122].mxu0  ;;  %v10737_v13 = vadd.f32 %v3593_v15, %v10661_v9 }
 0x1f5   : > { %v1647_v1 = vpop.f32.mrb[122].mxu1  ;;  %v10740_v19 = vadd.f32 %v3595_v27, %v10664_v41  ;;  %v3608_v59 = vmax.f32 %v1390_v12, 0.0  ;;  %v1392_v21 = vpop.f32.mrb[123].mxu0 }
 0x1f6   : > { %v3610_v43 = vmax.f32 %v1647_v1, 0.0  ;;  %v1649_v32 = vpop.f32.mrb[123].mxu1  ;;  %7693 = vmatmul.mubr.msk.f32.gmra.mrb[228].mxu0 %vm539_vm2, %v8460_v17  ;;  %v3609_v23 = vmax.f32 %v1392_v21, 0.0 }
 0x1f7   : > { %7725 = vmatmul.mubr.msk.f32.gmra.mrb[228].mxu1 %vm539_vm2, %v8460_v17  ;;  %v3611_v54 = vmax.f32 %v1649_v32, 0.0  ;;  %2356 = vmatprep.mubr.f32.mxu0 %v13710_v37  ;;  %v10750_v9 = vadd.f32 %v3608_v59, %v10674_v58  ;;  %v8461_v58 = vld [vmem:[%s13698_s1 + $0x98] sm:$0xff]  ;;  %v8463_v59 = vld [vmem:[%s13698_s1 + $0xa8] sm:$0xff] }
 0x1f8   : > { %2613 = vmatprep.mubr.f32.mxu1 %v13710_v37  ;;  %v10753_v41 = vadd.f32 %v3610_v43, %v10677_v50  ;;  %v1396_v24 = vpop.f32.mrb[124].mxu0  ;;  %v10756_v25 = vadd.f32 %v3609_v23, %v10680_v61  ;;  %v8464_v43 = vld [vmem:[%s13698_s1 + $0xb0] sm:$0xff] }
 0x1f9   : > { %13734 = vst [vmem:[#allocation12_spill] sm:$0xff] %v10750_v9  ;;  %v1653_v2 = vpop.f32.mrb[124].mxu1  ;;  %v10759_v8 = vadd.f32 %v3611_v54, %v10683_v62  ;;  %v3624_v40 = vmax.f32 %v1396_v24, 0.0  ;;  %v1398_v5 = vpop.f32.mrb[125].mxu0  ;;  %v8465_v54 = vld [vmem:[%s13698_s1 + $0xb8] sm:$0xff] }
 0x1fa   : > { %13735 = vst [vmem:[#allocation13_spill] sm:$0xff] %v10753_v41  ;;  %13736 = vst [vmem:[#allocation14_spill] sm:$0xff] %v10756_v25  ;;  %v3626_v45 = vmax.f32 %v1653_v2, 0.0  ;;  %v1655_v39 = vpop.f32.mrb[125].mxu1  ;;  %7694 = vmatmul.mubr.msk.f32.gmra.mrb[230].mxu0 %vm539_vm2, %v8461_v58  ;;  %v3625_v50 = vmax.f32 %v1398_v5, 0.0  ;;  %v8466_v5 = vld [vmem:[%s13698_s1 + $0xc0] sm:$0xff] }
 0x1fb   : > { %13737 = vst [vmem:[#allocation15_spill] sm:$0xff] %v10759_v8  ;;  %7726 = vmatmul.mubr.msk.f32.gmra.mrb[230].mxu1 %vm539_vm2, %v8461_v58  ;;  %v3627_v57 = vmax.f32 %v1655_v39, 0.0  ;;  %2362 = vmatprep.mubr.f32.mxu0 %v13710_v37  ;;  %v10769_v61 = vadd.f32 %v3624_v40, %v10693_v30  ;;  %v8462_v30 = vld [vmem:[%s13698_s1 + $0xa0] sm:$0xff] }
 0x1fc   : > { %2619 = vmatprep.mubr.f32.mxu1 %v13710_v37  ;;  %v10772_v62 = vadd.f32 %v3626_v45, %v10696_v31  ;;  %v1402_v29 = vpop.f32.mrb[126].mxu0  ;;  %v10775_v44 = vadd.f32 %v3625_v50, %v10699_v36 }
 0x1fd   : > { %13738 = vst [vmem:[#allocation16_spill] sm:$0xff] %v10769_v61  ;;  %v1659_v16 = vpop.f32.mrb[126].mxu1  ;;  %v10778_v47 = vadd.f32 %v3627_v57, %v10702_v4  ;;  %v3640_v18 = vmax.f32 %v1402_v29, 0.0  ;;  %v1404_v14 = vpop.f32.mrb[127].mxu0 }
 0x1fe   : > { %13739 = vst [vmem:[#allocation17_spill] sm:$0xff] %v10772_v62  ;;  %13740 = vst [vmem:[#allocation18_spill] sm:$0xff] %v10775_v44  ;;  %v3642_v46 = vmax.f32 %v1659_v16, 0.0  ;;  %v1661_v48 = vpop.f32.mrb[127].mxu1  ;;  %7695 = vmatmul.mubr.msk.f32.gmra.mrb[232].mxu0 %vm539_vm2, %v8462_v30  ;;  %v3641_v31 = vmax.f32 %v1404_v14, 0.0 }
 0x1ff   : > { %13741 = vst [vmem:[#allocation19_spill] sm:$0xff] %v10778_v47  ;;  %7727 = vmatmul.mubr.msk.f32.gmra.mrb[232].mxu1 %vm539_vm2, %v8462_v30  ;;  %v3643_v3 = vmax.f32 %v1661_v48, 0.0  ;;  %2368 = vmatprep.mubr.f32.mxu0 %v13710_v37  ;;  %v10788_v36 = vadd.f32 %v3640_v18, %v10712_v26  ;;  %v8467_v48 = vld [vmem:[%s13698_s1 + $0xc8] sm:$0xff] }
 0x200   : > { %2625 = vmatprep.mubr.f32.mxu1 %v13710_v37  ;;  %v10791_v4 = vadd.f32 %v3642_v46, %v10715_v34  ;;  %v1730_v33 = vpop.f32.mrb[128].mxu0  ;;  %v10794_v27 = vadd.f32 %v3641_v31, %v10718_v42 }
 0x201   : > { %13742 = vst [vmem:[#allocation20_spill] sm:$0xff] %v10788_v36  ;;  %v1987_v15 = vpop.f32.mrb[128].mxu1  ;;  %v10797_v12 = vadd.f32 %v3643_v3, %v10721_v60  ;;  %v1732_v1 = vpop.f32.mrb[129].mxu0  ;;  %v2700_v57 = vmax.f32 %v1730_v33, 0.0 }
 0x202   : > { %13743 = vst [vmem:[#allocation21_spill] sm:$0xff] %v10791_v4  ;;  %13744 = vst [vmem:[#allocation22_spill] sm:$0xff] %v10794_v27  ;;  %7696 = vmatmul.mubr.msk.f32.gmra.mrb[234].mxu0 %vm539_vm2, %v8463_v59  ;;  %v1989_v26 = vpop.f32.mrb[129].mxu1  ;;  %v2702_v29 = vmax.f32 %v1987_v15, 0.0  ;;  %v2701_v30 = vmax.f32 %v1732_v1, 0.0 }
 0x203   : > { %13745 = vst [vmem:[#allocation23_spill] sm:$0xff] %v10797_v12  ;;  %7728 = vmatmul.mubr.msk.f32.gmra.mrb[234].mxu1 %vm539_vm2, %v8463_v59  ;;  %2374 = vmatprep.mubr.f32.mxu0 %v13710_v37  ;;  %v2703_v31 = vmax.f32 %v1989_v26, 0.0 }
 0x204   : > { %2631 = vmatprep.mubr.f32.mxu1 %v13710_v37  ;;  %v10806_v34 = vpop.f32.mrb[130].mxu0 }
 0x205   : > { %v10808_v42 = vpop.f32.mrb[130].mxu1  ;;  %v10810_v60 = vpop.f32.mrb[131].mxu0 }
 0x206   : > { %7697 = vmatmul.mubr.msk.f32.gmra.mrb[236].mxu0 %vm539_vm2, %v8464_v43  ;;  %v10817_v21 = vpop.f32.mrb[131].mxu1  ;;  %v2718_v1 = vmax.f32 %v10808_v42, 0.0 }
 0x207   : > { %7729 = vmatmul.mubr.msk.f32.gmra.mrb[236].mxu1 %vm539_vm2, %v8464_v43  ;;  %2380 = vmatprep.mubr.f32.mxu0 %v13710_v37 }
 0x208   : > { %2637 = vmatprep.mubr.f32.mxu1 %v13710_v37  ;;  %v10821_v32 = vpop.f32.mrb[132].mxu0 }
 0x209   : > { %v10823_v17 = vpop.f32.mrb[132].mxu1  ;;  %v10825_v23 = vpop.f32.mrb[133].mxu0 }
 0x20a   : > { %7698 = vmatmul.mubr.msk.f32.gmra.mrb[238].mxu0 %vm539_vm2, %v8465_v54  ;;  %v10832_v24 = vpop.f32.mrb[133].mxu1 }
 0x20b   : > { %7730 = vmatmul.mubr.msk.f32.gmra.mrb[238].mxu1 %vm539_vm2, %v8465_v54  ;;  %2386 = vmatprep.mubr.f32.mxu0 %v13710_v37 }
 0x20c   : > { %2643 = vmatprep.mubr.f32.mxu1 %v13710_v37 }
 0x20d   : > { %v10836_v2 = vpop.f32.mrb[134].mxu0  ;;  %v10838_v40 = vpop.f32.mrb[134].mxu1 }
 0x20e   : > { %v10840_v45 = vpop.f32.mrb[135].mxu0  ;;  %7699 = vmatmul.mubr.msk.f32.gmra.mrb[240].mxu0 %vm539_vm2, %v8466_v5  ;;  %v10847_v39 = vpop.f32.mrb[135].mxu1 }
 0x20f   : > { %7731 = vmatmul.mubr.msk.f32.gmra.mrb[240].mxu1 %vm539_vm2, %v8466_v5  ;;  %2392 = vmatprep.mubr.f32.mxu0 %v13710_v37 }
 0x210   : > { %2649 = vmatprep.mubr.f32.mxu1 %v13710_v37 }
 0x211   : > { %v1754_v58 = vpop.f32.mrb[136].mxu0  ;;  %v2011_v50 = vpop.f32.mrb[136].mxu1 }
 0x212   : > { %v2828_v16 = vmax.f32 %v1754_v58, 0.0  ;;  %v2830_v18 = vmax.f32 %v2011_v50, 0.0  ;;  %v1756_v46 = vpop.f32.mrb[137].mxu0  ;;  %v2013_v14 = vpop.f32.mrb[137].mxu1  ;;  %7700 = vmatmul.mubr.msk.f32.gmra.mrb[242].mxu0 %vm539_vm2, %v8467_v48  ;;  %v2716_v50 = vmax.f32 %v10806_v34, 0.0  ;;  %v2719_v34 = vmax.f32 %v10817_v21, 0.0 }
 0x213   : > { %7732 = vmatmul.mubr.msk.f32.gmra.mrb[242].mxu1 %vm539_vm2, %v8467_v48  ;;  %v2829_v3 = vmax.f32 %v1756_v46, 0.0  ;;  %v2831_v59 = vmax.f32 %v2013_v14, 0.0  ;;  %2398 = vmatprep.mubr.f32.mxu0 %v13710_v37  ;;  %v2732_v21 = vmax.f32 %v10821_v32, 0.0 }
 0x214   : > { %2655 = vmatprep.mubr.f32.mxu1 %v13710_v37  ;;  %v10858_v33 = vadd.f32 %v2828_v16, %v2700_v57  ;;  %v10860_v15 = vadd.f32 %v2830_v18, %v2702_v29  ;;  %v8468_v57 = vld [vmem:[%s13698_s1 + $0xd0] sm:$0xff]  ;;  %v2717_v29 = vmax.f32 %v10810_v60, 0.0  ;;  %v3757_v60 = vld [vmem:[%s8662_s21 + $0x158] sm:$0x1] }
 0x215   : > { %v10862_v43 = vadd.f32 %v2829_v3, %v2701_v30  ;;  %v10864_v54 = vadd.f32 %v2831_v59, %v2703_v31  ;;  %v1760_v5 = vpop.f32.mrb[138].mxu0  ;;  %v2017_v58 = vpop.f32.mrb[138].mxu1 }
 0x216   : > { %v2844_v26 = vmax.f32 %v1760_v5, 0.0  ;;  %v2846_v46 = vmax.f32 %v2017_v58, 0.0  ;;  %v1762_v14 = vpop.f32.mrb[139].mxu0  ;;  %v2019_v48 = vpop.f32.mrb[139].mxu1  ;;  %7701 = vmatmul.mubr.msk.f32.gmra.mrb[244].mxu0 %vm539_vm2, %v8468_v57  ;;  %v10886_v58 = vld [vmem:[%s8662_s21 + $0xc8] sm:$0xfe] }
 0x217   : > { %7733 = vmatmul.mubr.msk.f32.gmra.mrb[244].mxu1 %vm539_vm2, %v8468_v57  ;;  %v2845_v16 = vmax.f32 %v1762_v14, 0.0  ;;  %v2847_v42 = vmax.f32 %v2019_v48, 0.0  ;;  %2404 = vmatprep.mubr.f32.mxu0 %v13710_v37  ;;  %v2734_v14 = vmax.f32 %v10823_v17, 0.0 }
 0x218   : > { %2661 = vmatprep.mubr.f32.mxu1 %v13710_v37  ;;  %v10877_v18 = vadd.f32 %v2844_v26, %v2716_v50  ;;  %v10879_v30 = vadd.f32 %v2846_v46, %v2718_v1  ;;  %v8469_v1 = vld [vmem:[%s13698_s1 + $0xd8] sm:$0xff]  ;;  %v2733_v26 = vmax.f32 %v10825_v23, 0.0  ;;  %v2735_v46 = vmax.f32 %v10832_v24, 0.0 }
 0x219   : > { %v10881_v31 = vadd.f32 %v2845_v16, %v2717_v29  ;;  %v10883_v3 = vadd.f32 %v2847_v42, %v2719_v34  ;;  %v1766_v59 = vpop.f32.mrb[140].mxu0  ;;  %v2023_v5 = vpop.f32.mrb[140].mxu1  ;;  %v3859_v23 = vrot.slane %v10886_v58, 1  ;;  %v2750_v24 = vmax.f32 %v10838_v40, 0.0 }
 0x21a   : > { %v2860_v48 = vmax.f32 %v1766_v59, 0.0  ;;  %v2862_v57 = vmax.f32 %v2023_v5, 0.0  ;;  %v1768_v0 = vpop.f32.mrb[141].mxu0  ;;  %v2025_v50 = vpop.f32.mrb[141].mxu1  ;;  %7702 = vmatmul.mubr.msk.f32.gmra.mrb[246].mxu0 %vm539_vm2, %v8469_v1  ;;  %v2749_v58 = vmax.f32 %v10840_v45, 0.0 }
 0x21b   : > { %7734 = vmatmul.mubr.msk.f32.gmra.mrb[246].mxu1 %vm539_vm2, %v8469_v1  ;;  %v2861_v29 = vmax.f32 %v1768_v0, 0.0  ;;  %v2863_v32 = vmax.f32 %v2025_v50, 0.0  ;;  %2410 = vmatprep.mubr.f32.mxu0 %v13710_v37  ;;  %v3860_v1 = vrot.slane %v3757_v60, 1  ;;  %v2748_v0 = vmax.f32 %v10836_v2, 0.0 }
 0x21c   : > { %2667 = vmatprep.mubr.f32.mxu1 %v13710_v37  ;;  %v10900_v17 = vadd.f32 %v2860_v48, %v2732_v21  ;;  %v10902_v34 = vadd.f32 %v2862_v57, %v2734_v14  ;;  %v8470_v14 = vld [vmem:[%s13698_s1 + $0xe0] sm:$0xff]  ;;  %v2751_v2 = vmax.f32 %v10847_v39, 0.0  ;;  %v3756_v39 = vld [vmem:[%s8662_s21 + $0x150] sm:$0x1] }
 0x21d   : > { %v10904_v16 = vadd.f32 %v2861_v29, %v2733_v26  ;;  %v10906_v42 = vadd.f32 %v2863_v32, %v2735_v46  ;;  %v1772_v59 = vpop.f32.mrb[142].mxu0  ;;  %v2029_v5 = vpop.f32.mrb[142].mxu1  ;;  %v10925_v46 = vld [vmem:[%s8662_s21 + $0xc0] sm:$0xfe]  ;;  %v3857_v27 = vrot.slane %v3756_v39, 1 }
 0x21e   : > { %v2876_v50 = vmax.f32 %v1772_v59, 0.0  ;;  %v2878_v12 = vmax.f32 %v2029_v5, 0.0  ;;  %v1774_v21 = vpop.f32.mrb[143].mxu0  ;;  %v2031_v48 = vpop.f32.mrb[143].mxu1  ;;  %7703 = vmatmul.mubr.msk.f32.gmra.mrb[248].mxu0 %vm539_vm2, %v8470_v14  ;;  %v10933_v5 = vld [vmem:[%s8662_s21 + $0xd0] sm:$0xfe] }
 0x21f   : > { %7735 = vmatmul.mubr.msk.f32.gmra.mrb[248].mxu1 %vm539_vm2, %v8470_v14  ;;  %v2877_v40 = vmax.f32 %v1774_v21, 0.0  ;;  %v2879_v60 = vmax.f32 %v2031_v48, 0.0  ;;  %2416 = vmatprep.mubr.f32.mxu0 %v13710_v37 }
 0x220   : > { %2673 = vmatprep.mubr.f32.mxu1 %v13710_v37  ;;  %v10920_v57 = vadd.f32 %v2876_v50, %v2748_v0  ;;  %v10922_v26 = vadd.f32 %v2878_v12, %v2750_v24  ;;  %v8471_v12 = vld [vmem:[%s13698_s1 + $0xe8] sm:$0xff]  ;;  %v3758_v24 = vld [vmem:[%s8662_s21 + $0x160] sm:$0x1] }
 0x221   : > { %v10927_v29 = vadd.f32 %v2877_v40, %v2749_v58  ;;  %v10929_v32 = vadd.f32 %v2879_v60, %v2751_v2  ;;  %v1778_v45 = vpop.f32.mrb[144].mxu0  ;;  %v2035_v59 = vpop.f32.mrb[144].mxu1  ;;  %v10944_v2 = vsel %vm321_vm0, %v3859_v23, %v3860_v1  ;;  %v3743_v40 = vld [vmem:[%s8662_s21 + $0xd8] sm:$0xfe]  ;;  %v3759_v60 = vld [vmem:[%s8662_s21 + $0x168] sm:$0x1] }
 0x222   : > { %v2956_v21 = vmax.f32 %v1778_v45, 0.0  ;;  %v2958_v48 = vmax.f32 %v2035_v59, 0.0  ;;  %v1780_v0 = vpop.f32.mrb[145].mxu0  ;;  %v2037_v50 = vpop.f32.mrb[145].mxu1  ;;  %7704 = vmatmul.mubr.msk.f32.gmra.mrb[250].mxu0 %vm539_vm2, %v8471_v12  ;;  %v10962_v1 = vld [vmem:[%s8662_s21 + $0xd8] sm:$0xff]  ;;  %v3866_v39 = vrot.slane %v3759_v60, 1 }
 0x223   : > { %7736 = vmatmul.mubr.msk.f32.gmra.mrb[250].mxu1 %vm539_vm2, %v8471_v12  ;;  %v2957_v14 = vmax.f32 %v1780_v0, 0.0  ;;  %v2959_v58 = vmax.f32 %v2037_v50, 0.0  ;;  %2422 = vmatprep.mubr.f32.mxu0 %v13710_v37  ;;  %v3856_v12 = vrot.slane %v10925_v46, 1  ;;  %v3776_v60 = vld [vmem:[%s8662_s21 + $0xc0] sm:$0xfc] }
 0x224   : > { %2679 = vmatprep.mubr.f32.mxu1 %v13710_v37  ;;  %v10949_v45 = vadd.f32 %v2956_v21, %v10858_v33  ;;  %v10952_v59 = vadd.f32 %v2958_v48, %v10860_v15  ;;  %v3862_v33 = vrot.slane %v10933_v5, 1  ;;  %v3863_v21 = vrot.slane %v3758_v24, 1  ;;  %v8474_v24 = vld [vmem:[%s8662_s21 + $0xb8] sm:$0xff] }
 0x225   : > { %v10956_v0 = vadd.f32 %v2957_v14, %v10862_v43  ;;  %v10959_v50 = vadd.f32 %v2959_v58, %v10864_v54  ;;  %v1784_v4 = vpop.f32.mrb[146].mxu0  ;;  %v2041_v23 = vpop.f32.mrb[146].mxu1  ;;  %v8472_v43 = vld [vmem:[%s13698_s1 + $0xf0] sm:$0xff]  ;;  %v3865_v54 = vrot.slane %v3743_v40, 1 }
 0x226   : > { %v2972_v15 = vmax.f32 %v1784_v4, 0.0  ;;  %v2974_v48 = vmax.f32 %v2041_v23, 0.0  ;;  %v1786_v36 = vpop.f32.mrb[147].mxu0  ;;  %v2043_v46 = vpop.f32.mrb[147].mxu1  ;;  %7705 = vmatmul.mubr.msk.f32.gmra.mrb[252].mxu0 %vm539_vm2, %v8472_v43  ;;  %v8473_v4 = vld [vmem:[%s8662_s21 + $0xb0] sm:$0xff] }
 0x227   : > { %7737 = vmatmul.mubr.msk.f32.gmra.mrb[252].mxu1 %vm539_vm2, %v8472_v43  ;;  %v2973_v5 = vmax.f32 %v1786_v36, 0.0  ;;  %v2975_v14 = vmax.f32 %v2043_v46, 0.0  ;;  %2428 = vmatprep.mubr.f32.mxu0 %v13710_v37  ;;  %v8268_v58 = vpack.c.bf16 %v8474_v24, %v8473_v4  ;;  %v3792_v46 = vld [vmem:[%s8662_s21 + $0x150] sm:$0x3]  ;;  %v3777_v43 = vld [vmem:[%s8662_s21 + $0xc8] sm:$0xfc] }
 0x228   : > { %2685 = vmatprep.mubr.f32.mxu1 %v13710_v37  ;;  %v10975_v23 = vadd.f32 %v2972_v15, %v10877_v18  ;;  %v10978_v47 = vadd.f32 %v2974_v48, %v10879_v30  ;;  %v8290_v30 = vpack.c.bf16 %v10944_v2, %v10962_v1  ;;  %v10996_v48 = vsel %vm321_vm0, %v3856_v12, %v3857_v27  ;;  %v3778_v24 = vld [vmem:[%s8662_s21 + $0xd0] sm:$0xfc]  ;;  %v3793_v36 = vld [vmem:[%s8662_s21 + $0x158] sm:$0x3]  ;;  %v3794_v12 = vld [vmem:[%s8662_s21 + $0x160] sm:$0x3] }
 0x229   : > { %v10988_v44 = vadd.f32 %v2973_v5, %v10881_v31  ;;  %v10991_v4 = vadd.f32 %v2975_v14, %v10883_v3  ;;  %v1790_v18 = vpop.f32.mrb[148].mxu0  ;;  %v2047_v15 = vpop.f32.mrb[148].mxu1  ;;  %v8475_v31 = vld [vmem:[%s13698_s1 + $0xf8] sm:$0xff]  ;;  %v11006_v3 = vsel %vm321_vm0, %v3862_v33, %v3863_v21  ;;  %v11009_v27 = vsel %vm321_vm0, %v3865_v54, %v3866_v39 }
 0x22a   : > { %v2988_v40 = vmax.f32 %v1790_v18, 0.0  ;;  %v2990_v62 = vmax.f32 %v2047_v15, 0.0  ;;  %v1792_v61 = vpop.f32.mrb[149].mxu0  ;;  %v2049_v8 = vpop.f32.mrb[149].mxu1  ;;  %7706 = vmatmul.mubr.msk.f32.gmra.mrb[254].mxu0 %vm539_vm2, %v8475_v31  ;;  %v3964_v18 = vrot.slane %v3776_v60, 2  ;;  %v3965_v15 = vrot.slane %v3792_v46, 2 }
 0x22b   : > { %7738 = vmatmul.mubr.msk.f32.gmra.mrb[254].mxu1 %vm539_vm2, %v8475_v31  ;;  %v2989_v5 = vmax.f32 %v1792_v61, 0.0  ;;  %v2991_v14 = vmax.f32 %v2049_v8, 0.0  ;;  %4086 = vmatprep.mubr.f32.mxu0 %v13710_v37  ;;  %v3967_v33 = vrot.slane %v3777_v43, 2  ;;  %v3968_v21 = vrot.slane %v3793_v36, 2 }
 0x22c   : > { %4343 = vmatprep.mubr.f32.mxu1 %v13710_v37  ;;  %v11015_v25 = vadd.f32 %v2988_v40, %v10900_v17  ;;  %v11018_v31 = vadd.f32 %v2990_v62, %v10902_v34  ;;  %v3970_v41 = vrot.slane %v3778_v24, 2  ;;  %v3971_v9 = vrot.slane %v3794_v12, 2  ;;  %v8476_v62 = vld [vmem:[%s13698_s1] sm:$0xff]  ;;  %v3779_v12 = vld [vmem:[%s8662_s21 + $0xd8] sm:$0xfc] }
 0x22d   : > { %v11021_v54 = vadd.f32 %v2989_v5, %v10904_v16  ;;  %v11024_v61 = vadd.f32 %v2991_v14, %v10906_v42  ;;  %v1796_v8 = vpop.f32.mrb[150].mxu0  ;;  %v2053_v39 = vpop.f32.mrb[150].mxu1  ;;  %v8292_v34 = vpack.c.bf16 %v10996_v48, %v10452_v52  ;;  %v8274_v16 = vpack.c.bf16 %v10944_v2, %v10996_v48  ;;  %v3795_v5 = vld [vmem:[%s8662_s21 + $0x168] sm:$0x3] }
 0x22e   : > { %v3004_v60 = vmax.f32 %v1796_v8, 0.0  ;;  %v3006_v17 = vmax.f32 %v2053_v39, 0.0  ;;  %v1798_v40 = vpop.f32.mrb[151].mxu0  ;;  %v2055_v46 = vpop.f32.mrb[151].mxu1  ;;  %7739 = vmatmul.mubr.msk.f32.vlgmr.msra.gmra.mrb[0].mxu0 %vm539_vm2, %v8476_v62  ;;  %v8294_v43 = vpack.c.bf16 %v11009_v27, %v11006_v3  ;;  %v11039_v24 = vsel %vm430_vm1, %v3964_v18, %v3965_v15 }
 0x22f   : > { %7771 = vmatmul.mubr.msk.f32.vlgmr.msra.gmra.mrb[0].mxu1 %vm539_vm2, %v8476_v62  ;;  %v3005_v42 = vmax.f32 %v1798_v40, 0.0  ;;  %v3007_v36 = vmax.f32 %v2055_v46, 0.0  ;;  %8269 = vmatpush1.bf16.msra.mxu0 %v8268_v58  ;;  %v13746_v58 = vpack.c.bf16 %v10410_v38, %v10379_v55  ;;  %v11054_v8 = vsel %vm430_vm1, %v3967_v33, %v3968_v21  ;;  %v11080_v62 = vld [vmem:[%s8662_s21 + $0xe0] sm:$0xff] }
 0x230   : > { %4092 = vmatprep.mubr.f32.mxu0 %v13710_v37  ;;  %v11044_v14 = vadd.f32 %v3004_v60, %v10920_v57  ;;  %v11047_v52 = vadd.f32 %v3006_v17, %v10922_v26  ;;  %4349 = vmatprep.mubr.f32.mxu1 %v13710_v37  ;;  %v13747_v26 = vpack.c.bf16 %v10269_v10, %v10410_v38  ;;  %v3974_v38 = vrot.slane %v3795_v5, 2 }
 0x231   : > { %8289 = vmatpush1.bf16.msra.mxu1 %v13746_v58  ;;  %v11057_v18 = vadd.f32 %v3005_v42, %v10927_v29  ;;  %v11060_v15 = vadd.f32 %v3007_v36, %v10929_v32  ;;  %v1802_v57 = vpop.f32.mrb[152].mxu0  ;;  %v2059_v39 = vpop.f32.mrb[152].mxu1  ;;  %v11066_v60 = vsel %vm430_vm1, %v3970_v41, %v3971_v9  ;;  %v8477_v29 = vld [vmem:[%s13698_s1 + $0x8] sm:$0xff]  ;;  %v3973_v32 = vrot.slane %v3779_v12, 2 }
 0x232   : > { %8271 = vmatprep.subr.bf16.mxu0 %v13747_v26  ;;  %8291 = vmatprep.subr.bf16.mxu1 %v8290_v30  ;;  %v3084_v17 = vmax.f32 %v1802_v57, 0.0  ;;  %v3086_v33 = vmax.f32 %v2059_v39, 0.0  ;;  %v1804_v21 = vpop.f32.mrb[153].mxu0  ;;  %v2061_v40 = vpop.f32.mrb[153].mxu1  ;;  %v8276_v9 = vpack.c.bf16 %v10996_v48, %v10269_v10  ;;  %v8296_v41 = vpack.c.bf16 %v11006_v3, %v10944_v2  ;;  %v11102_v58 = vld [vmem:[%s8662_s21 + $0xe8] sm:$0xff] }
 0x233   : > { %7740 = vmatmul.mubr.msk.f32.gmra.mrb[2].mxu0 %vm539_vm2, %v8477_v29  ;;  %7772 = vmatmul.mubr.msk.f32.gmra.mrb[2].mxu1 %vm539_vm2, %v8477_v29  ;;  %v3085_v46 = vmax.f32 %v1804_v21, 0.0  ;;  %v3087_v30 = vmax.f32 %v2061_v40, 0.0  ;;  %v13748_v12 = vpack.c.bf16 %v10266_v6, %v10379_v55  ;;  %v8278_v5 = vpack.c.bf16 %v11039_v24, %v10418_v22 }
 0x234   : > { %4098 = vmatprep.mubr.f32.mxu0 %v13710_v37  ;;  %4355 = vmatprep.mubr.f32.mxu1 %v13710_v37  ;;  %v11083_v42 = vadd.f32 %v3084_v17, %v10949_v45  ;;  %v11086_v36 = vadd.f32 %v3086_v33, %v10952_v59  ;;  %v8298_v59 = vpack.c.bf16 %v11066_v60, %v11054_v8 }
 0x235   : > { %8273 = vmatpush1.bf16.msra.mxu0 %v13748_v12  ;;  %8293 = vmatpush1.bf16.msra.mxu1 %v8292_v34  ;;  %v11094_v10 = vadd.f32 %v3085_v46, %v10956_v0  ;;  %v11097_v2 = vadd.f32 %v3087_v30, %v10959_v50  ;;  %v1808_v48 = vpop.f32.mrb[154].mxu0  ;;  %v2065_v45 = vpop.f32.mrb[154].mxu1  ;;  %v8478_v0 = vld [vmem:[%s13698_s1 + $0x10] sm:$0xff]  ;;  %v11110_v50 = vsel %vm430_vm1, %v3973_v32, %v3974_v38 }
 0x236   : > { %8275 = vmatprep.subr.bf16.mxu0 %v8274_v16  ;;  %8295 = vmatprep.subr.bf16.mxu1 %v8294_v43  ;;  %v3100_v6 = vmax.f32 %v1808_v48, 0.0  ;;  %v3102_v55 = vmax.f32 %v2065_v45, 0.0  ;;  %v1810_v34 = vpop.f32.mrb[155].mxu0  ;;  %v2067_v57 = vpop.f32.mrb[155].mxu1  ;;  %v8280_v26 = vpack.c.bf16 %v10418_v22, %v10366_v56  ;;  %v8300_v17 = vpack.c.bf16 %v11054_v8, %v11039_v24 }
 0x237   : > { %7741 = vmatmul.mubr.msk.f32.gmra.mrb[4].mxu0 %vm539_vm2, %v8478_v0  ;;  %7773 = vmatmul.mubr.msk.f32.gmra.mrb[4].mxu1 %vm539_vm2, %v8478_v0  ;;  %v3101_v43 = vmax.f32 %v1810_v34, 0.0  ;;  %v3103_v39 = vmax.f32 %v2067_v57, 0.0  ;;  %v8282_v40 = vpack.c.bf16 %v13714_v35, %v11054_v8  ;;  %v8479_v8 = vld [vmem:[%s13698_s1 + $0x18] sm:$0xff]  ;;  %v8304_v12 = vpack.c.bf16 %v13714_v35, %v11066_v60 }
 0x238   : > { %4104 = vmatprep.mubr.f32.mxu0 %v13710_v37  ;;  %4361 = vmatprep.mubr.f32.mxu1 %v13710_v37  ;;  %v11121_v33 = vadd.f32 %v3100_v6, %v10975_v23  ;;  %v11124_v21 = vadd.f32 %v3102_v55, %v10978_v47  ;;  %v8302_v47 = vpack.c.bf16 %v13714_v35, %v11110_v50 }
 0x239   : > { %8277 = vmatpush1.bf16.msra.mxu0 %v8276_v9  ;;  %8297 = vmatpush1.bf16.msra.mxu1 %v8296_v41  ;;  %v11129_v29 = vadd.f32 %v3101_v43, %v10988_v44  ;;  %v11132_v56 = vadd.f32 %v3103_v39, %v10991_v4  ;;  %v1814_v22 = vpop.f32.mrb[156].mxu0  ;;  %v2071_v32 = vpop.f32.mrb[156].mxu1  ;;  %v11142_v44 = vld [vmem:[%s8662_s21 + $0xf0] sm:$0xff]  ;;  %v8284_v41 = vpack.c.bf16 %v13714_v35, %v11039_v24 }
 0x23a   : > { %8279 = vmatprep.subr.bf16.mxu0 %v8278_v5  ;;  %8299 = vmatprep.subr.bf16.mxu1 %v8298_v59  ;;  %v3116_v23 = vmax.f32 %v1814_v22, 0.0  ;;  %v3118_v38 = vmax.f32 %v2071_v32, 0.0  ;;  %v1816_v46 = vpop.f32.mrb[157].mxu0  ;;  %v2073_v30 = vpop.f32.mrb[157].mxu1  ;;  %v8306_v45 = vpack.c.bf16 %v11080_v62, %v10962_v1  ;;  %v8480_v1 = vld [vmem:[%s13698_s1 + $0x20] sm:$0xff] }
 0x23b   : > { %7742 = vmatmul.mubr.msk.f32.gmra.mrb[6].mxu0 %vm539_vm2, %v8479_v8  ;;  %7774 = vmatmul.mubr.msk.f32.gmra.mrb[6].mxu1 %vm539_vm2, %v8479_v8  ;;  %v3117_v4 = vmax.f32 %v1816_v46, 0.0  ;;  %v3119_v9 = vmax.f32 %v2073_v30, 0.0 }
 0x23c   : > { %4110 = vmatprep.mubr.f32.mxu0 %v13710_v37  ;;  %4367 = vmatprep.mubr.f32.mxu1 %v13710_v37  ;;  %v11151_v5 = vadd.f32 %v3116_v23, %v11015_v25  ;;  %v11154_v48 = vadd.f32 %v3118_v38, %v11018_v31  ;;  %v8326_v25 = vpack.c.bf16 %v11142_v44, %v11102_v58 }
 0x23d   : > { %8281 = vmatpush1.bf16.msra.mxu0 %v8280_v26  ;;  %8301 = vmatpush1.bf16.msra.mxu1 %v8300_v17  ;;  %v11159_v59 = vadd.f32 %v3117_v4, %v11021_v54  ;;  %v11162_v6 = vadd.f32 %v3119_v9, %v11024_v61  ;;  %v1820_v24 = vpop.f32.mrb[158].mxu0  ;;  %v2077_v55 = vpop.f32.mrb[158].mxu1 }
 0x23e   : > { %8283 = vmatprep.subr.bf16.mxu0 %v8282_v40  ;;  %8303 = vmatprep.subr.bf16.mxu1 %v8302_v47  ;;  %v3132_v31 = vmax.f32 %v1820_v24, 0.0  ;;  %v3134_v34 = vmax.f32 %v2077_v55, 0.0  ;;  %v1822_v57 = vpop.f32.mrb[159].mxu0  ;;  %v2079_v0 = vpop.f32.mrb[159].mxu1 }
 0x23f   : > { %7743 = vmatmul.mubr.msk.f32.gmra.mrb[8].mxu0 %vm539_vm2, %v8480_v1  ;;  %7775 = vmatmul.mubr.msk.f32.gmra.mrb[8].mxu1 %vm539_vm2, %v8480_v1  ;;  %v3133_v54 = vmax.f32 %v1822_v57, 0.0  ;;  %v3135_v61 = vmax.f32 %v2079_v0, 0.0 }
 0x240   : > { %4116 = vmatprep.mubr.f32.mxu0 %v13710_v37  ;;  %4373 = vmatprep.mubr.f32.mxu1 %v13710_v37  ;;  %v11174_v43 = vadd.f32 %v3132_v31, %v11044_v14  ;;  %v11177_v39 = vadd.f32 %v3134_v34, %v11047_v52  ;;  %v8481_v52 = vld [vmem:[%s13698_s1 + $0x28] sm:$0xff] }
 0x241   : > { %8285 = vmatpush1.bf16.msra.mxu0 %v8284_v41  ;;  %8305 = vmatpush1.bf16.msra.mxu1 %v8304_v12  ;;  %v11180_v26 = vadd.f32 %v3133_v54, %v11057_v18  ;;  %v11183_v17 = vadd.f32 %v3135_v61, %v11060_v15  ;;  %v1826_v40 = vpop.f32.mrb[160].mxu0  ;;  %v2083_v22 = vpop.f32.mrb[160].mxu1 }
 0x242   : > { %8307 = vmatprep.subr.bf16.mxu0 %v8306_v45  ;;  %8327 = vmatprep.subr.bf16.mxu1 %v8326_v25  ;;  %v3212_v32 = vmax.f32 %v1826_v40, 0.0  ;;  %v3214_v47 = vmax.f32 %v2083_v22, 0.0  ;;  %v1828_v23 = vpop.f32.mrb[161].mxu0  ;;  %v2085_v14 = vpop.f32.mrb[161].mxu1 }
 0x243   : > { %7744 = vmatmul.mubr.msk.f32.gmra.mrb[10].mxu0 %vm539_vm2, %v8481_v52  ;;  %7776 = vmatmul.mubr.msk.f32.gmra.mrb[10].mxu1 %vm539_vm2, %v8481_v52  ;;  %v3213_v18 = vmax.f32 %v1828_v23, 0.0  ;;  %v3215_v38 = vmax.f32 %v2085_v14, 0.0 }
 0x244   : > { %4122 = vmatprep.mubr.f32.mxu0 %v13710_v37  ;;  %4379 = vmatprep.mubr.f32.mxu1 %v13710_v37  ;;  %v11193_v15 = vadd.f32 %v3212_v32, %v11083_v42  ;;  %v11196_v46 = vadd.f32 %v3214_v47, %v11086_v36  ;;  %v8482_v42 = vld [vmem:[%s13698_s1 + $0x30] sm:$0xff] }
 0x245   : > { %v11199_v30 = vadd.f32 %v3213_v18, %v11094_v10  ;;  %v11202_v8 = vadd.f32 %v3215_v38, %v11097_v2  ;;  %v1832_v4 = vpop.f32.mrb[162].mxu0  ;;  %v2089_v9 = vpop.f32.mrb[162].mxu1 }
 0x246   : > { %v3228_v41 = vmax.f32 %v1832_v4, 0.0  ;;  %v3230_v12 = vmax.f32 %v2089_v9, 0.0  ;;  %v1834_v45 = vpop.f32.mrb[163].mxu0  ;;  %v2091_v24 = vpop.f32.mrb[163].mxu1 }
 0x247   : > { %7745 = vmatmul.mubr.msk.f32.gmra.mrb[12].mxu0 %vm539_vm2, %v8482_v42  ;;  %7777 = vmatmul.mubr.msk.f32.gmra.mrb[12].mxu1 %vm539_vm2, %v8482_v42  ;;  %v3229_v36 = vmax.f32 %v1834_v45, 0.0  ;;  %v3231_v10 = vmax.f32 %v2091_v24, 0.0 }
 0x248   : > { %4128 = vmatprep.mubr.f32.mxu0 %v13710_v37  ;;  %4385 = vmatprep.mubr.f32.mxu1 %v13710_v37  ;;  %v11212_v2 = vadd.f32 %v3228_v41, %v11121_v33  ;;  %v11215_v55 = vadd.f32 %v3230_v12, %v11124_v21  ;;  %v8483_v33 = vld [vmem:[%s13698_s1 + $0x38] sm:$0xff] }
 0x249   : > { %v11218_v25 = vadd.f32 %v3229_v36, %v11129_v29  ;;  %v11221_v31 = vadd.f32 %v3231_v10, %v11132_v56  ;;  %v1838_v34 = vpop.f32.mrb[164].mxu0  ;;  %v2095_v57 = vpop.f32.mrb[164].mxu1 }
 0x24a   : > { %v3244_v0 = vmax.f32 %v1838_v34, 0.0  ;;  %v3246_v1 = vmax.f32 %v2095_v57, 0.0  ;;  %v1840_v54 = vpop.f32.mrb[165].mxu0  ;;  %v2097_v61 = vpop.f32.mrb[165].mxu1 }
 0x24b   : > { %7746 = vmatmul.mubr.msk.f32.gmra.mrb[14].mxu0 %vm539_vm2, %v8483_v33  ;;  %7778 = vmatmul.mubr.msk.f32.gmra.mrb[14].mxu1 %vm539_vm2, %v8483_v33  ;;  %v3245_v21 = vmax.f32 %v1840_v54, 0.0  ;;  %v3247_v29 = vmax.f32 %v2097_v61, 0.0 }
 0x24c   : > { %4134 = vmatprep.mubr.f32.mxu0 %v13710_v37  ;;  %4391 = vmatprep.mubr.f32.mxu1 %v13710_v37  ;;  %v11231_v56 = vadd.f32 %v3244_v0, %v11151_v5  ;;  %v11234_v40 = vadd.f32 %v3246_v1, %v11154_v48  ;;  %v8484_v5 = vld [vmem:[%s13698_s1 + $0x40] sm:$0xff] }
 0x24d   : > { %v11237_v22 = vadd.f32 %v3245_v21, %v11159_v59  ;;  %v11240_v32 = vadd.f32 %v3247_v29, %v11162_v6  ;;  %v1844_v47 = vpop.f32.mrb[166].mxu0  ;;  %v2101_v23 = vpop.f32.mrb[166].mxu1 }
 0x24e   : > { %v3260_v14 = vmax.f32 %v1844_v47, 0.0  ;;  %v3262_v52 = vmax.f32 %v2101_v23, 0.0  ;;  %v1846_v18 = vpop.f32.mrb[167].mxu0  ;;  %v2103_v38 = vpop.f32.mrb[167].mxu1 }
 0x24f   : > { %7747 = vmatmul.mubr.msk.f32.gmra.mrb[16].mxu0 %vm539_vm2, %v8484_v5  ;;  %7779 = vmatmul.mubr.msk.f32.gmra.mrb[16].mxu1 %vm539_vm2, %v8484_v5  ;;  %v3261_v48 = vmax.f32 %v1846_v18, 0.0  ;;  %v3263_v59 = vmax.f32 %v2103_v38, 0.0 }
 0x250   : > { %4140 = vmatprep.mubr.f32.mxu0 %v13710_v37  ;;  %4397 = vmatprep.mubr.f32.mxu1 %v13710_v37  ;;  %v11250_v6 = vadd.f32 %v3260_v14, %v11174_v43  ;;  %v11253_v4 = vadd.f32 %v3262_v52, %v11177_v39  ;;  %v8485_v43 = vld [vmem:[%s13698_s1 + $0x48] sm:$0xff] }
 0x251   : > { %v11256_v9 = vadd.f32 %v3261_v48, %v11180_v26  ;;  %v11259_v41 = vadd.f32 %v3263_v59, %v11183_v17  ;;  %v1850_v12 = vpop.f32.mrb[168].mxu0  ;;  %v2107_v45 = vpop.f32.mrb[168].mxu1 }
 0x252   : > { %v3340_v24 = vmax.f32 %v1850_v12, 0.0  ;;  %v3342_v42 = vmax.f32 %v2107_v45, 0.0  ;;  %v1852_v36 = vpop.f32.mrb[169].mxu0  ;;  %v2109_v10 = vpop.f32.mrb[169].mxu1 }
 0x253   : > { %7748 = vmatmul.mubr.msk.f32.gmra.mrb[18].mxu0 %vm539_vm2, %v8485_v43  ;;  %7780 = vmatmul.mubr.msk.f32.gmra.mrb[18].mxu1 %vm539_vm2, %v8485_v43  ;;  %v3341_v39 = vmax.f32 %v1852_v36, 0.0  ;;  %v3343_v26 = vmax.f32 %v2109_v10, 0.0 }
 0x254   : > { %4146 = vmatprep.mubr.f32.mxu0 %v13710_v37  ;;  %4403 = vmatprep.mubr.f32.mxu1 %v13710_v37  ;;  %v11269_v17 = vadd.f32 %v3340_v24, %v11193_v15  ;;  %v11272_v34 = vadd.f32 %v3342_v42, %v11196_v46  ;;  %v8486_v15 = vld [vmem:[%s13698_s1 + $0x50] sm:$0xff] }
 0x255   : > { %v11275_v57 = vadd.f32 %v3341_v39, %v11199_v30  ;;  %v11278_v0 = vadd.f32 %v3343_v26, %v11202_v8  ;;  %v1856_v1 = vpop.f32.mrb[170].mxu0  ;;  %v2113_v54 = vpop.f32.mrb[170].mxu1 }
 0x256   : > { %v3356_v61 = vmax.f32 %v1856_v1, 0.0  ;;  %v3358_v33 = vmax.f32 %v2113_v54, 0.0  ;;  %v1858_v21 = vpop.f32.mrb[171].mxu0  ;;  %v2115_v29 = vpop.f32.mrb[171].mxu1 }
 0x257   : > { %7749 = vmatmul.mubr.msk.f32.gmra.mrb[20].mxu0 %vm539_vm2, %v8486_v15  ;;  %7781 = vmatmul.mubr.msk.f32.gmra.mrb[20].mxu1 %vm539_vm2, %v8486_v15  ;;  %v3357_v46 = vmax.f32 %v1858_v21, 0.0  ;;  %v3359_v30 = vmax.f32 %v2115_v29, 0.0 }
 0x258   : > { %4152 = vmatprep.mubr.f32.mxu0 %v13710_v37  ;;  %4409 = vmatprep.mubr.f32.mxu1 %v13710_v37  ;;  %v11288_v8 = vadd.f32 %v3356_v61, %v11212_v2  ;;  %v11291_v47 = vadd.f32 %v3358_v33, %v11215_v55  ;;  %v8487_v2 = vld [vmem:[%s13698_s1 + $0x58] sm:$0xff] }
 0x259   : > { %v11294_v23 = vadd.f32 %v3357_v46, %v11218_v25  ;;  %v11297_v14 = vadd.f32 %v3359_v30, %v11221_v31  ;;  %v1862_v52 = vpop.f32.mrb[172].mxu0  ;;  %v2119_v18 = vpop.f32.mrb[172].mxu1 }
 0x25a   : > { %v3372_v38 = vmax.f32 %v1862_v52, 0.0  ;;  %v3374_v5 = vmax.f32 %v2119_v18, 0.0  ;;  %v1864_v48 = vpop.f32.mrb[173].mxu0  ;;  %v2121_v59 = vpop.f32.mrb[173].mxu1 }
 0x25b   : > { %7750 = vmatmul.mubr.msk.f32.gmra.mrb[22].mxu0 %vm539_vm2, %v8487_v2  ;;  %7782 = vmatmul.mubr.msk.f32.gmra.mrb[22].mxu1 %vm539_vm2, %v8487_v2  ;;  %v3373_v55 = vmax.f32 %v1864_v48, 0.0  ;;  %v3375_v25 = vmax.f32 %v2121_v59, 0.0 }
 0x25c   : > { %4158 = vmatprep.mubr.f32.mxu0 %v13710_v37  ;;  %4415 = vmatprep.mubr.f32.mxu1 %v13710_v37  ;;  %v11307_v31 = vadd.f32 %v3372_v38, %v11231_v56  ;;  %v11310_v12 = vadd.f32 %v3374_v5, %v11234_v40  ;;  %v8488_v56 = vld [vmem:[%s13698_s1 + $0x60] sm:$0xff] }
 0x25d   : > { %v11313_v45 = vadd.f32 %v3373_v55, %v11237_v22  ;;  %v11316_v24 = vadd.f32 %v3375_v25, %v11240_v32  ;;  %v1868_v42 = vpop.f32.mrb[174].mxu0  ;;  %v2125_v36 = vpop.f32.mrb[174].mxu1 }
 0x25e   : > { %v3388_v10 = vmax.f32 %v1868_v42, 0.0  ;;  %v3390_v43 = vmax.f32 %v2125_v36, 0.0  ;;  %v1870_v39 = vpop.f32.mrb[175].mxu0  ;;  %v2127_v26 = vpop.f32.mrb[175].mxu1 }
 0x25f   : > { %7751 = vmatmul.mubr.msk.f32.gmra.mrb[24].mxu0 %vm539_vm2, %v8488_v56  ;;  %7783 = vmatmul.mubr.msk.f32.gmra.mrb[24].mxu1 %vm539_vm2, %v8488_v56  ;;  %v3389_v40 = vmax.f32 %v1870_v39, 0.0  ;;  %v3391_v22 = vmax.f32 %v2127_v26, 0.0 }
 0x260   : > { %4164 = vmatprep.mubr.f32.mxu0 %v13710_v37  ;;  %4421 = vmatprep.mubr.f32.mxu1 %v13710_v37  ;;  %v11326_v32 = vadd.f32 %v3388_v10, %v11250_v6  ;;  %v11329_v1 = vadd.f32 %v3390_v43, %v11253_v4  ;;  %v8489_v6 = vld [vmem:[%s13698_s1 + $0x68] sm:$0xff] }
 0x261   : > { %v11332_v54 = vadd.f32 %v3389_v40, %v11256_v9  ;;  %v11335_v61 = vadd.f32 %v3391_v22, %v11259_v41  ;;  %v1874_v33 = vpop.f32.mrb[176].mxu0  ;;  %v2131_v21 = vpop.f32.mrb[176].mxu1 }
 0x262   : > { %v3468_v29 = vmax.f32 %v1874_v33, 0.0  ;;  %v3470_v15 = vmax.f32 %v2131_v21, 0.0  ;;  %v1876_v46 = vpop.f32.mrb[177].mxu0  ;;  %v2133_v30 = vpop.f32.mrb[177].mxu1 }
 0x263   : > { %7752 = vmatmul.mubr.msk.f32.gmra.mrb[26].mxu0 %vm539_vm2, %v8489_v6  ;;  %7784 = vmatmul.mubr.msk.f32.gmra.mrb[26].mxu1 %vm539_vm2, %v8489_v6  ;;  %v3469_v4 = vmax.f32 %v1876_v46, 0.0  ;;  %v3471_v9 = vmax.f32 %v2133_v30, 0.0 }
 0x264   : > { %4170 = vmatprep.mubr.f32.mxu0 %v13710_v37  ;;  %4427 = vmatprep.mubr.f32.mxu1 %v13710_v37  ;;  %v11345_v41 = vadd.f32 %v3468_v29, %v11269_v17  ;;  %v11348_v52 = vadd.f32 %v3470_v15, %v11272_v34  ;;  %v8490_v17 = vld [vmem:[%s13698_s1 + $0x70] sm:$0xff] }
 0x265   : > { %v11351_v18 = vadd.f32 %v3469_v4, %v11275_v57  ;;  %v11354_v38 = vadd.f32 %v3471_v9, %v11278_v0  ;;  %v1880_v5 = vpop.f32.mrb[178].mxu0  ;;  %v2137_v48 = vpop.f32.mrb[178].mxu1 }
 0x266   : > { %v3484_v59 = vmax.f32 %v1880_v5, 0.0  ;;  %v3486_v2 = vmax.f32 %v2137_v48, 0.0  ;;  %v1882_v55 = vpop.f32.mrb[179].mxu0  ;;  %v2139_v25 = vpop.f32.mrb[179].mxu1 }
 0x267   : > { %7753 = vmatmul.mubr.msk.f32.gmra.mrb[28].mxu0 %vm539_vm2, %v8490_v17  ;;  %7785 = vmatmul.mubr.msk.f32.gmra.mrb[28].mxu1 %vm539_vm2, %v8490_v17  ;;  %v3485_v34 = vmax.f32 %v1882_v55, 0.0  ;;  %v3487_v57 = vmax.f32 %v2139_v25, 0.0 }
 0x268   : > { %4176 = vmatprep.mubr.f32.mxu0 %v13710_v37  ;;  %4433 = vmatprep.mubr.f32.mxu1 %v13710_v37  ;;  %v11364_v0 = vadd.f32 %v3484_v59, %v11288_v8  ;;  %v11367_v42 = vadd.f32 %v3486_v2, %v11291_v47  ;;  %v8491_v8 = vld [vmem:[%s13698_s1 + $0x78] sm:$0xff] }
 0x269   : > { %v11370_v36 = vadd.f32 %v3485_v34, %v11294_v23  ;;  %v11373_v10 = vadd.f32 %v3487_v57, %v11297_v14  ;;  %v1886_v43 = vpop.f32.mrb[180].mxu0  ;;  %v2143_v39 = vpop.f32.mrb[180].mxu1 }
 0x26a   : > { %v3500_v26 = vmax.f32 %v1886_v43, 0.0  ;;  %v3502_v56 = vmax.f32 %v2143_v39, 0.0  ;;  %v1888_v40 = vpop.f32.mrb[181].mxu0  ;;  %v2145_v22 = vpop.f32.mrb[181].mxu1 }
 0x26b   : > { %7754 = vmatmul.mubr.msk.f32.gmra.mrb[30].mxu0 %vm539_vm2, %v8491_v8  ;;  %7786 = vmatmul.mubr.msk.f32.gmra.mrb[30].mxu1 %vm539_vm2, %v8491_v8  ;;  %v3501_v47 = vmax.f32 %v1888_v40, 0.0  ;;  %v3503_v23 = vmax.f32 %v2145_v22, 0.0 }
 0x26c   : > { %4182 = vmatprep.mubr.f32.mxu0 %v13710_v37  ;;  %4439 = vmatprep.mubr.f32.mxu1 %v13710_v37  ;;  %v11383_v14 = vadd.f32 %v3500_v26, %v11307_v31  ;;  %v11386_v33 = vadd.f32 %v3502_v56, %v11310_v12  ;;  %v8492_v31 = vld [vmem:[%s13698_s1 + $0x80] sm:$0xff] }
 0x26d   : > { %v11389_v21 = vadd.f32 %v3501_v47, %v11313_v45  ;;  %v11392_v29 = vadd.f32 %v3503_v23, %v11316_v24  ;;  %v1892_v15 = vpop.f32.mrb[182].mxu0  ;;  %v2149_v46 = vpop.f32.mrb[182].mxu1 }
 0x26e   : > { %v3516_v30 = vmax.f32 %v1892_v15, 0.0  ;;  %v3518_v6 = vmax.f32 %v2149_v46, 0.0  ;;  %v1894_v4 = vpop.f32.mrb[183].mxu0  ;;  %v2151_v9 = vpop.f32.mrb[183].mxu1 }
 0x26f   : > { %7755 = vmatmul.mubr.msk.f32.gmra.mrb[32].mxu0 %vm539_vm2, %v8492_v31  ;;  %7787 = vmatmul.mubr.msk.f32.gmra.mrb[32].mxu1 %vm539_vm2, %v8492_v31  ;;  %v3517_v12 = vmax.f32 %v1894_v4, 0.0  ;;  %v3519_v45 = vmax.f32 %v2151_v9, 0.0 }
 0x270   : > { %4188 = vmatprep.mubr.f32.mxu0 %v13710_v37  ;;  %4445 = vmatprep.mubr.f32.mxu1 %v13710_v37  ;;  %v11402_v24 = vadd.f32 %v3516_v30, %v11326_v32  ;;  %v11405_v5 = vadd.f32 %v3518_v6, %v11329_v1  ;;  %v8493_v32 = vld [vmem:[%s13698_s1 + $0x88] sm:$0xff] }
 0x271   : > { %v11408_v48 = vadd.f32 %v3517_v12, %v11332_v54  ;;  %v11411_v59 = vadd.f32 %v3519_v45, %v11335_v61  ;;  %v1898_v2 = vpop.f32.mrb[184].mxu0  ;;  %v2155_v55 = vpop.f32.mrb[184].mxu1 }
 0x272   : > { %v3596_v25 = vmax.f32 %v1898_v2, 0.0  ;;  %v3598_v17 = vmax.f32 %v2155_v55, 0.0  ;;  %v1900_v34 = vpop.f32.mrb[185].mxu0  ;;  %v2157_v57 = vpop.f32.mrb[185].mxu1 }
 0x273   : > { %7756 = vmatmul.mubr.msk.f32.gmra.mrb[34].mxu0 %vm539_vm2, %v8493_v32  ;;  %7788 = vmatmul.mubr.msk.f32.gmra.mrb[34].mxu1 %vm539_vm2, %v8493_v32  ;;  %v3597_v1 = vmax.f32 %v1900_v34, 0.0  ;;  %v3599_v54 = vmax.f32 %v2157_v57, 0.0 }
 0x274   : > { %4194 = vmatprep.mubr.f32.mxu0 %v13710_v37  ;;  %4451 = vmatprep.mubr.f32.mxu1 %v13710_v37  ;;  %v11421_v61 = vadd.f32 %v3596_v25, %v11345_v41  ;;  %v11424_v43 = vadd.f32 %v3598_v17, %v11348_v52  ;;  %v8494_v41 = vld [vmem:[%s13698_s1 + $0x90] sm:$0xff] }
 0x275   : > { %v1904_v39 = vpop.f32.mrb[186].mxu0  ;;  %v2161_v26 = vpop.f32.mrb[186].mxu1  ;;  %v11427_v56 = vadd.f32 %v3597_v1, %v11351_v18  ;;  %v11430_v40 = vadd.f32 %v3599_v54, %v11354_v38 }
 0x276   : > { %13749 = vst [vmem:[#allocation24_spill] sm:$0xff] %v11421_v61  ;;  %13750 = vst [vmem:[#allocation25_spill] sm:$0xff] %v11424_v43  ;;  %v3612_v22 = vmax.f32 %v1904_v39, 0.0  ;;  %v3614_v8 = vmax.f32 %v2161_v26, 0.0  ;;  %v1906_v47 = vpop.f32.mrb[187].mxu0  ;;  %v2163_v23 = vpop.f32.mrb[187].mxu1 }
 0x277   : > { %13751 = vst [vmem:[#allocation26_spill] sm:$0xff] %v11427_v56  ;;  %13752 = vst [vmem:[#allocation27_spill] sm:$0xff] %v11430_v40  ;;  %7757 = vmatmul.mubr.msk.f32.gmra.mrb[36].mxu0 %vm539_vm2, %v8494_v41  ;;  %7789 = vmatmul.mubr.msk.f32.gmra.mrb[36].mxu1 %vm539_vm2, %v8494_v41  ;;  %v3613_v52 = vmax.f32 %v1906_v47, 0.0  ;;  %v3615_v15 = vmax.f32 %v2163_v23, 0.0  ;;  %v8497_v41 = vld [vmem:[%s13698_s1 + $0xa8] sm:$0xff] }
 0x278   : > { %4200 = vmatprep.mubr.f32.mxu0 %v13710_v37  ;;  %4457 = vmatprep.mubr.f32.mxu1 %v13710_v37  ;;  %v11440_v18 = vadd.f32 %v3612_v22, %v11364_v0  ;;  %v11443_v38 = vadd.f32 %v3614_v8, %v11367_v42  ;;  %v8495_v0 = vld [vmem:[%s13698_s1 + $0x98] sm:$0xff] }
 0x279   : > { %v1910_v46 = vpop.f32.mrb[188].mxu0  ;;  %v2167_v30 = vpop.f32.mrb[188].mxu1  ;;  %v11446_v6 = vadd.f32 %v3613_v52, %v11370_v36  ;;  %v11449_v4 = vadd.f32 %v3615_v15, %v11373_v10  ;;  %v8498_v52 = vld [vmem:[%s13698_s1 + $0xb0] sm:$0xff] }
 0x27a   : > { %13753 = vst [vmem:[#allocation28_spill] sm:$0xff] %v11440_v18  ;;  %13754 = vst [vmem:[#allocation29_spill] sm:$0xff] %v11443_v38  ;;  %v3628_v9 = vmax.f32 %v1910_v46, 0.0  ;;  %v3630_v31 = vmax.f32 %v2167_v30, 0.0  ;;  %v1912_v12 = vpop.f32.mrb[189].mxu0  ;;  %v2169_v45 = vpop.f32.mrb[189].mxu1 }
 0x27b   : > { %13755 = vst [vmem:[#allocation30_spill] sm:$0xff] %v11446_v6  ;;  %13756 = vst [vmem:[#allocation31_spill] sm:$0xff] %v11449_v4  ;;  %7758 = vmatmul.mubr.msk.f32.gmra.mrb[38].mxu0 %vm539_vm2, %v8495_v0  ;;  %7790 = vmatmul.mubr.msk.f32.gmra.mrb[38].mxu1 %vm539_vm2, %v8495_v0  ;;  %v3629_v42 = vmax.f32 %v1912_v12, 0.0  ;;  %v3631_v2 = vmax.f32 %v2169_v45, 0.0 }
 0x27c   : > { %4206 = vmatprep.mubr.f32.mxu0 %v13710_v37  ;;  %4463 = vmatprep.mubr.f32.mxu1 %v13710_v37  ;;  %v11459_v36 = vadd.f32 %v3628_v9, %v11383_v14  ;;  %v11462_v10 = vadd.f32 %v3630_v31, %v11386_v33  ;;  %v8496_v14 = vld [vmem:[%s13698_s1 + $0xa0] sm:$0xff]  ;;  %v8499_v31 = vld [vmem:[%s13698_s1 + $0xb8] sm:$0xff] }
 0x27d   : > { %v1916_v55 = vpop.f32.mrb[190].mxu0  ;;  %v2173_v25 = vpop.f32.mrb[190].mxu1  ;;  %v11465_v17 = vadd.f32 %v3629_v42, %v11389_v21  ;;  %v11468_v34 = vadd.f32 %v3631_v2, %v11392_v29  ;;  %v8500_v2 = vld [vmem:[%s13698_s1 + $0xc0] sm:$0xff] }
 0x27e   : > { %13757 = vst [vmem:[#allocation32_spill] sm:$0xff] %v11459_v36  ;;  %13758 = vst [vmem:[#allocation33_spill] sm:$0xff] %v11462_v10  ;;  %v3644_v57 = vmax.f32 %v1916_v55, 0.0  ;;  %v3646_v32 = vmax.f32 %v2173_v25, 0.0  ;;  %v1918_v1 = vpop.f32.mrb[191].mxu0  ;;  %v2175_v54 = vpop.f32.mrb[191].mxu1 }
 0x27f   : > { %13759 = vst [vmem:[#allocation34_spill] sm:$0xff] %v11465_v17  ;;  %13760 = vst [vmem:[#allocation35_spill] sm:$0xff] %v11468_v34  ;;  %7759 = vmatmul.mubr.msk.f32.gmra.mrb[40].mxu0 %vm539_vm2, %v8496_v14  ;;  %7791 = vmatmul.mubr.msk.f32.gmra.mrb[40].mxu1 %vm539_vm2, %v8496_v14  ;;  %v3645_v33 = vmax.f32 %v1918_v1, 0.0  ;;  %v3647_v39 = vmax.f32 %v2175_v54, 0.0 }
 0x280   : > { %4212 = vmatprep.mubr.f32.mxu0 %v13710_v37  ;;  %4469 = vmatprep.mubr.f32.mxu1 %v13710_v37  ;;  %v11478_v21 = vadd.f32 %v3644_v57, %v11402_v24  ;;  %v11481_v29 = vadd.f32 %v3646_v32, %v11405_v5 }
 0x281   : > { %v2244_v26 = vpop.f32.mrb[192].mxu0  ;;  %v2501_v22 = vpop.f32.mrb[192].mxu1  ;;  %v11484_v8 = vadd.f32 %v3645_v33, %v11408_v48  ;;  %v11487_v47 = vadd.f32 %v3647_v39, %v11411_v59 }
 0x282   : > { %13761 = vst [vmem:[#allocation36_spill] sm:$0xff] %v11478_v21  ;;  %13762 = vst [vmem:[#allocation37_spill] sm:$0xff] %v11481_v29  ;;  %v2246_v23 = vpop.f32.mrb[193].mxu0  ;;  %v2503_v24 = vpop.f32.mrb[193].mxu1  ;;  %v2704_v32 = vmax.f32 %v2244_v26, 0.0  ;;  %v2706_v1 = vmax.f32 %v2501_v22, 0.0 }
 0x283   : > { %13763 = vst [vmem:[#allocation38_spill] sm:$0xff] %v11484_v8  ;;  %13764 = vst [vmem:[#allocation39_spill] sm:$0xff] %v11487_v47  ;;  %7760 = vmatmul.mubr.msk.f32.gmra.mrb[42].mxu0 %vm539_vm2, %v8497_v41  ;;  %7792 = vmatmul.mubr.msk.f32.gmra.mrb[42].mxu1 %vm539_vm2, %v8497_v41  ;;  %v8501_v41 = vld [vmem:[%s13698_s1 + $0xc8] sm:$0xff] }
 0x284   : > { %4218 = vmatprep.mubr.f32.mxu0 %v13710_v37  ;;  %4475 = vmatprep.mubr.f32.mxu1 %v13710_v37 }
 0x285   : > { %v11496_v5 = vpop.f32.mrb[194].mxu0 }
 0x286   : > { %v11498_v48 = vpop.f32.mrb[194].mxu1  ;;  %v11500_v59 = vpop.f32.mrb[195].mxu0 }
 0x287   : > { %7761 = vmatmul.mubr.msk.f32.gmra.mrb[44].mxu0 %vm539_vm2, %v8498_v52  ;;  %7793 = vmatmul.mubr.msk.f32.gmra.mrb[44].mxu1 %vm539_vm2, %v8498_v52  ;;  %v11507_v15 = vpop.f32.mrb[195].mxu1  ;;  %v2705_v52 = vmax.f32 %v2246_v23, 0.0  ;;  %v2722_v23 = vmax.f32 %v11498_v48, 0.0 }
 0x288   : > { %4224 = vmatprep.mubr.f32.mxu0 %v13710_v37  ;;  %4481 = vmatprep.mubr.f32.mxu1 %v13710_v37 }
 0x289   : > { %v11511_v46 = vpop.f32.mrb[196].mxu0 }
 0x28a   : > { %v11513_v30 = vpop.f32.mrb[196].mxu1  ;;  %v11515_v9 = vpop.f32.mrb[197].mxu0 }
 0x28b   : > { %7762 = vmatmul.mubr.msk.f32.gmra.mrb[46].mxu0 %vm539_vm2, %v8499_v31  ;;  %7794 = vmatmul.mubr.msk.f32.gmra.mrb[46].mxu1 %vm539_vm2, %v8499_v31  ;;  %v11522_v12 = vpop.f32.mrb[197].mxu1  ;;  %v2707_v31 = vmax.f32 %v2503_v24, 0.0 }
 0x28c   : > { %4230 = vmatprep.mubr.f32.mxu0 %v13710_v37  ;;  %4487 = vmatprep.mubr.f32.mxu1 %v13710_v37 }
 0x28d   : > { %v11526_v45 = vpop.f32.mrb[198].mxu0 }
 0x28e   : > { %v11528_v0 = vpop.f32.mrb[198].mxu1  ;;  %v11530_v42 = vpop.f32.mrb[199].mxu0 }
 0x28f   : > { %7763 = vmatmul.mubr.msk.f32.gmra.mrb[48].mxu0 %vm539_vm2, %v8500_v2  ;;  %7795 = vmatmul.mubr.msk.f32.gmra.mrb[48].mxu1 %vm539_vm2, %v8500_v2  ;;  %v11537_v55 = vpop.f32.mrb[199].mxu1 }
 0x290   : > { %4236 = vmatprep.mubr.f32.mxu0 %v13710_v37  ;;  %4493 = vmatprep.mubr.f32.mxu1 %v13710_v37 }
 0x291   : > { %v2268_v25 = vpop.f32.mrb[200].mxu0 }
 0x292   : > { %v2525_v57 = vpop.f32.mrb[200].mxu1  ;;  %v2832_v54 = vmax.f32 %v2268_v25, 0.0  ;;  %v2270_v33 = vpop.f32.mrb[201].mxu0 }
 0x293   : > { %v2834_v14 = vmax.f32 %v2525_v57, 0.0  ;;  %v2527_v39 = vpop.f32.mrb[201].mxu1  ;;  %7764 = vmatmul.mubr.msk.f32.gmra.mrb[50].mxu0 %vm539_vm2, %v8501_v41  ;;  %7796 = vmatmul.mubr.msk.f32.gmra.mrb[50].mxu1 %vm539_vm2, %v8501_v41  ;;  %v2833_v2 = vmax.f32 %v2270_v33, 0.0  ;;  %v2720_v41 = vmax.f32 %v11496_v5, 0.0  ;;  %v2723_v5 = vmax.f32 %v11507_v15, 0.0 }
 0x294   : > { %v2835_v16 = vmax.f32 %v2527_v39, 0.0  ;;  %4242 = vmatprep.mubr.f32.mxu0 %v13710_v37  ;;  %4499 = vmatprep.mubr.f32.mxu1 %v13710_v37  ;;  %v11548_v26 = vadd.f32 %v2832_v54, %v2704_v32  ;;  %v8502_v32 = vld [vmem:[%s13698_s1 + $0xd0] sm:$0xff]  ;;  %v2736_v15 = vmax.f32 %v11511_v46, 0.0 }
 0x295   : > { %v11550_v22 = vadd.f32 %v2834_v14, %v2706_v1  ;;  %v11552_v25 = vadd.f32 %v2833_v2, %v2705_v52  ;;  %v2274_v47 = vpop.f32.mrb[202].mxu0  ;;  %v11576_v2 = vld [vmem:[%s8662_s21 + $0xe8] sm:$0xfe] }
 0x296   : > { %v11554_v57 = vadd.f32 %v2835_v16, %v2707_v31  ;;  %v2531_v8 = vpop.f32.mrb[202].mxu1  ;;  %v2848_v24 = vmax.f32 %v2274_v47, 0.0  ;;  %v2276_v39 = vpop.f32.mrb[203].mxu0  ;;  %v2721_v16 = vmax.f32 %v11500_v59, 0.0  ;;  %v3761_v59 = vld [vmem:[%s8662_s21 + $0x178] sm:$0x1] }
 0x297   : > { %v2850_v33 = vmax.f32 %v2531_v8, 0.0  ;;  %v2533_v29 = vpop.f32.mrb[203].mxu1  ;;  %7765 = vmatmul.mubr.msk.f32.gmra.mrb[52].mxu0 %vm539_vm2, %v8502_v32  ;;  %7797 = vmatmul.mubr.msk.f32.gmra.mrb[52].mxu1 %vm539_vm2, %v8502_v32  ;;  %v2849_v1 = vmax.f32 %v2276_v39, 0.0 }
 0x298   : > { %v2851_v48 = vmax.f32 %v2533_v29, 0.0  ;;  %4248 = vmatprep.mubr.f32.mxu0 %v13710_v37  ;;  %4505 = vmatprep.mubr.f32.mxu1 %v13710_v37  ;;  %v11567_v8 = vadd.f32 %v2848_v24, %v2720_v41  ;;  %v2738_v29 = vmax.f32 %v11513_v30, 0.0  ;;  %v2737_v24 = vmax.f32 %v11515_v9, 0.0 }
 0x299   : > { %v11569_v47 = vadd.f32 %v2850_v33, %v2722_v23  ;;  %v11571_v54 = vadd.f32 %v2849_v1, %v2721_v16  ;;  %v2280_v52 = vpop.f32.mrb[204].mxu0  ;;  %v8503_v23 = vld [vmem:[%s13698_s1 + $0xd8] sm:$0xff]  ;;  %v2739_v33 = vmax.f32 %v11522_v12, 0.0  ;;  %v3871_v9 = vrot.slane %v11576_v2, 1 }
 0x29a   : > { %v11573_v14 = vadd.f32 %v2851_v48, %v2723_v5  ;;  %v2537_v31 = vpop.f32.mrb[204].mxu1  ;;  %v2864_v39 = vmax.f32 %v2280_v52, 0.0  ;;  %v2282_v21 = vpop.f32.mrb[205].mxu0  ;;  %v2754_v12 = vmax.f32 %v11528_v0, 0.0  ;;  %v2753_v2 = vmax.f32 %v11530_v42, 0.0 }
 0x29b   : > { %v2866_v32 = vmax.f32 %v2537_v31, 0.0  ;;  %v2539_v41 = vpop.f32.mrb[205].mxu1  ;;  %7766 = vmatmul.mubr.msk.f32.gmra.mrb[54].mxu0 %vm539_vm2, %v8503_v23  ;;  %7798 = vmatmul.mubr.msk.f32.gmra.mrb[54].mxu1 %vm539_vm2, %v8503_v23  ;;  %v2865_v16 = vmax.f32 %v2282_v21, 0.0  ;;  %v3872_v23 = vrot.slane %v3761_v59, 1  ;;  %v2752_v21 = vmax.f32 %v11526_v45, 0.0 }
 0x29c   : > { %v2867_v46 = vmax.f32 %v2539_v41, 0.0  ;;  %4254 = vmatprep.mubr.f32.mxu0 %v13710_v37  ;;  %4511 = vmatprep.mubr.f32.mxu1 %v13710_v37  ;;  %v11590_v30 = vadd.f32 %v2864_v39, %v2736_v15  ;;  %v2755_v45 = vmax.f32 %v11537_v55, 0.0  ;;  %v3760_v55 = vld [vmem:[%s8662_s21 + $0x170] sm:$0x1] }
 0x29d   : > { %v11592_v5 = vadd.f32 %v2866_v32, %v2738_v29  ;;  %v11594_v1 = vadd.f32 %v2865_v16, %v2737_v24  ;;  %v2286_v52 = vpop.f32.mrb[206].mxu0  ;;  %v8504_v29 = vld [vmem:[%s13698_s1 + $0xe0] sm:$0xff]  ;;  %v3869_v17 = vrot.slane %v3760_v55, 1 }
 0x29e   : > { %v11596_v48 = vadd.f32 %v2867_v46, %v2739_v33  ;;  %v2543_v31 = vpop.f32.mrb[206].mxu1  ;;  %v2880_v41 = vmax.f32 %v2286_v52, 0.0  ;;  %v2288_v15 = vpop.f32.mrb[207].mxu0  ;;  %v11615_v33 = vld [vmem:[%s8662_s21 + $0xe0] sm:$0xfe] }
 0x29f   : > { %v2882_v34 = vmax.f32 %v2543_v31, 0.0  ;;  %v2545_v39 = vpop.f32.mrb[207].mxu1  ;;  %7767 = vmatmul.mubr.msk.f32.gmra.mrb[56].mxu0 %vm539_vm2, %v8504_v29  ;;  %7799 = vmatmul.mubr.msk.f32.gmra.mrb[56].mxu1 %vm539_vm2, %v8504_v29  ;;  %v2881_v0 = vmax.f32 %v2288_v15, 0.0  ;;  %v11623_v31 = vld [vmem:[%s8662_s21 + $0xf0] sm:$0xfe] }
 0x2a0   : > { %v2883_v59 = vmax.f32 %v2545_v39, 0.0  ;;  %4260 = vmatprep.mubr.f32.mxu0 %v13710_v37  ;;  %4517 = vmatprep.mubr.f32.mxu1 %v13710_v37  ;;  %v11610_v32 = vadd.f32 %v2880_v41, %v2752_v21 }
 0x2a1   : > { %v11612_v24 = vadd.f32 %v2882_v34, %v2754_v12  ;;  %v11617_v16 = vadd.f32 %v2881_v0, %v2753_v2  ;;  %v2292_v42 = vpop.f32.mrb[208].mxu0  ;;  %v8505_v34 = vld [vmem:[%s13698_s1 + $0xe8] sm:$0xff]  ;;  %v3762_v12 = vld [vmem:[%s8662_s21 + $0x180] sm:$0x1]  ;;  %v3747_v0 = vld [vmem:[%s8662_s21 + $0xf8] sm:$0xfe] }
 0x2a2   : > { %v11619_v46 = vadd.f32 %v2883_v59, %v2755_v45  ;;  %v2549_v52 = vpop.f32.mrb[208].mxu1  ;;  %v2960_v15 = vmax.f32 %v2292_v42, 0.0  ;;  %v2294_v21 = vpop.f32.mrb[209].mxu0  ;;  %v11634_v45 = vsel %vm321_vm0, %v3871_v9, %v3872_v23  ;;  %v3763_v59 = vld [vmem:[%s8662_s21 + $0x188] sm:$0x1]  ;;  %v11652_v23 = vld [vmem:[%s8662_s21 + $0xf8] sm:$0xff] }
 0x2a3   : > { %v2962_v39 = vmax.f32 %v2549_v52, 0.0  ;;  %v2551_v41 = vpop.f32.mrb[209].mxu1  ;;  %7768 = vmatmul.mubr.msk.f32.gmra.mrb[58].mxu0 %vm539_vm2, %v8505_v34  ;;  %7800 = vmatmul.mubr.msk.f32.gmra.mrb[58].mxu1 %vm539_vm2, %v8505_v34  ;;  %v2961_v29 = vmax.f32 %v2294_v21, 0.0  ;;  %v3868_v34 = vrot.slane %v11615_v33, 1  ;;  %v3878_v55 = vrot.slane %v3763_v59, 1 }
 0x2a4   : > { %v2963_v2 = vmax.f32 %v2551_v41, 0.0  ;;  %4266 = vmatprep.mubr.f32.mxu0 %v13710_v37  ;;  %4523 = vmatprep.mubr.f32.mxu1 %v13710_v37  ;;  %v11639_v42 = vadd.f32 %v2960_v15, %v11548_v26  ;;  %v3874_v26 = vrot.slane %v11623_v31, 1  ;;  %v3875_v15 = vrot.slane %v3762_v12, 1  ;;  %v8508_v12 = vld [vmem:[%s8662_s21 + $0xd8] sm:$0xff]  ;;  %v3780_v59 = vld [vmem:[%s8662_s21 + $0xe0] sm:$0xfc] }
 0x2a5   : > { %v11642_v52 = vadd.f32 %v2962_v39, %v11550_v22  ;;  %v11646_v21 = vadd.f32 %v2961_v29, %v11552_v25  ;;  %v2298_v10 = vpop.f32.mrb[210].mxu0  ;;  %v8506_v25 = vld [vmem:[%s13698_s1 + $0xf0] sm:$0xff] }
 0x2a6   : > { %v11649_v41 = vadd.f32 %v2963_v2, %v11554_v57  ;;  %v2555_v9 = vpop.f32.mrb[210].mxu1  ;;  %v2976_v22 = vmax.f32 %v2298_v10, 0.0  ;;  %v2300_v36 = vpop.f32.mrb[211].mxu0  ;;  %v3877_v57 = vrot.slane %v3747_v0, 1  ;;  %v8507_v10 = vld [vmem:[%s8662_s21 + $0xd0] sm:$0xff] }
 0x2a7   : > { %v2978_v39 = vmax.f32 %v2555_v9, 0.0  ;;  %v2557_v33 = vpop.f32.mrb[211].mxu1  ;;  %7769 = vmatmul.mubr.msk.f32.gmra.mrb[60].mxu0 %vm539_vm2, %v8506_v25  ;;  %7801 = vmatmul.mubr.msk.f32.gmra.mrb[60].mxu1 %vm539_vm2, %v8506_v25  ;;  %v2977_v31 = vmax.f32 %v2300_v36, 0.0  ;;  %v8308_v2 = vpack.c.bf16 %v8508_v12, %v8507_v10  ;;  %v3781_v25 = vld [vmem:[%s8662_s21 + $0xe8] sm:$0xfc] }
 0x2a8   : > { %v2979_v29 = vmax.f32 %v2557_v33, 0.0  ;;  %4272 = vmatprep.mubr.f32.mxu0 %v13710_v37  ;;  %4529 = vmatprep.mubr.f32.mxu1 %v13710_v37  ;;  %v11665_v9 = vadd.f32 %v2976_v22, %v11567_v8  ;;  %v3796_v33 = vld [vmem:[%s8662_s21 + $0x170] sm:$0x3]  ;;  %v3782_v12 = vld [vmem:[%s8662_s21 + $0xf0] sm:$0xfc] }
 0x2a9   : > { %v11668_v4 = vadd.f32 %v2978_v39, %v11569_v47  ;;  %v11678_v6 = vadd.f32 %v2977_v31, %v11571_v54  ;;  %v2304_v8 = vpop.f32.mrb[212].mxu0  ;;  %v8330_v47 = vpack.c.bf16 %v11634_v45, %v11652_v23  ;;  %v11686_v39 = vsel %vm321_vm0, %v3868_v34, %v3869_v17  ;;  %v3797_v36 = vld [vmem:[%s8662_s21 + $0x178] sm:$0x3]  ;;  %v3798_v34 = vld [vmem:[%s8662_s21 + $0x180] sm:$0x3] }
 0x2aa   : > { %v11681_v10 = vadd.f32 %v2979_v29, %v11573_v14  ;;  %v2561_v22 = vpop.f32.mrb[212].mxu1  ;;  %v2992_v0 = vmax.f32 %v2304_v8, 0.0  ;;  %v2306_v18 = vpop.f32.mrb[213].mxu0  ;;  %v8509_v54 = vld [vmem:[%s13698_s1 + $0xf8] sm:$0xff]  ;;  %v11696_v14 = vsel %vm321_vm0, %v3874_v26, %v3875_v15  ;;  %v11699_v17 = vsel %vm321_vm0, %v3877_v57, %v3878_v55 }
 0x2ab   : > { %v2994_v38 = vmax.f32 %v2561_v22, 0.0  ;;  %v2563_v40 = vpop.f32.mrb[213].mxu1  ;;  %7770 = vmatmul.mubr.msk.f32.gmra.mrb[62].mxu0 %vm539_vm2, %v8509_v54  ;;  %7802 = vmatmul.mubr.msk.f32.gmra.mrb[62].mxu1 %vm539_vm2, %v8509_v54  ;;  %v2993_v31 = vmax.f32 %v2306_v18, 0.0  ;;  %v3976_v8 = vrot.slane %v3780_v59, 2  ;;  %v3977_v22 = vrot.slane %v3796_v33, 2 }
 0x2ac   : > { %v2995_v29 = vmax.f32 %v2563_v40, 0.0  ;;  %4600 = vmatprep.mubr.f32.mxu0 %v13710_v37  ;;  %4857 = vmatprep.mubr.f32.mxu1 %v13710_v37  ;;  %v11705_v56 = vadd.f32 %v2992_v0, %v11590_v30  ;;  %v3979_v26 = vrot.slane %v3781_v25, 2  ;;  %v3980_v15 = vrot.slane %v3797_v36, 2 }
 0x2ad   : > { %v11708_v54 = vadd.f32 %v2994_v38, %v11592_v5  ;;  %v11711_v57 = vadd.f32 %v2993_v31, %v11594_v1  ;;  %v2310_v40 = vpop.f32.mrb[214].mxu0  ;;  %v3982_v43 = vrot.slane %v3782_v12, 2  ;;  %v3983_v61 = vrot.slane %v3798_v34, 2  ;;  %v8510_v38 = vld [vmem:[%s13698_s1] sm:$0xff]  ;;  %v3783_v34 = vld [vmem:[%s8662_s21 + $0xf8] sm:$0xfc] }
 0x2ae   : > { %v11714_v18 = vadd.f32 %v2995_v29, %v11596_v48  ;;  %v2567_v55 = vpop.f32.mrb[214].mxu1  ;;  %v3008_v59 = vmax.f32 %v2310_v40, 0.0  ;;  %v2312_v0 = vpop.f32.mrb[215].mxu0  ;;  %v8332_v5 = vpack.c.bf16 %v11686_v39, %v11142_v44  ;;  %v8314_v1 = vpack.c.bf16 %v11634_v45, %v11686_v39  ;;  %v3799_v31 = vld [vmem:[%s8662_s21 + $0x188] sm:$0x3] }
 0x2af   : > { %v3010_v30 = vmax.f32 %v2567_v55, 0.0  ;;  %v2569_v33 = vpop.f32.mrb[215].mxu1  ;;  %7803 = vmatmul.mubr.msk.f32.vlgmr.msra.gmra.mrb[64].mxu0 %vm539_vm2, %v8510_v38  ;;  %7835 = vmatmul.mubr.msk.f32.vlgmr.msra.gmra.mrb[64].mxu1 %vm539_vm2, %v8510_v38  ;;  %v3009_v48 = vmax.f32 %v2312_v0, 0.0  ;;  %v8334_v25 = vpack.c.bf16 %v11699_v17, %v11696_v14  ;;  %v11729_v12 = vsel %vm430_vm1, %v3976_v8, %v3977_v22  ;;  %v11770_v38 = vld [vmem:[%s8662_s21 + $0x100] sm:$0xff] }
 0x2b0   : > { %v3011_v36 = vmax.f32 %v2569_v33, 0.0  ;;  %8309 = vmatpush1.bf16.msra.mxu0 %v8308_v2  ;;  %4606 = vmatprep.mubr.f32.mxu0 %v13710_v37  ;;  %v11734_v29 = vadd.f32 %v3008_v59, %v11610_v32  ;;  %v13765_v2 = vpack.c.bf16 %v11102_v58, %v11080_v62  ;;  %v11744_v40 = vsel %vm430_vm1, %v3979_v26, %v3980_v15 }
 0x2b1   : > { %v11737_v44 = vadd.f32 %v3010_v30, %v11612_v24  ;;  %4863 = vmatprep.mubr.f32.mxu1 %v13710_v37  ;;  %v11747_v8 = vadd.f32 %v3009_v48, %v11617_v16  ;;  %v2316_v32 = vpop.f32.mrb[216].mxu0  ;;  %v13766_v24 = vpack.c.bf16 %v11009_v27, %v11102_v58  ;;  %v11756_v59 = vsel %vm430_vm1, %v3982_v43, %v3983_v61  ;;  %v8511_v16 = vld [vmem:[%s13698_s1 + $0x8] sm:$0xff] }
 0x2b2   : > { %8329 = vmatpush1.bf16.msra.mxu1 %v13765_v2  ;;  %v11750_v22 = vadd.f32 %v3011_v36, %v11619_v46  ;;  %v2573_v55 = vpop.f32.mrb[216].mxu1  ;;  %v3088_v30 = vmax.f32 %v2316_v32, 0.0  ;;  %v2318_v15 = vpop.f32.mrb[217].mxu0  ;;  %v3985_v46 = vrot.slane %v3783_v34, 2  ;;  %v3986_v58 = vrot.slane %v3799_v31, 2  ;;  %v11792_v2 = vld [vmem:[%s8662_s21 + $0x108] sm:$0xff] }
 0x2b3   : > { %8311 = vmatprep.subr.bf16.mxu0 %v13766_v24  ;;  %8331 = vmatprep.subr.bf16.mxu1 %v8330_v47  ;;  %v3090_v26 = vmax.f32 %v2573_v55, 0.0  ;;  %v2575_v0 = vpop.f32.mrb[217].mxu1  ;;  %v3089_v33 = vmax.f32 %v2318_v15, 0.0  ;;  %v8316_v61 = vpack.c.bf16 %v11686_v39, %v11009_v27  ;;  %v8336_v43 = vpack.c.bf16 %v11696_v14, %v11634_v45 }
 0x2b4   : > { %7804 = vmatmul.mubr.msk.f32.gmra.mrb[66].mxu0 %vm539_vm2, %v8511_v16  ;;  %7836 = vmatmul.mubr.msk.f32.gmra.mrb[66].mxu1 %vm539_vm2, %v8511_v16  ;;  %v3091_v47 = vmax.f32 %v2575_v0, 0.0  ;;  %v11773_v48 = vadd.f32 %v3088_v30, %v11639_v42  ;;  %v13767_v34 = vpack.c.bf16 %v11006_v3, %v11080_v62  ;;  %v8318_v31 = vpack.c.bf16 %v11729_v12, %v11110_v50 }
 0x2b5   : > { %4612 = vmatprep.mubr.f32.mxu0 %v13710_v37  ;;  %4869 = vmatprep.mubr.f32.mxu1 %v13710_v37  ;;  %v11776_v36 = vadd.f32 %v3090_v26, %v11642_v52  ;;  %v11784_v27 = vadd.f32 %v3089_v33, %v11646_v21  ;;  %v2322_v39 = vpop.f32.mrb[218].mxu0  ;;  %v8338_v52 = vpack.c.bf16 %v11756_v59, %v11744_v40  ;;  %v8512_v21 = vld [vmem:[%s13698_s1 + $0x10] sm:$0xff] }
 0x2b6   : > { %8313 = vmatpush1.bf16.msra.mxu0 %v13767_v34  ;;  %8333 = vmatpush1.bf16.msra.mxu1 %v8332_v5  ;;  %v11787_v45 = vadd.f32 %v3091_v47, %v11649_v41  ;;  %v2579_v42 = vpop.f32.mrb[218].mxu1  ;;  %v3104_v3 = vmax.f32 %v2322_v39, 0.0  ;;  %v2324_v5 = vpop.f32.mrb[219].mxu0  ;;  %v11800_v41 = vsel %vm430_vm1, %v3985_v46, %v3986_v58  ;;  %v8320_v24 = vpack.c.bf16 %v11110_v50, %v11066_v60 }
 0x2b7   : > { %8315 = vmatprep.subr.bf16.mxu0 %v8314_v1  ;;  %8335 = vmatprep.subr.bf16.mxu1 %v8334_v25  ;;  %v3106_v62 = vmax.f32 %v2579_v42, 0.0  ;;  %v2581_v32 = vpop.f32.mrb[219].mxu1  ;;  %v3105_v25 = vmax.f32 %v2324_v5, 0.0  ;;  %v8340_v30 = vpack.c.bf16 %v11744_v40, %v11729_v12  ;;  %v8322_v0 = vpack.c.bf16 %v13714_v35, %v11744_v40  ;;  %v8513_v40 = vld [vmem:[%s13698_s1 + $0x18] sm:$0xff] }
 0x2b8   : > { %7805 = vmatmul.mubr.msk.f32.gmra.mrb[68].mxu0 %vm539_vm2, %v8512_v21  ;;  %7837 = vmatmul.mubr.msk.f32.gmra.mrb[68].mxu1 %vm539_vm2, %v8512_v21  ;;  %v3107_v55 = vmax.f32 %v2581_v32, 0.0  ;;  %v11811_v26 = vadd.f32 %v3104_v3, %v11665_v9  ;;  %v8344_v34 = vpack.c.bf16 %v13714_v35, %v11756_v59  ;;  %v8346_v42 = vpack.c.bf16 %v11770_v38, %v11652_v23  ;;  %v8514_v23 = vld [vmem:[%s13698_s1 + $0x20] sm:$0xff] }
 0x2b9   : > { %4618 = vmatprep.mubr.f32.mxu0 %v13710_v37  ;;  %4875 = vmatprep.mubr.f32.mxu1 %v13710_v37  ;;  %v11814_v15 = vadd.f32 %v3106_v62, %v11668_v4  ;;  %v11819_v16 = vadd.f32 %v3105_v25, %v11678_v6  ;;  %v2328_v50 = vpop.f32.mrb[220].mxu0  ;;  %v8342_v4 = vpack.c.bf16 %v13714_v35, %v11800_v41  ;;  %v11832_v6 = vld [vmem:[%s8662_s21 + $0x110] sm:$0xff] }
 0x2ba   : > { %8317 = vmatpush1.bf16.msra.mxu0 %v8316_v61  ;;  %8337 = vmatpush1.bf16.msra.mxu1 %v8336_v43  ;;  %v11822_v60 = vadd.f32 %v3107_v55, %v11681_v10  ;;  %v2585_v46 = vpop.f32.mrb[220].mxu1  ;;  %v3120_v9 = vmax.f32 %v2328_v50, 0.0  ;;  %v2330_v33 = vpop.f32.mrb[221].mxu0  ;;  %v8324_v43 = vpack.c.bf16 %v13714_v35, %v11729_v12 }
 0x2bb   : > { %8319 = vmatprep.subr.bf16.mxu0 %v8318_v31  ;;  %8339 = vmatprep.subr.bf16.mxu1 %v8338_v52  ;;  %v3122_v58 = vmax.f32 %v2585_v46, 0.0  ;;  %v2587_v47 = vpop.f32.mrb[221].mxu1  ;;  %v3121_v10 = vmax.f32 %v2330_v33, 0.0 }
 0x2bc   : > { %7806 = vmatmul.mubr.msk.f32.gmra.mrb[70].mxu0 %vm539_vm2, %v8513_v40  ;;  %7838 = vmatmul.mubr.msk.f32.gmra.mrb[70].mxu1 %vm539_vm2, %v8513_v40  ;;  %v3123_v61 = vmax.f32 %v2587_v47, 0.0  ;;  %v11841_v31 = vadd.f32 %v3120_v9, %v11705_v56  ;;  %v8366_v56 = vpack.c.bf16 %v11832_v6, %v11792_v2 }
 0x2bd   : > { %4624 = vmatprep.mubr.f32.mxu0 %v13710_v37  ;;  %4881 = vmatprep.mubr.f32.mxu1 %v13710_v37  ;;  %v11844_v39 = vadd.f32 %v3122_v58, %v11708_v54  ;;  %v11849_v52 = vadd.f32 %v3121_v10, %v11711_v57  ;;  %v2334_v12 = vpop.f32.mrb[222].mxu0 }
 0x2be   : > { %8321 = vmatpush1.bf16.msra.mxu0 %v8320_v24  ;;  %8341 = vmatpush1.bf16.msra.mxu1 %v8340_v30  ;;  %v11852_v3 = vadd.f32 %v3123_v61, %v11714_v18  ;;  %v2591_v62 = vpop.f32.mrb[222].mxu1  ;;  %v3136_v54 = vmax.f32 %v2334_v12, 0.0  ;;  %v2336_v32 = vpop.f32.mrb[223].mxu0 }
 0x2bf   : > { %8323 = vmatprep.subr.bf16.mxu0 %v8322_v0  ;;  %8343 = vmatprep.subr.bf16.mxu1 %v8342_v4  ;;  %v3138_v5 = vmax.f32 %v2591_v62, 0.0  ;;  %v2593_v21 = vpop.f32.mrb[223].mxu1  ;;  %v3137_v57 = vmax.f32 %v2336_v32, 0.0 }
 0x2c0   : > { %7807 = vmatmul.mubr.msk.f32.gmra.mrb[72].mxu0 %vm539_vm2, %v8514_v23  ;;  %7839 = vmatmul.mubr.msk.f32.gmra.mrb[72].mxu1 %vm539_vm2, %v8514_v23  ;;  %v3139_v18 = vmax.f32 %v2593_v21, 0.0  ;;  %v11864_v25 = vadd.f32 %v3136_v54, %v11734_v29 }
 0x2c1   : > { %4630 = vmatprep.mubr.f32.mxu0 %v13710_v37  ;;  %4887 = vmatprep.mubr.f32.mxu1 %v13710_v37  ;;  %v11867_v55 = vadd.f32 %v3138_v5, %v11737_v44  ;;  %v11870_v24 = vadd.f32 %v3137_v57, %v11747_v8  ;;  %v2340_v0 = vpop.f32.mrb[224].mxu0  ;;  %v8515_v44 = vld [vmem:[%s13698_s1 + $0x28] sm:$0xff] }
 0x2c2   : > { %8325 = vmatpush1.bf16.msra.mxu0 %v8324_v43  ;;  %8345 = vmatpush1.bf16.msra.mxu1 %v8344_v34  ;;  %v11873_v30 = vadd.f32 %v3139_v18, %v11750_v22  ;;  %v2597_v50 = vpop.f32.mrb[224].mxu1  ;;  %v3216_v46 = vmax.f32 %v2340_v0, 0.0  ;;  %v2342_v9 = vpop.f32.mrb[225].mxu0 }
 0x2c3   : > { %8347 = vmatprep.subr.bf16.mxu0 %v8346_v42  ;;  %8367 = vmatprep.subr.bf16.mxu1 %v8366_v56  ;;  %v3218_v4 = vmax.f32 %v2597_v50, 0.0  ;;  %v2599_v29 = vpop.f32.mrb[225].mxu1  ;;  %v3217_v8 = vmax.f32 %v2342_v9, 0.0 }
 0x2c4   : > { %7808 = vmatmul.mubr.msk.f32.gmra.mrb[74].mxu0 %vm539_vm2, %v8515_v44  ;;  %7840 = vmatmul.mubr.msk.f32.gmra.mrb[74].mxu1 %vm539_vm2, %v8515_v44  ;;  %v3219_v58 = vmax.f32 %v2599_v29, 0.0  ;;  %v11883_v22 = vadd.f32 %v3216_v46, %v11773_v48  ;;  %v8516_v48 = vld [vmem:[%s13698_s1 + $0x30] sm:$0xff] }
 0x2c5   : > { %4636 = vmatprep.mubr.f32.mxu0 %v13710_v37  ;;  %4893 = vmatprep.mubr.f32.mxu1 %v13710_v37  ;;  %v11886_v33 = vadd.f32 %v3218_v4, %v11776_v36  ;;  %v11889_v47 = vadd.f32 %v3217_v8, %v11784_v27  ;;  %v2346_v10 = vpop.f32.mrb[226].mxu0 }
 0x2c6   : > { %v11892_v40 = vadd.f32 %v3219_v58, %v11787_v45  ;;  %v2603_v61 = vpop.f32.mrb[226].mxu1  ;;  %v3232_v43 = vmax.f32 %v2346_v10, 0.0  ;;  %v2348_v42 = vpop.f32.mrb[227].mxu0 }
 0x2c7   : > { %v3234_v34 = vmax.f32 %v2603_v61, 0.0  ;;  %v2605_v12 = vpop.f32.mrb[227].mxu1  ;;  %v3233_v36 = vmax.f32 %v2348_v42, 0.0 }
 0x2c8   : > { %7809 = vmatmul.mubr.msk.f32.gmra.mrb[76].mxu0 %vm539_vm2, %v8516_v48  ;;  %7841 = vmatmul.mubr.msk.f32.gmra.mrb[76].mxu1 %vm539_vm2, %v8516_v48  ;;  %v3235_v27 = vmax.f32 %v2605_v12, 0.0  ;;  %v11902_v45 = vadd.f32 %v3232_v43, %v11811_v26  ;;  %v8517_v26 = vld [vmem:[%s13698_s1 + $0x38] sm:$0xff] }
 0x2c9   : > { %4642 = vmatprep.mubr.f32.mxu0 %v13710_v37  ;;  %4899 = vmatprep.mubr.f32.mxu1 %v13710_v37  ;;  %v11905_v62 = vadd.f32 %v3234_v34, %v11814_v15  ;;  %v11908_v56 = vadd.f32 %v3233_v36, %v11819_v16  ;;  %v2352_v5 = vpop.f32.mrb[228].mxu0 }
 0x2ca   : > { %v11911_v54 = vadd.f32 %v3235_v27, %v11822_v60  ;;  %v2609_v32 = vpop.f32.mrb[228].mxu1  ;;  %v3248_v21 = vmax.f32 %v2352_v5, 0.0  ;;  %v2354_v57 = vpop.f32.mrb[229].mxu0 }
 0x2cb   : > { %v3250_v23 = vmax.f32 %v2609_v32, 0.0  ;;  %v2611_v18 = vpop.f32.mrb[229].mxu1  ;;  %v3249_v15 = vmax.f32 %v2354_v57, 0.0 }
 0x2cc   : > { %7810 = vmatmul.mubr.msk.f32.gmra.mrb[78].mxu0 %vm539_vm2, %v8517_v26  ;;  %7842 = vmatmul.mubr.msk.f32.gmra.mrb[78].mxu1 %vm539_vm2, %v8517_v26  ;;  %v3251_v16 = vmax.f32 %v2611_v18, 0.0  ;;  %v11921_v60 = vadd.f32 %v3248_v21, %v11841_v31  ;;  %v8518_v31 = vld [vmem:[%s13698_s1 + $0x40] sm:$0xff] }
 0x2cd   : > { %4648 = vmatprep.mubr.f32.mxu0 %v13710_v37  ;;  %4905 = vmatprep.mubr.f32.mxu1 %v13710_v37  ;;  %v11924_v0 = vadd.f32 %v3250_v23, %v11844_v39  ;;  %v11927_v50 = vadd.f32 %v3249_v15, %v11849_v52  ;;  %v2358_v4 = vpop.f32.mrb[230].mxu0 }
 0x2ce   : > { %v11930_v46 = vadd.f32 %v3251_v16, %v11852_v3  ;;  %v2615_v9 = vpop.f32.mrb[230].mxu1  ;;  %v3264_v29 = vmax.f32 %v2358_v4, 0.0  ;;  %v2360_v8 = vpop.f32.mrb[231].mxu0 }
 0x2cf   : > { %v3266_v44 = vmax.f32 %v2615_v9, 0.0  ;;  %v2617_v58 = vpop.f32.mrb[231].mxu1  ;;  %v3265_v39 = vmax.f32 %v2360_v8, 0.0 }
 0x2d0   : > { %7811 = vmatmul.mubr.msk.f32.gmra.mrb[80].mxu0 %vm539_vm2, %v8518_v31  ;;  %7843 = vmatmul.mubr.msk.f32.gmra.mrb[80].mxu1 %vm539_vm2, %v8518_v31  ;;  %v3267_v52 = vmax.f32 %v2617_v58, 0.0  ;;  %v11940_v3 = vadd.f32 %v3264_v29, %v11864_v25  ;;  %v8519_v25 = vld [vmem:[%s13698_s1 + $0x48] sm:$0xff] }
 0x2d1   : > { %4654 = vmatprep.mubr.f32.mxu0 %v13710_v37  ;;  %4911 = vmatprep.mubr.f32.mxu1 %v13710_v37  ;;  %v11943_v10 = vadd.f32 %v3266_v44, %v11867_v55  ;;  %v11946_v61 = vadd.f32 %v3265_v39, %v11870_v24  ;;  %v2364_v34 = vpop.f32.mrb[232].mxu0 }
 0x2d2   : > { %v11949_v43 = vadd.f32 %v3267_v52, %v11873_v30  ;;  %v2621_v42 = vpop.f32.mrb[232].mxu1  ;;  %v3344_v12 = vmax.f32 %v2364_v34, 0.0  ;;  %v2366_v36 = vpop.f32.mrb[233].mxu0 }
 0x2d3   : > { %v3346_v48 = vmax.f32 %v2621_v42, 0.0  ;;  %v2623_v27 = vpop.f32.mrb[233].mxu1  ;;  %v3345_v55 = vmax.f32 %v2366_v36, 0.0 }
 0x2d4   : > { %7812 = vmatmul.mubr.msk.f32.gmra.mrb[82].mxu0 %vm539_vm2, %v8519_v25  ;;  %7844 = vmatmul.mubr.msk.f32.gmra.mrb[82].mxu1 %vm539_vm2, %v8519_v25  ;;  %v3347_v24 = vmax.f32 %v2623_v27, 0.0  ;;  %v11959_v30 = vadd.f32 %v3344_v12, %v11883_v22  ;;  %v8520_v22 = vld [vmem:[%s13698_s1 + $0x50] sm:$0xff] }
 0x2d5   : > { %4660 = vmatprep.mubr.f32.mxu0 %v13710_v37  ;;  %4917 = vmatprep.mubr.f32.mxu1 %v13710_v37  ;;  %v11962_v5 = vadd.f32 %v3346_v48, %v11886_v33  ;;  %v11965_v32 = vadd.f32 %v3345_v55, %v11889_v47  ;;  %v2370_v23 = vpop.f32.mrb[234].mxu0 }
 0x2d6   : > { %v11968_v21 = vadd.f32 %v3347_v24, %v11892_v40  ;;  %v2627_v57 = vpop.f32.mrb[234].mxu1  ;;  %v3360_v18 = vmax.f32 %v2370_v23, 0.0  ;;  %v2372_v15 = vpop.f32.mrb[235].mxu0 }
 0x2d7   : > { %v3362_v26 = vmax.f32 %v2627_v57, 0.0  ;;  %v2629_v16 = vpop.f32.mrb[235].mxu1  ;;  %v3361_v33 = vmax.f32 %v2372_v15, 0.0 }
 0x2d8   : > { %7813 = vmatmul.mubr.msk.f32.gmra.mrb[84].mxu0 %vm539_vm2, %v8520_v22  ;;  %7845 = vmatmul.mubr.msk.f32.gmra.mrb[84].mxu1 %vm539_vm2, %v8520_v22  ;;  %v3363_v47 = vmax.f32 %v2629_v16, 0.0  ;;  %v11978_v40 = vadd.f32 %v3360_v18, %v11902_v45  ;;  %v8521_v45 = vld [vmem:[%s13698_s1 + $0x58] sm:$0xff] }
 0x2d9   : > { %4666 = vmatprep.mubr.f32.mxu0 %v13710_v37  ;;  %4923 = vmatprep.mubr.f32.mxu1 %v13710_v37  ;;  %v11981_v4 = vadd.f32 %v3362_v26, %v11905_v62  ;;  %v11984_v9 = vadd.f32 %v3361_v33, %v11908_v56  ;;  %v2376_v44 = vpop.f32.mrb[236].mxu0 }
 0x2da   : > { %v11987_v29 = vadd.f32 %v3363_v47, %v11911_v54  ;;  %v2633_v8 = vpop.f32.mrb[236].mxu1  ;;  %v3376_v58 = vmax.f32 %v2376_v44, 0.0  ;;  %v2378_v39 = vpop.f32.mrb[237].mxu0 }
 0x2db   : > { %v3378_v31 = vmax.f32 %v2633_v8, 0.0  ;;  %v2635_v52 = vpop.f32.mrb[237].mxu1  ;;  %v3377_v62 = vmax.f32 %v2378_v39, 0.0 }
 0x2dc   : > { %7814 = vmatmul.mubr.msk.f32.gmra.mrb[86].mxu0 %vm539_vm2, %v8521_v45  ;;  %7846 = vmatmul.mubr.msk.f32.gmra.mrb[86].mxu1 %vm539_vm2, %v8521_v45  ;;  %v3379_v56 = vmax.f32 %v2635_v52, 0.0  ;;  %v11997_v54 = vadd.f32 %v3376_v58, %v11921_v60  ;;  %v8522_v60 = vld [vmem:[%s13698_s1 + $0x60] sm:$0xff] }
 0x2dd   : > { %4672 = vmatprep.mubr.f32.mxu0 %v13710_v37  ;;  %4929 = vmatprep.mubr.f32.mxu1 %v13710_v37  ;;  %v12000_v34 = vadd.f32 %v3378_v31, %v11924_v0  ;;  %v12003_v42 = vadd.f32 %v3377_v62, %v11927_v50  ;;  %v2382_v48 = vpop.f32.mrb[238].mxu0 }
 0x2de   : > { %v12006_v12 = vadd.f32 %v3379_v56, %v11930_v46  ;;  %v2639_v36 = vpop.f32.mrb[238].mxu1  ;;  %v3392_v27 = vmax.f32 %v2382_v48, 0.0  ;;  %v2384_v55 = vpop.f32.mrb[239].mxu0 }
 0x2df   : > { %v3394_v25 = vmax.f32 %v2639_v36, 0.0  ;;  %v2641_v24 = vpop.f32.mrb[239].mxu1  ;;  %v3393_v0 = vmax.f32 %v2384_v55, 0.0 }
 0x2e0   : > { %7815 = vmatmul.mubr.msk.f32.gmra.mrb[88].mxu0 %vm539_vm2, %v8522_v60  ;;  %7847 = vmatmul.mubr.msk.f32.gmra.mrb[88].mxu1 %vm539_vm2, %v8522_v60  ;;  %v3395_v50 = vmax.f32 %v2641_v24, 0.0  ;;  %v12016_v46 = vadd.f32 %v3392_v27, %v11940_v3  ;;  %v8523_v3 = vld [vmem:[%s13698_s1 + $0x68] sm:$0xff] }
 0x2e1   : > { %4678 = vmatprep.mubr.f32.mxu0 %v13710_v37  ;;  %4935 = vmatprep.mubr.f32.mxu1 %v13710_v37  ;;  %v12019_v23 = vadd.f32 %v3394_v25, %v11943_v10  ;;  %v12022_v57 = vadd.f32 %v3393_v0, %v11946_v61  ;;  %v2388_v26 = vpop.f32.mrb[240].mxu0 }
 0x2e2   : > { %v12025_v18 = vadd.f32 %v3395_v50, %v11949_v43  ;;  %v2645_v15 = vpop.f32.mrb[240].mxu1  ;;  %v3472_v16 = vmax.f32 %v2388_v26, 0.0  ;;  %v2390_v33 = vpop.f32.mrb[241].mxu0 }
 0x2e3   : > { %v3474_v22 = vmax.f32 %v2645_v15, 0.0  ;;  %v2647_v47 = vpop.f32.mrb[241].mxu1  ;;  %v3473_v10 = vmax.f32 %v2390_v33, 0.0 }
 0x2e4   : > { %7816 = vmatmul.mubr.msk.f32.gmra.mrb[90].mxu0 %vm539_vm2, %v8523_v3  ;;  %7848 = vmatmul.mubr.msk.f32.gmra.mrb[90].mxu1 %vm539_vm2, %v8523_v3  ;;  %v3475_v61 = vmax.f32 %v2647_v47, 0.0  ;;  %v12035_v43 = vadd.f32 %v3472_v16, %v11959_v30  ;;  %v8524_v30 = vld [vmem:[%s13698_s1 + $0x70] sm:$0xff] }
 0x2e5   : > { %4684 = vmatprep.mubr.f32.mxu0 %v13710_v37  ;;  %4941 = vmatprep.mubr.f32.mxu1 %v13710_v37  ;;  %v12038_v44 = vadd.f32 %v3474_v22, %v11962_v5  ;;  %v12041_v8 = vadd.f32 %v3473_v10, %v11965_v32  ;;  %v2394_v31 = vpop.f32.mrb[242].mxu0 }
 0x2e6   : > { %v12044_v58 = vadd.f32 %v3475_v61, %v11968_v21  ;;  %v2651_v39 = vpop.f32.mrb[242].mxu1  ;;  %v3488_v52 = vmax.f32 %v2394_v31, 0.0  ;;  %v2396_v62 = vpop.f32.mrb[243].mxu0 }
 0x2e7   : > { %v3490_v45 = vmax.f32 %v2651_v39, 0.0  ;;  %v2653_v56 = vpop.f32.mrb[243].mxu1  ;;  %v3489_v5 = vmax.f32 %v2396_v62, 0.0 }
 0x2e8   : > { %7817 = vmatmul.mubr.msk.f32.gmra.mrb[92].mxu0 %vm539_vm2, %v8524_v30  ;;  %7849 = vmatmul.mubr.msk.f32.gmra.mrb[92].mxu1 %vm539_vm2, %v8524_v30  ;;  %v3491_v32 = vmax.f32 %v2653_v56, 0.0  ;;  %v12054_v21 = vadd.f32 %v3488_v52, %v11978_v40  ;;  %v8525_v40 = vld [vmem:[%s13698_s1 + $0x78] sm:$0xff] }
 0x2e9   : > { %4690 = vmatprep.mubr.f32.mxu0 %v13710_v37  ;;  %4947 = vmatprep.mubr.f32.mxu1 %v13710_v37  ;;  %v12057_v48 = vadd.f32 %v3490_v45, %v11981_v4  ;;  %v12060_v36 = vadd.f32 %v3489_v5, %v11984_v9  ;;  %v2400_v25 = vpop.f32.mrb[244].mxu0 }
 0x2ea   : > { %v12063_v27 = vadd.f32 %v3491_v32, %v11987_v29  ;;  %v2657_v55 = vpop.f32.mrb[244].mxu1  ;;  %v3504_v24 = vmax.f32 %v2400_v25, 0.0  ;;  %v2402_v0 = vpop.f32.mrb[245].mxu0 }
 0x2eb   : > { %v3506_v60 = vmax.f32 %v2657_v55, 0.0  ;;  %v2659_v50 = vpop.f32.mrb[245].mxu1  ;;  %v3505_v4 = vmax.f32 %v2402_v0, 0.0 }
 0x2ec   : > { %7818 = vmatmul.mubr.msk.f32.gmra.mrb[94].mxu0 %vm539_vm2, %v8525_v40  ;;  %7850 = vmatmul.mubr.msk.f32.gmra.mrb[94].mxu1 %vm539_vm2, %v8525_v40  ;;  %v3507_v9 = vmax.f32 %v2659_v50, 0.0  ;;  %v12073_v29 = vadd.f32 %v3504_v24, %v11997_v54  ;;  %v8526_v54 = vld [vmem:[%s13698_s1 + $0x80] sm:$0xff] }
 0x2ed   : > { %4696 = vmatprep.mubr.f32.mxu0 %v13710_v37  ;;  %4953 = vmatprep.mubr.f32.mxu1 %v13710_v37  ;;  %v12076_v26 = vadd.f32 %v3506_v60, %v12000_v34  ;;  %v12079_v15 = vadd.f32 %v3505_v4, %v12003_v42  ;;  %v2406_v22 = vpop.f32.mrb[246].mxu0 }
 0x2ee   : > { %v12082_v16 = vadd.f32 %v3507_v9, %v12006_v12  ;;  %v2663_v33 = vpop.f32.mrb[246].mxu1  ;;  %v3520_v47 = vmax.f32 %v2406_v22, 0.0  ;;  %v2408_v10 = vpop.f32.mrb[247].mxu0 }
 0x2ef   : > { %v3522_v3 = vmax.f32 %v2663_v33, 0.0  ;;  %v2665_v61 = vpop.f32.mrb[247].mxu1  ;;  %v3521_v34 = vmax.f32 %v2408_v10, 0.0 }
 0x2f0   : > { %7819 = vmatmul.mubr.msk.f32.gmra.mrb[96].mxu0 %vm539_vm2, %v8526_v54  ;;  %7851 = vmatmul.mubr.msk.f32.gmra.mrb[96].mxu1 %vm539_vm2, %v8526_v54  ;;  %v3523_v42 = vmax.f32 %v2665_v61, 0.0  ;;  %v12092_v12 = vadd.f32 %v3520_v47, %v12016_v46  ;;  %v8527_v46 = vld [vmem:[%s13698_s1 + $0x88] sm:$0xff] }
 0x2f1   : > { %4702 = vmatprep.mubr.f32.mxu0 %v13710_v37  ;;  %4959 = vmatprep.mubr.f32.mxu1 %v13710_v37  ;;  %v12095_v31 = vadd.f32 %v3522_v3, %v12019_v23  ;;  %v12098_v39 = vadd.f32 %v3521_v34, %v12022_v57  ;;  %v2412_v45 = vpop.f32.mrb[248].mxu0 }
 0x2f2   : > { %v12101_v52 = vadd.f32 %v3523_v42, %v12025_v18  ;;  %v2669_v62 = vpop.f32.mrb[248].mxu1  ;;  %v3600_v56 = vmax.f32 %v2412_v45, 0.0  ;;  %v2414_v5 = vpop.f32.mrb[249].mxu0 }
 0x2f3   : > { %v3602_v30 = vmax.f32 %v2669_v62, 0.0  ;;  %v2671_v32 = vpop.f32.mrb[249].mxu1  ;;  %v3601_v23 = vmax.f32 %v2414_v5, 0.0 }
 0x2f4   : > { %7820 = vmatmul.mubr.msk.f32.gmra.mrb[98].mxu0 %vm539_vm2, %v8527_v46  ;;  %7852 = vmatmul.mubr.msk.f32.gmra.mrb[98].mxu1 %vm539_vm2, %v8527_v46  ;;  %v3603_v57 = vmax.f32 %v2671_v32, 0.0  ;;  %v12111_v18 = vadd.f32 %v3600_v56, %v12035_v43  ;;  %v8528_v43 = vld [vmem:[%s13698_s1 + $0x90] sm:$0xff] }
 0x2f5   : > { %4708 = vmatprep.mubr.f32.mxu0 %v13710_v37  ;;  %4965 = vmatprep.mubr.f32.mxu1 %v13710_v37  ;;  %v12114_v25 = vadd.f32 %v3602_v30, %v12038_v44  ;;  %v2418_v55 = vpop.f32.mrb[250].mxu0  ;;  %v12117_v60 = vadd.f32 %v3601_v23, %v12041_v8 }
 0x2f6   : > { %v2675_v24 = vpop.f32.mrb[250].mxu1  ;;  %v12120_v0 = vadd.f32 %v3603_v57, %v12044_v58  ;;  %v3616_v50 = vmax.f32 %v2418_v55, 0.0  ;;  %v2420_v4 = vpop.f32.mrb[251].mxu0 }
 0x2f7   : > { %v3618_v40 = vmax.f32 %v2675_v24, 0.0  ;;  %v2677_v9 = vpop.f32.mrb[251].mxu1  ;;  %v3617_v44 = vmax.f32 %v2420_v4, 0.0 }
 0x2f8   : > { %7821 = vmatmul.mubr.msk.f32.gmra.mrb[100].mxu0 %vm539_vm2, %v8528_v43  ;;  %7853 = vmatmul.mubr.msk.f32.gmra.mrb[100].mxu1 %vm539_vm2, %v8528_v43  ;;  %v3619_v22 = vmax.f32 %v2677_v9, 0.0  ;;  %v12130_v8 = vadd.f32 %v3616_v50, %v12054_v21  ;;  %v8529_v21 = vld [vmem:[%s13698_s1 + $0x98] sm:$0xff] }
 0x2f9   : > { %4714 = vmatprep.mubr.f32.mxu0 %v13710_v37  ;;  %4971 = vmatprep.mubr.f32.mxu1 %v13710_v37  ;;  %v12133_v58 = vadd.f32 %v3618_v40, %v12057_v48  ;;  %v2424_v33 = vpop.f32.mrb[252].mxu0  ;;  %v12136_v3 = vadd.f32 %v3617_v44, %v12060_v36 }
 0x2fa   : > { %v2681_v47 = vpop.f32.mrb[252].mxu1  ;;  %v12139_v10 = vadd.f32 %v3619_v22, %v12063_v27  ;;  %v3632_v61 = vmax.f32 %v2424_v33, 0.0  ;;  %v2426_v34 = vpop.f32.mrb[253].mxu0 }
 0x2fb   : > { %v3634_v54 = vmax.f32 %v2681_v47, 0.0  ;;  %v2683_v42 = vpop.f32.mrb[253].mxu1  ;;  %v3633_v48 = vmax.f32 %v2426_v34, 0.0 }
 0x2fc   : > { %13768 = vst [vmem:[#allocation40_spill] sm:$0xff] %v12139_v10  ;;  %7822 = vmatmul.mubr.msk.f32.gmra.mrb[102].mxu0 %vm539_vm2, %v8529_v21  ;;  %7854 = vmatmul.mubr.msk.f32.gmra.mrb[102].mxu1 %vm539_vm2, %v8529_v21  ;;  %v3635_v45 = vmax.f32 %v2683_v42, 0.0  ;;  %v12149_v36 = vadd.f32 %v3632_v61, %v12073_v29  ;;  %v8530_v29 = vld [vmem:[%s13698_s1 + $0xa0] sm:$0xff] }
 0x2fd   : > { %4720 = vmatprep.mubr.f32.mxu0 %v13710_v37  ;;  %4977 = vmatprep.mubr.f32.mxu1 %v13710_v37  ;;  %v12152_v27 = vadd.f32 %v3634_v54, %v12076_v26  ;;  %v2430_v62 = vpop.f32.mrb[254].mxu0  ;;  %v12155_v30 = vadd.f32 %v3633_v48, %v12079_v15 }
 0x2fe   : > { %13769 = vst [vmem:[#allocation41_spill] sm:$0xff] %v12149_v36  ;;  %v2687_v56 = vpop.f32.mrb[254].mxu1  ;;  %v12158_v5 = vadd.f32 %v3635_v45, %v12082_v16  ;;  %v3648_v32 = vmax.f32 %v2430_v62, 0.0  ;;  %v2432_v23 = vpop.f32.mrb[255].mxu0 }
 0x2ff   : > { %13770 = vst [vmem:[#allocation42_spill] sm:$0xff] %v12152_v27  ;;  %13771 = vst [vmem:[#allocation43_spill] sm:$0xff] %v12155_v30  ;;  %v3650_v46 = vmax.f32 %v2687_v56, 0.0  ;;  %v2689_v57 = vpop.f32.mrb[255].mxu1  ;;  %v3649_v26 = vmax.f32 %v2432_v23, 0.0 }
 0x300   : > { %13772 = vst [vmem:[#allocation44_spill] sm:$0xff] %v12158_v5  ;;  %7823 = vmatmul.mubr.msk.f32.gmra.mrb[104].mxu0 %vm539_vm2, %v8530_v29  ;;  %7855 = vmatmul.mubr.msk.f32.gmra.mrb[104].mxu1 %vm539_vm2, %v8530_v29  ;;  %v3651_v55 = vmax.f32 %v2689_v57, 0.0  ;;  %v12168_v15 = vadd.f32 %v3648_v32, %v12092_v12  ;;  %v8531_v12 = vld [vmem:[%s13698_s1 + $0xa8] sm:$0xff] }
 0x301   : > { %4726 = vmatprep.mubr.f32.mxu0 %v13710_v37  ;;  %4983 = vmatprep.mubr.f32.mxu1 %v13710_v37  ;;  %v12171_v16 = vadd.f32 %v3650_v46, %v12095_v31  ;;  %v4088_v24 = vpop.f32.mrb[0].mxu0  ;;  %v12174_v40 = vadd.f32 %v3649_v26, %v12098_v39  ;;  %v13777_v46 = vld [vmem:[#allocation2_spill] sm:$0xff]  ;;  %v13778_v57 = vld [vmem:[#allocation3_spill] sm:$0xff] }
 0x302   : > { %13773 = vst [vmem:[#allocation45_spill] sm:$0xff] %v12168_v15  ;;  %v4345_v50 = vpop.f32.mrb[0].mxu1  ;;  %v12177_v4 = vadd.f32 %v3651_v55, %v12101_v52  ;;  %v6078_v9 = vmax.f32 %v4088_v24, 0.0  ;;  %v4090_v44 = vpop.f32.mrb[1].mxu0 }
 0x303   : > { %13774 = vst [vmem:[#allocation46_spill] sm:$0xff] %v12171_v16  ;;  %13775 = vst [vmem:[#allocation47_spill] sm:$0xff] %v12174_v40  ;;  %v6080_v43 = vmax.f32 %v4345_v50, 0.0  ;;  %v4347_v22 = vpop.f32.mrb[1].mxu1  ;;  %v6079_v31 = vmax.f32 %v4090_v44, 0.0  ;;  %v12367_v40 = vld [vmem:[%s8662_s21 + $0x118] sm:$0xff] }
 0x304   : > { %13776 = vst [vmem:[#allocation48_spill] sm:$0xff] %v12177_v4  ;;  %7824 = vmatmul.mubr.msk.f32.gmra.mrb[106].mxu0 %vm539_vm2, %v8531_v12  ;;  %7856 = vmatmul.mubr.msk.f32.gmra.mrb[106].mxu1 %vm539_vm2, %v8531_v12  ;;  %v6081_v33 = vmax.f32 %v4347_v22, 0.0  ;;  %v12187_v39 = vadd.f32 %v6078_v9, %v9983_v7  ;;  %v8532_v7 = vld [vmem:[%s13698_s1 + $0xb0] sm:$0xff]  ;;  %v13780_v22 = vld [vmem:[#allocation5_spill] sm:$0xff] }
 0x305   : > { %4732 = vmatprep.mubr.f32.mxu0 %v13710_v37  ;;  %4989 = vmatprep.mubr.f32.mxu1 %v13710_v37  ;;  %v12190_v52 = vadd.f32 %v6080_v43, %v9986_v28  ;;  %v12193_v54 = vadd.f32 %v6079_v31, %v9989_v63  ;;  %v13779_v43 = vld [vmem:[#allocation4_spill] sm:$0xff] }
 0x306   : > { %v4094_v47 = vpop.f32.mrb[2].mxu0  ;;  %v4351_v61 = vpop.f32.mrb[2].mxu1  ;;  %v12196_v34 = vadd.f32 %v6081_v33, %v9992_v51 }
 0x307   : > { %v6094_v42 = vmax.f32 %v4094_v47, 0.0  ;;  %v6096_v21 = vmax.f32 %v4351_v61, 0.0  ;;  %v4096_v48 = vpop.f32.mrb[3].mxu0  ;;  %v4353_v45 = vpop.f32.mrb[3].mxu1  ;;  %v13781_v47 = vld [vmem:[#allocation6_spill] sm:$0xff] }
 0x308   : > { %7825 = vmatmul.mubr.msk.f32.gmra.mrb[108].mxu0 %vm539_vm2, %v8532_v7  ;;  %7857 = vmatmul.mubr.msk.f32.gmra.mrb[108].mxu1 %vm539_vm2, %v8532_v7  ;;  %v6095_v28 = vmax.f32 %v4096_v48, 0.0  ;;  %v6097_v62 = vmax.f32 %v4353_v45, 0.0 }
 0x309   : > { %4738 = vmatprep.mubr.f32.mxu0 %v13710_v37  ;;  %4995 = vmatprep.mubr.f32.mxu1 %v13710_v37  ;;  %v12206_v63 = vadd.f32 %v6094_v42, %v10002_v49  ;;  %v12209_v51 = vadd.f32 %v6096_v21, %v10005_v20  ;;  %v8533_v49 = vld [vmem:[%s13698_s1 + $0xb8] sm:$0xff]  ;;  %v13782_v42 = vld [vmem:[#allocation7_spill] sm:$0xff] }
 0x30a   : > { %v4100_v56 = vpop.f32.mrb[4].mxu0  ;;  %v4357_v32 = vpop.f32.mrb[4].mxu1  ;;  %v12212_v23 = vadd.f32 %v6095_v28, %v13777_v46  ;;  %v12215_v29 = vadd.f32 %v6097_v62, %v13778_v57  ;;  %v8534_v62 = vld [vmem:[%s13698_s1 + $0xc0] sm:$0xff]  ;;  %v13783_v46 = vld [vmem:[#allocation8_spill] sm:$0xff] }
 0x30b   : > { %v6110_v26 = vmax.f32 %v4100_v56, 0.0  ;;  %v6112_v55 = vmax.f32 %v4357_v32, 0.0  ;;  %v4102_v24 = vpop.f32.mrb[5].mxu0  ;;  %v4359_v50 = vpop.f32.mrb[5].mxu1 }
 0x30c   : > { %7826 = vmatmul.mubr.msk.f32.gmra.mrb[110].mxu0 %vm539_vm2, %v8533_v49  ;;  %7858 = vmatmul.mubr.msk.f32.gmra.mrb[110].mxu1 %vm539_vm2, %v8533_v49  ;;  %v6111_v20 = vmax.f32 %v4102_v24, 0.0  ;;  %v6113_v9 = vmax.f32 %v4359_v50, 0.0  ;;  %v13785_v49 = vld [vmem:[#allocation10_spill] sm:$0xff] }
 0x30d   : > { %4744 = vmatprep.mubr.f32.mxu0 %v13710_v37  ;;  %5001 = vmatprep.mubr.f32.mxu1 %v13710_v37  ;;  %v12225_v44 = vadd.f32 %v6110_v26, %v13779_v43  ;;  %v12228_v12 = vadd.f32 %v6112_v55, %v13780_v22  ;;  %v13784_v26 = vld [vmem:[#allocation9_spill] sm:$0xff] }
 0x30e   : > { %v4106_v31 = vpop.f32.mrb[6].mxu0  ;;  %v4363_v33 = vpop.f32.mrb[6].mxu1  ;;  %v12231_v61 = vadd.f32 %v6111_v20, %v13781_v47  ;;  %v12234_v21 = vadd.f32 %v6113_v9, %v13782_v42  ;;  %v13786_v9 = vld [vmem:[#allocation11_spill] sm:$0xff] }
 0x30f   : > { %v6126_v48 = vmax.f32 %v4106_v31, 0.0  ;;  %v6128_v45 = vmax.f32 %v4363_v33, 0.0  ;;  %v4108_v7 = vpop.f32.mrb[7].mxu0  ;;  %v4365_v28 = vpop.f32.mrb[7].mxu1  ;;  %v8535_v42 = vld [vmem:[%s13698_s1 + $0xc8] sm:$0xff] }
 0x310   : > { %7827 = vmatmul.mubr.msk.f32.gmra.mrb[112].mxu0 %vm539_vm2, %v8534_v62  ;;  %7859 = vmatmul.mubr.msk.f32.gmra.mrb[112].mxu1 %vm539_vm2, %v8534_v62  ;;  %v6127_v56 = vmax.f32 %v4108_v7, 0.0  ;;  %v6129_v32 = vmax.f32 %v4365_v28, 0.0 }
 0x311   : > { %4750 = vmatprep.mubr.f32.mxu0 %v13710_v37  ;;  %5007 = vmatprep.mubr.f32.mxu1 %v13710_v37  ;;  %v12244_v57 = vadd.f32 %v6126_v48, %v13783_v46  ;;  %v12247_v55 = vadd.f32 %v6128_v45, %v13784_v26 }
 0x312   : > { %v4112_v24 = vpop.f32.mrb[8].mxu0  ;;  %v4369_v50 = vpop.f32.mrb[8].mxu1  ;;  %v12250_v20 = vadd.f32 %v6127_v56, %v13785_v49  ;;  %v12253_v43 = vadd.f32 %v6129_v32, %v13786_v9 }
 0x313   : > { %v6206_v22 = vmax.f32 %v4112_v24, 0.0  ;;  %v6208_v31 = vmax.f32 %v4369_v50, 0.0  ;;  %v4114_v33 = vpop.f32.mrb[9].mxu0  ;;  %v4371_v47 = vpop.f32.mrb[9].mxu1 }
 0x314   : > { %7828 = vmatmul.mubr.msk.f32.gmra.mrb[114].mxu0 %vm539_vm2, %v8535_v42  ;;  %7860 = vmatmul.mubr.msk.f32.gmra.mrb[114].mxu1 %vm539_vm2, %v8535_v42  ;;  %v6207_v48 = vmax.f32 %v4114_v33, 0.0  ;;  %v6209_v45 = vmax.f32 %v4371_v47, 0.0 }
 0x315   : > { %4756 = vmatprep.mubr.f32.mxu0 %v13710_v37  ;;  %5013 = vmatprep.mubr.f32.mxu1 %v13710_v37  ;;  %v12263_v7 = vadd.f32 %v6206_v22, %v12187_v39  ;;  %v12266_v28 = vadd.f32 %v6208_v31, %v12190_v52  ;;  %v8536_v39 = vld [vmem:[%s13698_s1 + $0xd0] sm:$0xff] }
 0x316   : > { %v12269_v62 = vadd.f32 %v6207_v48, %v12193_v54  ;;  %v12272_v56 = vadd.f32 %v6209_v45, %v12196_v34  ;;  %v4118_v32 = vpop.f32.mrb[10].mxu0  ;;  %v4375_v46 = vpop.f32.mrb[10].mxu1 }
 0x317   : > { %v6222_v26 = vmax.f32 %v4118_v32, 0.0  ;;  %v6224_v24 = vmax.f32 %v4375_v46, 0.0  ;;  %v4120_v50 = vpop.f32.mrb[11].mxu0  ;;  %v4377_v49 = vpop.f32.mrb[11].mxu1 }
 0x318   : > { %7829 = vmatmul.mubr.msk.f32.gmra.mrb[116].mxu0 %vm539_vm2, %v8536_v39  ;;  %7861 = vmatmul.mubr.msk.f32.gmra.mrb[116].mxu1 %vm539_vm2, %v8536_v39  ;;  %v6223_v52 = vmax.f32 %v4120_v50, 0.0  ;;  %v6225_v54 = vmax.f32 %v4377_v49, 0.0 }
 0x319   : > { %4762 = vmatprep.mubr.f32.mxu0 %v13710_v37  ;;  %5019 = vmatprep.mubr.f32.mxu1 %v13710_v37  ;;  %v12282_v34 = vadd.f32 %v6222_v26, %v12206_v63  ;;  %v12285_v9 = vadd.f32 %v6224_v24, %v12209_v51  ;;  %v8537_v63 = vld [vmem:[%s13698_s1 + $0xd8] sm:$0xff]  ;;  %v3748_v26 = vld [vmem:[%s8662_s21 + $0x100] sm:$0xfe]  ;;  %v3764_v24 = vld [vmem:[%s8662_s21 + $0x190] sm:$0x1] }
 0x31a   : > { %v12288_v22 = vadd.f32 %v6223_v52, %v12212_v23  ;;  %v12291_v31 = vadd.f32 %v6225_v54, %v12215_v29  ;;  %v4124_v33 = vpop.f32.mrb[12].mxu0  ;;  %v4381_v47 = vpop.f32.mrb[12].mxu1  ;;  %v3749_v54 = vld [vmem:[%s8662_s21 + $0x108] sm:$0xfe] }
 0x31b   : > { %v6238_v42 = vmax.f32 %v4124_v33, 0.0  ;;  %v6240_v48 = vmax.f32 %v4381_v47, 0.0  ;;  %v4126_v45 = vpop.f32.mrb[13].mxu0  ;;  %v4383_v32 = vpop.f32.mrb[13].mxu1  ;;  %v3765_v33 = vld [vmem:[%s8662_s21 + $0x198] sm:$0x1] }
 0x31c   : > { %7830 = vmatmul.mubr.msk.f32.gmra.mrb[118].mxu0 %vm539_vm2, %v8537_v63  ;;  %7862 = vmatmul.mubr.msk.f32.gmra.mrb[118].mxu1 %vm539_vm2, %v8537_v63  ;;  %v6239_v51 = vmax.f32 %v4126_v45, 0.0  ;;  %v6241_v23 = vmax.f32 %v4383_v32, 0.0 }
 0x31d   : > { %4768 = vmatprep.mubr.f32.mxu0 %v13710_v37  ;;  %5025 = vmatprep.mubr.f32.mxu1 %v13710_v37  ;;  %v12301_v29 = vadd.f32 %v6238_v42, %v12225_v44  ;;  %v12304_v46 = vadd.f32 %v6240_v48, %v12228_v12  ;;  %v8538_v12 = vld [vmem:[%s13698_s1 + $0xe0] sm:$0xff]  ;;  %v3880_v42 = vrot.slane %v3748_v26, 1  ;;  %v3881_v48 = vrot.slane %v3764_v24, 1  ;;  %v12336_v24 = vld [vmem:[%s8662_s21 + $0x110] sm:$0xfe] }
 0x31e   : > { %v12309_v50 = vadd.f32 %v6239_v51, %v12231_v61  ;;  %v12312_v49 = vadd.f32 %v6241_v23, %v12234_v21  ;;  %v4130_v39 = vpop.f32.mrb[14].mxu0  ;;  %v4387_v52 = vpop.f32.mrb[14].mxu1  ;;  %v3883_v23 = vrot.slane %v3749_v54, 1 }
 0x31f   : > { %v6254_v47 = vmax.f32 %v4130_v39, 0.0  ;;  %v6256_v45 = vmax.f32 %v4387_v52, 0.0  ;;  %v4132_v32 = vpop.f32.mrb[15].mxu0  ;;  %v4389_v44 = vpop.f32.mrb[15].mxu1  ;;  %v3884_v39 = vrot.slane %v3765_v33, 1 }
 0x320   : > { %7831 = vmatmul.mubr.msk.f32.gmra.mrb[120].mxu0 %vm539_vm2, %v8538_v12  ;;  %7863 = vmatmul.mubr.msk.f32.gmra.mrb[120].mxu1 %vm539_vm2, %v8538_v12  ;;  %v6255_v61 = vmax.f32 %v4132_v32, 0.0  ;;  %v6257_v21 = vmax.f32 %v4389_v44, 0.0  ;;  %v3768_v33 = vld [vmem:[%s8662_s21 + $0x118] sm:$0xfe] }
 0x321   : > { %4774 = vmatprep.mubr.f32.mxu0 %v13710_v37  ;;  %5031 = vmatprep.mubr.f32.mxu1 %v13710_v37  ;;  %v12324_v63 = vadd.f32 %v6254_v47, %v12244_v57  ;;  %v12327_v51 = vadd.f32 %v6256_v45, %v12247_v55  ;;  %v8539_v55 = vld [vmem:[%s13698_s1 + $0xe8] sm:$0xff] }
 0x322   : > { %v12330_v52 = vadd.f32 %v6255_v61, %v12250_v20  ;;  %v12333_v32 = vadd.f32 %v6257_v21, %v12253_v43  ;;  %v4136_v44 = vpop.f32.mrb[16].mxu0  ;;  %v4393_v26 = vpop.f32.mrb[16].mxu1  ;;  %v3767_v20 = vld [vmem:[%s8662_s21 + $0x1a0] sm:$0x1]  ;;  %v3769_v45 = vld [vmem:[%s8662_s21 + $0x1a8] sm:$0x1] }
 0x323   : > { %v6334_v57 = vmax.f32 %v4136_v44, 0.0  ;;  %v6336_v47 = vmax.f32 %v4393_v26, 0.0  ;;  %v4138_v12 = vpop.f32.mrb[17].mxu0  ;;  %v4395_v1 = vpop.f32.mrb[17].mxu1  ;;  %v12355_v44 = vsel %vm321_vm0, %v3880_v42, %v3881_v48  ;;  %v12358_v26 = vsel %vm321_vm0, %v3883_v23, %v3884_v39 }
 0x324   : > { %7832 = vmatmul.mubr.msk.f32.gmra.mrb[122].mxu0 %vm539_vm2, %v8539_v55  ;;  %7864 = vmatmul.mubr.msk.f32.gmra.mrb[122].mxu1 %vm539_vm2, %v8539_v55  ;;  %v6335_v43 = vmax.f32 %v4138_v12, 0.0  ;;  %v6337_v54 = vmax.f32 %v4395_v1, 0.0  ;;  %v3911_v39 = vrot.slane %v3769_v45, 1  ;;  %v3784_v45 = vld [vmem:[%s8662_s21 + $0x100] sm:$0xfc] }
 0x325   : > { %4780 = vmatprep.mubr.f32.mxu0 %v13710_v37  ;;  %5037 = vmatprep.mubr.f32.mxu1 %v13710_v37  ;;  %v12349_v61 = vadd.f32 %v6334_v57, %v12263_v7  ;;  %v12352_v21 = vadd.f32 %v6336_v47, %v12266_v28  ;;  %v3904_v7 = vrot.slane %v12336_v24, 1  ;;  %v3905_v28 = vrot.slane %v3767_v20, 1 }
 0x326   : > { %v12361_v1 = vadd.f32 %v6335_v43, %v12269_v62  ;;  %v12364_v12 = vadd.f32 %v6337_v54, %v12272_v56  ;;  %v4142_v55 = vpop.f32.mrb[18].mxu0  ;;  %v4399_v4 = vpop.f32.mrb[18].mxu1  ;;  %v8540_v62 = vld [vmem:[%s13698_s1 + $0xf0] sm:$0xff]  ;;  %v3910_v56 = vrot.slane %v3768_v33, 1  ;;  %v8542_v54 = vld [vmem:[%s8662_s21 + $0xf8] sm:$0xff] }
 0x327   : > { %v6350_v57 = vmax.f32 %v4142_v55, 0.0  ;;  %v6352_v42 = vmax.f32 %v4399_v4, 0.0  ;;  %v4144_v48 = vpop.f32.mrb[19].mxu0  ;;  %v4401_v23 = vpop.f32.mrb[19].mxu1  ;;  %v8541_v43 = vld [vmem:[%s8662_s21 + $0xf0] sm:$0xff] }
 0x328   : > { %7833 = vmatmul.mubr.msk.f32.gmra.mrb[124].mxu0 %vm539_vm2, %v8540_v62  ;;  %7865 = vmatmul.mubr.msk.f32.gmra.mrb[124].mxu1 %vm539_vm2, %v8540_v62  ;;  %v6351_v24 = vmax.f32 %v4144_v48, 0.0  ;;  %v6353_v47 = vmax.f32 %v4401_v23, 0.0  ;;  %v8348_v55 = vpack.c.bf16 %v8542_v54, %v8541_v43  ;;  %v3800_v48 = vld [vmem:[%s8662_s21 + $0x190] sm:$0x3]  ;;  %v3785_v23 = vld [vmem:[%s8662_s21 + $0x108] sm:$0xfc]  ;;  %v8370_v43 = vpack.c.bf16 %v12358_v26, %v12367_v40 }
 0x329   : > { %4786 = vmatprep.mubr.f32.mxu0 %v13710_v37  ;;  %5043 = vmatprep.mubr.f32.mxu1 %v13710_v37  ;;  %v12378_v4 = vadd.f32 %v6350_v57, %v12282_v34  ;;  %v12381_v20 = vadd.f32 %v6352_v42, %v12285_v9  ;;  %v8543_v42 = vld [vmem:[%s8662_s21 + $0x108] sm:$0xff]  ;;  %v3801_v54 = vld [vmem:[%s8662_s21 + $0x198] sm:$0x3]  ;;  %v3802_v33 = vld [vmem:[%s8662_s21 + $0x110] sm:$0xfc] }
 0x32a   : > { %v12391_v62 = vadd.f32 %v6351_v24, %v12288_v22  ;;  %v12394_v34 = vadd.f32 %v6353_v47, %v12291_v31  ;;  %v4148_v57 = vpop.f32.mrb[20].mxu0  ;;  %v4405_v9 = vpop.f32.mrb[20].mxu1  ;;  %v8350_v16 = vpack.c.bf16 %v11699_v17, %v8543_v42  ;;  %v8544_v22 = vld [vmem:[%s13698_s1 + $0xf8] sm:$0xff]  ;;  %v12408_v31 = vsel %vm321_vm0, %v3904_v7, %v3905_v28  ;;  %v3803_v40 = vld [vmem:[%s8662_s21 + $0x1a0] sm:$0x3] }
 0x32b   : > { %v6366_v15 = vmax.f32 %v4148_v57, 0.0  ;;  %v6368_v5 = vmax.f32 %v4405_v9, 0.0  ;;  %v4150_v30 = vpop.f32.mrb[21].mxu0  ;;  %v4407_v27 = vpop.f32.mrb[21].mxu1  ;;  %v12411_v24 = vsel %vm321_vm0, %v3910_v56, %v3911_v39  ;;  %v3988_v9 = vrot.slane %v3784_v45, 2 }
 0x32c   : > { %7834 = vmatmul.mubr.msk.f32.gmra.mrb[126].mxu0 %vm539_vm2, %v8544_v22  ;;  %7866 = vmatmul.mubr.msk.f32.gmra.mrb[126].mxu1 %vm539_vm2, %v8544_v22  ;;  %v6367_v47 = vmax.f32 %v4150_v30, 0.0  ;;  %v6369_v57 = vmax.f32 %v4407_v27, 0.0  ;;  %v3989_v42 = vrot.slane %v3800_v48, 2  ;;  %v3991_v7 = vrot.slane %v3785_v23, 2 }
 0x32d   : > { %5114 = vmatprep.mubr.f32.mxu0 %v13710_v37  ;;  %5371 = vmatprep.mubr.f32.mxu1 %v13710_v37  ;;  %v12417_v36 = vadd.f32 %v6366_v15, %v12301_v29  ;;  %v12420_v22 = vadd.f32 %v6368_v5, %v12304_v46  ;;  %v3992_v28 = vrot.slane %v3801_v54, 2  ;;  %v4012_v10 = vrot.slane %v3802_v33, 2  ;;  %v8545_v46 = vld [vmem:[%s13698_s1] sm:$0xff] }
 0x32e   : > { %v12423_v56 = vadd.f32 %v6367_v47, %v12309_v50  ;;  %v12426_v27 = vadd.f32 %v6369_v57, %v12312_v49  ;;  %v4154_v30 = vpop.f32.mrb[22].mxu0  ;;  %v4411_v39 = vpop.f32.mrb[22].mxu1  ;;  %v4013_v45 = vrot.slane %v3803_v40, 2  ;;  %v8546_v50 = vld [vmem:[%s8662_s21 + $0x100] sm:$0xff]  ;;  %v8354_v33 = vpack.c.bf16 %v12358_v26, %v12355_v44  ;;  %v3804_v57 = vld [vmem:[%s8662_s21 + $0x118] sm:$0xfc] }
 0x32f   : > { %v6382_v48 = vmax.f32 %v4154_v30, 0.0  ;;  %v6384_v15 = vmax.f32 %v4411_v39, 0.0  ;;  %v4156_v29 = vpop.f32.mrb[23].mxu0  ;;  %v4413_v5 = vpop.f32.mrb[23].mxu1  ;;  %v8352_v49 = vpack.c.bf16 %v11696_v14, %v8546_v50  ;;  %v8374_v40 = vpack.c.bf16 %v12411_v24, %v12408_v31  ;;  %v3805_v30 = vld [vmem:[%s8662_s21 + $0x1a8] sm:$0x3] }
 0x330   : > { %7867 = vmatmul.mubr.msk.f32.vlgmr.msra.gmra.mrb[128].mxu0 %vm539_vm2, %v8545_v46  ;;  %7899 = vmatmul.mubr.msk.f32.vlgmr.msra.gmra.mrb[128].mxu1 %vm539_vm2, %v8545_v46  ;;  %v6383_v23 = vmax.f32 %v4156_v29, 0.0  ;;  %v6385_v54 = vmax.f32 %v4413_v5, 0.0  ;;  %v12441_v47 = vsel %vm430_vm1, %v3988_v9, %v3989_v42  ;;  %v12456_v29 = vsel %vm430_vm1, %v3991_v7, %v3992_v28  ;;  %v8547_v7 = vld [vmem:[%s13698_s1 + $0x8] sm:$0xff] }
 0x331   : > { %8349 = vmatpush1.bf16.msra.mxu0 %v8348_v55  ;;  %5120 = vmatprep.mubr.f32.mxu0 %v13710_v37  ;;  %v12446_v39 = vadd.f32 %v6382_v48, %v12324_v63  ;;  %v12449_v14 = vadd.f32 %v6384_v15, %v12327_v51  ;;  %v13787_v55 = vpack.c.bf16 %v11792_v2, %v11770_v38 }
 0x332   : > { %5377 = vmatprep.mubr.f32.mxu1 %v13710_v37  ;;  %v12459_v24 = vadd.f32 %v6383_v23, %v12330_v52  ;;  %v12462_v9 = vadd.f32 %v6385_v54, %v12333_v32  ;;  %v4160_v63 = vpop.f32.mrb[24].mxu0  ;;  %v4417_v42 = vpop.f32.mrb[24].mxu1  ;;  %8351 = vmatprep.subr.bf16.mxu0 %v8350_v16  ;;  %v12465_v51 = vsel %vm430_vm1, %v4012_v10, %v4013_v45  ;;  %v4018_v52 = vrot.slane %v3804_v57, 2  ;;  %v8548_v54 = vld [vmem:[%s13698_s1 + $0x10] sm:$0xff] }
 0x333   : > { %8369 = vmatpush1.bf16.msra.mxu1 %v13787_v55  ;;  %v6462_v48 = vmax.f32 %v4160_v63, 0.0  ;;  %v6464_v15 = vmax.f32 %v4417_v42, 0.0  ;;  %v4162_v38 = vpop.f32.mrb[25].mxu0  ;;  %v4419_v2 = vpop.f32.mrb[25].mxu1  ;;  %v4019_v32 = vrot.slane %v3805_v30, 2  ;;  %v8356_v10 = vpack.c.bf16 %v12355_v44, %v11699_v17 }
 0x334   : > { %8371 = vmatprep.subr.bf16.mxu1 %v8370_v43  ;;  %7868 = vmatmul.mubr.msk.f32.gmra.mrb[130].mxu0 %vm539_vm2, %v8547_v7  ;;  %v6463_v28 = vmax.f32 %v4162_v38, 0.0  ;;  %v6465_v16 = vmax.f32 %v4419_v2, 0.0  ;;  %v8376_v43 = vpack.c.bf16 %v12408_v31, %v12358_v26  ;;  %v13788_v46 = vpack.c.bf16 %v12355_v44, %v11832_v6 }
 0x335   : > { %7900 = vmatmul.mubr.msk.f32.gmra.mrb[130].mxu1 %vm539_vm2, %v8547_v7  ;;  %5126 = vmatprep.mubr.f32.mxu0 %v13710_v37  ;;  %v12479_v45 = vadd.f32 %v6462_v48, %v12349_v61  ;;  %v12482_v5 = vadd.f32 %v6464_v15, %v12352_v21  ;;  %v8358_v50 = vpack.c.bf16 %v12441_v47, %v11800_v41 }
 0x336   : > { %5383 = vmatprep.mubr.f32.mxu1 %v13710_v37  ;;  %8353 = vmatpush1.bf16.msra.mxu0 %v8352_v49  ;;  %v12490_v23 = vadd.f32 %v6463_v28, %v12361_v1  ;;  %v12493_v17 = vadd.f32 %v6465_v16, %v12364_v12  ;;  %v4166_v26 = vpop.f32.mrb[26].mxu0  ;;  %v4423_v61 = vpop.f32.mrb[26].mxu1  ;;  %v8378_v21 = vpack.c.bf16 %v12465_v51, %v12456_v29 }
 0x337   : > { %8373 = vmatpush1.bf16.msra.mxu1 %v13788_v46  ;;  %8355 = vmatprep.subr.bf16.mxu0 %v8354_v33  ;;  %v6478_v31 = vmax.f32 %v4166_v26, 0.0  ;;  %v6480_v49 = vmax.f32 %v4423_v61, 0.0  ;;  %v4168_v6 = vpop.f32.mrb[27].mxu0  ;;  %v4425_v44 = vpop.f32.mrb[27].mxu1  ;;  %v4020_v1 = vsel %vm430_vm1, %v4018_v52, %v4019_v32  ;;  %v8380_v57 = vpack.c.bf16 %v12456_v29, %v12441_v47  ;;  %v8550_v26 = vld [vmem:[%s13698_s1 + $0x20] sm:$0xff] }
 0x338   : > { %8375 = vmatprep.subr.bf16.mxu1 %v8374_v40  ;;  %7869 = vmatmul.mubr.msk.f32.gmra.mrb[132].mxu0 %vm539_vm2, %v8548_v54  ;;  %v6479_v12 = vmax.f32 %v4168_v6, 0.0  ;;  %v6481_v33 = vmax.f32 %v4425_v44, 0.0  ;;  %v8360_v40 = vpack.c.bf16 %v11800_v41, %v11756_v59  ;;  %v8362_v63 = vpack.c.bf16 %v13714_v35, %v12456_v29  ;;  %v8549_v29 = vld [vmem:[%s13698_s1 + $0x18] sm:$0xff] }
 0x339   : > { %7901 = vmatmul.mubr.msk.f32.gmra.mrb[132].mxu1 %vm539_vm2, %v8548_v54  ;;  %5132 = vmatprep.mubr.f32.mxu0 %v13710_v37  ;;  %v12510_v30 = vadd.f32 %v6478_v31, %v12378_v4  ;;  %v12513_v55 = vadd.f32 %v6480_v49, %v12381_v20  ;;  %v8382_v4 = vpack.c.bf16 %v13714_v35, %v4020_v1 }
 0x33a   : > { %5389 = vmatprep.mubr.f32.mxu1 %v13710_v37  ;;  %8357 = vmatpush1.bf16.msra.mxu0 %v8356_v10  ;;  %v12518_v42 = vadd.f32 %v6479_v12, %v12391_v62  ;;  %v12521_v48 = vadd.f32 %v6481_v33, %v12394_v34  ;;  %v4172_v59 = vpop.f32.mrb[28].mxu0  ;;  %v4429_v41 = vpop.f32.mrb[28].mxu1  ;;  %v8384_v7 = vpack.c.bf16 %v13714_v35, %v12465_v51 }
 0x33b   : > { %8377 = vmatpush1.bf16.msra.mxu1 %v8376_v43  ;;  %8359 = vmatprep.subr.bf16.mxu0 %v8358_v50  ;;  %v6494_v15 = vmax.f32 %v4172_v59, 0.0  ;;  %v6496_v20 = vmax.f32 %v4429_v41, 0.0  ;;  %v4174_v38 = vpop.f32.mrb[29].mxu0  ;;  %v4431_v2 = vpop.f32.mrb[29].mxu1  ;;  %v8364_v28 = vpack.c.bf16 %v13714_v35, %v12441_v47 }
 0x33c   : > { %8379 = vmatprep.subr.bf16.mxu1 %v8378_v21  ;;  %7870 = vmatmul.mubr.msk.f32.gmra.mrb[134].mxu0 %vm539_vm2, %v8549_v29  ;;  %v6495_v62 = vmax.f32 %v4174_v38, 0.0  ;;  %v6497_v34 = vmax.f32 %v4431_v2, 0.0 }
 0x33d   : > { %7902 = vmatmul.mubr.msk.f32.gmra.mrb[134].mxu1 %vm539_vm2, %v8549_v29  ;;  %5138 = vmatprep.mubr.f32.mxu0 %v13710_v37  ;;  %v12534_v52 = vadd.f32 %v6494_v15, %v12417_v36  ;;  %v12537_v32 = vadd.f32 %v6496_v20, %v12420_v22 }
 0x33e   : > { %5395 = vmatprep.mubr.f32.mxu1 %v13710_v37  ;;  %8361 = vmatpush1.bf16.msra.mxu0 %v8360_v40  ;;  %v12542_v16 = vadd.f32 %v6495_v62, %v12423_v56  ;;  %v12545_v10 = vadd.f32 %v6497_v34, %v12426_v27  ;;  %v4178_v43 = vpop.f32.mrb[30].mxu0  ;;  %v4435_v46 = vpop.f32.mrb[30].mxu1 }
 0x33f   : > { %8381 = vmatpush1.bf16.msra.mxu1 %v8380_v57  ;;  %8363 = vmatprep.subr.bf16.mxu0 %v8362_v63  ;;  %v6510_v36 = vmax.f32 %v4178_v43, 0.0  ;;  %v6512_v51 = vmax.f32 %v4435_v46, 0.0  ;;  %v4180_v50 = vpop.f32.mrb[31].mxu0  ;;  %v4437_v22 = vpop.f32.mrb[31].mxu1 }
 0x340   : > { %8383 = vmatprep.subr.bf16.mxu1 %v8382_v4  ;;  %7871 = vmatmul.mubr.msk.f32.gmra.mrb[136].mxu0 %vm539_vm2, %v8550_v26  ;;  %v6511_v35 = vmax.f32 %v4180_v50, 0.0  ;;  %v6513_v56 = vmax.f32 %v4437_v22, 0.0 }
 0x341   : > { %7903 = vmatmul.mubr.msk.f32.gmra.mrb[136].mxu1 %vm539_vm2, %v8550_v26  ;;  %5144 = vmatprep.mubr.f32.mxu0 %v13710_v37  ;;  %v12555_v27 = vadd.f32 %v6510_v36, %v12446_v39  ;;  %v12558_v47 = vadd.f32 %v6512_v51, %v12449_v14  ;;  %v8551_v39 = vld [vmem:[%s13698_s1 + $0x28] sm:$0xff] }
 0x342   : > { %5401 = vmatprep.mubr.f32.mxu1 %v13710_v37  ;;  %8365 = vmatpush1.bf16.msra.mxu0 %v8364_v28  ;;  %v12561_v61 = vadd.f32 %v6511_v35, %v12459_v24  ;;  %v12564_v21 = vadd.f32 %v6513_v56, %v12462_v9  ;;  %v4184_v31 = vpop.f32.mrb[32].mxu0  ;;  %v4441_v49 = vpop.f32.mrb[32].mxu1 }
 0x343   : > { %8385 = vmatpush1.bf16.msra.mxu1 %v8384_v7  ;;  %v6590_v6 = vmax.f32 %v4184_v31, 0.0  ;;  %v6592_v44 = vmax.f32 %v4441_v49, 0.0  ;;  %v4186_v54 = vpop.f32.mrb[33].mxu0  ;;  %v4443_v1 = vpop.f32.mrb[33].mxu1 }
 0x344   : > { %7872 = vmatmul.mubr.msk.f32.gmra.mrb[138].mxu0 %vm539_vm2, %v8551_v39  ;;  %v6591_v14 = vmax.f32 %v4186_v54, 0.0  ;;  %v6593_v24 = vmax.f32 %v4443_v1, 0.0 }
 0x345   : > { %7904 = vmatmul.mubr.msk.f32.gmra.mrb[138].mxu1 %vm539_vm2, %v8551_v39  ;;  %5150 = vmatprep.mubr.f32.mxu0 %v13710_v37  ;;  %v12574_v9 = vadd.f32 %v6590_v6, %v12479_v45  ;;  %v12577_v12 = vadd.f32 %v6592_v44, %v12482_v5  ;;  %v8552_v45 = vld [vmem:[%s13698_s1 + $0x30] sm:$0xff] }
 0x346   : > { %5407 = vmatprep.mubr.f32.mxu1 %v13710_v37  ;;  %v12580_v33 = vadd.f32 %v6591_v14, %v12490_v23  ;;  %v12583_v40 = vadd.f32 %v6593_v24, %v12493_v17  ;;  %v4190_v57 = vpop.f32.mrb[34].mxu0  ;;  %v4447_v63 = vpop.f32.mrb[34].mxu1 }
 0x347   : > { %v6606_v59 = vmax.f32 %v4190_v57, 0.0  ;;  %v6608_v41 = vmax.f32 %v4447_v63, 0.0  ;;  %v4192_v4 = vpop.f32.mrb[35].mxu0  ;;  %v4449_v15 = vpop.f32.mrb[35].mxu1 }
 0x348   : > { %7873 = vmatmul.mubr.msk.f32.gmra.mrb[140].mxu0 %vm539_vm2, %v8552_v45  ;;  %v6607_v5 = vmax.f32 %v4192_v4, 0.0  ;;  %v6609_v23 = vmax.f32 %v4449_v15, 0.0 }
 0x349   : > { %7905 = vmatmul.mubr.msk.f32.gmra.mrb[140].mxu1 %vm539_vm2, %v8552_v45  ;;  %5156 = vmatprep.mubr.f32.mxu0 %v13710_v37  ;;  %v12593_v17 = vadd.f32 %v6606_v59, %v12510_v30  ;;  %v12596_v20 = vadd.f32 %v6608_v41, %v12513_v55  ;;  %v8553_v30 = vld [vmem:[%s13698_s1 + $0x38] sm:$0xff] }
 0x34a   : > { %5413 = vmatprep.mubr.f32.mxu1 %v13710_v37  ;;  %v12599_v38 = vadd.f32 %v6607_v5, %v12518_v42  ;;  %v12602_v2 = vadd.f32 %v6609_v23, %v12521_v48  ;;  %v4196_v29 = vpop.f32.mrb[36].mxu0  ;;  %v4453_v62 = vpop.f32.mrb[36].mxu1 }
 0x34b   : > { %v6622_v34 = vmax.f32 %v4196_v29, 0.0  ;;  %v6624_v7 = vmax.f32 %v4453_v62, 0.0  ;;  %v4198_v28 = vpop.f32.mrb[37].mxu0  ;;  %v4455_v43 = vpop.f32.mrb[37].mxu1 }
 0x34c   : > { %7874 = vmatmul.mubr.msk.f32.gmra.mrb[142].mxu0 %vm539_vm2, %v8553_v30  ;;  %v6623_v55 = vmax.f32 %v4198_v28, 0.0  ;;  %v6625_v42 = vmax.f32 %v4455_v43, 0.0 }
 0x34d   : > { %7906 = vmatmul.mubr.msk.f32.gmra.mrb[142].mxu1 %vm539_vm2, %v8553_v30  ;;  %5162 = vmatprep.mubr.f32.mxu0 %v13710_v37  ;;  %v12612_v48 = vadd.f32 %v6622_v34, %v12534_v52  ;;  %v12615_v46 = vadd.f32 %v6624_v7, %v12537_v32  ;;  %v8554_v52 = vld [vmem:[%s13698_s1 + $0x40] sm:$0xff] }
 0x34e   : > { %5419 = vmatprep.mubr.f32.mxu1 %v13710_v37  ;;  %v12618_v36 = vadd.f32 %v6623_v55, %v12542_v16  ;;  %v12621_v51 = vadd.f32 %v6625_v42, %v12545_v10  ;;  %v4202_v50 = vpop.f32.mrb[38].mxu0  ;;  %v4459_v22 = vpop.f32.mrb[38].mxu1 }
 0x34f   : > { %v6638_v26 = vmax.f32 %v4202_v50, 0.0  ;;  %v6640_v35 = vmax.f32 %v4459_v22, 0.0  ;;  %v4204_v56 = vpop.f32.mrb[39].mxu0  ;;  %v4461_v31 = vpop.f32.mrb[39].mxu1 }
 0x350   : > { %7875 = vmatmul.mubr.msk.f32.gmra.mrb[144].mxu0 %vm539_vm2, %v8554_v52  ;;  %v6639_v32 = vmax.f32 %v4204_v56, 0.0  ;;  %v6641_v16 = vmax.f32 %v4461_v31, 0.0 }
 0x351   : > { %7907 = vmatmul.mubr.msk.f32.gmra.mrb[144].mxu1 %vm539_vm2, %v8554_v52  ;;  %5168 = vmatprep.mubr.f32.mxu0 %v13710_v37  ;;  %v12631_v10 = vadd.f32 %v6638_v26, %v12555_v27  ;;  %v12634_v49 = vadd.f32 %v6640_v35, %v12558_v47  ;;  %v8555_v27 = vld [vmem:[%s13698_s1 + $0x48] sm:$0xff] }
 0x352   : > { %5425 = vmatprep.mubr.f32.mxu1 %v13710_v37  ;;  %v12637_v6 = vadd.f32 %v6639_v32, %v12561_v61  ;;  %v12640_v44 = vadd.f32 %v6641_v16, %v12564_v21  ;;  %v4208_v54 = vpop.f32.mrb[40].mxu0  ;;  %v4465_v1 = vpop.f32.mrb[40].mxu1 }
 0x353   : > { %v6718_v39 = vmax.f32 %v4208_v54, 0.0  ;;  %v6720_v14 = vmax.f32 %v4465_v1, 0.0  ;;  %v4210_v24 = vpop.f32.mrb[41].mxu0  ;;  %v4467_v57 = vpop.f32.mrb[41].mxu1 }
 0x354   : > { %7876 = vmatmul.mubr.msk.f32.gmra.mrb[146].mxu0 %vm539_vm2, %v8555_v27  ;;  %v6719_v47 = vmax.f32 %v4210_v24, 0.0  ;;  %v6721_v61 = vmax.f32 %v4467_v57, 0.0 }
 0x355   : > { %7908 = vmatmul.mubr.msk.f32.gmra.mrb[146].mxu1 %vm539_vm2, %v8555_v27  ;;  %5174 = vmatprep.mubr.f32.mxu0 %v13710_v37  ;;  %v12650_v21 = vadd.f32 %v6718_v39, %v12574_v9  ;;  %v12653_v63 = vadd.f32 %v6720_v14, %v12577_v12  ;;  %v8556_v9 = vld [vmem:[%s13698_s1 + $0x50] sm:$0xff] }
 0x356   : > { %5431 = vmatprep.mubr.f32.mxu1 %v13710_v37  ;;  %v12656_v59 = vadd.f32 %v6719_v47, %v12580_v33  ;;  %v12659_v41 = vadd.f32 %v6721_v61, %v12583_v40  ;;  %v4214_v4 = vpop.f32.mrb[42].mxu0  ;;  %v4471_v15 = vpop.f32.mrb[42].mxu1 }
 0x357   : > { %v6734_v45 = vmax.f32 %v4214_v4, 0.0  ;;  %v6736_v5 = vmax.f32 %v4471_v15, 0.0  ;;  %v4216_v23 = vpop.f32.mrb[43].mxu0  ;;  %v4473_v29 = vpop.f32.mrb[43].mxu1 }
 0x358   : > { %7877 = vmatmul.mubr.msk.f32.gmra.mrb[148].mxu0 %vm539_vm2, %v8556_v9  ;;  %v6735_v12 = vmax.f32 %v4216_v23, 0.0  ;;  %v6737_v33 = vmax.f32 %v4473_v29, 0.0 }
 0x359   : > { %7909 = vmatmul.mubr.msk.f32.gmra.mrb[148].mxu1 %vm539_vm2, %v8556_v9  ;;  %5180 = vmatprep.mubr.f32.mxu0 %v13710_v37  ;;  %v12669_v40 = vadd.f32 %v6734_v45, %v12593_v17  ;;  %v12672_v62 = vadd.f32 %v6736_v5, %v12596_v20  ;;  %v8557_v17 = vld [vmem:[%s13698_s1 + $0x58] sm:$0xff] }
 0x35a   : > { %5437 = vmatprep.mubr.f32.mxu1 %v13710_v37  ;;  %v12675_v34 = vadd.f32 %v6735_v12, %v12599_v38  ;;  %v12678_v7 = vadd.f32 %v6737_v33, %v12602_v2  ;;  %v4220_v28 = vpop.f32.mrb[44].mxu0  ;;  %v4477_v43 = vpop.f32.mrb[44].mxu1 }
 0x35b   : > { %v6750_v30 = vmax.f32 %v4220_v28, 0.0  ;;  %v6752_v55 = vmax.f32 %v4477_v43, 0.0  ;;  %v4222_v42 = vpop.f32.mrb[45].mxu0  ;;  %v4479_v50 = vpop.f32.mrb[45].mxu1 }
 0x35c   : > { %7878 = vmatmul.mubr.msk.f32.gmra.mrb[150].mxu0 %vm539_vm2, %v8557_v17  ;;  %v6751_v20 = vmax.f32 %v4222_v42, 0.0  ;;  %v6753_v38 = vmax.f32 %v4479_v50, 0.0 }
 0x35d   : > { %7910 = vmatmul.mubr.msk.f32.gmra.mrb[150].mxu1 %vm539_vm2, %v8557_v17  ;;  %5186 = vmatprep.mubr.f32.mxu0 %v13710_v37  ;;  %v12688_v2 = vadd.f32 %v6750_v30, %v12612_v48  ;;  %v12691_v22 = vadd.f32 %v6752_v55, %v12615_v46  ;;  %v8558_v48 = vld [vmem:[%s13698_s1 + $0x60] sm:$0xff] }
 0x35e   : > { %5443 = vmatprep.mubr.f32.mxu1 %v13710_v37  ;;  %v12694_v26 = vadd.f32 %v6751_v20, %v12618_v36  ;;  %v12697_v35 = vadd.f32 %v6753_v38, %v12621_v51  ;;  %v4226_v56 = vpop.f32.mrb[46].mxu0  ;;  %v4483_v31 = vpop.f32.mrb[46].mxu1 }
 0x35f   : > { %v6766_v52 = vmax.f32 %v4226_v56, 0.0  ;;  %v6768_v32 = vmax.f32 %v4483_v31, 0.0  ;;  %v4228_v16 = vpop.f32.mrb[47].mxu0  ;;  %v4485_v54 = vpop.f32.mrb[47].mxu1 }
 0x360   : > { %7879 = vmatmul.mubr.msk.f32.gmra.mrb[152].mxu0 %vm539_vm2, %v8558_v48  ;;  %v6767_v46 = vmax.f32 %v4228_v16, 0.0  ;;  %v6769_v36 = vmax.f32 %v4485_v54, 0.0 }
 0x361   : > { %7911 = vmatmul.mubr.msk.f32.gmra.mrb[152].mxu1 %vm539_vm2, %v8558_v48  ;;  %5192 = vmatprep.mubr.f32.mxu0 %v13710_v37  ;;  %v12707_v51 = vadd.f32 %v6766_v52, %v12631_v10  ;;  %v12710_v1 = vadd.f32 %v6768_v32, %v12634_v49  ;;  %v8559_v10 = vld [vmem:[%s13698_s1 + $0x68] sm:$0xff] }
 0x362   : > { %5449 = vmatprep.mubr.f32.mxu1 %v13710_v37  ;;  %v12713_v39 = vadd.f32 %v6767_v46, %v12637_v6  ;;  %v12716_v14 = vadd.f32 %v6769_v36, %v12640_v44  ;;  %v4232_v24 = vpop.f32.mrb[48].mxu0  ;;  %v4489_v57 = vpop.f32.mrb[48].mxu1 }
 0x363   : > { %v6846_v27 = vmax.f32 %v4232_v24, 0.0  ;;  %v6848_v47 = vmax.f32 %v4489_v57, 0.0  ;;  %v4234_v61 = vpop.f32.mrb[49].mxu0  ;;  %v4491_v4 = vpop.f32.mrb[49].mxu1 }
 0x364   : > { %7880 = vmatmul.mubr.msk.f32.gmra.mrb[154].mxu0 %vm539_vm2, %v8559_v10  ;;  %v6847_v49 = vmax.f32 %v4234_v61, 0.0  ;;  %v6849_v6 = vmax.f32 %v4491_v4, 0.0 }
 0x365   : > { %7912 = vmatmul.mubr.msk.f32.gmra.mrb[154].mxu1 %vm539_vm2, %v8559_v10  ;;  %5198 = vmatprep.mubr.f32.mxu0 %v13710_v37  ;;  %v12726_v44 = vadd.f32 %v6846_v27, %v12650_v21  ;;  %v12729_v15 = vadd.f32 %v6848_v47, %v12653_v63  ;;  %v8560_v21 = vld [vmem:[%s13698_s1 + $0x70] sm:$0xff] }
 0x366   : > { %5455 = vmatprep.mubr.f32.mxu1 %v13710_v37  ;;  %v12732_v45 = vadd.f32 %v6847_v49, %v12656_v59  ;;  %v12735_v5 = vadd.f32 %v6849_v6, %v12659_v41  ;;  %v4238_v23 = vpop.f32.mrb[50].mxu0  ;;  %v4495_v29 = vpop.f32.mrb[50].mxu1 }
 0x367   : > { %v6862_v9 = vmax.f32 %v4238_v23, 0.0  ;;  %v6864_v12 = vmax.f32 %v4495_v29, 0.0  ;;  %v4240_v33 = vpop.f32.mrb[51].mxu0  ;;  %v4497_v28 = vpop.f32.mrb[51].mxu1 }
 0x368   : > { %7881 = vmatmul.mubr.msk.f32.gmra.mrb[156].mxu0 %vm539_vm2, %v8560_v21  ;;  %v6863_v63 = vmax.f32 %v4240_v33, 0.0  ;;  %v6865_v59 = vmax.f32 %v4497_v28, 0.0 }
 0x369   : > { %7913 = vmatmul.mubr.msk.f32.gmra.mrb[156].mxu1 %vm539_vm2, %v8560_v21  ;;  %5204 = vmatprep.mubr.f32.mxu0 %v13710_v37  ;;  %v12745_v41 = vadd.f32 %v6862_v9, %v12669_v40  ;;  %v12748_v43 = vadd.f32 %v6864_v12, %v12672_v62  ;;  %v8561_v40 = vld [vmem:[%s13698_s1 + $0x78] sm:$0xff] }
 0x36a   : > { %5461 = vmatprep.mubr.f32.mxu1 %v13710_v37  ;;  %v12751_v30 = vadd.f32 %v6863_v63, %v12675_v34  ;;  %v12754_v55 = vadd.f32 %v6865_v59, %v12678_v7  ;;  %v4244_v42 = vpop.f32.mrb[52].mxu0  ;;  %v4501_v50 = vpop.f32.mrb[52].mxu1 }
 0x36b   : > { %v6878_v17 = vmax.f32 %v4244_v42, 0.0  ;;  %v6880_v20 = vmax.f32 %v4501_v50, 0.0  ;;  %v4246_v38 = vpop.f32.mrb[53].mxu0  ;;  %v4503_v56 = vpop.f32.mrb[53].mxu1  ;;  %v8564_v50 = vld [vmem:[%s13698_s1 + $0x90] sm:$0xff] }
 0x36c   : > { %7882 = vmatmul.mubr.msk.f32.gmra.mrb[158].mxu0 %vm539_vm2, %v8561_v40  ;;  %v6879_v62 = vmax.f32 %v4246_v38, 0.0  ;;  %v6881_v34 = vmax.f32 %v4503_v56, 0.0 }
 0x36d   : > { %7914 = vmatmul.mubr.msk.f32.gmra.mrb[158].mxu1 %vm539_vm2, %v8561_v40  ;;  %5210 = vmatprep.mubr.f32.mxu0 %v13710_v37  ;;  %v12764_v7 = vadd.f32 %v6878_v17, %v12688_v2  ;;  %v12767_v31 = vadd.f32 %v6880_v20, %v12691_v22  ;;  %v8562_v2 = vld [vmem:[%s13698_s1 + $0x80] sm:$0xff] }
 0x36e   : > { %5467 = vmatprep.mubr.f32.mxu1 %v13710_v37  ;;  %v12770_v52 = vadd.f32 %v6879_v62, %v12694_v26  ;;  %v12773_v32 = vadd.f32 %v6881_v34, %v12697_v35  ;;  %v4250_v16 = vpop.f32.mrb[54].mxu0  ;;  %v4507_v54 = vpop.f32.mrb[54].mxu1 }
 0x36f   : > { %v6894_v48 = vmax.f32 %v4250_v16, 0.0  ;;  %v6896_v46 = vmax.f32 %v4507_v54, 0.0  ;;  %v4252_v36 = vpop.f32.mrb[55].mxu0  ;;  %v4509_v24 = vpop.f32.mrb[55].mxu1 }
 0x370   : > { %7883 = vmatmul.mubr.msk.f32.gmra.mrb[160].mxu0 %vm539_vm2, %v8562_v2  ;;  %v6895_v22 = vmax.f32 %v4252_v36, 0.0  ;;  %v6897_v26 = vmax.f32 %v4509_v24, 0.0 }
 0x371   : > { %7915 = vmatmul.mubr.msk.f32.gmra.mrb[160].mxu1 %vm539_vm2, %v8562_v2  ;;  %5216 = vmatprep.mubr.f32.mxu0 %v13710_v37  ;;  %v12783_v35 = vadd.f32 %v6894_v48, %v12707_v51  ;;  %v12786_v57 = vadd.f32 %v6896_v46, %v12710_v1  ;;  %v8563_v51 = vld [vmem:[%s13698_s1 + $0x88] sm:$0xff]  ;;  %v8565_v46 = vld [vmem:[%s13698_s1 + $0x98] sm:$0xff] }
 0x372   : > { %5473 = vmatprep.mubr.f32.mxu1 %v13710_v37  ;;  %v12789_v27 = vadd.f32 %v6895_v22, %v12713_v39  ;;  %v12792_v47 = vadd.f32 %v6897_v26, %v12716_v14  ;;  %v4256_v61 = vpop.f32.mrb[56].mxu0  ;;  %v4513_v4 = vpop.f32.mrb[56].mxu1 }
 0x373   : > { %v6974_v10 = vmax.f32 %v4256_v61, 0.0  ;;  %v6976_v49 = vmax.f32 %v4513_v4, 0.0  ;;  %v4258_v6 = vpop.f32.mrb[57].mxu0  ;;  %v4515_v23 = vpop.f32.mrb[57].mxu1 }
 0x374   : > { %7884 = vmatmul.mubr.msk.f32.gmra.mrb[162].mxu0 %vm539_vm2, %v8563_v51  ;;  %v6975_v1 = vmax.f32 %v4258_v6, 0.0  ;;  %v6977_v39 = vmax.f32 %v4515_v23, 0.0 }
 0x375   : > { %7916 = vmatmul.mubr.msk.f32.gmra.mrb[162].mxu1 %vm539_vm2, %v8563_v51  ;;  %5222 = vmatprep.mubr.f32.mxu0 %v13710_v37  ;;  %v7038_v14 = vadd.f32 %v6974_v10, %v12726_v44  ;;  %v7040_v29 = vadd.f32 %v6976_v49, %v12729_v15  ;;  %v8566_v51 = vld [vmem:[%s13698_s1 + $0xa0] sm:$0xff] }
 0x376   : > { %5479 = vmatprep.mubr.f32.mxu1 %v13710_v37  ;;  %v7039_v9 = vadd.f32 %v6975_v1, %v12732_v45  ;;  %v7041_v12 = vadd.f32 %v6977_v39, %v12735_v5  ;;  %v4262_v33 = vpop.f32.mrb[58].mxu0  ;;  %v4519_v28 = vpop.f32.mrb[58].mxu1 }
 0x377   : > { %v6990_v21 = vmax.f32 %v4262_v33, 0.0  ;;  %v6992_v63 = vmax.f32 %v4519_v28, 0.0  ;;  %v4264_v59 = vpop.f32.mrb[59].mxu0  ;;  %v4521_v42 = vpop.f32.mrb[59].mxu1 }
 0x378   : > { %7885 = vmatmul.mubr.msk.f32.gmra.mrb[164].mxu0 %vm539_vm2, %v8564_v50  ;;  %v7102_v44 = vadd.f32 %v7039_v9, %v7038_v14  ;;  %v6991_v15 = vmax.f32 %v4264_v59, 0.0  ;;  %v6993_v17 = vmax.f32 %v4521_v42, 0.0  ;;  %v8567_v42 = vld [vmem:[%s13698_s1 + $0xa8] sm:$0xff] }
 0x379   : > { %7917 = vmatmul.mubr.msk.f32.gmra.mrb[164].mxu1 %vm539_vm2, %v8564_v50  ;;  %5228 = vmatprep.mubr.f32.mxu0 %v13710_v37  ;;  %v7054_v45 = vadd.f32 %v6990_v21, %v12745_v41  ;;  %v7056_v5 = vadd.f32 %v6992_v63, %v12748_v43 }
 0x37a   : > { %5485 = vmatprep.mubr.f32.mxu1 %v13710_v37  ;;  %v7106_v20 = vadd.f32 %v7102_v44, %v7040_v29  ;;  %v7055_v38 = vadd.f32 %v6991_v15, %v12751_v30  ;;  %v7057_v56 = vadd.f32 %v6993_v17, %v12754_v55  ;;  %v4268_v40 = vpop.f32.mrb[60].mxu0  ;;  %v4525_v62 = vpop.f32.mrb[60].mxu1 }
 0x37b   : > { %v7006_v34 = vmax.f32 %v4268_v40, 0.0  ;;  %v7008_v16 = vmax.f32 %v4525_v62, 0.0  ;;  %v4270_v54 = vpop.f32.mrb[61].mxu0  ;;  %v4527_v48 = vpop.f32.mrb[61].mxu1 }
 0x37c   : > { %7886 = vmatmul.mubr.msk.f32.gmra.mrb[166].mxu0 %vm539_vm2, %v8565_v46  ;;  %v12821_v41 = vadd.f32 %v7106_v20, %v7041_v12  ;;  %v7103_v43 = vadd.f32 %v7055_v38, %v7054_v45  ;;  %v7007_v30 = vmax.f32 %v4270_v54, 0.0  ;;  %v7009_v36 = vmax.f32 %v4527_v48, 0.0  ;;  %v13790_v54 = vld [vmem:[#allocation13_spill] sm:$0xff] }
 0x37d   : > { %7918 = vmatmul.mubr.msk.f32.gmra.mrb[166].mxu1 %vm539_vm2, %v8565_v46  ;;  %5234 = vmatprep.mubr.f32.mxu0 %v13710_v37  ;;  %v7070_v55 = vadd.f32 %v7006_v34, %v12764_v7  ;;  %v7072_v24 = vadd.f32 %v7008_v16, %v12767_v31  ;;  %v13791_v46 = vld [vmem:[#allocation14_spill] sm:$0xff] }
 0x37e   : > { %5491 = vmatprep.mubr.f32.mxu1 %v13710_v37  ;;  %v7107_v2 = vadd.f32 %v7103_v43, %v7056_v5  ;;  %v7071_v22 = vadd.f32 %v7007_v30, %v12770_v52  ;;  %v7073_v26 = vadd.f32 %v7009_v36, %v12773_v32  ;;  %v4274_v61 = vpop.f32.mrb[62].mxu0  ;;  %v4531_v4 = vpop.f32.mrb[62].mxu1  ;;  %v13792_v30 = vld [vmem:[#allocation15_spill] sm:$0xff] }
 0x37f   : > { %v7022_v10 = vmax.f32 %v4274_v61, 0.0  ;;  %v7024_v49 = vmax.f32 %v4531_v4, 0.0  ;;  %v4276_v6 = vpop.f32.mrb[63].mxu0  ;;  %v4533_v23 = vpop.f32.mrb[63].mxu1  ;;  %v8569_v4 = vld [vmem:[%s13698_s1 + $0xb8] sm:$0xff] }
 0x380   : > { %7887 = vmatmul.mubr.msk.f32.gmra.mrb[168].mxu0 %vm539_vm2, %v8566_v51  ;;  %v12834_v7 = vadd.f32 %v7107_v2, %v7057_v56  ;;  %v7104_v31 = vadd.f32 %v7071_v22, %v7070_v55  ;;  %v7023_v52 = vmax.f32 %v4276_v6, 0.0  ;;  %v7025_v1 = vmax.f32 %v4533_v23, 0.0  ;;  %v13793_v6 = vld [vmem:[#allocation16_spill] sm:$0xff] }
 0x381   : > { %7919 = vmatmul.mubr.msk.f32.gmra.mrb[168].mxu1 %vm539_vm2, %v8566_v51  ;;  %5240 = vmatprep.mubr.f32.mxu0 %v13710_v37  ;;  %v7086_v32 = vadd.f32 %v7022_v10, %v12783_v35  ;;  %v7088_v39 = vadd.f32 %v7024_v49, %v12786_v57  ;;  %v13794_v51 = vld [vmem:[#allocation17_spill] sm:$0xff] }
 0x382   : > { %5497 = vmatprep.mubr.f32.mxu1 %v13710_v37  ;;  %v7108_v14 = vadd.f32 %v7104_v31, %v7072_v24  ;;  %v7087_v29 = vadd.f32 %v7023_v52, %v12789_v27  ;;  %v7089_v9 = vadd.f32 %v7025_v1, %v12792_v47  ;;  %v4602_v12 = vpop.f32.mrb[64].mxu0  ;;  %v4859_v33 = vpop.f32.mrb[64].mxu1  ;;  %v13795_v52 = vld [vmem:[#allocation18_spill] sm:$0xff] }
 0x383   : > { %v6082_v28 = vmax.f32 %v4602_v12, 0.0  ;;  %v6084_v21 = vmax.f32 %v4859_v33, 0.0  ;;  %v4604_v63 = vpop.f32.mrb[65].mxu0  ;;  %v4861_v59 = vpop.f32.mrb[65].mxu1 }
 0x384   : > { %7888 = vmatmul.mubr.msk.f32.gmra.mrb[170].mxu0 %vm539_vm2, %v8567_v42  ;;  %v12847_v35 = vadd.f32 %v7108_v14, %v7073_v26  ;;  %v7105_v57 = vadd.f32 %v7087_v29, %v7086_v32  ;;  %v6083_v27 = vmax.f32 %v4604_v63, 0.0  ;;  %v6085_v50 = vmax.f32 %v4861_v59, 0.0  ;;  %v13796_v32 = vld [vmem:[#allocation19_spill] sm:$0xff] }
 0x385   : > { %7920 = vmatmul.mubr.msk.f32.gmra.mrb[170].mxu1 %vm539_vm2, %v8567_v42  ;;  %5246 = vmatprep.mubr.f32.mxu0 %v13710_v37  ;;  %v12852_v47 = vadd.f32 %v6082_v28, %v10731_v11  ;;  %v12855_v44 = vadd.f32 %v6084_v21, %v10734_v53  ;;  %v8568_v11 = vld [vmem:[%s13698_s1 + $0xb0] sm:$0xff]  ;;  %v8570_v21 = vld [vmem:[%s13698_s1 + $0xc0] sm:$0xff] }
 0x386   : > { %5503 = vmatprep.mubr.f32.mxu1 %v13710_v37  ;;  %v7109_v15 = vadd.f32 %v7105_v57, %v7088_v39  ;;  %v12858_v17 = vadd.f32 %v6083_v27, %v10737_v13  ;;  %v12861_v45 = vadd.f32 %v6085_v50, %v10740_v19  ;;  %v13789_v19 = vld [vmem:[#allocation12_spill] sm:$0xff]  ;;  %v13798_v27 = vld [vmem:[#allocation21_spill] sm:$0xff] }
 0x387   : > { %v4608_v5 = vpop.f32.mrb[66].mxu0  ;;  %v4865_v20 = vpop.f32.mrb[66].mxu1  ;;  %v13797_v42 = vld [vmem:[#allocation20_spill] sm:$0xff] }
 0x388   : > { %v6098_v38 = vmax.f32 %v4608_v5, 0.0  ;;  %v6100_v56 = vmax.f32 %v4865_v20, 0.0  ;;  %v4610_v40 = vpop.f32.mrb[67].mxu0  ;;  %v4867_v62 = vpop.f32.mrb[67].mxu1  ;;  %7889 = vmatmul.mubr.msk.f32.gmra.mrb[172].mxu0 %vm539_vm2, %v8568_v11  ;;  %v12868_v53 = vadd.f32 %v7109_v15, %v7089_v9  ;;  %v13799_v15 = vld [vmem:[#allocation22_spill] sm:$0xff]  ;;  %v13800_v20 = vld [vmem:[#allocation23_spill] sm:$0xff] }
 0x389   : > { %7921 = vmatmul.mubr.msk.f32.gmra.mrb[172].mxu1 %vm539_vm2, %v8568_v11  ;;  %v6099_v13 = vmax.f32 %v4610_v40, 0.0  ;;  %v6101_v34 = vmax.f32 %v4867_v62, 0.0  ;;  %5252 = vmatprep.mubr.f32.mxu0 %v13710_v37 }
 0x38a   : > { %5509 = vmatprep.mubr.f32.mxu1 %v13710_v37  ;;  %v12873_v16 = vadd.f32 %v6098_v38, %v13789_v19  ;;  %v12876_v48 = vadd.f32 %v6100_v56, %v13790_v54  ;;  %v8571_v19 = vld [vmem:[%s13698_s1 + $0xc8] sm:$0xff] }
 0x38b   : > { %v12879_v43 = vadd.f32 %v6099_v13, %v13791_v46  ;;  %v12882_v36 = vadd.f32 %v6101_v34, %v13792_v30  ;;  %v4614_v55 = vpop.f32.mrb[68].mxu0  ;;  %v4871_v24 = vpop.f32.mrb[68].mxu1 }
 0x38c   : > { %v6114_v2 = vmax.f32 %v4614_v55, 0.0  ;;  %v6116_v22 = vmax.f32 %v4871_v24, 0.0  ;;  %v4616_v26 = vpop.f32.mrb[69].mxu0  ;;  %v4873_v61 = vpop.f32.mrb[69].mxu1  ;;  %7890 = vmatmul.mubr.msk.f32.gmra.mrb[174].mxu0 %vm539_vm2, %v8569_v4 }
 0x38d   : > { %7922 = vmatmul.mubr.msk.f32.gmra.mrb[174].mxu1 %vm539_vm2, %v8569_v4  ;;  %v6115_v10 = vmax.f32 %v4616_v26, 0.0  ;;  %v6117_v49 = vmax.f32 %v4873_v61, 0.0  ;;  %5258 = vmatprep.mubr.f32.mxu0 %v13710_v37 }
 0x38e   : > { %5515 = vmatprep.mubr.f32.mxu1 %v13710_v37  ;;  %v12892_v23 = vadd.f32 %v6114_v2, %v13793_v6  ;;  %v12895_v31 = vadd.f32 %v6116_v22, %v13794_v51 }
 0x38f   : > { %v12898_v1 = vadd.f32 %v6115_v10, %v13795_v52  ;;  %v12901_v39 = vadd.f32 %v6117_v49, %v13796_v32  ;;  %v4620_v14 = vpop.f32.mrb[70].mxu0  ;;  %v4877_v29 = vpop.f32.mrb[70].mxu1 }
 0x390   : > { %v6130_v9 = vmax.f32 %v4620_v14, 0.0  ;;  %v6132_v12 = vmax.f32 %v4877_v29, 0.0  ;;  %v4622_v33 = vpop.f32.mrb[71].mxu0  ;;  %v4879_v28 = vpop.f32.mrb[71].mxu1  ;;  %7891 = vmatmul.mubr.msk.f32.gmra.mrb[176].mxu0 %vm539_vm2, %v8570_v21 }
 0x391   : > { %7923 = vmatmul.mubr.msk.f32.gmra.mrb[176].mxu1 %vm539_vm2, %v8570_v21  ;;  %v6131_v63 = vmax.f32 %v4622_v33, 0.0  ;;  %v6133_v59 = vmax.f32 %v4879_v28, 0.0  ;;  %5264 = vmatprep.mubr.f32.mxu0 %v13710_v37 }
 0x392   : > { %5521 = vmatprep.mubr.f32.mxu1 %v13710_v37  ;;  %v12911_v57 = vadd.f32 %v6130_v9, %v13797_v42  ;;  %v12914_v50 = vadd.f32 %v6132_v12, %v13798_v27 }
 0x393   : > { %v12917_v5 = vadd.f32 %v6131_v63, %v13799_v15  ;;  %v12920_v38 = vadd.f32 %v6133_v59, %v13800_v20  ;;  %v4626_v56 = vpop.f32.mrb[72].mxu0  ;;  %v4883_v40 = vpop.f32.mrb[72].mxu1 }
 0x394   : > { %v6210_v62 = vmax.f32 %v4626_v56, 0.0  ;;  %v6212_v11 = vmax.f32 %v4883_v40, 0.0  ;;  %v4628_v13 = vpop.f32.mrb[73].mxu0  ;;  %v4885_v34 = vpop.f32.mrb[73].mxu1  ;;  %7892 = vmatmul.mubr.msk.f32.gmra.mrb[178].mxu0 %vm539_vm2, %v8571_v19 }
 0x395   : > { %7924 = vmatmul.mubr.msk.f32.gmra.mrb[178].mxu1 %vm539_vm2, %v8571_v19  ;;  %v6211_v54 = vmax.f32 %v4628_v13, 0.0  ;;  %v6213_v46 = vmax.f32 %v4885_v34, 0.0  ;;  %5270 = vmatprep.mubr.f32.mxu0 %v13710_v37 }
 0x396   : > { %5527 = vmatprep.mubr.f32.mxu1 %v13710_v37  ;;  %v12930_v30 = vadd.f32 %v6210_v62, %v12852_v47  ;;  %v12933_v55 = vadd.f32 %v6212_v11, %v12855_v44  ;;  %v8572_v47 = vld [vmem:[%s13698_s1 + $0xd0] sm:$0xff] }
 0x397   : > { %v12936_v24 = vadd.f32 %v6211_v54, %v12858_v17  ;;  %v12939_v2 = vadd.f32 %v6213_v46, %v12861_v45  ;;  %v4632_v22 = vpop.f32.mrb[74].mxu0  ;;  %v4889_v26 = vpop.f32.mrb[74].mxu1 }
 0x398   : > { %v6226_v61 = vmax.f32 %v4632_v22, 0.0  ;;  %v6228_v4 = vmax.f32 %v4889_v26, 0.0  ;;  %v4634_v10 = vpop.f32.mrb[75].mxu0  ;;  %v4891_v49 = vpop.f32.mrb[75].mxu1  ;;  %7893 = vmatmul.mubr.msk.f32.gmra.mrb[180].mxu0 %vm539_vm2, %v8572_v47 }
 0x399   : > { %7925 = vmatmul.mubr.msk.f32.gmra.mrb[180].mxu1 %vm539_vm2, %v8572_v47  ;;  %v6227_v44 = vmax.f32 %v4634_v10, 0.0  ;;  %v6229_v17 = vmax.f32 %v4891_v49, 0.0  ;;  %5276 = vmatprep.mubr.f32.mxu0 %v13710_v37 }
 0x39a   : > { %5533 = vmatprep.mubr.f32.mxu1 %v13710_v37  ;;  %v12949_v45 = vadd.f32 %v6226_v61, %v12873_v16  ;;  %v12952_v6 = vadd.f32 %v6228_v4, %v12876_v48  ;;  %v8573_v16 = vld [vmem:[%s13698_s1 + $0xd8] sm:$0xff] }
 0x39b   : > { %v12955_v51 = vadd.f32 %v6227_v44, %v12879_v43  ;;  %v12958_v52 = vadd.f32 %v6229_v17, %v12882_v36  ;;  %v4638_v32 = vpop.f32.mrb[76].mxu0  ;;  %v4895_v14 = vpop.f32.mrb[76].mxu1 }
 0x39c   : > { %v6242_v29 = vmax.f32 %v4638_v32, 0.0  ;;  %v6244_v9 = vmax.f32 %v4895_v14, 0.0  ;;  %v4640_v12 = vpop.f32.mrb[77].mxu0  ;;  %v4897_v33 = vpop.f32.mrb[77].mxu1  ;;  %7894 = vmatmul.mubr.msk.f32.gmra.mrb[182].mxu0 %vm539_vm2, %v8573_v16 }
 0x39d   : > { %7926 = vmatmul.mubr.msk.f32.gmra.mrb[182].mxu1 %vm539_vm2, %v8573_v16  ;;  %v6243_v48 = vmax.f32 %v4640_v12, 0.0  ;;  %v6245_v43 = vmax.f32 %v4897_v33, 0.0  ;;  %5282 = vmatprep.mubr.f32.mxu0 %v13710_v37 }
 0x39e   : > { %5539 = vmatprep.mubr.f32.mxu1 %v13710_v37  ;;  %v12968_v36 = vadd.f32 %v6242_v29, %v12892_v23  ;;  %v12971_v28 = vadd.f32 %v6244_v9, %v12895_v31  ;;  %v8574_v23 = vld [vmem:[%s13698_s1 + $0xe0] sm:$0xff] }
 0x39f   : > { %v12974_v21 = vadd.f32 %v6243_v48, %v12898_v1  ;;  %v12977_v63 = vadd.f32 %v6245_v43, %v12901_v39  ;;  %v4644_v59 = vpop.f32.mrb[78].mxu0  ;;  %v4901_v42 = vpop.f32.mrb[78].mxu1 }
 0x3a0   : > { %v6258_v27 = vmax.f32 %v4644_v59, 0.0  ;;  %v6260_v15 = vmax.f32 %v4901_v42, 0.0  ;;  %v4646_v20 = vpop.f32.mrb[79].mxu0  ;;  %v4903_v56 = vpop.f32.mrb[79].mxu1  ;;  %7895 = vmatmul.mubr.msk.f32.gmra.mrb[184].mxu0 %vm539_vm2, %v8574_v23 }
 0x3a1   : > { %7927 = vmatmul.mubr.msk.f32.gmra.mrb[184].mxu1 %vm539_vm2, %v8574_v23  ;;  %v6259_v31 = vmax.f32 %v4646_v20, 0.0  ;;  %v6261_v1 = vmax.f32 %v4903_v56, 0.0  ;;  %5288 = vmatprep.mubr.f32.mxu0 %v13710_v37 }
 0x3a2   : > { %5545 = vmatprep.mubr.f32.mxu1 %v13710_v37  ;;  %v12987_v39 = vadd.f32 %v6258_v27, %v12911_v57  ;;  %v12990_v40 = vadd.f32 %v6260_v15, %v12914_v50  ;;  %v8575_v57 = vld [vmem:[%s13698_s1 + $0xe8] sm:$0xff] }
 0x3a3   : > { %v12993_v62 = vadd.f32 %v6259_v31, %v12917_v5  ;;  %v12996_v11 = vadd.f32 %v6261_v1, %v12920_v38  ;;  %v4650_v13 = vpop.f32.mrb[80].mxu0  ;;  %v4907_v34 = vpop.f32.mrb[80].mxu1 }
 0x3a4   : > { %v6338_v19 = vmax.f32 %v4650_v13, 0.0  ;;  %v6340_v54 = vmax.f32 %v4907_v34, 0.0  ;;  %v4652_v46 = vpop.f32.mrb[81].mxu0  ;;  %v4909_v22 = vpop.f32.mrb[81].mxu1  ;;  %7896 = vmatmul.mubr.msk.f32.gmra.mrb[186].mxu0 %vm539_vm2, %v8575_v57 }
 0x3a5   : > { %7928 = vmatmul.mubr.msk.f32.gmra.mrb[186].mxu1 %vm539_vm2, %v8575_v57  ;;  %v6339_v50 = vmax.f32 %v4652_v46, 0.0  ;;  %v6341_v5 = vmax.f32 %v4909_v22, 0.0  ;;  %5294 = vmatprep.mubr.f32.mxu0 %v13710_v37 }
 0x3a6   : > { %5551 = vmatprep.mubr.f32.mxu1 %v13710_v37  ;;  %v13006_v38 = vadd.f32 %v6338_v19, %v12930_v30  ;;  %v13009_v26 = vadd.f32 %v6340_v54, %v12933_v55  ;;  %v8576_v30 = vld [vmem:[%s13698_s1 + $0xf0] sm:$0xff] }
 0x3a7   : > { %v13012_v61 = vadd.f32 %v6339_v50, %v12936_v24  ;;  %v13015_v4 = vadd.f32 %v6341_v5, %v12939_v2  ;;  %v4656_v10 = vpop.f32.mrb[82].mxu0  ;;  %v4913_v49 = vpop.f32.mrb[82].mxu1 }
 0x3a8   : > { %v6354_v47 = vmax.f32 %v4656_v10, 0.0  ;;  %v6356_v44 = vmax.f32 %v4913_v49, 0.0  ;;  %v4658_v17 = vpop.f32.mrb[83].mxu0  ;;  %v4915_v32 = vpop.f32.mrb[83].mxu1  ;;  %7897 = vmatmul.mubr.msk.f32.gmra.mrb[188].mxu0 %vm539_vm2, %v8576_v30 }
 0x3a9   : > { %7929 = vmatmul.mubr.msk.f32.gmra.mrb[188].mxu1 %vm539_vm2, %v8576_v30  ;;  %v6355_v55 = vmax.f32 %v4658_v17, 0.0  ;;  %v6357_v24 = vmax.f32 %v4915_v32, 0.0  ;;  %5300 = vmatprep.mubr.f32.mxu0 %v13710_v37 }
 0x3aa   : > { %5557 = vmatprep.mubr.f32.mxu1 %v13710_v37  ;;  %v13025_v2 = vadd.f32 %v6354_v47, %v12949_v45  ;;  %v13028_v14 = vadd.f32 %v6356_v44, %v12952_v6  ;;  %v8577_v45 = vld [vmem:[%s13698_s1 + $0xf8] sm:$0xff] }
 0x3ab   : > { %v13031_v29 = vadd.f32 %v6355_v55, %v12955_v51  ;;  %v13034_v9 = vadd.f32 %v6357_v24, %v12958_v52  ;;  %v4662_v12 = vpop.f32.mrb[84].mxu0  ;;  %v4919_v33 = vpop.f32.mrb[84].mxu1 }
 0x3ac   : > { %v6370_v16 = vmax.f32 %v4662_v12, 0.0  ;;  %v6372_v48 = vmax.f32 %v4919_v33, 0.0  ;;  %v4664_v43 = vpop.f32.mrb[85].mxu0  ;;  %v4921_v59 = vpop.f32.mrb[85].mxu1  ;;  %7898 = vmatmul.mubr.msk.f32.gmra.mrb[190].mxu0 %vm539_vm2, %v8577_v45 }
 0x3ad   : > { %7930 = vmatmul.mubr.msk.f32.gmra.mrb[190].mxu1 %vm539_vm2, %v8577_v45  ;;  %v6371_v6 = vmax.f32 %v4664_v43, 0.0  ;;  %v6373_v51 = vmax.f32 %v4921_v59, 0.0  ;;  %5628 = vmatprep.mubr.f32.mxu0 %v13710_v37 }
 0x3ae   : > { %5885 = vmatprep.mubr.f32.mxu1 %v13710_v37  ;;  %v13044_v52 = vadd.f32 %v6370_v16, %v12968_v36  ;;  %v13047_v42 = vadd.f32 %v6372_v48, %v12971_v28  ;;  %v8578_v36 = vld [vmem:[%s13698_s1] sm:$0xff] }
 0x3af   : > { %v13050_v27 = vadd.f32 %v6371_v6, %v12974_v21  ;;  %v13053_v15 = vadd.f32 %v6373_v51, %v12977_v63  ;;  %v4668_v20 = vpop.f32.mrb[86].mxu0  ;;  %v4925_v56 = vpop.f32.mrb[86].mxu1 }
 0x3b0   : > { %v6386_v23 = vmax.f32 %v4668_v20, 0.0  ;;  %v6388_v31 = vmax.f32 %v4925_v56, 0.0  ;;  %v4670_v1 = vpop.f32.mrb[87].mxu0  ;;  %v4927_v13 = vpop.f32.mrb[87].mxu1  ;;  %7931 = vmatmul.mubr.msk.f32.vlgmr.msra.gmra.mrb[192].mxu0 %vm539_vm2, %v8578_v36 }
 0x3b1   : > { %7963 = vmatmul.mubr.msk.f32.vlgmr.msra.gmra.mrb[192].mxu1 %vm539_vm2, %v8578_v36  ;;  %v6387_v28 = vmax.f32 %v4670_v1, 0.0  ;;  %v6389_v21 = vmax.f32 %v4927_v13, 0.0  ;;  %5634 = vmatprep.mubr.f32.mxu0 %v13710_v37 }
 0x3b2   : > { %5891 = vmatprep.mubr.f32.mxu1 %v13710_v37  ;;  %v13063_v63 = vadd.f32 %v6386_v23, %v12987_v39  ;;  %v13066_v34 = vadd.f32 %v6388_v31, %v12990_v40  ;;  %v8579_v39 = vld [vmem:[%s13698_s1 + $0x8] sm:$0xff] }
 0x3b3   : > { %v13069_v19 = vadd.f32 %v6387_v28, %v12993_v62  ;;  %v13072_v54 = vadd.f32 %v6389_v21, %v12996_v11  ;;  %v4674_v46 = vpop.f32.mrb[88].mxu0  ;;  %v4931_v22 = vpop.f32.mrb[88].mxu1 }
 0x3b4   : > { %v6466_v57 = vmax.f32 %v4674_v46, 0.0  ;;  %v6468_v50 = vmax.f32 %v4931_v22, 0.0  ;;  %v4676_v5 = vpop.f32.mrb[89].mxu0  ;;  %v4933_v10 = vpop.f32.mrb[89].mxu1  ;;  %7932 = vmatmul.mubr.msk.f32.gmra.mrb[194].mxu0 %vm539_vm2, %v8579_v39 }
 0x3b5   : > { %7964 = vmatmul.mubr.msk.f32.gmra.mrb[194].mxu1 %vm539_vm2, %v8579_v39  ;;  %v6467_v40 = vmax.f32 %v4676_v5, 0.0  ;;  %v6469_v62 = vmax.f32 %v4933_v10, 0.0  ;;  %5640 = vmatprep.mubr.f32.mxu0 %v13710_v37 }
 0x3b6   : > { %5897 = vmatprep.mubr.f32.mxu1 %v13710_v37  ;;  %v13082_v11 = vadd.f32 %v6466_v57, %v13006_v38  ;;  %v13085_v49 = vadd.f32 %v6468_v50, %v13009_v26  ;;  %v8580_v38 = vld [vmem:[%s13698_s1 + $0x10] sm:$0xff] }
 0x3b7   : > { %v13088_v47 = vadd.f32 %v6467_v40, %v13012_v61  ;;  %v13091_v44 = vadd.f32 %v6469_v62, %v13015_v4  ;;  %v4680_v17 = vpop.f32.mrb[90].mxu0  ;;  %v4937_v32 = vpop.f32.mrb[90].mxu1 }
 0x3b8   : > { %v6482_v30 = vmax.f32 %v4680_v17, 0.0  ;;  %v6484_v55 = vmax.f32 %v4937_v32, 0.0  ;;  %v4682_v24 = vpop.f32.mrb[91].mxu0  ;;  %v4939_v12 = vpop.f32.mrb[91].mxu1  ;;  %7933 = vmatmul.mubr.msk.f32.gmra.mrb[196].mxu0 %vm539_vm2, %v8580_v38 }
 0x3b9   : > { %7965 = vmatmul.mubr.msk.f32.gmra.mrb[196].mxu1 %vm539_vm2, %v8580_v38  ;;  %v6483_v26 = vmax.f32 %v4682_v24, 0.0  ;;  %v6485_v61 = vmax.f32 %v4939_v12, 0.0  ;;  %5646 = vmatprep.mubr.f32.mxu0 %v13710_v37 }
 0x3ba   : > { %5903 = vmatprep.mubr.f32.mxu1 %v13710_v37  ;;  %v13101_v4 = vadd.f32 %v6482_v30, %v13025_v2  ;;  %v13104_v33 = vadd.f32 %v6484_v55, %v13028_v14  ;;  %v8581_v2 = vld [vmem:[%s13698_s1 + $0x18] sm:$0xff] }
 0x3bb   : > { %v13107_v16 = vadd.f32 %v6483_v26, %v13031_v29  ;;  %v13110_v48 = vadd.f32 %v6485_v61, %v13034_v9  ;;  %v4686_v43 = vpop.f32.mrb[92].mxu0  ;;  %v4943_v59 = vpop.f32.mrb[92].mxu1 }
 0x3bc   : > { %v6498_v45 = vmax.f32 %v4686_v43, 0.0  ;;  %v6500_v6 = vmax.f32 %v4943_v59, 0.0  ;;  %v4688_v51 = vpop.f32.mrb[93].mxu0  ;;  %v4945_v20 = vpop.f32.mrb[93].mxu1  ;;  %7934 = vmatmul.mubr.msk.f32.gmra.mrb[198].mxu0 %vm539_vm2, %v8581_v2 }
 0x3bd   : > { %7966 = vmatmul.mubr.msk.f32.gmra.mrb[198].mxu1 %vm539_vm2, %v8581_v2  ;;  %v6499_v14 = vmax.f32 %v4688_v51, 0.0  ;;  %v6501_v29 = vmax.f32 %v4945_v20, 0.0  ;;  %5652 = vmatprep.mubr.f32.mxu0 %v13710_v37 }
 0x3be   : > { %5909 = vmatprep.mubr.f32.mxu1 %v13710_v37  ;;  %v13120_v9 = vadd.f32 %v6498_v45, %v13044_v52  ;;  %v13123_v56 = vadd.f32 %v6500_v6, %v13047_v42  ;;  %v8582_v52 = vld [vmem:[%s13698_s1 + $0x20] sm:$0xff] }
 0x3bf   : > { %v13126_v23 = vadd.f32 %v6499_v14, %v13050_v27  ;;  %v13129_v31 = vadd.f32 %v6501_v29, %v13053_v15  ;;  %v4692_v1 = vpop.f32.mrb[94].mxu0  ;;  %v4949_v13 = vpop.f32.mrb[94].mxu1 }
 0x3c0   : > { %v6514_v36 = vmax.f32 %v4692_v1, 0.0  ;;  %v6516_v28 = vmax.f32 %v4949_v13, 0.0  ;;  %v4694_v21 = vpop.f32.mrb[95].mxu0  ;;  %v4951_v46 = vpop.f32.mrb[95].mxu1  ;;  %7935 = vmatmul.mubr.msk.f32.gmra.mrb[200].mxu0 %vm539_vm2, %v8582_v52 }
 0x3c1   : > { %7967 = vmatmul.mubr.msk.f32.gmra.mrb[200].mxu1 %vm539_vm2, %v8582_v52  ;;  %v6515_v42 = vmax.f32 %v4694_v21, 0.0  ;;  %v6517_v27 = vmax.f32 %v4951_v46, 0.0  ;;  %5658 = vmatprep.mubr.f32.mxu0 %v13710_v37 }
 0x3c2   : > { %5915 = vmatprep.mubr.f32.mxu1 %v13710_v37  ;;  %v13139_v15 = vadd.f32 %v6514_v36, %v13063_v63  ;;  %v13142_v22 = vadd.f32 %v6516_v28, %v13066_v34  ;;  %v8583_v63 = vld [vmem:[%s13698_s1 + $0x28] sm:$0xff] }
 0x3c3   : > { %v13145_v57 = vadd.f32 %v6515_v42, %v13069_v19  ;;  %v13148_v50 = vadd.f32 %v6517_v27, %v13072_v54  ;;  %v4698_v5 = vpop.f32.mrb[96].mxu0  ;;  %v4955_v10 = vpop.f32.mrb[96].mxu1 }
 0x3c4   : > { %v6594_v39 = vmax.f32 %v4698_v5, 0.0  ;;  %v6596_v40 = vmax.f32 %v4955_v10, 0.0  ;;  %v4700_v62 = vpop.f32.mrb[97].mxu0  ;;  %v4957_v17 = vpop.f32.mrb[97].mxu1  ;;  %7936 = vmatmul.mubr.msk.f32.gmra.mrb[202].mxu0 %vm539_vm2, %v8583_v63 }
 0x3c5   : > { %7968 = vmatmul.mubr.msk.f32.gmra.mrb[202].mxu1 %vm539_vm2, %v8583_v63  ;;  %v6595_v34 = vmax.f32 %v4700_v62, 0.0  ;;  %v6597_v19 = vmax.f32 %v4957_v17, 0.0  ;;  %5664 = vmatprep.mubr.f32.mxu0 %v13710_v37 }
 0x3c6   : > { %5921 = vmatprep.mubr.f32.mxu1 %v13710_v37  ;;  %v13158_v54 = vadd.f32 %v6594_v39, %v13082_v11  ;;  %v13161_v32 = vadd.f32 %v6596_v40, %v13085_v49  ;;  %v8584_v11 = vld [vmem:[%s13698_s1 + $0x30] sm:$0xff] }
 0x3c7   : > { %v13164_v30 = vadd.f32 %v6595_v34, %v13088_v47  ;;  %v13167_v55 = vadd.f32 %v6597_v19, %v13091_v44  ;;  %v4704_v24 = vpop.f32.mrb[98].mxu0  ;;  %v4961_v12 = vpop.f32.mrb[98].mxu1 }
 0x3c8   : > { %v6610_v38 = vmax.f32 %v4704_v24, 0.0  ;;  %v6612_v26 = vmax.f32 %v4961_v12, 0.0  ;;  %v4706_v61 = vpop.f32.mrb[99].mxu0  ;;  %v4963_v43 = vpop.f32.mrb[99].mxu1  ;;  %7937 = vmatmul.mubr.msk.f32.gmra.mrb[204].mxu0 %vm539_vm2, %v8584_v11 }
 0x3c9   : > { %7969 = vmatmul.mubr.msk.f32.gmra.mrb[204].mxu1 %vm539_vm2, %v8584_v11  ;;  %v6611_v49 = vmax.f32 %v4706_v61, 0.0  ;;  %v6613_v47 = vmax.f32 %v4963_v43, 0.0  ;;  %5670 = vmatprep.mubr.f32.mxu0 %v13710_v37 }
 0x3ca   : > { %5927 = vmatprep.mubr.f32.mxu1 %v13710_v37  ;;  %v13177_v44 = vadd.f32 %v6610_v38, %v13101_v4  ;;  %v13180_v59 = vadd.f32 %v6612_v26, %v13104_v33  ;;  %v8585_v4 = vld [vmem:[%s13698_s1 + $0x38] sm:$0xff] }
 0x3cb   : > { %v13183_v45 = vadd.f32 %v6611_v49, %v13107_v16  ;;  %v13186_v6 = vadd.f32 %v6613_v47, %v13110_v48  ;;  %v4710_v51 = vpop.f32.mrb[100].mxu0  ;;  %v4967_v20 = vpop.f32.mrb[100].mxu1 }
 0x3cc   : > { %v6626_v2 = vmax.f32 %v4710_v51, 0.0  ;;  %v6628_v14 = vmax.f32 %v4967_v20, 0.0  ;;  %v4712_v29 = vpop.f32.mrb[101].mxu0  ;;  %v4969_v1 = vpop.f32.mrb[101].mxu1  ;;  %7938 = vmatmul.mubr.msk.f32.gmra.mrb[206].mxu0 %vm539_vm2, %v8585_v4 }
 0x3cd   : > { %7970 = vmatmul.mubr.msk.f32.gmra.mrb[206].mxu1 %vm539_vm2, %v8585_v4  ;;  %v6627_v33 = vmax.f32 %v4712_v29, 0.0  ;;  %v6629_v16 = vmax.f32 %v4969_v1, 0.0  ;;  %5676 = vmatprep.mubr.f32.mxu0 %v13710_v37 }
 0x3ce   : > { %5933 = vmatprep.mubr.f32.mxu1 %v13710_v37  ;;  %v13196_v48 = vadd.f32 %v6626_v2, %v13120_v9  ;;  %v13199_v13 = vadd.f32 %v6628_v14, %v13123_v56  ;;  %v8586_v9 = vld [vmem:[%s13698_s1 + $0x40] sm:$0xff] }
 0x3cf   : > { %v13202_v36 = vadd.f32 %v6627_v33, %v13126_v23  ;;  %v13205_v28 = vadd.f32 %v6629_v16, %v13129_v31  ;;  %v4716_v21 = vpop.f32.mrb[102].mxu0  ;;  %v4973_v46 = vpop.f32.mrb[102].mxu1 }
 0x3d0   : > { %v6642_v52 = vmax.f32 %v4716_v21, 0.0  ;;  %v6644_v42 = vmax.f32 %v4973_v46, 0.0  ;;  %v4718_v27 = vpop.f32.mrb[103].mxu0  ;;  %v4975_v5 = vpop.f32.mrb[103].mxu1  ;;  %7939 = vmatmul.mubr.msk.f32.gmra.mrb[208].mxu0 %vm539_vm2, %v8586_v9 }
 0x3d1   : > { %7971 = vmatmul.mubr.msk.f32.gmra.mrb[208].mxu1 %vm539_vm2, %v8586_v9  ;;  %v6643_v56 = vmax.f32 %v4718_v27, 0.0  ;;  %v6645_v23 = vmax.f32 %v4975_v5, 0.0  ;;  %5682 = vmatprep.mubr.f32.mxu0 %v13710_v37 }
 0x3d2   : > { %5939 = vmatprep.mubr.f32.mxu1 %v13710_v37  ;;  %v13215_v31 = vadd.f32 %v6642_v52, %v13139_v15  ;;  %v13218_v10 = vadd.f32 %v6644_v42, %v13142_v22  ;;  %v8587_v15 = vld [vmem:[%s13698_s1 + $0x48] sm:$0xff] }
 0x3d3   : > { %v13221_v39 = vadd.f32 %v6643_v56, %v13145_v57  ;;  %v13224_v40 = vadd.f32 %v6645_v23, %v13148_v50  ;;  %v4722_v62 = vpop.f32.mrb[104].mxu0  ;;  %v4979_v17 = vpop.f32.mrb[104].mxu1 }
 0x3d4   : > { %v6722_v63 = vmax.f32 %v4722_v62, 0.0  ;;  %v6724_v34 = vmax.f32 %v4979_v17, 0.0  ;;  %v4724_v19 = vpop.f32.mrb[105].mxu0  ;;  %v4981_v24 = vpop.f32.mrb[105].mxu1  ;;  %7940 = vmatmul.mubr.msk.f32.gmra.mrb[210].mxu0 %vm539_vm2, %v8587_v15 }
 0x3d5   : > { %7972 = vmatmul.mubr.msk.f32.gmra.mrb[210].mxu1 %vm539_vm2, %v8587_v15  ;;  %v6723_v22 = vmax.f32 %v4724_v19, 0.0  ;;  %v6725_v57 = vmax.f32 %v4981_v24, 0.0  ;;  %5688 = vmatprep.mubr.f32.mxu0 %v13710_v37 }
 0x3d6   : > { %5945 = vmatprep.mubr.f32.mxu1 %v13710_v37  ;;  %v13234_v50 = vadd.f32 %v6722_v63, %v13158_v54  ;;  %v13237_v12 = vadd.f32 %v6724_v34, %v13161_v32  ;;  %v8588_v54 = vld [vmem:[%s13698_s1 + $0x50] sm:$0xff] }
 0x3d7   : > { %v13240_v38 = vadd.f32 %v6723_v22, %v13164_v30  ;;  %v13243_v26 = vadd.f32 %v6725_v57, %v13167_v55  ;;  %v4728_v61 = vpop.f32.mrb[106].mxu0  ;;  %v4985_v43 = vpop.f32.mrb[106].mxu1 }
 0x3d8   : > { %v6738_v11 = vmax.f32 %v4728_v61, 0.0  ;;  %v6740_v49 = vmax.f32 %v4985_v43, 0.0  ;;  %v4730_v47 = vpop.f32.mrb[107].mxu0  ;;  %v4987_v51 = vpop.f32.mrb[107].mxu1  ;;  %7941 = vmatmul.mubr.msk.f32.gmra.mrb[212].mxu0 %vm539_vm2, %v8588_v54 }
 0x3d9   : > { %7973 = vmatmul.mubr.msk.f32.gmra.mrb[212].mxu1 %vm539_vm2, %v8588_v54  ;;  %v6739_v32 = vmax.f32 %v4730_v47, 0.0  ;;  %v6741_v30 = vmax.f32 %v4987_v51, 0.0  ;;  %5694 = vmatprep.mubr.f32.mxu0 %v13710_v37 }
 0x3da   : > { %5951 = vmatprep.mubr.f32.mxu1 %v13710_v37  ;;  %v13253_v55 = vadd.f32 %v6738_v11, %v13177_v44  ;;  %v13256_v20 = vadd.f32 %v6740_v49, %v13180_v59  ;;  %v8589_v44 = vld [vmem:[%s13698_s1 + $0x58] sm:$0xff] }
 0x3db   : > { %v13259_v2 = vadd.f32 %v6739_v32, %v13183_v45  ;;  %v13262_v14 = vadd.f32 %v6741_v30, %v13186_v6  ;;  %v4734_v29 = vpop.f32.mrb[108].mxu0  ;;  %v4991_v1 = vpop.f32.mrb[108].mxu1 }
 0x3dc   : > { %v6754_v4 = vmax.f32 %v4734_v29, 0.0  ;;  %v6756_v33 = vmax.f32 %v4991_v1, 0.0  ;;  %v4736_v16 = vpop.f32.mrb[109].mxu0  ;;  %v4993_v21 = vpop.f32.mrb[109].mxu1  ;;  %7942 = vmatmul.mubr.msk.f32.gmra.mrb[214].mxu0 %vm539_vm2, %v8589_v44 }
 0x3dd   : > { %7974 = vmatmul.mubr.msk.f32.gmra.mrb[214].mxu1 %vm539_vm2, %v8589_v44  ;;  %v6755_v59 = vmax.f32 %v4736_v16, 0.0  ;;  %v6757_v45 = vmax.f32 %v4993_v21, 0.0  ;;  %5700 = vmatprep.mubr.f32.mxu0 %v13710_v37 }
 0x3de   : > { %5957 = vmatprep.mubr.f32.mxu1 %v13710_v37  ;;  %v13272_v6 = vadd.f32 %v6754_v4, %v13196_v48  ;;  %v13275_v46 = vadd.f32 %v6756_v33, %v13199_v13  ;;  %v8590_v48 = vld [vmem:[%s13698_s1 + $0x60] sm:$0xff] }
 0x3df   : > { %v13278_v52 = vadd.f32 %v6755_v59, %v13202_v36  ;;  %v13281_v42 = vadd.f32 %v6757_v45, %v13205_v28  ;;  %v4740_v27 = vpop.f32.mrb[110].mxu0  ;;  %v4997_v5 = vpop.f32.mrb[110].mxu1 }
 0x3e0   : > { %v6770_v9 = vmax.f32 %v4740_v27, 0.0  ;;  %v6772_v56 = vmax.f32 %v4997_v5, 0.0  ;;  %v4742_v23 = vpop.f32.mrb[111].mxu0  ;;  %v4999_v62 = vpop.f32.mrb[111].mxu1  ;;  %7943 = vmatmul.mubr.msk.f32.gmra.mrb[216].mxu0 %vm539_vm2, %v8590_v48 }
 0x3e1   : > { %7975 = vmatmul.mubr.msk.f32.gmra.mrb[216].mxu1 %vm539_vm2, %v8590_v48  ;;  %v6771_v13 = vmax.f32 %v4742_v23, 0.0  ;;  %v6773_v36 = vmax.f32 %v4999_v62, 0.0  ;;  %5706 = vmatprep.mubr.f32.mxu0 %v13710_v37 }
 0x3e2   : > { %5963 = vmatprep.mubr.f32.mxu1 %v13710_v37  ;;  %v13291_v28 = vadd.f32 %v6770_v9, %v13215_v31  ;;  %v13294_v17 = vadd.f32 %v6772_v56, %v13218_v10  ;;  %v8591_v31 = vld [vmem:[%s13698_s1 + $0x68] sm:$0xff] }
 0x3e3   : > { %v13297_v63 = vadd.f32 %v6771_v13, %v13221_v39  ;;  %v13300_v34 = vadd.f32 %v6773_v36, %v13224_v40  ;;  %v4746_v19 = vpop.f32.mrb[112].mxu0  ;;  %v5003_v24 = vpop.f32.mrb[112].mxu1 }
 0x3e4   : > { %v6850_v15 = vmax.f32 %v4746_v19, 0.0  ;;  %v6852_v22 = vmax.f32 %v5003_v24, 0.0  ;;  %v4748_v57 = vpop.f32.mrb[113].mxu0  ;;  %v5005_v61 = vpop.f32.mrb[113].mxu1  ;;  %7944 = vmatmul.mubr.msk.f32.gmra.mrb[218].mxu0 %vm539_vm2, %v8591_v31 }
 0x3e5   : > { %7976 = vmatmul.mubr.msk.f32.gmra.mrb[218].mxu1 %vm539_vm2, %v8591_v31  ;;  %v6851_v10 = vmax.f32 %v4748_v57, 0.0  ;;  %v6853_v39 = vmax.f32 %v5005_v61, 0.0  ;;  %5712 = vmatprep.mubr.f32.mxu0 %v13710_v37 }
 0x3e6   : > { %5969 = vmatprep.mubr.f32.mxu1 %v13710_v37  ;;  %v13310_v40 = vadd.f32 %v6850_v15, %v13234_v50  ;;  %v13313_v43 = vadd.f32 %v6852_v22, %v13237_v12  ;;  %v8592_v50 = vld [vmem:[%s13698_s1 + $0x70] sm:$0xff] }
 0x3e7   : > { %v13316_v11 = vadd.f32 %v6851_v10, %v13240_v38  ;;  %v13319_v49 = vadd.f32 %v6853_v39, %v13243_v26  ;;  %v4752_v47 = vpop.f32.mrb[114].mxu0  ;;  %v5009_v51 = vpop.f32.mrb[114].mxu1 }
 0x3e8   : > { %v6866_v54 = vmax.f32 %v4752_v47, 0.0  ;;  %v6868_v32 = vmax.f32 %v5009_v51, 0.0  ;;  %v4754_v30 = vpop.f32.mrb[115].mxu0  ;;  %v5011_v29 = vpop.f32.mrb[115].mxu1  ;;  %7945 = vmatmul.mubr.msk.f32.gmra.mrb[220].mxu0 %vm539_vm2, %v8592_v50 }
 0x3e9   : > { %7977 = vmatmul.mubr.msk.f32.gmra.mrb[220].mxu1 %vm539_vm2, %v8592_v50  ;;  %v6867_v12 = vmax.f32 %v4754_v30, 0.0  ;;  %v6869_v38 = vmax.f32 %v5011_v29, 0.0  ;;  %5718 = vmatprep.mubr.f32.mxu0 %v13710_v37 }
 0x3ea   : > { %5975 = vmatprep.mubr.f32.mxu1 %v13710_v37  ;;  %v13329_v26 = vadd.f32 %v6866_v54, %v13253_v55  ;;  %v13332_v1 = vadd.f32 %v6868_v32, %v13256_v20  ;;  %v8593_v55 = vld [vmem:[%s13698_s1 + $0x78] sm:$0xff] }
 0x3eb   : > { %v13335_v4 = vadd.f32 %v6867_v12, %v13259_v2  ;;  %v13338_v33 = vadd.f32 %v6869_v38, %v13262_v14  ;;  %v4758_v16 = vpop.f32.mrb[116].mxu0  ;;  %v5015_v21 = vpop.f32.mrb[116].mxu1 }
 0x3ec   : > { %v6882_v44 = vmax.f32 %v4758_v16, 0.0  ;;  %v6884_v59 = vmax.f32 %v5015_v21, 0.0  ;;  %v4760_v45 = vpop.f32.mrb[117].mxu0  ;;  %v5017_v27 = vpop.f32.mrb[117].mxu1  ;;  %7946 = vmatmul.mubr.msk.f32.gmra.mrb[222].mxu0 %vm539_vm2, %v8593_v55 }
 0x3ed   : > { %7978 = vmatmul.mubr.msk.f32.gmra.mrb[222].mxu1 %vm539_vm2, %v8593_v55  ;;  %v6883_v20 = vmax.f32 %v4760_v45, 0.0  ;;  %v6885_v2 = vmax.f32 %v5017_v27, 0.0  ;;  %5724 = vmatprep.mubr.f32.mxu0 %v13710_v37 }
 0x3ee   : > { %5981 = vmatprep.mubr.f32.mxu1 %v13710_v37  ;;  %v13348_v14 = vadd.f32 %v6882_v44, %v13272_v6  ;;  %v13351_v5 = vadd.f32 %v6884_v59, %v13275_v46  ;;  %v8594_v6 = vld [vmem:[%s13698_s1 + $0x80] sm:$0xff]  ;;  %v8596_v44 = vld [vmem:[%s13698_s1 + $0x90] sm:$0xff] }
 0x3ef   : > { %v13354_v9 = vadd.f32 %v6883_v20, %v13278_v52  ;;  %v13357_v56 = vadd.f32 %v6885_v2, %v13281_v42  ;;  %v4764_v23 = vpop.f32.mrb[118].mxu0  ;;  %v5021_v62 = vpop.f32.mrb[118].mxu1 }
 0x3f0   : > { %v6898_v48 = vmax.f32 %v4764_v23, 0.0  ;;  %v6900_v13 = vmax.f32 %v5021_v62, 0.0  ;;  %v4766_v36 = vpop.f32.mrb[119].mxu0  ;;  %v5023_v19 = vpop.f32.mrb[119].mxu1  ;;  %7947 = vmatmul.mubr.msk.f32.gmra.mrb[224].mxu0 %vm539_vm2, %v8594_v6 }
 0x3f1   : > { %7979 = vmatmul.mubr.msk.f32.gmra.mrb[224].mxu1 %vm539_vm2, %v8594_v6  ;;  %v6899_v46 = vmax.f32 %v4766_v36, 0.0  ;;  %v6901_v52 = vmax.f32 %v5023_v19, 0.0  ;;  %5730 = vmatprep.mubr.f32.mxu0 %v13710_v37  ;;  %v8597_v36 = vld [vmem:[%s13698_s1 + $0x98] sm:$0xff] }
 0x3f2   : > { %5987 = vmatprep.mubr.f32.mxu1 %v13710_v37  ;;  %v13367_v42 = vadd.f32 %v6898_v48, %v13291_v28  ;;  %v13370_v24 = vadd.f32 %v6900_v13, %v13294_v17  ;;  %v8595_v28 = vld [vmem:[%s13698_s1 + $0x88] sm:$0xff] }
 0x3f3   : > { %v13373_v15 = vadd.f32 %v6899_v46, %v13297_v63  ;;  %v13376_v22 = vadd.f32 %v6901_v52, %v13300_v34  ;;  %v4770_v57 = vpop.f32.mrb[120].mxu0  ;;  %v5027_v61 = vpop.f32.mrb[120].mxu1 }
 0x3f4   : > { %v6978_v31 = vmax.f32 %v4770_v57, 0.0  ;;  %v6980_v10 = vmax.f32 %v5027_v61, 0.0  ;;  %v4772_v39 = vpop.f32.mrb[121].mxu0  ;;  %v5029_v47 = vpop.f32.mrb[121].mxu1  ;;  %7948 = vmatmul.mubr.msk.f32.gmra.mrb[226].mxu0 %vm539_vm2, %v8595_v28 }
 0x3f5   : > { %7980 = vmatmul.mubr.msk.f32.gmra.mrb[226].mxu1 %vm539_vm2, %v8595_v28  ;;  %v6979_v17 = vmax.f32 %v4772_v39, 0.0  ;;  %v6981_v63 = vmax.f32 %v5029_v47, 0.0  ;;  %5736 = vmatprep.mubr.f32.mxu0 %v13710_v37 }
 0x3f6   : > { %5993 = vmatprep.mubr.f32.mxu1 %v13710_v37  ;;  %v7042_v34 = vadd.f32 %v6978_v31, %v13310_v40  ;;  %v7044_v51 = vadd.f32 %v6980_v10, %v13313_v43 }
 0x3f7   : > { %v7043_v54 = vadd.f32 %v6979_v17, %v13316_v11  ;;  %v7045_v32 = vadd.f32 %v6981_v63, %v13319_v49  ;;  %v4776_v30 = vpop.f32.mrb[122].mxu0  ;;  %v5033_v29 = vpop.f32.mrb[122].mxu1  ;;  %v8598_v17 = vld [vmem:[%s13698_s1 + $0xa0] sm:$0xff] }
 0x3f8   : > { %v7114_v50 = vadd.f32 %v12821_v41, %v7042_v34  ;;  %v6994_v12 = vmax.f32 %v4776_v30, 0.0  ;;  %v6996_v38 = vmax.f32 %v5033_v29, 0.0  ;;  %v4778_v16 = vpop.f32.mrb[123].mxu0  ;;  %v5035_v21 = vpop.f32.mrb[123].mxu1  ;;  %7949 = vmatmul.mubr.msk.f32.gmra.mrb[228].mxu0 %vm539_vm2, %v8596_v44 }
 0x3f9   : > { %7981 = vmatmul.mubr.msk.f32.gmra.mrb[228].mxu1 %vm539_vm2, %v8596_v44  ;;  %v6995_v40 = vmax.f32 %v4778_v16, 0.0  ;;  %v6997_v43 = vmax.f32 %v5035_v21, 0.0  ;;  %5742 = vmatprep.mubr.f32.mxu0 %v13710_v37  ;;  %v8599_v21 = vld [vmem:[%s13698_s1 + $0xa8] sm:$0xff] }
 0x3fa   : > { %5999 = vmatprep.mubr.f32.mxu1 %v13710_v37  ;;  %v7118_v11 = vadd.f32 %v7114_v50, %v7043_v54  ;;  %v7058_v41 = vadd.f32 %v6994_v12, %v13329_v26  ;;  %v7060_v49 = vadd.f32 %v6996_v38, %v13332_v1 }
 0x3fb   : > { %v7059_v59 = vadd.f32 %v6995_v40, %v13335_v4  ;;  %v7061_v45 = vadd.f32 %v6997_v43, %v13338_v33  ;;  %v4782_v27 = vpop.f32.mrb[124].mxu0  ;;  %v5039_v55 = vpop.f32.mrb[124].mxu1  ;;  %v13802_v40 = vld [vmem:[#allocation25_spill] sm:$0xff] }
 0x3fc   : > { %v7122_v20 = vadd.f32 %v7118_v11, %v7044_v51  ;;  %v7115_v2 = vadd.f32 %v12834_v7, %v7058_v41  ;;  %v7010_v23 = vmax.f32 %v4782_v27, 0.0  ;;  %v7012_v62 = vmax.f32 %v5039_v55, 0.0  ;;  %v4784_v48 = vpop.f32.mrb[125].mxu0  ;;  %v5041_v13 = vpop.f32.mrb[125].mxu1  ;;  %7950 = vmatmul.mubr.msk.f32.gmra.mrb[230].mxu0 %vm539_vm2, %v8597_v36  ;;  %v13803_v11 = vld [vmem:[#allocation26_spill] sm:$0xff] }
 0x3fd   : > { %7982 = vmatmul.mubr.msk.f32.gmra.mrb[230].mxu1 %vm539_vm2, %v8597_v36  ;;  %v7011_v26 = vmax.f32 %v4784_v48, 0.0  ;;  %v7013_v1 = vmax.f32 %v5041_v13, 0.0  ;;  %5748 = vmatprep.mubr.f32.mxu0 %v13710_v37  ;;  %v8600_v48 = vld [vmem:[%s13698_s1 + $0xb0] sm:$0xff] }
 0x3fe   : > { %6005 = vmatprep.mubr.f32.mxu1 %v13710_v37  ;;  %v13409_v4 = vadd.f32 %v7122_v20, %v7045_v32  ;;  %v7119_v7 = vadd.f32 %v7115_v2, %v7059_v59  ;;  %v7074_v33 = vadd.f32 %v7010_v23, %v13348_v14  ;;  %v7076_v19 = vadd.f32 %v7012_v62, %v13351_v5 }
 0x3ff   : > { %v7075_v6 = vadd.f32 %v7011_v26, %v13354_v9  ;;  %v7077_v46 = vadd.f32 %v7013_v1, %v13357_v56  ;;  %v4788_v52 = vpop.f32.mrb[126].mxu0  ;;  %v5045_v57 = vpop.f32.mrb[126].mxu1  ;;  %v13805_v1 = vld [vmem:[#allocation28_spill] sm:$0xff] }
 0x400   : > { %v7123_v61 = vadd.f32 %v7119_v7, %v7060_v49  ;;  %v7116_v31 = vadd.f32 %v12847_v35, %v7074_v33  ;;  %v7026_v10 = vmax.f32 %v4788_v52, 0.0  ;;  %v7028_v39 = vmax.f32 %v5045_v57, 0.0  ;;  %v4790_v47 = vpop.f32.mrb[127].mxu0  ;;  %v5047_v28 = vpop.f32.mrb[127].mxu1  ;;  %7951 = vmatmul.mubr.msk.f32.gmra.mrb[232].mxu0 %vm539_vm2, %v8598_v17  ;;  %v13804_v49 = vld [vmem:[#allocation27_spill] sm:$0xff]  ;;  %v13806_v33 = vld [vmem:[#allocation29_spill] sm:$0xff] }
 0x401   : > { %7983 = vmatmul.mubr.msk.f32.gmra.mrb[232].mxu1 %vm539_vm2, %v8598_v17  ;;  %v7027_v14 = vmax.f32 %v4790_v47, 0.0  ;;  %v7029_v5 = vmax.f32 %v5047_v28, 0.0  ;;  %5754 = vmatprep.mubr.f32.mxu0 %v13710_v37  ;;  %v13808_v52 = vld [vmem:[#allocation31_spill] sm:$0xff]  ;;  %v8601_v17 = vld [vmem:[%s13698_s1 + $0xb8] sm:$0xff] }
 0x402   : > { %6011 = vmatprep.mubr.f32.mxu1 %v13710_v37  ;;  %v13423_v9 = vadd.f32 %v7123_v61, %v7061_v45  ;;  %v7120_v35 = vadd.f32 %v7116_v31, %v7075_v6  ;;  %v7090_v56 = vadd.f32 %v7026_v10, %v13367_v42  ;;  %v7092_v63 = vadd.f32 %v7028_v39, %v13370_v24  ;;  %v13807_v6 = vld [vmem:[#allocation30_spill] sm:$0xff] }
 0x403   : > { %v7091_v34 = vadd.f32 %v7027_v14, %v13373_v15  ;;  %v7093_v51 = vadd.f32 %v7029_v5, %v13376_v22  ;;  %v5116_v54 = vpop.f32.mrb[128].mxu0  ;;  %v5373_v32 = vpop.f32.mrb[128].mxu1  ;;  %v13801_v22 = vld [vmem:[#allocation24_spill] sm:$0xff] }
 0x404   : > { %v7124_v30 = vadd.f32 %v7120_v35, %v7076_v19  ;;  %v7117_v29 = vadd.f32 %v12868_v53, %v7090_v56  ;;  %v6086_v50 = vmax.f32 %v5116_v54, 0.0  ;;  %v6088_v12 = vmax.f32 %v5373_v32, 0.0  ;;  %v5118_v38 = vpop.f32.mrb[129].mxu0  ;;  %v5375_v16 = vpop.f32.mrb[129].mxu1  ;;  %7952 = vmatmul.mubr.msk.f32.gmra.mrb[234].mxu0 %vm539_vm2, %v8599_v21  ;;  %v13809_v35 = vld [vmem:[#allocation32_spill] sm:$0xff]  ;;  %v13812_v32 = vld [vmem:[#allocation35_spill] sm:$0xff] }
 0x405   : > { %7984 = vmatmul.mubr.msk.f32.gmra.mrb[234].mxu1 %vm539_vm2, %v8599_v21  ;;  %v6087_v42 = vmax.f32 %v5118_v38, 0.0  ;;  %v6089_v24 = vmax.f32 %v5375_v16, 0.0  ;;  %5760 = vmatprep.mubr.f32.mxu0 %v13710_v37 }
 0x406   : > { %6017 = vmatprep.mubr.f32.mxu1 %v13710_v37  ;;  %v13437_v15 = vadd.f32 %v7124_v30, %v7077_v46  ;;  %v7121_v53 = vadd.f32 %v7117_v29, %v7091_v34  ;;  %v13440_v44 = vadd.f32 %v6086_v50, %v13801_v22  ;;  %v13443_v43 = vadd.f32 %v6088_v12, %v13802_v40  ;;  %v13813_v22 = vld [vmem:[#allocation36_spill] sm:$0xff] }
 0x407   : > { %v13446_v41 = vadd.f32 %v6087_v42, %v13803_v11  ;;  %v13449_v59 = vadd.f32 %v6089_v24, %v13804_v49  ;;  %v5122_v45 = vpop.f32.mrb[130].mxu0  ;;  %v8602_v42 = vld [vmem:[%s13698_s1 + $0xc0] sm:$0xff]  ;;  %v13814_v11 = vld [vmem:[#allocation37_spill] sm:$0xff] }
 0x408   : > { %v5379_v27 = vpop.f32.mrb[130].mxu1  ;;  %v7125_v55 = vadd.f32 %v7121_v53, %v7092_v63  ;;  %v6102_v20 = vmax.f32 %v5122_v45, 0.0  ;;  %v5124_v23 = vpop.f32.mrb[131].mxu0  ;;  %7953 = vmatmul.mubr.msk.f32.gmra.mrb[236].mxu0 %vm539_vm2, %v8600_v48  ;;  %v13810_v63 = vld [vmem:[#allocation33_spill] sm:$0xff]  ;;  %v13815_v45 = vld [vmem:[#allocation38_spill] sm:$0xff] }
 0x409   : > { %v6104_v2 = vmax.f32 %v5379_v27, 0.0  ;;  %v5381_v62 = vpop.f32.mrb[131].mxu1  ;;  %7985 = vmatmul.mubr.msk.f32.gmra.mrb[236].mxu1 %vm539_vm2, %v8600_v48  ;;  %v6103_v13 = vmax.f32 %v5124_v23, 0.0  ;;  %5766 = vmatprep.mubr.f32.mxu0 %v13710_v37 }
 0x40a   : > { %v6105_v36 = vmax.f32 %v5381_v62, 0.0  ;;  %6023 = vmatprep.mubr.f32.mxu1 %v13710_v37  ;;  %v13458_v26 = vadd.f32 %v7125_v55, %v7093_v51  ;;  %v13461_v7 = vadd.f32 %v6102_v20, %v13805_v1  ;;  %v13811_v51 = vld [vmem:[#allocation34_spill] sm:$0xff]  ;;  %v13816_v55 = vld [vmem:[#allocation39_spill] sm:$0xff] }
 0x40b   : > { %v13464_v19 = vadd.f32 %v6104_v2, %v13806_v33  ;;  %v13467_v46 = vadd.f32 %v6103_v13, %v13807_v6  ;;  %v5128_v61 = vpop.f32.mrb[132].mxu0  ;;  %v8603_v1 = vld [vmem:[%s13698_s1 + $0xc8] sm:$0xff] }
 0x40c   : > { %v13470_v57 = vadd.f32 %v6105_v36, %v13808_v52  ;;  %v5385_v31 = vpop.f32.mrb[132].mxu1  ;;  %v6118_v10 = vmax.f32 %v5128_v61, 0.0  ;;  %v5130_v47 = vpop.f32.mrb[133].mxu0  ;;  %7954 = vmatmul.mubr.msk.f32.gmra.mrb[238].mxu0 %vm539_vm2, %v8601_v17 }
 0x40d   : > { %v6120_v39 = vmax.f32 %v5385_v31, 0.0  ;;  %v5387_v28 = vpop.f32.mrb[133].mxu1  ;;  %7986 = vmatmul.mubr.msk.f32.gmra.mrb[238].mxu1 %vm539_vm2, %v8601_v17  ;;  %v6119_v14 = vmax.f32 %v5130_v47, 0.0  ;;  %5772 = vmatprep.mubr.f32.mxu0 %v13710_v37 }
 0x40e   : > { %v6121_v5 = vmax.f32 %v5387_v28, 0.0  ;;  %6029 = vmatprep.mubr.f32.mxu1 %v13710_v37  ;;  %v13480_v56 = vadd.f32 %v6118_v10, %v13809_v35 }
 0x40f   : > { %v13483_v34 = vadd.f32 %v6120_v39, %v13810_v63  ;;  %v13486_v54 = vadd.f32 %v6119_v14, %v13811_v51  ;;  %v5134_v29 = vpop.f32.mrb[134].mxu0 }
 0x410   : > { %v13489_v30 = vadd.f32 %v6121_v5, %v13812_v32  ;;  %v5391_v50 = vpop.f32.mrb[134].mxu1  ;;  %v6134_v12 = vmax.f32 %v5134_v29, 0.0  ;;  %v5136_v16 = vpop.f32.mrb[135].mxu0  ;;  %7955 = vmatmul.mubr.msk.f32.gmra.mrb[240].mxu0 %vm539_vm2, %v8602_v42 }
 0x411   : > { %v6136_v38 = vmax.f32 %v5391_v50, 0.0  ;;  %v5393_v21 = vpop.f32.mrb[135].mxu1  ;;  %7987 = vmatmul.mubr.msk.f32.gmra.mrb[240].mxu1 %vm539_vm2, %v8602_v42  ;;  %v6135_v24 = vmax.f32 %v5136_v16, 0.0  ;;  %5778 = vmatprep.mubr.f32.mxu0 %v13710_v37 }
 0x412   : > { %v6137_v53 = vmax.f32 %v5393_v21, 0.0  ;;  %6035 = vmatprep.mubr.f32.mxu1 %v13710_v37  ;;  %v13499_v40 = vadd.f32 %v6134_v12, %v13813_v22 }
 0x413   : > { %v13502_v49 = vadd.f32 %v6136_v38, %v13814_v11  ;;  %v13505_v27 = vadd.f32 %v6135_v24, %v13815_v45  ;;  %v5140_v2 = vpop.f32.mrb[136].mxu0 }
 0x414   : > { %v13508_v20 = vadd.f32 %v6137_v53, %v13816_v55  ;;  %v5397_v23 = vpop.f32.mrb[136].mxu1  ;;  %v6214_v62 = vmax.f32 %v5140_v2, 0.0  ;;  %v5142_v13 = vpop.f32.mrb[137].mxu0  ;;  %7956 = vmatmul.mubr.msk.f32.gmra.mrb[242].mxu0 %vm539_vm2, %v8603_v1 }
 0x415   : > { %v6216_v48 = vmax.f32 %v5397_v23, 0.0  ;;  %v5399_v36 = vpop.f32.mrb[137].mxu1  ;;  %7988 = vmatmul.mubr.msk.f32.gmra.mrb[242].mxu1 %vm539_vm2, %v8603_v1  ;;  %v6215_v33 = vmax.f32 %v5142_v13, 0.0  ;;  %5784 = vmatprep.mubr.f32.mxu0 %v13710_v37 }
 0x416   : > { %v6217_v6 = vmax.f32 %v5399_v36, 0.0  ;;  %6041 = vmatprep.mubr.f32.mxu1 %v13710_v37  ;;  %v13518_v52 = vadd.f32 %v6214_v62, %v13440_v44  ;;  %v8604_v44 = vld [vmem:[%s13698_s1 + $0xd0] sm:$0xff] }
 0x417   : > { %v13521_v61 = vadd.f32 %v6216_v48, %v13443_v43  ;;  %v13524_v31 = vadd.f32 %v6215_v33, %v13446_v41  ;;  %v5146_v39 = vpop.f32.mrb[138].mxu0 }
 0x418   : > { %v13527_v10 = vadd.f32 %v6217_v6, %v13449_v59  ;;  %v5403_v47 = vpop.f32.mrb[138].mxu1  ;;  %v6230_v28 = vmax.f32 %v5146_v39, 0.0  ;;  %v5148_v14 = vpop.f32.mrb[139].mxu0  ;;  %7957 = vmatmul.mubr.msk.f32.gmra.mrb[244].mxu0 %vm539_vm2, %v8604_v44 }
 0x419   : > { %v6232_v17 = vmax.f32 %v5403_v47, 0.0  ;;  %v5405_v5 = vpop.f32.mrb[139].mxu1  ;;  %7989 = vmatmul.mubr.msk.f32.gmra.mrb[244].mxu1 %vm539_vm2, %v8604_v44  ;;  %v6231_v43 = vmax.f32 %v5148_v14, 0.0  ;;  %5790 = vmatprep.mubr.f32.mxu0 %v13710_v37  ;;  %v8607_v47 = vld [vmem:[%s13698_s1 + $0xe8] sm:$0xff] }
 0x41a   : > { %v6233_v41 = vmax.f32 %v5405_v5, 0.0  ;;  %6047 = vmatprep.mubr.f32.mxu1 %v13710_v37  ;;  %v13537_v59 = vadd.f32 %v6230_v28, %v13461_v7  ;;  %v8605_v7 = vld [vmem:[%s13698_s1 + $0xd8] sm:$0xff] }
 0x41b   : > { %v13540_v35 = vadd.f32 %v6232_v17, %v13464_v19  ;;  %v13543_v63 = vadd.f32 %v6231_v43, %v13467_v46  ;;  %v5152_v32 = vpop.f32.mrb[140].mxu0 }
 0x41c   : > { %v13546_v51 = vadd.f32 %v6233_v41, %v13470_v57  ;;  %v5409_v29 = vpop.f32.mrb[140].mxu1  ;;  %v6246_v50 = vmax.f32 %v5152_v32, 0.0  ;;  %v5154_v38 = vpop.f32.mrb[141].mxu0  ;;  %7958 = vmatmul.mubr.msk.f32.gmra.mrb[246].mxu0 %vm539_vm2, %v8605_v7 }
 0x41d   : > { %v6248_v12 = vmax.f32 %v5409_v29, 0.0  ;;  %v5411_v16 = vpop.f32.mrb[141].mxu1  ;;  %7990 = vmatmul.mubr.msk.f32.gmra.mrb[246].mxu1 %vm539_vm2, %v8605_v7  ;;  %v6247_v19 = vmax.f32 %v5154_v38, 0.0  ;;  %5796 = vmatprep.mubr.f32.mxu0 %v13710_v37  ;;  %v8608_v29 = vld [vmem:[%s13698_s1 + $0xf0] sm:$0xff] }
 0x41e   : > { %v6249_v46 = vmax.f32 %v5411_v16, 0.0  ;;  %6053 = vmatprep.mubr.f32.mxu1 %v13710_v37  ;;  %v13556_v57 = vadd.f32 %v6246_v50, %v13480_v56  ;;  %v8606_v56 = vld [vmem:[%s13698_s1 + $0xe0] sm:$0xff] }
 0x41f   : > { %v13559_v21 = vadd.f32 %v6248_v12, %v13483_v34  ;;  %v13562_v42 = vadd.f32 %v6247_v19, %v13486_v54  ;;  %v5158_v53 = vpop.f32.mrb[142].mxu0 }
 0x420   : > { %v13565_v24 = vadd.f32 %v6249_v46, %v13489_v30  ;;  %v5415_v22 = vpop.f32.mrb[142].mxu1  ;;  %v6262_v11 = vmax.f32 %v5158_v53, 0.0  ;;  %v5160_v55 = vpop.f32.mrb[143].mxu0  ;;  %7959 = vmatmul.mubr.msk.f32.gmra.mrb[248].mxu0 %vm539_vm2, %v8606_v56 }
 0x421   : > { %v6264_v45 = vmax.f32 %v5415_v22, 0.0  ;;  %v5417_v2 = vpop.f32.mrb[143].mxu1  ;;  %7991 = vmatmul.mubr.msk.f32.gmra.mrb[248].mxu1 %vm539_vm2, %v8606_v56  ;;  %v6263_v34 = vmax.f32 %v5160_v55, 0.0  ;;  %5802 = vmatprep.mubr.f32.mxu0 %v13710_v37  ;;  %v8609_v22 = vld [vmem:[%s13698_s1 + $0xf8] sm:$0xff] }
 0x422   : > { %v6265_v54 = vmax.f32 %v5417_v2, 0.0  ;;  %6059 = vmatprep.mubr.f32.mxu1 %v13710_v37  ;;  %v6326_v30 = vadd.f32 %v6262_v11, %v13499_v40 }
 0x423   : > { %v6328_v23 = vadd.f32 %v6264_v45, %v13502_v49  ;;  %v6327_v62 = vadd.f32 %v6263_v34, %v13505_v27  ;;  %v5164_v13 = vpop.f32.mrb[144].mxu0 }
 0x424   : > { %v6329_v48 = vadd.f32 %v6265_v54, %v13508_v20  ;;  %v5421_v36 = vpop.f32.mrb[144].mxu1  ;;  %v6342_v1 = vmax.f32 %v5164_v13, 0.0  ;;  %v5166_v6 = vpop.f32.mrb[145].mxu0  ;;  %7960 = vmatmul.mubr.msk.f32.gmra.mrb[250].mxu0 %vm539_vm2, %v8607_v47 }
 0x425   : > { %v6344_v33 = vmax.f32 %v5421_v36, 0.0  ;;  %v5423_v39 = vpop.f32.mrb[145].mxu1  ;;  %7992 = vmatmul.mubr.msk.f32.gmra.mrb[250].mxu1 %vm539_vm2, %v8607_v47  ;;  %v6343_v40 = vmax.f32 %v5166_v6, 0.0  ;;  %5808 = vmatprep.mubr.f32.mxu0 %v13710_v37 }
 0x426   : > { %v6345_v49 = vmax.f32 %v5423_v39, 0.0  ;;  %6065 = vmatprep.mubr.f32.mxu1 %v13710_v37  ;;  %v6406_v27 = vadd.f32 %v6342_v1, %v13518_v52 }
 0x427   : > { %v6408_v20 = vadd.f32 %v6344_v33, %v13521_v61  ;;  %v6407_v28 = vadd.f32 %v6343_v40, %v13524_v31  ;;  %v5170_v14 = vpop.f32.mrb[146].mxu0 }
 0x428   : > { %v6409_v17 = vadd.f32 %v6345_v49, %v13527_v10  ;;  %v5427_v5 = vpop.f32.mrb[146].mxu1  ;;  %v6358_v44 = vmax.f32 %v5170_v14, 0.0  ;;  %v5172_v41 = vpop.f32.mrb[147].mxu0  ;;  %7961 = vmatmul.mubr.msk.f32.gmra.mrb[252].mxu0 %vm539_vm2, %v8608_v29 }
 0x429   : > { %v6360_v43 = vmax.f32 %v5427_v5, 0.0  ;;  %v5429_v32 = vpop.f32.mrb[147].mxu1  ;;  %7993 = vmatmul.mubr.msk.f32.gmra.mrb[252].mxu1 %vm539_vm2, %v8608_v29  ;;  %v6359_v52 = vmax.f32 %v5172_v41, 0.0  ;;  %5814 = vmatprep.mubr.f32.mxu0 %v13710_v37 }
 0x42a   : > { %v6361_v61 = vmax.f32 %v5429_v32, 0.0  ;;  %6071 = vmatprep.mubr.f32.mxu1 %v13710_v37  ;;  %v6422_v31 = vadd.f32 %v6358_v44, %v13537_v59 }
 0x42b   : > { %v6424_v10 = vadd.f32 %v6360_v43, %v13540_v35  ;;  %v6423_v50 = vadd.f32 %v6359_v52, %v13543_v63  ;;  %v5176_v38 = vpop.f32.mrb[148].mxu0 }
 0x42c   : > { %v6425_v12 = vadd.f32 %v6361_v61, %v13546_v51  ;;  %v5433_v16 = vpop.f32.mrb[148].mxu1  ;;  %v6374_v7 = vmax.f32 %v5176_v38, 0.0  ;;  %v5178_v46 = vpop.f32.mrb[149].mxu0  ;;  %7962 = vmatmul.mubr.msk.f32.gmra.mrb[254].mxu0 %vm539_vm2, %v8609_v22 }
 0x42d   : > { %v6376_v19 = vmax.f32 %v5433_v16, 0.0  ;;  %v5435_v53 = vpop.f32.mrb[149].mxu1  ;;  %7994 = vmatmul.mubr.msk.f32.gmra.mrb[254].mxu1 %vm539_vm2, %v8609_v22  ;;  %v6375_v37 = vmax.f32 %v5178_v46, 0.0 }
 0x42e   : > { %v6377_v59 = vmax.f32 %v5435_v53, 0.0  ;;  %v6438_v35 = vadd.f32 %v6374_v7, %v13556_v57 }
 0x42f   : > { %v6440_v63 = vadd.f32 %v6376_v19, %v13559_v21  ;;  %v6439_v51 = vadd.f32 %v6375_v37, %v13562_v42  ;;  %v5182_v45 = vpop.f32.mrb[150].mxu0 }
 0x430   : > { %v6441_v11 = vadd.f32 %v6377_v59, %v13565_v24  ;;  %v5439_v55 = vpop.f32.mrb[150].mxu1  ;;  %v6390_v2 = vmax.f32 %v5182_v45, 0.0  ;;  %v5184_v34 = vpop.f32.mrb[151].mxu0 }
 0x431   : > { %v6392_v56 = vmax.f32 %v5439_v55, 0.0  ;;  %v5441_v54 = vpop.f32.mrb[151].mxu1  ;;  %v6391_v13 = vmax.f32 %v5184_v34, 0.0 }
 0x432   : > { %v6393_v36 = vmax.f32 %v5441_v54, 0.0  ;;  %v6454_v1 = vadd.f32 %v6390_v2, %v6326_v30 }
 0x433   : > { %v6456_v33 = vadd.f32 %v6392_v56, %v6328_v23  ;;  %v6455_v6 = vadd.f32 %v6391_v13, %v6327_v62  ;;  %v5188_v47 = vpop.f32.mrb[152].mxu0 }
 0x434   : > { %v6457_v39 = vadd.f32 %v6393_v36, %v6329_v48  ;;  %v5445_v57 = vpop.f32.mrb[152].mxu1  ;;  %v6470_v40 = vmax.f32 %v5188_v47, 0.0  ;;  %v5190_v49 = vpop.f32.mrb[153].mxu0 }
 0x435   : > { %v6472_v21 = vmax.f32 %v5445_v57, 0.0  ;;  %v5447_v42 = vpop.f32.mrb[153].mxu1  ;;  %v6471_v14 = vmax.f32 %v5190_v49, 0.0 }
 0x436   : > { %v6473_v24 = vmax.f32 %v5447_v42, 0.0  ;;  %v6534_v5 = vadd.f32 %v6470_v40, %v6406_v27 }
 0x437   : > { %v6536_v44 = vadd.f32 %v6472_v21, %v6408_v20  ;;  %v6535_v43 = vadd.f32 %v6471_v14, %v6407_v28  ;;  %v5194_v32 = vpop.f32.mrb[154].mxu0 }
 0x438   : > { %v6537_v41 = vadd.f32 %v6473_v24, %v6409_v17  ;;  %v5451_v29 = vpop.f32.mrb[154].mxu1  ;;  %v6486_v52 = vmax.f32 %v5194_v32, 0.0  ;;  %v5196_v30 = vpop.f32.mrb[155].mxu0 }
 0x439   : > { %v6488_v61 = vmax.f32 %v5451_v29, 0.0  ;;  %v5453_v23 = vpop.f32.mrb[155].mxu1  ;;  %v6487_v62 = vmax.f32 %v5196_v30, 0.0 }
 0x43a   : > { %v6489_v48 = vmax.f32 %v5453_v23, 0.0  ;;  %v6550_v38 = vadd.f32 %v6486_v52, %v6422_v31 }
 0x43b   : > { %v6552_v16 = vadd.f32 %v6488_v61, %v6424_v10  ;;  %v6551_v7 = vadd.f32 %v6487_v62, %v6423_v50  ;;  %v5200_v46 = vpop.f32.mrb[156].mxu0 }
 0x43c   : > { %v6553_v19 = vadd.f32 %v6489_v48, %v6425_v12  ;;  %v5457_v53 = vpop.f32.mrb[156].mxu1  ;;  %v6502_v22 = vmax.f32 %v5200_v46, 0.0  ;;  %v5202_v27 = vpop.f32.mrb[157].mxu0 }
 0x43d   : > { %v6504_v37 = vmax.f32 %v5457_v53, 0.0  ;;  %v5459_v20 = vpop.f32.mrb[157].mxu1  ;;  %v6503_v28 = vmax.f32 %v5202_v27, 0.0 }
 0x43e   : > { %v6505_v17 = vmax.f32 %v5459_v20, 0.0  ;;  %v6566_v59 = vadd.f32 %v6502_v22, %v6438_v35 }
 0x43f   : > { %v6568_v45 = vadd.f32 %v6504_v37, %v6440_v63  ;;  %v6567_v55 = vadd.f32 %v6503_v28, %v6439_v51  ;;  %v5206_v56 = vpop.f32.mrb[158].mxu0 }
 0x440   : > { %v6569_v2 = vadd.f32 %v6505_v17, %v6441_v11  ;;  %v5463_v34 = vpop.f32.mrb[158].mxu1  ;;  %v6518_v54 = vmax.f32 %v5206_v56, 0.0  ;;  %v5208_v31 = vpop.f32.mrb[159].mxu0 }
 0x441   : > { %v6520_v13 = vmax.f32 %v5463_v34, 0.0  ;;  %v5465_v10 = vpop.f32.mrb[159].mxu1  ;;  %v6519_v50 = vmax.f32 %v5208_v31, 0.0 }
 0x442   : > { %v6521_v12 = vmax.f32 %v5465_v10, 0.0  ;;  %v6582_v36 = vadd.f32 %v6518_v54, %v6454_v1 }
 0x443   : > { %v6584_v47 = vadd.f32 %v6520_v13, %v6456_v33  ;;  %v6583_v57 = vadd.f32 %v6519_v50, %v6455_v6  ;;  %v5212_v21 = vpop.f32.mrb[160].mxu0 }
 0x444   : > { %v6585_v40 = vadd.f32 %v6521_v12, %v6457_v39  ;;  %v5469_v49 = vpop.f32.mrb[160].mxu1  ;;  %v6598_v42 = vmax.f32 %v5212_v21, 0.0  ;;  %v5214_v35 = vpop.f32.mrb[161].mxu0 }
 0x445   : > { %v6600_v14 = vmax.f32 %v5469_v49, 0.0  ;;  %v5471_v63 = vpop.f32.mrb[161].mxu1  ;;  %v6599_v51 = vmax.f32 %v5214_v35, 0.0 }
 0x446   : > { %v6601_v11 = vmax.f32 %v5471_v63, 0.0  ;;  %v6662_v24 = vadd.f32 %v6598_v42, %v6534_v5 }
 0x447   : > { %v6664_v32 = vadd.f32 %v6600_v14, %v6536_v44  ;;  %v6663_v29 = vadd.f32 %v6599_v51, %v6535_v43  ;;  %v5218_v61 = vpop.f32.mrb[162].mxu0 }
 0x448   : > { %v6665_v52 = vadd.f32 %v6601_v11, %v6537_v41  ;;  %v5475_v30 = vpop.f32.mrb[162].mxu1  ;;  %v6614_v23 = vmax.f32 %v5218_v61, 0.0  ;;  %v5220_v1 = vpop.f32.mrb[163].mxu0 }
 0x449   : > { %v6616_v62 = vmax.f32 %v5475_v30, 0.0  ;;  %v5477_v33 = vpop.f32.mrb[163].mxu1  ;;  %v6615_v6 = vmax.f32 %v5220_v1, 0.0 }
 0x44a   : > { %v6617_v39 = vmax.f32 %v5477_v33, 0.0  ;;  %v6678_v48 = vadd.f32 %v6614_v23, %v6550_v38 }
 0x44b   : > { %v6680_v46 = vadd.f32 %v6616_v62, %v6552_v16  ;;  %v6679_v53 = vadd.f32 %v6615_v6, %v6551_v7  ;;  %v5224_v37 = vpop.f32.mrb[164].mxu0 }
 0x44c   : > { %v6681_v22 = vadd.f32 %v6617_v39, %v6553_v19  ;;  %v5481_v27 = vpop.f32.mrb[164].mxu1  ;;  %v6630_v20 = vmax.f32 %v5224_v37, 0.0  ;;  %v5226_v5 = vpop.f32.mrb[165].mxu0 }
 0x44d   : > { %v6632_v28 = vmax.f32 %v5481_v27, 0.0  ;;  %v5483_v44 = vpop.f32.mrb[165].mxu1  ;;  %v6631_v43 = vmax.f32 %v5226_v5, 0.0 }
 0x44e   : > { %v6633_v41 = vmax.f32 %v5483_v44, 0.0  ;;  %v6694_v17 = vadd.f32 %v6630_v20, %v6566_v59 }
 0x44f   : > { %v6696_v56 = vadd.f32 %v6632_v28, %v6568_v45  ;;  %v6695_v34 = vadd.f32 %v6631_v43, %v6567_v55  ;;  %v5230_v13 = vpop.f32.mrb[166].mxu0 }
 0x450   : > { %v6697_v54 = vadd.f32 %v6633_v41, %v6569_v2  ;;  %v5487_v31 = vpop.f32.mrb[166].mxu1  ;;  %v6646_v10 = vmax.f32 %v5230_v13, 0.0  ;;  %v5232_v38 = vpop.f32.mrb[167].mxu0 }
 0x451   : > { %v6648_v50 = vmax.f32 %v5487_v31, 0.0  ;;  %v5489_v16 = vpop.f32.mrb[167].mxu1  ;;  %v6647_v7 = vmax.f32 %v5232_v38, 0.0 }
 0x452   : > { %v6649_v19 = vmax.f32 %v5489_v16, 0.0  ;;  %v6710_v12 = vadd.f32 %v6646_v10, %v6582_v36 }
 0x453   : > { %v6712_v21 = vadd.f32 %v6648_v50, %v6584_v47  ;;  %v6711_v49 = vadd.f32 %v6647_v7, %v6583_v57  ;;  %v5236_v14 = vpop.f32.mrb[168].mxu0 }
 0x454   : > { %v6713_v42 = vadd.f32 %v6649_v19, %v6585_v40  ;;  %v5493_v35 = vpop.f32.mrb[168].mxu1  ;;  %v6726_v63 = vmax.f32 %v5236_v14, 0.0  ;;  %v5238_v59 = vpop.f32.mrb[169].mxu0 }
 0x455   : > { %v6728_v51 = vmax.f32 %v5493_v35, 0.0  ;;  %v5495_v45 = vpop.f32.mrb[169].mxu1  ;;  %v6727_v55 = vmax.f32 %v5238_v59, 0.0 }
 0x456   : > { %v6729_v2 = vmax.f32 %v5495_v45, 0.0  ;;  %v6790_v11 = vadd.f32 %v6726_v63, %v6662_v24 }
 0x457   : > { %v6792_v61 = vadd.f32 %v6728_v51, %v6664_v32  ;;  %v6791_v30 = vadd.f32 %v6727_v55, %v6663_v29  ;;  %v5242_v62 = vpop.f32.mrb[170].mxu0 }
 0x458   : > { %v6793_v23 = vadd.f32 %v6729_v2, %v6665_v52  ;;  %v5499_v1 = vpop.f32.mrb[170].mxu1  ;;  %v6742_v33 = vmax.f32 %v5242_v62, 0.0  ;;  %v5244_v36 = vpop.f32.mrb[171].mxu0 }
 0x459   : > { %v6744_v6 = vmax.f32 %v5499_v1, 0.0  ;;  %v5501_v47 = vpop.f32.mrb[171].mxu1  ;;  %v6743_v57 = vmax.f32 %v5244_v36, 0.0 }
 0x45a   : > { %v6745_v40 = vmax.f32 %v5501_v47, 0.0  ;;  %v6806_v39 = vadd.f32 %v6742_v33, %v6678_v48 }
 0x45b   : > { %v6808_v37 = vadd.f32 %v6744_v6, %v6680_v46  ;;  %v6807_v27 = vadd.f32 %v6743_v57, %v6679_v53  ;;  %v5248_v28 = vpop.f32.mrb[172].mxu0 }
 0x45c   : > { %v6809_v20 = vadd.f32 %v6745_v40, %v6681_v22  ;;  %v5505_v5 = vpop.f32.mrb[172].mxu1  ;;  %v6758_v44 = vmax.f32 %v5248_v28, 0.0  ;;  %v5250_v24 = vpop.f32.mrb[173].mxu0 }
 0x45d   : > { %v6760_v43 = vmax.f32 %v5505_v5, 0.0  ;;  %v5507_v32 = vpop.f32.mrb[173].mxu1  ;;  %v6759_v29 = vmax.f32 %v5250_v24, 0.0 }
 0x45e   : > { %v6761_v52 = vmax.f32 %v5507_v32, 0.0  ;;  %v6822_v41 = vadd.f32 %v6758_v44, %v6694_v17 }
 0x45f   : > { %v6824_v13 = vadd.f32 %v6760_v43, %v6696_v56  ;;  %v6823_v31 = vadd.f32 %v6759_v29, %v6695_v34  ;;  %v5254_v50 = vpop.f32.mrb[174].mxu0 }
 0x460   : > { %v6825_v10 = vadd.f32 %v6761_v52, %v6697_v54  ;;  %v5511_v38 = vpop.f32.mrb[174].mxu1  ;;  %v6774_v16 = vmax.f32 %v5254_v50, 0.0  ;;  %v5256_v48 = vpop.f32.mrb[175].mxu0 }
 0x461   : > { %v6776_v7 = vmax.f32 %v5511_v38, 0.0  ;;  %v5513_v46 = vpop.f32.mrb[175].mxu1  ;;  %v6775_v53 = vmax.f32 %v5256_v48, 0.0 }
 0x462   : > { %v6777_v22 = vmax.f32 %v5513_v46, 0.0  ;;  %v6838_v19 = vadd.f32 %v6774_v16, %v6710_v12 }
 0x463   : > { %v6840_v14 = vadd.f32 %v6776_v7, %v6712_v21  ;;  %v6839_v35 = vadd.f32 %v6775_v53, %v6711_v49  ;;  %v5260_v51 = vpop.f32.mrb[176].mxu0 }
 0x464   : > { %v6841_v63 = vadd.f32 %v6777_v22, %v6713_v42  ;;  %v5517_v59 = vpop.f32.mrb[176].mxu1  ;;  %v6854_v45 = vmax.f32 %v5260_v51, 0.0  ;;  %v5262_v17 = vpop.f32.mrb[177].mxu0 }
 0x465   : > { %v6856_v55 = vmax.f32 %v5517_v59, 0.0  ;;  %v5519_v56 = vpop.f32.mrb[177].mxu1  ;;  %v6855_v34 = vmax.f32 %v5262_v17, 0.0 }
 0x466   : > { %v6857_v54 = vmax.f32 %v5519_v56, 0.0  ;;  %v6918_v2 = vadd.f32 %v6854_v45, %v6790_v11 }
 0x467   : > { %v6920_v62 = vadd.f32 %v6856_v55, %v6792_v61  ;;  %v6919_v1 = vadd.f32 %v6855_v34, %v6791_v30  ;;  %v5266_v6 = vpop.f32.mrb[178].mxu0 }
 0x468   : > { %v6921_v33 = vadd.f32 %v6857_v54, %v6793_v23  ;;  %v5523_v36 = vpop.f32.mrb[178].mxu1  ;;  %v6870_v47 = vmax.f32 %v5266_v6, 0.0  ;;  %v5268_v12 = vpop.f32.mrb[179].mxu0 }
 0x469   : > { %v6872_v57 = vmax.f32 %v5523_v36, 0.0  ;;  %v5525_v21 = vpop.f32.mrb[179].mxu1  ;;  %v6871_v49 = vmax.f32 %v5268_v12, 0.0 }
 0x46a   : > { %v6873_v42 = vmax.f32 %v5525_v21, 0.0  ;;  %v6934_v40 = vadd.f32 %v6870_v47, %v6806_v39 }
 0x46b   : > { %v6936_v28 = vadd.f32 %v6872_v57, %v6808_v37  ;;  %v6935_v5 = vadd.f32 %v6871_v49, %v6807_v27  ;;  %v5272_v43 = vpop.f32.mrb[180].mxu0 }
 0x46c   : > { %v6937_v44 = vadd.f32 %v6873_v42, %v6809_v20  ;;  %v5529_v24 = vpop.f32.mrb[180].mxu1  ;;  %v6886_v32 = vmax.f32 %v5272_v43, 0.0  ;;  %v5274_v11 = vpop.f32.mrb[181].mxu0 }
 0x46d   : > { %v6888_v29 = vmax.f32 %v5529_v24, 0.0  ;;  %v5531_v61 = vpop.f32.mrb[181].mxu1  ;;  %v6887_v30 = vmax.f32 %v5274_v11, 0.0 }
 0x46e   : > { %v6889_v23 = vmax.f32 %v5531_v61, 0.0  ;;  %v6950_v52 = vadd.f32 %v6886_v32, %v6822_v41 }
 0x46f   : > { %v6952_v50 = vadd.f32 %v6888_v29, %v6824_v13  ;;  %v6951_v38 = vadd.f32 %v6887_v30, %v6823_v31  ;;  %v5278_v7 = vpop.f32.mrb[182].mxu0 }
 0x470   : > { %v6953_v16 = vadd.f32 %v6889_v23, %v6825_v10  ;;  %v5535_v48 = vpop.f32.mrb[182].mxu1  ;;  %v6902_v46 = vmax.f32 %v5278_v7, 0.0  ;;  %v5280_v39 = vpop.f32.mrb[183].mxu0 }
 0x471   : > { %v6904_v53 = vmax.f32 %v5535_v48, 0.0  ;;  %v5537_v37 = vpop.f32.mrb[183].mxu1  ;;  %v6903_v27 = vmax.f32 %v5280_v39, 0.0 }
 0x472   : > { %v6905_v20 = vmax.f32 %v5537_v37, 0.0  ;;  %v6966_v22 = vadd.f32 %v6902_v46, %v6838_v19 }
 0x473   : > { %v6968_v51 = vadd.f32 %v6904_v53, %v6840_v14  ;;  %v6967_v59 = vadd.f32 %v6903_v27, %v6839_v35  ;;  %v5284_v55 = vpop.f32.mrb[184].mxu0 }
 0x474   : > { %v6969_v45 = vadd.f32 %v6905_v20, %v6841_v63  ;;  %v5541_v17 = vpop.f32.mrb[184].mxu1  ;;  %v6982_v56 = vmax.f32 %v5284_v55, 0.0  ;;  %v5286_v41 = vpop.f32.mrb[185].mxu0 }
 0x475   : > { %v6984_v34 = vmax.f32 %v5541_v17, 0.0  ;;  %v5543_v13 = vpop.f32.mrb[185].mxu1  ;;  %v6983_v31 = vmax.f32 %v5286_v41, 0.0 }
 0x476   : > { %v6985_v10 = vmax.f32 %v5543_v13, 0.0  ;;  %v7046_v54 = vadd.f32 %v6982_v56, %v6918_v2 }
 0x477   : > { %v7048_v6 = vadd.f32 %v6984_v34, %v6920_v62  ;;  %v7047_v36 = vadd.f32 %v6983_v31, %v6919_v1  ;;  %v5290_v57 = vpop.f32.mrb[186].mxu0 }
 0x478   : > { %v7049_v47 = vadd.f32 %v6985_v10, %v6921_v33  ;;  %v5547_v12 = vpop.f32.mrb[186].mxu1  ;;  %v7130_v21 = vadd.f32 %v13409_v4, %v7046_v54  ;;  %v6998_v19 = vmax.f32 %v5290_v57, 0.0  ;;  %v5292_v35 = vpop.f32.mrb[187].mxu0 }
 0x479   : > { %v7000_v14 = vmax.f32 %v5547_v12, 0.0  ;;  %v5549_v63 = vpop.f32.mrb[187].mxu1  ;;  %v6999_v49 = vmax.f32 %v5292_v35, 0.0 }
 0x47a   : > { %v7001_v42 = vmax.f32 %v5549_v63, 0.0  ;;  %v7134_v43 = vadd.f32 %v7130_v21, %v7047_v36  ;;  %v7062_v24 = vadd.f32 %v6998_v19, %v6934_v40 }
 0x47b   : > { %v7064_v32 = vadd.f32 %v7000_v14, %v6936_v28  ;;  %v7063_v29 = vadd.f32 %v6999_v49, %v6935_v5  ;;  %v5296_v61 = vpop.f32.mrb[188].mxu0 }
 0x47c   : > { %v7065_v11 = vadd.f32 %v7001_v42, %v6937_v44  ;;  %v5553_v2 = vpop.f32.mrb[188].mxu1  ;;  %v7138_v62 = vadd.f32 %v7134_v43, %v7048_v6  ;;  %v7131_v1 = vadd.f32 %v13423_v9, %v7062_v24  ;;  %v7014_v33 = vmax.f32 %v5296_v61, 0.0  ;;  %v5298_v23 = vpop.f32.mrb[189].mxu0 }
 0x47d   : > { %v7016_v30 = vmax.f32 %v5553_v2, 0.0  ;;  %v5555_v4 = vpop.f32.mrb[189].mxu1  ;;  %v7015_v7 = vmax.f32 %v5298_v23, 0.0 }
 0x47e   : > { %v7017_v48 = vmax.f32 %v5555_v4, 0.0  ;;  %v13611_v46 = vadd.f32 %v7138_v62, %v7049_v47  ;;  %v7135_v53 = vadd.f32 %v7131_v1, %v7063_v29  ;;  %v7078_v39 = vadd.f32 %v7014_v33, %v6950_v52 }
 0x47f   : > { %v7080_v37 = vadd.f32 %v7016_v30, %v6952_v50  ;;  %v7079_v40 = vadd.f32 %v7015_v7, %v6951_v38  ;;  %v5302_v5 = vpop.f32.mrb[190].mxu0 }
 0x480   : > { %v7081_v28 = vadd.f32 %v7017_v48, %v6953_v16  ;;  %v5559_v44 = vpop.f32.mrb[190].mxu1  ;;  %v7139_v27 = vadd.f32 %v7135_v53, %v7064_v32  ;;  %v7132_v20 = vadd.f32 %v13437_v15, %v7078_v39  ;;  %v7030_v55 = vmax.f32 %v5302_v5, 0.0  ;;  %v5304_v17 = vpop.f32.mrb[191].mxu0  ;;  %v13818_v53 = vld [vmem:[#allocation41_spill] sm:$0xff]  ;;  %v13821_v5 = vld [vmem:[#allocation44_spill] sm:$0xff] }
 0x481   : > { %v7032_v9 = vmax.f32 %v5559_v44, 0.0  ;;  %v5561_v56 = vpop.f32.mrb[191].mxu1  ;;  %v7031_v34 = vmax.f32 %v5304_v17, 0.0 }
 0x482   : > { %v7033_v41 = vmax.f32 %v5561_v56, 0.0  ;;  %v13614_v13 = vadd.f32 %v7139_v27, %v7065_v11  ;;  %v7136_v31 = vadd.f32 %v7132_v20, %v7079_v40  ;;  %v7094_v10 = vadd.f32 %v7030_v55, %v6966_v22  ;;  %v7198_v27 = vld [vmem:[%s13699_s2] sm:$0xff]  ;;  %v7199_v20 = vld [vmem:[%s13699_s2 + $0x8] sm:$0xff]  ;;  %v7200_v55 = vld [vmem:[%s13699_s2 + $0x10] sm:$0xff] }
 0x483   : > { %v7096_v54 = vadd.f32 %v7032_v9, %v6968_v51  ;;  %v7095_v52 = vadd.f32 %v7031_v34, %v6967_v59  ;;  %v5630_v38 = vpop.f32.mrb[192].mxu0 }
 0x484   : > { %v7097_v50 = vadd.f32 %v7033_v41, %v6969_v45  ;;  %v5887_v16 = vpop.f32.mrb[192].mxu1  ;;  %v7140_v6 = vadd.f32 %v7136_v31, %v7080_v37  ;;  %v7133_v36 = vadd.f32 %v13458_v26, %v7094_v10  ;;  %v6090_v47 = vmax.f32 %v5630_v38, 0.0  ;;  %v5632_v57 = vpop.f32.mrb[193].mxu0  ;;  %v13819_v37 = vld [vmem:[#allocation42_spill] sm:$0xff]  ;;  %v7201_v31 = vld [vmem:[%s13699_s2 + $0x18] sm:$0xff] }
 0x485   : > { %v6092_v15 = vmax.f32 %v5887_v16, 0.0  ;;  %v5889_v12 = vpop.f32.mrb[193].mxu1  ;;  %v6091_v21 = vmax.f32 %v5632_v57, 0.0  ;;  %v8386_v41 = vpack.c.bf16 %v7199_v20, %v7198_v27  ;;  %v13823_v16 = vld [vmem:[#allocation46_spill] sm:$0xff] }
 0x486   : > { %v6093_v19 = vmax.f32 %v5889_v12, 0.0  ;;  %v13617_v14 = vadd.f32 %v7140_v6, %v7081_v28  ;;  %v7137_v35 = vadd.f32 %v7133_v36, %v7095_v52  ;;  %v6154_v63 = vadd.f32 %v6090_v47, %v12111_v18  ;;  %v13820_v28 = vld [vmem:[#allocation43_spill] sm:$0xff] }
 0x487   : > { %v6156_v22 = vadd.f32 %v6092_v15, %v12114_v25  ;;  %v6155_v51 = vadd.f32 %v6091_v21, %v12117_v60  ;;  %v5636_v45 = vpop.f32.mrb[194].mxu0  ;;  %v13817_v60 = vld [vmem:[#allocation40_spill] sm:$0xff]  ;;  %v8390_v52 = vpack.c.bf16 %v7201_v31, %v7200_v55  ;;  %8387 = vmatprep.subr.bf16.mxu0 %v8386_v41  ;;  %8394 = vmatprep.subr.bf16.mxu1 %v8386_v41  ;;  %v13824_v36 = vld [vmem:[#allocation47_spill] sm:$0xff] }
 0x488   : > { %v6157_v59 = vadd.f32 %v6093_v19, %v12120_v0  ;;  %v5893_v49 = vpop.f32.mrb[194].mxu1  ;;  %v7141_v26 = vadd.f32 %v7137_v35, %v7096_v54  ;;  %v6106_v42 = vmax.f32 %v5636_v45, 0.0  ;;  %v5638_v24 = vpop.f32.mrb[195].mxu0  ;;  %v13825_v15 = vld [vmem:[#allocation48_spill] sm:$0xff]  ;;  %8389 = vmatpush3.bf16.msra.mxu0 %v8386_v41  ;;  %8396 = vmatpush3.bf16.msra.mxu1 %v8386_v41 }
 0x489   : > { %v6108_v43 = vmax.f32 %v5893_v49, 0.0  ;;  %v5895_v32 = vpop.f32.mrb[195].mxu1  ;;  %v6107_v29 = vmax.f32 %v5638_v24, 0.0  ;;  %8391 = vmatprep.subr.bf16.mxu0 %v8390_v52  ;;  %8395 = vmatprep.subr.bf16.mxu1 %v8390_v52 }
 0x48a   : > { %v6109_v11 = vmax.f32 %v5895_v32, 0.0  ;;  %v13623_v61 = vadd.f32 %v7141_v26, %v7097_v50  ;;  %v6170_v2 = vadd.f32 %v6106_v42, %v12130_v8  ;;  %v13822_v50 = vld [vmem:[#allocation45_spill] sm:$0xff] }
 0x48b   : > { %v6172_v18 = vadd.f32 %v6108_v43, %v12133_v58  ;;  %v6171_v25 = vadd.f32 %v6107_v29, %v12136_v3  ;;  %v5642_v0 = vpop.f32.mrb[196].mxu0 }
 0x48c   : > { %v6173_v62 = vadd.f32 %v6109_v11, %v13817_v60  ;;  %v5899_v1 = vpop.f32.mrb[196].mxu1  ;;  %v6122_v33 = vmax.f32 %v5642_v0, 0.0  ;;  %v5644_v23 = vpop.f32.mrb[197].mxu0  ;;  %8393 = vmatpush3.bf16.msra.mxu0 %v8390_v52  ;;  %8397 = vmatpush3.bf16.msra.mxu1 %v8390_v52 }
 0x48d   : > { %v6124_v30 = vmax.f32 %v5899_v1, 0.0  ;;  %v5901_v4 = vpop.f32.mrb[197].mxu1  ;;  %v6123_v7 = vmax.f32 %v5644_v23, 0.0 }
 0x48e   : > { %v6125_v48 = vmax.f32 %v5901_v4, 0.0  ;;  %v6186_v39 = vadd.f32 %v6122_v33, %v13818_v53 }
 0x48f   : > { %v6188_v40 = vadd.f32 %v6124_v30, %v13819_v37  ;;  %v6187_v8 = vadd.f32 %v6123_v7, %v13820_v28  ;;  %v5648_v44 = vpop.f32.mrb[198].mxu0 }
 0x490   : > { %v6189_v58 = vadd.f32 %v6125_v48, %v13821_v5  ;;  %v5905_v3 = vpop.f32.mrb[198].mxu1  ;;  %v6138_v9 = vmax.f32 %v5648_v44, 0.0  ;;  %v5650_v56 = vpop.f32.mrb[199].mxu0 }
 0x491   : > { %v6140_v17 = vmax.f32 %v5905_v3, 0.0  ;;  %v5907_v34 = vpop.f32.mrb[199].mxu1  ;;  %v6139_v10 = vmax.f32 %v5650_v56, 0.0 }
 0x492   : > { %v6141_v54 = vmax.f32 %v5907_v34, 0.0  ;;  %v6202_v38 = vadd.f32 %v6138_v9, %v13822_v50 }
 0x493   : > { %v6204_v6 = vadd.f32 %v6140_v17, %v13823_v16  ;;  %v6203_v47 = vadd.f32 %v6139_v10, %v13824_v36  ;;  %v5654_v12 = vpop.f32.mrb[200].mxu0 }
 0x494   : > { %v6205_v57 = vadd.f32 %v6141_v54, %v13825_v15  ;;  %v5911_v21 = vpop.f32.mrb[200].mxu1  ;;  %v6218_v19 = vmax.f32 %v5654_v12, 0.0  ;;  %v5656_v45 = vpop.f32.mrb[201].mxu0 }
 0x495   : > { %v6220_v35 = vmax.f32 %v5911_v21, 0.0  ;;  %v5913_v49 = vpop.f32.mrb[201].mxu1  ;;  %v6219_v26 = vmax.f32 %v5656_v45, 0.0 }
 0x496   : > { %v6221_v42 = vmax.f32 %v5913_v49, 0.0  ;;  %v6282_v43 = vadd.f32 %v6218_v19, %v6154_v63 }
 0x497   : > { %v6284_v24 = vadd.f32 %v6220_v35, %v6156_v22  ;;  %v6283_v32 = vadd.f32 %v6219_v26, %v6155_v51  ;;  %v5660_v11 = vpop.f32.mrb[202].mxu0 }
 0x498   : > { %v6285_v29 = vadd.f32 %v6221_v42, %v6157_v59  ;;  %v5917_v60 = vpop.f32.mrb[202].mxu1  ;;  %v6234_v0 = vmax.f32 %v5660_v11, 0.0  ;;  %v5662_v33 = vpop.f32.mrb[203].mxu0 }
 0x499   : > { %v6236_v1 = vmax.f32 %v5917_v60, 0.0  ;;  %v5919_v30 = vpop.f32.mrb[203].mxu1  ;;  %v6235_v23 = vmax.f32 %v5662_v33, 0.0 }
 0x49a   : > { %v6237_v4 = vmax.f32 %v5919_v30, 0.0  ;;  %v6298_v7 = vadd.f32 %v6234_v0, %v6170_v2 }
 0x49b   : > { %v6300_v48 = vadd.f32 %v6236_v1, %v6172_v18  ;;  %v6299_v53 = vadd.f32 %v6235_v23, %v6171_v25  ;;  %v5666_v28 = vpop.f32.mrb[204].mxu0 }
 0x49c   : > { %v6301_v37 = vadd.f32 %v6237_v4, %v6173_v62  ;;  %v5923_v5 = vpop.f32.mrb[204].mxu1  ;;  %v6250_v63 = vmax.f32 %v5666_v28, 0.0  ;;  %v5668_v51 = vpop.f32.mrb[205].mxu0 }
 0x49d   : > { %v6252_v22 = vmax.f32 %v5923_v5, 0.0  ;;  %v5925_v59 = vpop.f32.mrb[205].mxu1  ;;  %v6251_v44 = vmax.f32 %v5668_v51, 0.0 }
 0x49e   : > { %v6253_v3 = vmax.f32 %v5925_v59, 0.0  ;;  %v6314_v27 = vadd.f32 %v6250_v63, %v6186_v39 }
 0x49f   : > { %v6316_v20 = vadd.f32 %v6252_v22, %v6188_v40  ;;  %v6315_v55 = vadd.f32 %v6251_v44, %v6187_v8  ;;  %v5672_v17 = vpop.f32.mrb[206].mxu0 }
 0x4a0   : > { %v6317_v9 = vadd.f32 %v6253_v3, %v6189_v58  ;;  %v5929_v56 = vpop.f32.mrb[206].mxu1  ;;  %v6266_v34 = vmax.f32 %v5672_v17, 0.0  ;;  %v5674_v2 = vpop.f32.mrb[207].mxu0 }
 0x4a1   : > { %v6268_v41 = vmax.f32 %v5929_v56, 0.0  ;;  %v5931_v18 = vpop.f32.mrb[207].mxu1  ;;  %v6267_v25 = vmax.f32 %v5674_v2, 0.0 }
 0x4a2   : > { %v6269_v62 = vmax.f32 %v5931_v18, 0.0  ;;  %v6330_v31 = vadd.f32 %v6266_v34, %v6202_v38 }
 0x4a3   : > { %v6332_v10 = vadd.f32 %v6268_v41, %v6204_v6  ;;  %v6331_v54 = vadd.f32 %v6267_v25, %v6203_v47  ;;  %v5678_v50 = vpop.f32.mrb[208].mxu0 }
 0x4a4   : > { %v6333_v52 = vadd.f32 %v6269_v62, %v6205_v57  ;;  %v5935_v16 = vpop.f32.mrb[208].mxu1  ;;  %v6346_v36 = vmax.f32 %v5678_v50, 0.0  ;;  %v5680_v39 = vpop.f32.mrb[209].mxu0 }
 0x4a5   : > { %v6348_v15 = vmax.f32 %v5935_v16, 0.0  ;;  %v5937_v40 = vpop.f32.mrb[209].mxu1  ;;  %v6347_v8 = vmax.f32 %v5680_v39, 0.0 }
 0x4a6   : > { %v6349_v58 = vmax.f32 %v5937_v40, 0.0  ;;  %v6410_v12 = vadd.f32 %v6346_v36, %v6282_v43 }
 0x4a7   : > { %v6412_v21 = vadd.f32 %v6348_v15, %v6284_v24  ;;  %v6411_v19 = vadd.f32 %v6347_v8, %v6283_v32  ;;  %v5684_v45 = vpop.f32.mrb[210].mxu0 }
 0x4a8   : > { %v6413_v35 = vadd.f32 %v6349_v58, %v6285_v29  ;;  %v5941_v49 = vpop.f32.mrb[210].mxu1  ;;  %v6362_v26 = vmax.f32 %v5684_v45, 0.0  ;;  %v5686_v38 = vpop.f32.mrb[211].mxu0 }
 0x4a9   : > { %v6364_v42 = vmax.f32 %v5941_v49, 0.0  ;;  %v5943_v6 = vpop.f32.mrb[211].mxu1  ;;  %v6363_v47 = vmax.f32 %v5686_v38, 0.0 }
 0x4aa   : > { %v6365_v57 = vmax.f32 %v5943_v6, 0.0  ;;  %v6426_v11 = vadd.f32 %v6362_v26, %v6298_v7 }
 0x4ab   : > { %v6428_v60 = vadd.f32 %v6364_v42, %v6300_v48  ;;  %v6427_v0 = vadd.f32 %v6363_v47, %v6299_v53  ;;  %v5690_v33 = vpop.f32.mrb[212].mxu0 }
 0x4ac   : > { %v6429_v1 = vadd.f32 %v6365_v57, %v6301_v37  ;;  %v5947_v30 = vpop.f32.mrb[212].mxu1  ;;  %v6378_v23 = vmax.f32 %v5690_v33, 0.0  ;;  %v5692_v43 = vpop.f32.mrb[213].mxu0 }
 0x4ad   : > { %v6380_v4 = vmax.f32 %v5947_v30, 0.0  ;;  %v5949_v24 = vpop.f32.mrb[213].mxu1  ;;  %v6379_v32 = vmax.f32 %v5692_v43, 0.0 }
 0x4ae   : > { %v6381_v29 = vmax.f32 %v5949_v24, 0.0  ;;  %v6442_v28 = vadd.f32 %v6378_v23, %v6314_v27 }
 0x4af   : > { %v6444_v5 = vadd.f32 %v6380_v4, %v6316_v20  ;;  %v6443_v63 = vadd.f32 %v6379_v32, %v6315_v55  ;;  %v5696_v51 = vpop.f32.mrb[214].mxu0 }
 0x4b0   : > { %v6445_v22 = vadd.f32 %v6381_v29, %v6317_v9  ;;  %v5953_v59 = vpop.f32.mrb[214].mxu1  ;;  %v6394_v44 = vmax.f32 %v5696_v51, 0.0  ;;  %v5698_v7 = vpop.f32.mrb[215].mxu0 }
 0x4b1   : > { %v6396_v3 = vmax.f32 %v5953_v59, 0.0  ;;  %v5955_v48 = vpop.f32.mrb[215].mxu1  ;;  %v6395_v53 = vmax.f32 %v5698_v7, 0.0 }
 0x4b2   : > { %v6397_v37 = vmax.f32 %v5955_v48, 0.0  ;;  %v6458_v17 = vadd.f32 %v6394_v44, %v6330_v31 }
 0x4b3   : > { %v6460_v56 = vadd.f32 %v6396_v3, %v6332_v10  ;;  %v6459_v34 = vadd.f32 %v6395_v53, %v6331_v54  ;;  %v5702_v2 = vpop.f32.mrb[216].mxu0 }
 0x4b4   : > { %v6461_v41 = vadd.f32 %v6397_v37, %v6333_v52  ;;  %v5959_v18 = vpop.f32.mrb[216].mxu1  ;;  %v6474_v25 = vmax.f32 %v5702_v2, 0.0  ;;  %v5704_v27 = vpop.f32.mrb[217].mxu0 }
 0x4b5   : > { %v6476_v62 = vmax.f32 %v5959_v18, 0.0  ;;  %v5961_v20 = vpop.f32.mrb[217].mxu1  ;;  %v6475_v55 = vmax.f32 %v5704_v27, 0.0 }
 0x4b6   : > { %v6477_v9 = vmax.f32 %v5961_v20, 0.0  ;;  %v6538_v50 = vadd.f32 %v6474_v25, %v6410_v12 }
 0x4b7   : > { %v6540_v16 = vadd.f32 %v6476_v62, %v6412_v21  ;;  %v6539_v36 = vadd.f32 %v6475_v55, %v6411_v19  ;;  %v5708_v39 = vpop.f32.mrb[218].mxu0 }
 0x4b8   : > { %v6541_v15 = vadd.f32 %v6477_v9, %v6413_v35  ;;  %v5965_v40 = vpop.f32.mrb[218].mxu1  ;;  %v6490_v8 = vmax.f32 %v5708_v39, 0.0  ;;  %v5710_v31 = vpop.f32.mrb[219].mxu0 }
 0x4b9   : > { %v6492_v58 = vmax.f32 %v5965_v40, 0.0  ;;  %v5967_v10 = vpop.f32.mrb[219].mxu1  ;;  %v6491_v54 = vmax.f32 %v5710_v31, 0.0 }
 0x4ba   : > { %v6493_v52 = vmax.f32 %v5967_v10, 0.0  ;;  %v6554_v45 = vadd.f32 %v6490_v8, %v6426_v11 }
 0x4bb   : > { %v6556_v49 = vadd.f32 %v6492_v58, %v6428_v60  ;;  %v6555_v26 = vadd.f32 %v6491_v54, %v6427_v0  ;;  %v5714_v38 = vpop.f32.mrb[220].mxu0 }
 0x4bc   : > { %v6557_v42 = vadd.f32 %v6493_v52, %v6429_v1  ;;  %v5971_v6 = vpop.f32.mrb[220].mxu1  ;;  %v6506_v47 = vmax.f32 %v5714_v38, 0.0  ;;  %v5716_v12 = vpop.f32.mrb[221].mxu0 }
 0x4bd   : > { %v6508_v57 = vmax.f32 %v5971_v6, 0.0  ;;  %v5973_v21 = vpop.f32.mrb[221].mxu1  ;;  %v6507_v19 = vmax.f32 %v5716_v12, 0.0 }
 0x4be   : > { %v6509_v35 = vmax.f32 %v5973_v21, 0.0  ;;  %v6570_v33 = vadd.f32 %v6506_v47, %v6442_v28 }
 0x4bf   : > { %v6572_v30 = vadd.f32 %v6508_v57, %v6444_v5  ;;  %v6571_v23 = vadd.f32 %v6507_v19, %v6443_v63  ;;  %v5720_v43 = vpop.f32.mrb[222].mxu0 }
 0x4c0   : > { %v6573_v4 = vadd.f32 %v6509_v35, %v6445_v22  ;;  %v5977_v24 = vpop.f32.mrb[222].mxu1  ;;  %v6522_v32 = vmax.f32 %v5720_v43, 0.0  ;;  %v5722_v11 = vpop.f32.mrb[223].mxu0 }
 0x4c1   : > { %v6524_v29 = vmax.f32 %v5977_v24, 0.0  ;;  %v5979_v60 = vpop.f32.mrb[223].mxu1  ;;  %v6523_v0 = vmax.f32 %v5722_v11, 0.0 }
 0x4c2   : > { %v6525_v1 = vmax.f32 %v5979_v60, 0.0  ;;  %v6586_v51 = vadd.f32 %v6522_v32, %v6458_v17 }
 0x4c3   : > { %v6588_v59 = vadd.f32 %v6524_v29, %v6460_v56  ;;  %v6587_v44 = vadd.f32 %v6523_v0, %v6459_v34  ;;  %v5726_v7 = vpop.f32.mrb[224].mxu0 }
 0x4c4   : > { %v6589_v3 = vadd.f32 %v6525_v1, %v6461_v41  ;;  %v5983_v48 = vpop.f32.mrb[224].mxu1  ;;  %v6602_v53 = vmax.f32 %v5726_v7, 0.0  ;;  %v5728_v28 = vpop.f32.mrb[225].mxu0 }
 0x4c5   : > { %v6604_v37 = vmax.f32 %v5983_v48, 0.0  ;;  %v5985_v5 = vpop.f32.mrb[225].mxu1  ;;  %v6603_v63 = vmax.f32 %v5728_v28, 0.0 }
 0x4c6   : > { %v6605_v22 = vmax.f32 %v5985_v5, 0.0  ;;  %v6666_v2 = vadd.f32 %v6602_v53, %v6538_v50 }
 0x4c7   : > { %v6668_v18 = vadd.f32 %v6604_v37, %v6540_v16  ;;  %v6667_v25 = vadd.f32 %v6603_v63, %v6539_v36  ;;  %v5732_v27 = vpop.f32.mrb[226].mxu0 }
 0x4c8   : > { %v6669_v62 = vadd.f32 %v6605_v22, %v6541_v15  ;;  %v5989_v20 = vpop.f32.mrb[226].mxu1  ;;  %v6618_v55 = vmax.f32 %v5732_v27, 0.0  ;;  %v5734_v17 = vpop.f32.mrb[227].mxu0 }
 0x4c9   : > { %v6620_v9 = vmax.f32 %v5989_v20, 0.0  ;;  %v5991_v56 = vpop.f32.mrb[227].mxu1  ;;  %v6619_v34 = vmax.f32 %v5734_v17, 0.0 }
 0x4ca   : > { %v6621_v41 = vmax.f32 %v5991_v56, 0.0  ;;  %v6682_v39 = vadd.f32 %v6618_v55, %v6554_v45 }
 0x4cb   : > { %v6684_v40 = vadd.f32 %v6620_v9, %v6556_v49  ;;  %v6683_v8 = vadd.f32 %v6619_v34, %v6555_v26  ;;  %v5738_v31 = vpop.f32.mrb[228].mxu0 }
 0x4cc   : > { %v6685_v58 = vadd.f32 %v6621_v41, %v6557_v42  ;;  %v5995_v10 = vpop.f32.mrb[228].mxu1  ;;  %v6634_v54 = vmax.f32 %v5738_v31, 0.0  ;;  %v5740_v50 = vpop.f32.mrb[229].mxu0 }
 0x4cd   : > { %v6636_v52 = vmax.f32 %v5995_v10, 0.0  ;;  %v5997_v16 = vpop.f32.mrb[229].mxu1  ;;  %v6635_v36 = vmax.f32 %v5740_v50, 0.0 }
 0x4ce   : > { %v6637_v15 = vmax.f32 %v5997_v16, 0.0  ;;  %v6698_v38 = vadd.f32 %v6634_v54, %v6570_v33 }
 0x4cf   : > { %v6700_v6 = vadd.f32 %v6636_v52, %v6572_v30  ;;  %v6699_v47 = vadd.f32 %v6635_v36, %v6571_v23  ;;  %v5744_v12 = vpop.f32.mrb[230].mxu0 }
 0x4d0   : > { %v6701_v57 = vadd.f32 %v6637_v15, %v6573_v4  ;;  %v6001_v21 = vpop.f32.mrb[230].mxu1  ;;  %v6650_v19 = vmax.f32 %v5744_v12, 0.0  ;;  %v5746_v45 = vpop.f32.mrb[231].mxu0 }
 0x4d1   : > { %v6652_v35 = vmax.f32 %v6001_v21, 0.0  ;;  %v6003_v49 = vpop.f32.mrb[231].mxu1  ;;  %v6651_v26 = vmax.f32 %v5746_v45, 0.0 }
 0x4d2   : > { %v6653_v42 = vmax.f32 %v6003_v49, 0.0  ;;  %v6714_v43 = vadd.f32 %v6650_v19, %v6586_v51 }
 0x4d3   : > { %v6716_v24 = vadd.f32 %v6652_v35, %v6588_v59  ;;  %v6715_v32 = vadd.f32 %v6651_v26, %v6587_v44  ;;  %v5750_v11 = vpop.f32.mrb[232].mxu0 }
 0x4d4   : > { %v6717_v29 = vadd.f32 %v6653_v42, %v6589_v3  ;;  %v6007_v60 = vpop.f32.mrb[232].mxu1  ;;  %v6730_v0 = vmax.f32 %v5750_v11, 0.0  ;;  %v5752_v33 = vpop.f32.mrb[233].mxu0 }
 0x4d5   : > { %v6732_v1 = vmax.f32 %v6007_v60, 0.0  ;;  %v6009_v30 = vpop.f32.mrb[233].mxu1  ;;  %v6731_v23 = vmax.f32 %v5752_v33, 0.0 }
 0x4d6   : > { %v6733_v4 = vmax.f32 %v6009_v30, 0.0  ;;  %v6794_v7 = vadd.f32 %v6730_v0, %v6666_v2 }
 0x4d7   : > { %v6796_v48 = vadd.f32 %v6732_v1, %v6668_v18  ;;  %v6795_v53 = vadd.f32 %v6731_v23, %v6667_v25  ;;  %v5756_v28 = vpop.f32.mrb[234].mxu0 }
 0x4d8   : > { %v6797_v37 = vadd.f32 %v6733_v4, %v6669_v62  ;;  %v6013_v5 = vpop.f32.mrb[234].mxu1  ;;  %v6746_v63 = vmax.f32 %v5756_v28, 0.0  ;;  %v5758_v51 = vpop.f32.mrb[235].mxu0 }
 0x4d9   : > { %v6748_v22 = vmax.f32 %v6013_v5, 0.0  ;;  %v6015_v59 = vpop.f32.mrb[235].mxu1  ;;  %v6747_v44 = vmax.f32 %v5758_v51, 0.0 }
 0x4da   : > { %v6749_v3 = vmax.f32 %v6015_v59, 0.0  ;;  %v6810_v27 = vadd.f32 %v6746_v63, %v6682_v39 }
 0x4db   : > { %v6812_v20 = vadd.f32 %v6748_v22, %v6684_v40  ;;  %v6811_v55 = vadd.f32 %v6747_v44, %v6683_v8  ;;  %v5762_v17 = vpop.f32.mrb[236].mxu0 }
 0x4dc   : > { %v6813_v9 = vadd.f32 %v6749_v3, %v6685_v58  ;;  %v6019_v56 = vpop.f32.mrb[236].mxu1  ;;  %v6762_v34 = vmax.f32 %v5762_v17, 0.0  ;;  %v5764_v2 = vpop.f32.mrb[237].mxu0 }
 0x4dd   : > { %v6764_v41 = vmax.f32 %v6019_v56, 0.0  ;;  %v6021_v18 = vpop.f32.mrb[237].mxu1  ;;  %v6763_v25 = vmax.f32 %v5764_v2, 0.0 }
 0x4de   : > { %v6765_v62 = vmax.f32 %v6021_v18, 0.0  ;;  %v6826_v31 = vadd.f32 %v6762_v34, %v6698_v38 }
 0x4df   : > { %v6828_v10 = vadd.f32 %v6764_v41, %v6700_v6  ;;  %v6827_v54 = vadd.f32 %v6763_v25, %v6699_v47  ;;  %v5768_v50 = vpop.f32.mrb[238].mxu0 }
 0x4e0   : > { %v6829_v52 = vadd.f32 %v6765_v62, %v6701_v57  ;;  %v6025_v16 = vpop.f32.mrb[238].mxu1  ;;  %v6778_v36 = vmax.f32 %v5768_v50, 0.0  ;;  %v5770_v39 = vpop.f32.mrb[239].mxu0 }
 0x4e1   : > { %v6780_v15 = vmax.f32 %v6025_v16, 0.0  ;;  %v6027_v40 = vpop.f32.mrb[239].mxu1  ;;  %v6779_v8 = vmax.f32 %v5770_v39, 0.0 }
 0x4e2   : > { %v6781_v58 = vmax.f32 %v6027_v40, 0.0  ;;  %v6842_v12 = vadd.f32 %v6778_v36, %v6714_v43 }
 0x4e3   : > { %v6844_v21 = vadd.f32 %v6780_v15, %v6716_v24  ;;  %v6843_v19 = vadd.f32 %v6779_v8, %v6715_v32  ;;  %v5774_v45 = vpop.f32.mrb[240].mxu0 }
 0x4e4   : > { %v6845_v35 = vadd.f32 %v6781_v58, %v6717_v29  ;;  %v6031_v49 = vpop.f32.mrb[240].mxu1  ;;  %v6858_v26 = vmax.f32 %v5774_v45, 0.0  ;;  %v5776_v38 = vpop.f32.mrb[241].mxu0 }
 0x4e5   : > { %v6860_v42 = vmax.f32 %v6031_v49, 0.0  ;;  %v6033_v6 = vpop.f32.mrb[241].mxu1  ;;  %v6859_v47 = vmax.f32 %v5776_v38, 0.0 }
 0x4e6   : > { %v6861_v57 = vmax.f32 %v6033_v6, 0.0  ;;  %v6922_v11 = vadd.f32 %v6858_v26, %v6794_v7 }
 0x4e7   : > { %v6924_v60 = vadd.f32 %v6860_v42, %v6796_v48  ;;  %v6923_v0 = vadd.f32 %v6859_v47, %v6795_v53  ;;  %v5780_v33 = vpop.f32.mrb[242].mxu0 }
 0x4e8   : > { %v6925_v1 = vadd.f32 %v6861_v57, %v6797_v37  ;;  %v6037_v30 = vpop.f32.mrb[242].mxu1  ;;  %v6874_v23 = vmax.f32 %v5780_v33, 0.0  ;;  %v5782_v43 = vpop.f32.mrb[243].mxu0 }
 0x4e9   : > { %v6876_v4 = vmax.f32 %v6037_v30, 0.0  ;;  %v6039_v24 = vpop.f32.mrb[243].mxu1  ;;  %v6875_v32 = vmax.f32 %v5782_v43, 0.0 }
 0x4ea   : > { %v6877_v29 = vmax.f32 %v6039_v24, 0.0  ;;  %v6938_v28 = vadd.f32 %v6874_v23, %v6810_v27 }
 0x4eb   : > { %v6940_v5 = vadd.f32 %v6876_v4, %v6812_v20  ;;  %v6939_v63 = vadd.f32 %v6875_v32, %v6811_v55  ;;  %v5786_v51 = vpop.f32.mrb[244].mxu0 }
 0x4ec   : > { %v6941_v22 = vadd.f32 %v6877_v29, %v6813_v9  ;;  %v6043_v59 = vpop.f32.mrb[244].mxu1  ;;  %v6890_v44 = vmax.f32 %v5786_v51, 0.0  ;;  %v5788_v7 = vpop.f32.mrb[245].mxu0 }
 0x4ed   : > { %v6892_v3 = vmax.f32 %v6043_v59, 0.0  ;;  %v6045_v48 = vpop.f32.mrb[245].mxu1  ;;  %v6891_v53 = vmax.f32 %v5788_v7, 0.0 }
 0x4ee   : > { %v6893_v37 = vmax.f32 %v6045_v48, 0.0  ;;  %v6954_v17 = vadd.f32 %v6890_v44, %v6826_v31 }
 0x4ef   : > { %v6956_v56 = vadd.f32 %v6892_v3, %v6828_v10  ;;  %v6955_v34 = vadd.f32 %v6891_v53, %v6827_v54  ;;  %v5792_v2 = vpop.f32.mrb[246].mxu0 }
 0x4f0   : > { %v6957_v41 = vadd.f32 %v6893_v37, %v6829_v52  ;;  %v6049_v18 = vpop.f32.mrb[246].mxu1  ;;  %v6906_v25 = vmax.f32 %v5792_v2, 0.0  ;;  %v5794_v27 = vpop.f32.mrb[247].mxu0 }
 0x4f1   : > { %v6908_v62 = vmax.f32 %v6049_v18, 0.0  ;;  %v6051_v20 = vpop.f32.mrb[247].mxu1  ;;  %v6907_v55 = vmax.f32 %v5794_v27, 0.0 }
 0x4f2   : > { %v6909_v9 = vmax.f32 %v6051_v20, 0.0  ;;  %v6970_v50 = vadd.f32 %v6906_v25, %v6842_v12 }
 0x4f3   : > { %v6972_v16 = vadd.f32 %v6908_v62, %v6844_v21  ;;  %v6971_v36 = vadd.f32 %v6907_v55, %v6843_v19  ;;  %v5798_v39 = vpop.f32.mrb[248].mxu0 }
 0x4f4   : > { %v6973_v15 = vadd.f32 %v6909_v9, %v6845_v35  ;;  %v6055_v40 = vpop.f32.mrb[248].mxu1  ;;  %v6986_v8 = vmax.f32 %v5798_v39, 0.0  ;;  %v5800_v31 = vpop.f32.mrb[249].mxu0 }
 0x4f5   : > { %v6988_v58 = vmax.f32 %v6055_v40, 0.0  ;;  %v6057_v10 = vpop.f32.mrb[249].mxu1  ;;  %v6987_v54 = vmax.f32 %v5800_v31, 0.0 }
 0x4f6   : > { %v6989_v52 = vmax.f32 %v6057_v10, 0.0  ;;  %v7050_v45 = vadd.f32 %v6986_v8, %v6922_v11 }
 0x4f7   : > { %v7052_v49 = vadd.f32 %v6988_v58, %v6924_v60  ;;  %v7051_v26 = vadd.f32 %v6987_v54, %v6923_v0  ;;  %v5804_v42 = vpop.f32.mrb[250].mxu0 }
 0x4f8   : > { %v6061_v38 = vpop.f32.mrb[250].mxu1  ;;  %v7053_v6 = vadd.f32 %v6989_v52, %v6925_v1  ;;  %v7146_v47 = vadd.f32 %v13611_v46, %v7050_v45  ;;  %v7002_v12 = vmax.f32 %v5804_v42, 0.0  ;;  %v5806_v19 = vpop.f32.mrb[251].mxu0 }
 0x4f9   : > { %v7004_v21 = vmax.f32 %v6061_v38, 0.0  ;;  %v6063_v35 = vpop.f32.mrb[251].mxu1  ;;  %v7003_v57 = vmax.f32 %v5806_v19, 0.0 }
 0x4fa   : > { %v7005_v33 = vmax.f32 %v6063_v35, 0.0  ;;  %v7066_v30 = vadd.f32 %v7002_v12, %v6938_v28  ;;  %v7150_v4 = vadd.f32 %v7146_v47, %v7051_v26 }
 0x4fb   : > { %v7068_v23 = vadd.f32 %v7004_v21, %v6940_v5  ;;  %v7067_v43 = vadd.f32 %v7003_v57, %v6939_v63  ;;  %v5810_v32 = vpop.f32.mrb[252].mxu0 }
 0x4fc   : > { %v7069_v24 = vadd.f32 %v7005_v33, %v6941_v22  ;;  %v6067_v11 = vpop.f32.mrb[252].mxu1  ;;  %v7147_v60 = vadd.f32 %v13614_v13, %v7066_v30  ;;  %v7018_v0 = vmax.f32 %v5810_v32, 0.0  ;;  %v5812_v1 = vpop.f32.mrb[253].mxu0  ;;  %v7154_v46 = vadd.f32 %v7150_v4, %v7052_v49  ;;  %v7995_v33 = vld [vmem:[%s13700_s3] ss:$0 sm:$0xff] }
 0x4fd   : > { %v7020_v29 = vmax.f32 %v6067_v11, 0.0  ;;  %v6069_v51 = vpop.f32.mrb[253].mxu1  ;;  %v7019_v59 = vmax.f32 %v5812_v1, 0.0 }
 0x4fe   : > { %v7021_v44 = vmax.f32 %v6069_v51, 0.0  ;;  %v7151_v3 = vadd.f32 %v7147_v60, %v7067_v43  ;;  %v7082_v7 = vadd.f32 %v7018_v0, %v6954_v17  ;;  %v7158_v53 = vadd.f32 %v7154_v46, %v7053_v6 }
 0x4ff   : > { %v7084_v48 = vadd.f32 %v7020_v29, %v6956_v56  ;;  %v7083_v28 = vadd.f32 %v7019_v59, %v6955_v34  ;;  %v5816_v37 = vpop.f32.mrb[254].mxu0 }
 0x500   : > { %v7085_v5 = vadd.f32 %v7021_v44, %v6957_v41  ;;  %v6073_v63 = vpop.f32.mrb[254].mxu1  ;;  %v7148_v22 = vadd.f32 %v13617_v14, %v7082_v7  ;;  %v7034_v2 = vmax.f32 %v5816_v37, 0.0  ;;  %v5818_v13 = vpop.f32.mrb[255].mxu0  ;;  %v7162_v62 = vmul.f32 0.00390625, %v7158_v53 }
 0x501   : > { %v7036_v18 = vmax.f32 %v6073_v63, 0.0  ;;  %v6075_v25 = vpop.f32.mrb[255].mxu1  ;;  %v7035_v27 = vmax.f32 %v5818_v13, 0.0  ;;  %v7155_v55 = vadd.f32 %v7151_v3, %v7068_v23 }
 0x502   : > { %v7037_v20 = vmax.f32 %v6075_v25, 0.0  ;;  %v7152_v9 = vadd.f32 %v7148_v22, %v7083_v28  ;;  %v7098_v39 = vadd.f32 %v7034_v2, %v6970_v50  ;;  %7166 = vxpose.xlu0.b32.start [1/4] (short) %v7162_v62, 128 }
 0x503   : > { %v7100_v40 = vadd.f32 %v7036_v18, %v6972_v16  ;;  %v7099_v17 = vadd.f32 %v7035_v27, %v6971_v36  ;;  %v7159_v34 = vadd.f32 %v7155_v55, %v7069_v24 }
 0x504   : > { %v7101_v56 = vadd.f32 %v7037_v20, %v6973_v15  ;;  %v7149_v41 = vadd.f32 %v13623_v61, %v7098_v39  ;;  %v7156_v8 = vadd.f32 %v7152_v9, %v7084_v48 }
 0x505   : > { %v7163_v58 = vmul.f32 0.00390625, %v7159_v34 }
 0x506   : > { %v7153_v14 = vadd.f32 %v7149_v41, %v7099_v17  ;;  %v7160_v31 = vadd.f32 %v7156_v8, %v7085_v5 }
 0x507   : > { %7167 = vxpose.xlu0.b32.cont [2/4] (short) %v7163_v58, 128 }
 0x508   : > { %v7164_v10 = vmul.f32 0.00390625, %v7160_v31  ;;  %v7157_v54 = vadd.f32 %v7153_v14, %v7100_v40 }
 0x50a   : > { %v7161_v52 = vadd.f32 %v7157_v54, %v7101_v56 }
 0x50b   : > { %7168 = vxpose.xlu0.b32.cont [3/4] (short) %v7164_v10, 128 }
 0x50c   : > { %v7165_v45 = vmul.f32 0.00390625, %v7161_v52 }
 0x50f   : > { %7169 = vxpose.xlu0.b32.end [4/4] (short) %v7165_v45, 128 }
 0x583   : > { %v7182_v50 = vpop.trf.xlu0 }
 0x584   : > { %8042 = vmatprep.mubr.msk.f32.mxu0 %vm7209_vm3, %v7182_v50 }
 0x587   : > { %v7183_v16 = vpop.trf.xlu0 }
 0x588   : > { %8043 = vmatmul.mubr.msk.f32.vlgmr.msra.gmra.mrb[0].mxu0 %vm7209_vm3, %v7183_v16 }
 0x58b   : > { %v7184_v36 = vpop.trf.xlu0 }
 0x58c   : > { %8045 = vmatprep.mubr.msk.f32.mxu0 %vm7209_vm3, %v7184_v36 }
 0x58f   : > { %v7185_v61 = vpop.trf.xlu0 }
 0x590   : > { %8046 = vmatmul.mubr.msk.f32.gmra.mrb[2].mxu0 %vm7209_vm3, %v7185_v61 }
 0x593   : > { %v7186_v15 = vpop.trf.xlu0 }
 0x594   : > { %8048 = vmatprep.mubr.msk.f32.mxu0 %vm7209_vm3, %v7186_v15 }
 0x597   : > { %v7187_v49 = vpop.trf.xlu0 }
 0x598   : > { %8049 = vmatmul.mubr.msk.f32.gmra.mrb[4].mxu0 %vm7209_vm3, %v7187_v49 }
 0x59b   : > { %v7188_v26 = vpop.trf.xlu0 }
 0x59c   : > { %8051 = vmatprep.mubr.msk.f32.mxu0 %vm7209_vm3, %v7188_v26 }
 0x59f   : > { %v7189_v42 = vpop.trf.xlu0 }
 0x5a0   : > { %8052 = vmatmul.mubr.msk.f32.gmra.mrb[6].mxu0 %vm7209_vm3, %v7189_v42 }
 0x5a3   : > { %v7190_v38 = vpop.trf.xlu0 }
 0x5a4   : > { %8054 = vmatprep.mubr.msk.f32.mxu1 %vm7209_vm3, %v7190_v38 }
 0x5a7   : > { %v7191_v6 = vpop.trf.xlu0 }
 0x5a8   : > { %8055 = vmatmul.mubr.msk.f32.vlgmr.msra.gmra.mrb[0].mxu1 %vm7209_vm3, %v7191_v6 }
 0x5ab   : > { %v7192_v47 = vpop.trf.xlu0 }
 0x5ac   : > { %8057 = vmatprep.mubr.msk.f32.mxu1 %vm7209_vm3, %v7192_v47 }
 0x5af   : > { %v7193_v12 = vpop.trf.xlu0 }
 0x5b0   : > { %8058 = vmatmul.mubr.msk.f32.gmra.mrb[2].mxu1 %vm7209_vm3, %v7193_v12 }
 0x5b3   : > { %v7194_v21 = vpop.trf.xlu0 }
 0x5b4   : > { %8060 = vmatprep.mubr.msk.f32.mxu1 %vm7209_vm3, %v7194_v21 }
 0x5b7   : > { %v7195_v19 = vpop.trf.xlu0 }
 0x5b8   : > { %8061 = vmatmul.mubr.msk.f32.gmra.mrb[4].mxu1 %vm7209_vm3, %v7195_v19 }
 0x5bb   : > { %v7196_v35 = vpop.trf.xlu0 }
 0x5bc   : > { %8063 = vmatprep.mubr.msk.f32.mxu1 %vm7209_vm3, %v7196_v35 }
 0x5bf   : > { %v7197_v57 = vpop.trf.xlu0 }
 0x5c0   : > { %8064 = vmatmul.mubr.msk.f32.gmra.mrb[6].mxu1 %vm7209_vm3, %v7197_v57 }
 0x65b   : > { %v8044_v30 = vpop.f32.mrb[0].mxu0 }
 0x65c   : > { %v7330_v23 = vadd.f32 %v8044_v30, %v7995_v33  ;;  %v7324_v4 = vpop.f32.mrb[1].mxu0 }
 0x65d   : > { %v7325_v43 = vadd.f32 %v7995_v33, %v7324_v4 }
 0x65e   : > { %7404 = vst [vmem:[%s13676_s17 + $0x8] sm:$0xff] %v7330_v23 }
 0x65f   : > { %7403 = vst [vmem:[%s13676_s17] sm:$0xff] %v7325_v43 }
 0x663   : > { %v8047_v24 = vpop.f32.mrb[2].mxu0 }
 0x664   : > { %v7340_v32 = vadd.f32 %v8047_v24, %v7995_v33  ;;  %v7334_v11 = vpop.f32.mrb[3].mxu0 }
 0x665   : > { %v7335_v60 = vadd.f32 %v7995_v33, %v7334_v11 }
 0x666   : > { %7406 = vst [vmem:[%s13676_s17 + $0x18] sm:$0xff] %v7340_v32 }
 0x667   : > { %7405 = vst [vmem:[%s13676_s17 + $0x10] sm:$0xff] %v7335_v60 }
 0x66b   : > { %v8050_v0 = vpop.f32.mrb[4].mxu0 }
 0x66c   : > { %v7350_v29 = vadd.f32 %v8050_v0, %v7995_v33  ;;  %v7344_v1 = vpop.f32.mrb[5].mxu0 }
 0x66d   : > { %v7345_v51 = vadd.f32 %v7995_v33, %v7344_v1 }
 0x66e   : > { %7408 = vst [vmem:[%s13676_s17 + $0x28] sm:$0xff] %v7350_v29 }
 0x66f   : > { %7407 = vst [vmem:[%s13676_s17 + $0x20] sm:$0xff] %v7345_v51 }
 0x673   : > { %v8053_v46 = vpop.f32.mrb[6].mxu0 }
 0x674   : > { %v7360_v59 = vadd.f32 %v8053_v46, %v7995_v33  ;;  %v7354_v44 = vpop.f32.mrb[7].mxu0 }
 0x675   : > { %v7355_v3 = vadd.f32 %v7995_v33, %v7354_v44 }
 0x676   : > { %7410 = vst [vmem:[%s13676_s17 + $0x38] sm:$0xff] %v7360_v59 }
 0x677   : > { %7409 = vst [vmem:[%s13676_s17 + $0x30] sm:$0xff] %v7355_v3 }
 0x67b   : > { %v8056_v7 = vpop.f32.mrb[0].mxu1 }
 0x67c   : > { %v7370_v48 = vadd.f32 %v8056_v7, %v7995_v33  ;;  %v7364_v53 = vpop.f32.mrb[1].mxu1 }
 0x67d   : > { %v7365_v28 = vadd.f32 %v7995_v33, %v7364_v53 }
 0x67e   : > { %7412 = vst [vmem:[%s13676_s17 + $0x48] sm:$0xff] %v7370_v48 }
 0x67f   : > { %7411 = vst [vmem:[%s13676_s17 + $0x40] sm:$0xff] %v7365_v28 }
 0x683   : > { %v8059_v5 = vpop.f32.mrb[2].mxu1 }
 0x684   : > { %v7380_v37 = vadd.f32 %v8059_v5, %v7995_v33  ;;  %v7374_v63 = vpop.f32.mrb[3].mxu1 }
 0x685   : > { %v7375_v22 = vadd.f32 %v7995_v33, %v7374_v63 }
 0x686   : > { %7414 = vst [vmem:[%s13676_s17 + $0x58] sm:$0xff] %v7380_v37 }
 0x687   : > { %7413 = vst [vmem:[%s13676_s17 + $0x50] sm:$0xff] %v7375_v22 }
 0x68b   : > { %v8062_v2 = vpop.f32.mrb[4].mxu1 }
 0x68c   : > { %v7390_v18 = vadd.f32 %v8062_v2, %v7995_v33  ;;  %v7384_v13 = vpop.f32.mrb[5].mxu1 }
 0x68d   : > { %v7385_v25 = vadd.f32 %v7995_v33, %v7384_v13 }
 0x68e   : > { %7416 = vst [vmem:[%s13676_s17 + $0x68] sm:$0xff] %v7390_v18 }
 0x68f   : > { %7415 = vst [vmem:[%s13676_s17 + $0x60] sm:$0xff] %v7385_v25 }
 0x693   : > { %v8065_v62 = vpop.f32.mrb[6].mxu1 }
 0x694   : > { %v7400_v27 = vadd.f32 %v8065_v62, %v7995_v33  ;;  %v7394_v20 = vpop.f32.mrb[7].mxu1 }
 0x695   : > { %v7395_v55 = vadd.f32 %v7995_v33, %v7394_v20 }
 0x696   : > { %7418 = vst [vmem:[%s13676_s17 + $0x78] sm:$0xff] %v7400_v27 }
 0x697   : > { %7417 = vst [vmem:[%s13676_s17 + $0x70] sm:$0xff] %v7395_v55 }
 0x698 PF: > { %s14_s15 = sadd.s32 1, %s8616_s15  }
 0x699   : > { %p11_p5 = scmp.ge.s32.totalorder %s14_s15, 4  }
 0x69b   :  { %13 = sbr.rel (!%p11_p5) target bundleno = 1 (0x1), region = 66 }

</bundles_post_ra>
